<compile_context>
chip_gen: v5e
topology: v5e:2x2
jax: 0.10.0
libtpu: 0.0.40
codegen_flags: <defaults>
</compile_context>

<pallas_src>
import functools

import numpy as np
import jax
import jax.numpy as jnp
from jax.experimental import pallas as pl
from jax.experimental.pallas import tpu as pltpu

EPS = 1e-5


# ------------------------------ kernel helpers ------------------------------

def _next_block(x, w1_ref, b1_ref, w2_ref, b2_ref, mk_ref, Hs, Ws):
    """One NextBlock on a per-image (HW, Cin) activation matrix, all in VMEM.

    w1_ref : (Cin, 2*Cout)   [main | shortcut] 1x1 weights merged along N,
                             BN scale folded in
    b1_ref : (1, 2*Cout)     merged folded BN shifts (conv bias included)
    w2_ref : (9, Cout, Cout) per-tap dense grouped-3x3 weights (BN folded)
    b2_ref : (1, Cout)       folded BN shift of the 3x3 conv
    mk_ref : (8, HW, 1)      precomputed zero-padding masks (off-center taps)
    """
    HW = Hs * Ws
    Cout = w2_ref.shape[-1]

    # main + shortcut 1x1 convs (+BN+ReLU) as ONE wide-N matmul, lane-split.
    h = jnp.maximum(
        jnp.dot(x, w1_ref[...], preferred_element_type=jnp.float32)
        + b1_ref[...], 0.0)                               # (HW, 2*Cout)
    h1 = h[:, :Cout]                                      # main branch
    sc = h[:, Cout:]                                      # shortcut branch

    # Grouped 3x3 conv (padding=1) as 9 accumulating shifted+masked matmuls.
    # Output pixel m=(y,x) needs h1[m + dy*Ws + dx]; wrap-around rows of the
    # roll correspond exactly to zero padding and are zeroed by the masks.
    acc = jnp.dot(h1, w2_ref[4], preferred_element_type=jnp.float32)  # center
    mi = 0
    k = 0
    for dy in (-1, 0, 1):
        for dx in (-1, 0, 1):
            if dy == 0 and dx == 0:
                k += 1
                continue
            off = dy * Ws + dx
            src = pltpu.roll(h1, shift=(-off) % HW, axis=0) * mk_ref[mi]
            acc = acc + jnp.dot(src, w2_ref[k],
                                preferred_element_type=jnp.float32)
            mi += 1
            k += 1
    h2 = jnp.maximum(acc + b2_ref[...], 0.0)

    # Residual merge.  The reference applies ReLU to both branches AND after
    # the add; the outer ReLU is kept for fidelity (mathematically a no-op
    # because both operands are already non-negative).
    return jnp.maximum(h2 + sc, 0.0)


def _pool2x2(y, sel_ref, Hs, Ws):
    """2x2 / stride-2 max pool on a row-flattened (HW, C) map, in VMEM.

    max(y, roll(y,+1), roll(y,+Ws), roll(y,+Ws+1)) gives every pixel the max
    of its forward 2x2 window; the precomputed 0/1 selection matrix keeps only
    the even (y, x) anchors.  No masks needed: anchors never read wrapped rows.
    """
    HW = Hs * Ws
    m = jnp.maximum(
        jnp.maximum(y, pltpu.roll(y, shift=HW - 1, axis=0)),
        jnp.maximum(pltpu.roll(y, shift=HW - Ws, axis=0),
                    pltpu.roll(y, shift=HW - Ws - 1, axis=0)))
    return jnp.dot(sel_ref[...], m, preferred_element_type=jnp.float32)


def _danet_kernel(x_ref,
                  w1a_ref, b1a_ref, w2a_ref, b2a_ref, mka_ref, sela_ref,
                  w1b_ref, b1b_ref, w2b_ref, b2b_ref, mkb_ref, selb_ref,
                  w1c_ref, b1c_ref, w2c_ref, b2c_ref, mkc_ref, selc_ref,
                  wh_ref, bh_ref,
                  o_ref, *, Hs, Ws):
    """Whole DaNet forward for one image: 3x(NextBlock + 2x2 maxpool) + head."""
    y = x_ref[...]                                                  # (HW, Cinp)

    y = _next_block(y, w1a_ref, b1a_ref, w2a_ref, b2a_ref, mka_ref, Hs, Ws)
    y = _pool2x2(y, sela_ref, Hs, Ws)
    Hs, Ws = Hs // 2, Ws // 2

    y = _next_block(y, w1b_ref, b1b_ref, w2b_ref, b2b_ref, mkb_ref, Hs, Ws)
    y = _pool2x2(y, selb_ref, Hs, Ws)
    Hs, Ws = Hs // 2, Ws // 2

    y = _next_block(y, w1c_ref, b1c_ref, w2c_ref, b2c_ref, mkc_ref, Hs, Ws)
    y = _pool2x2(y, selc_ref, Hs, Ws)
    Hs, Ws = Hs // 2, Ws // 2

    # Head: 1x1 conv + folded BN + ReLU, global average pool, log-softmax.
    h = jnp.maximum(
        jnp.dot(y, wh_ref[...], preferred_element_type=jnp.float32)
        + bh_ref[...], 0.0)                                         # (HW, 100)
    m = jnp.sum(h, axis=0, keepdims=True) * (1.0 / (Hs * Ws))       # (1, 100)
    z = m - jnp.max(m, axis=1, keepdims=True)
    o_ref[...] = z - jnp.log(jnp.sum(jnp.exp(z), axis=1, keepdims=True))


# ------------------------------ kernel wrapper -------------------------------

def danet_fused(x3, params, Hs, Ws):
    """x3: (N, Hs*Ws, Cin_padded) NHWC-flattened input -> (N, classes) logprobs."""
    N, HW, Cin = x3.shape
    b1, b2, b3 = params['block1'], params['block2'], params['block3']
    wh, bh = params['head']['w'], params['head']['b']
    n_cls = wh.shape[1]

    def blk_specs(p, hw):
        cin, two_cout = p['w1'].shape
        cout = two_cout // 2
        return [
            pl.BlockSpec((cin, two_cout), lambda n: (0, 0)),
            pl.BlockSpec((1, two_cout), lambda n: (0, 0)),
            pl.BlockSpec((9, cout, cout), lambda n: (0, 0, 0)),
            pl.BlockSpec((1, cout), lambda n: (0, 0)),
            pl.BlockSpec((8, hw, 1), lambda n: (0, 0, 0)),
            pl.BlockSpec((hw // 4, hw), lambda n: (0, 0)),
        ]

    def blk_args(p):
        return [p['w1'], p['b1'], p['w2'], p['b2'], p['mask'], p['sel']]

    in_specs = ([pl.BlockSpec((None, HW, Cin), lambda n: (n, 0, 0))]
                + blk_specs(b1, HW)
                + blk_specs(b2, HW // 4)
                + blk_specs(b3, HW // 16)
                + [pl.BlockSpec(wh.shape, lambda n: (0, 0)),
                   pl.BlockSpec(bh.shape, lambda n: (0, 0))])

    def blk_flops(hw, cin, cout):
        return (2 * hw * cin * 2 * cout          # merged main|shortcut 1x1
                + 9 * 2 * hw * cout * cout       # grouped 3x3 taps
                + 2 * (hw // 4) * hw * cout)     # max-pool selection matmul
    c1 = b1['w2'].shape[-1]
    c2 = b2['w2'].shape[-1]
    c3 = b3['w2'].shape[-1]
    flops = N * (blk_flops(HW, Cin, c1) + blk_flops(HW // 4, c1, c2)
                 + blk_flops(HW // 16, c2, c3) + 2 * (HW // 64) * c3 * n_cls)
    bytes_accessed = 4 * (x3.size
                          + sum(int(a.size) for a in
                                blk_args(b1) + blk_args(b2) + blk_args(b3))
                          + wh.size + bh.size + N * n_cls)

    out = pl.pallas_call(
        functools.partial(_danet_kernel, Hs=Hs, Ws=Ws),
        out_shape=jax.ShapeDtypeStruct((N, 1, n_cls), jnp.float32),
        grid=(N,),
        in_specs=in_specs,
        out_specs=pl.BlockSpec((None, 1, n_cls), lambda n: (n, 0, 0)),
        compiler_params=pltpu.CompilerParams(
            dimension_semantics=("parallel",)),
        cost_estimate=pl.CostEstimate(flops=int(flops),
                                      transcendentals=int(N * 2 * n_cls),
                                      bytes_accessed=int(bytes_accessed)),
    )(x3, *blk_args(b1), *blk_args(b2), *blk_args(b3), wh, bh)
    return out.reshape(N, n_cls)


# ---------------------- deterministic parameter setup ----------------------

def _bn_fold(rng, outc, bias):
    gamma = rng.uniform(0.8, 1.2, size=(outc,)).astype(np.float32)
    beta = rng.normal(0.0, 0.05, size=(outc,)).astype(np.float32)
    mean = rng.normal(0.0, 0.05, size=(outc,)).astype(np.float32)
    var = rng.uniform(0.5, 1.5, size=(outc,)).astype(np.float32)
    scale = gamma / np.sqrt(var + EPS)
    shift = beta - mean * scale + bias * scale          # conv bias folded in
    return scale.astype(np.float32), shift.astype(np.float32)


def _conv1x1_bn(rng, inc, outc):
    w = rng.normal(0.0, 0.1, size=(outc, inc)).astype(np.float32)
    b = rng.normal(0.0, 0.05, size=(outc,)).astype(np.float32)
    scale, shift = _bn_fold(rng, outc, b)
    return (w.T * scale[None, :]).astype(np.float32), shift.reshape(1, outc)


def _grouped_conv3x3_bn(rng, groups, c):
    """Grouped 3x3 conv + BN as 9 per-tap dense (c, c) matrices, scale folded."""
    cg = c // groups
    w = rng.normal(0.0, 0.1, size=(c, cg, 3, 3)).astype(np.float32)
    b = rng.normal(0.0, 0.05, size=(c,)).astype(np.float32)
    scale, shift = _bn_fold(rng, c, b)
    taps = np.zeros((9, c, c), np.float32)               # (tap, cin, cout)
    for cout in range(c):
        g = cout // cg
        for ky in range(3):
            for kx in range(3):
                taps[ky * 3 + kx, g * cg:(g + 1) * cg, cout] = w[cout, :, ky, kx]
    taps *= scale[None, None, :]
    return taps, shift.reshape(1, c)


def _tap_masks(Hs, Ws):
    """(8, HW, 1) validity masks for the 8 off-center 3x3 taps (padding=1)."""
    yy, xx = np.divmod(np.arange(Hs * Ws), Ws)
    rows = []
    for dy in (-1, 0, 1):
        for dx in (-1, 0, 1):
            if dy == 0 and dx == 0:
                continue
            rows.append(((yy + dy >= 0) & (yy + dy < Hs) &
                         (xx + dx >= 0) & (xx + dx < Ws)).astype(np.float32))
    return np.stack(rows, 0)[:, :, None]


def _pool_select(Hs, Ws):
    """(HW/4, HW) 0/1 matrix picking the even-(y,x) anchors after the roll-max."""
    Ho, Wo = Hs // 2, Ws // 2
    sel = np.zeros((Ho * Wo, Hs * Ws), np.float32)
    for yo in range(Ho):
        for xo in range(Wo):
            sel[yo * Wo + xo, (2 * yo) * Ws + 2 * xo] = 1.0
    return sel


def init_params(cin=3, cin_pad=8, Hs=16, Ws=16):
    rng = np.random.default_rng(0)

    def block(groups, inc, outc, hs, ws, pad_in_to=None):
        w1, b1 = _conv1x1_bn(rng, inc, outc)
        w2, b2 = _grouped_conv3x3_bn(rng, groups, outc)
        wsc, bsc = _conv1x1_bn(rng, inc, outc)
        wm = np.concatenate([w1, wsc], axis=1)       # (inc, 2*outc) main|shortcut
        bm = np.concatenate([b1, bsc], axis=1)       # (1, 2*outc)
        if pad_in_to is not None and pad_in_to > inc:
            wm = np.pad(wm, ((0, pad_in_to - inc), (0, 0)))
        return dict(w1=jnp.asarray(wm), b1=jnp.asarray(bm),
                    w2=jnp.asarray(w2), b2=jnp.asarray(b2),
                    mask=jnp.asarray(_tap_masks(hs, ws)),
                    sel=jnp.asarray(_pool_select(hs, ws)))

    wh, bh = _conv1x1_bn(rng, 64, 100)
    return dict(
        cin_pad=cin_pad,
        block1=block(8, cin, 24, Hs, Ws, cin_pad),
        block2=block(16, 24, 48, Hs // 2, Ws // 2),
        block3=block(16, 48, 64, Hs // 4, Ws // 4),
        head=dict(w=jnp.asarray(wh), b=jnp.asarray(bh)),
    )


# ------------------------------ model forward -------------------------------

def danet_forward(x_nchw, params):
    N, Cin, Hs, Ws = x_nchw.shape
    x = jnp.transpose(x_nchw, (0, 2, 3, 1)).astype(jnp.float32)   # NCHW -> NHWC
    cp = params['cin_pad']
    if cp > Cin:                                  # lane-friendlier K for block1
        x = jnp.pad(x, ((0, 0), (0, 0), (0, 0), (0, cp - Cin)))
    x3 = x.reshape(N, Hs * Ws, max(cp, Cin))
    return danet_fused(x3, params, Hs, Ws)                         # (N, 100)


# --------------------------------- main -------------------------------------

if __name__ == "__main__":
    params = init_params()
    key = jax.random.PRNGKey(0)
    x = jax.random.normal(key, (2, 3, 16, 16), dtype=jnp.float32)  # NCHW input

    fwd = jax.jit(lambda inp: danet_forward(inp, params))
    out = jax.block_until_ready(fwd(x))

    assert out.shape == (2, 100), out.shape
    # log-softmax sanity: probabilities sum to 1
    assert jnp.allclose(jnp.exp(out).sum(axis=1), 1.0, atol=1e-3)
    print("KERNEL_OK")
</pallas_src>

<mosaic_0001>
module attributes {stable_mosaic.version = 11 : i64} {
  func.func @_danet_kernel(%arg0: i32, %arg1: memref<1x256x8xf32, #tpu.memory_space<vmem>>, %arg2: memref<8x48xf32, #tpu.memory_space<vmem>>, %arg3: memref<1x48xf32, #tpu.memory_space<vmem>>, %arg4: memref<9x24x24xf32, #tpu.memory_space<vmem>>, %arg5: memref<1x24xf32, #tpu.memory_space<vmem>>, %arg6: memref<8x256x1xf32, #tpu.memory_space<vmem>>, %arg7: memref<64x256xf32, #tpu.memory_space<vmem>>, %arg8: memref<24x96xf32, #tpu.memory_space<vmem>>, %arg9: memref<1x96xf32, #tpu.memory_space<vmem>>, %arg10: memref<9x48x48xf32, #tpu.memory_space<vmem>>, %arg11: memref<1x48xf32, #tpu.memory_space<vmem>>, %arg12: memref<8x64x1xf32, #tpu.memory_space<vmem>>, %arg13: memref<16x64xf32, #tpu.memory_space<vmem>>, %arg14: memref<48x128xf32, #tpu.memory_space<vmem>>, %arg15: memref<1x128xf32, #tpu.memory_space<vmem>>, %arg16: memref<9x64x64xf32, #tpu.memory_space<vmem>>, %arg17: memref<1x64xf32, #tpu.memory_space<vmem>>, %arg18: memref<8x16x1xf32, #tpu.memory_space<vmem>>, %arg19: memref<4x16xf32, #tpu.memory_space<vmem>>, %arg20: memref<64x100xf32, #tpu.memory_space<vmem>>, %arg21: memref<1x100xf32, #tpu.memory_space<vmem>>, %arg22: memref<1x1x100xf32, #tpu.memory_space<vmem>>) attributes {dimension_semantics = [#tpu.dimension_semantics<parallel>], iteration_bounds = array<i64: 2>, scalar_prefetch = 0 : i64, scratch_operands = 0 : i64, tpu.core_type = #tpu.core_type<tc>, window_params = [{transform_indices = @transform_0, window_bounds = array<i64: 1, 256, 8>}, {pipeline_mode = #tpu.pipeline_mode<synchronous>, transform_indices = @transform_1, window_bounds = array<i64: 8, 48>}, {pipeline_mode = #tpu.pipeline_mode<synchronous>, transform_indices = @transform_2, window_bounds = array<i64: 1, 48>}, {pipeline_mode = #tpu.pipeline_mode<synchronous>, transform_indices = @transform_3, window_bounds = array<i64: 9, 24, 24>}, {pipeline_mode = #tpu.pipeline_mode<synchronous>, transform_indices = @transform_4, window_bounds = array<i64: 1, 24>}, {pipeline_mode = #tpu.pipeline_mode<synchronous>, transform_indices = @transform_5, window_bounds = array<i64: 8, 256, 1>}, {pipeline_mode = #tpu.pipeline_mode<synchronous>, transform_indices = @transform_6, window_bounds = array<i64: 64, 256>}, {pipeline_mode = #tpu.pipeline_mode<synchronous>, transform_indices = @transform_7, window_bounds = array<i64: 24, 96>}, {pipeline_mode = #tpu.pipeline_mode<synchronous>, transform_indices = @transform_8, window_bounds = array<i64: 1, 96>}, {pipeline_mode = #tpu.pipeline_mode<synchronous>, transform_indices = @transform_9, window_bounds = array<i64: 9, 48, 48>}, {pipeline_mode = #tpu.pipeline_mode<synchronous>, transform_indices = @transform_10, window_bounds = array<i64: 1, 48>}, {pipeline_mode = #tpu.pipeline_mode<synchronous>, transform_indices = @transform_11, window_bounds = array<i64: 8, 64, 1>}, {pipeline_mode = #tpu.pipeline_mode<synchronous>, transform_indices = @transform_12, window_bounds = array<i64: 16, 64>}, {pipeline_mode = #tpu.pipeline_mode<synchronous>, transform_indices = @transform_13, window_bounds = array<i64: 48, 128>}, {pipeline_mode = #tpu.pipeline_mode<synchronous>, transform_indices = @transform_14, window_bounds = array<i64: 1, 128>}, {pipeline_mode = #tpu.pipeline_mode<synchronous>, transform_indices = @transform_15, window_bounds = array<i64: 9, 64, 64>}, {pipeline_mode = #tpu.pipeline_mode<synchronous>, transform_indices = @transform_16, window_bounds = array<i64: 1, 64>}, {pipeline_mode = #tpu.pipeline_mode<synchronous>, transform_indices = @transform_17, window_bounds = array<i64: 8, 16, 1>}, {pipeline_mode = #tpu.pipeline_mode<synchronous>, transform_indices = @transform_18, window_bounds = array<i64: 4, 16>}, {pipeline_mode = #tpu.pipeline_mode<synchronous>, transform_indices = @transform_19, window_bounds = array<i64: 64, 100>}, {pipeline_mode = #tpu.pipeline_mode<synchronous>, transform_indices = @transform_20, window_bounds = array<i64: 1, 100>}, {transform_indices = @transform_21, window_bounds = array<i64: 1, 1, 100>}]} {
    %c0 = arith.constant 0 : index
    %c0_0 = arith.constant 0 : index
    %c0_1 = arith.constant 0 : index
    %0 = vector.load %arg1[%c0, %c0_0, %c0_1] : memref<1x256x8xf32, #tpu.memory_space<vmem>>, vector<1x256x8xf32>
    %1 = vector.shape_cast %0 : vector<1x256x8xf32> to vector<256x8xf32>
    %c0_2 = arith.constant 0 : index
    %c0_3 = arith.constant 0 : index
    %2 = vector.load %arg2[%c0_2, %c0_3] : memref<8x48xf32, #tpu.memory_space<vmem>>, vector<8x48xf32>
    %cst = arith.constant dense<0.000000e+00> : vector<256x48xf32>
    %3 = tpu.matmul %1, %2, %cst {dimension_numbers = #tpu.dot_dimension_numbers<[1], [0], [0], [1], [0, 0, 1, 1], [], []>} : vector<256x8xf32>, vector<8x48xf32>, vector<256x48xf32> -> vector<256x48xf32>
    %c0_4 = arith.constant 0 : index
    %c0_5 = arith.constant 0 : index
    %4 = vector.load %arg3[%c0_4, %c0_5] : memref<1x48xf32, #tpu.memory_space<vmem>>, vector<1x48xf32>
    %5 = vector.broadcast %4 : vector<1x48xf32> to vector<256x48xf32>
    %6 = arith.addf %3, %5 : vector<256x48xf32>
    %cst_6 = arith.constant 0.000000e+00 : f32
    %7 = vector.broadcast %cst_6 : f32 to vector<256x48xf32>
    %8 = arith.maximumf %6, %7 : vector<256x48xf32>
    %9 = vector.extract_strided_slice %8 {offsets = [0, 0], sizes = [256, 24], strides = [1, 1]} : vector<256x48xf32> to vector<256x24xf32>
    %10 = vector.extract_strided_slice %8 {offsets = [0, 24], sizes = [256, 24], strides = [1, 1]} : vector<256x48xf32> to vector<256x24xf32>
    %c4 = arith.constant 4 : index
    %c0_7 = arith.constant 0 : index
    %c0_8 = arith.constant 0 : index
    %11 = vector.load %arg4[%c4, %c0_7, %c0_8] : memref<9x24x24xf32, #tpu.memory_space<vmem>>, vector<1x24x24xf32>
    %12 = vector.shape_cast %11 : vector<1x24x24xf32> to vector<24x24xf32>
    %cst_9 = arith.constant dense<0.000000e+00> : vector<256x24xf32>
    %13 = tpu.matmul %9, %12, %cst_9 {dimension_numbers = #tpu.dot_dimension_numbers<[1], [0], [0], [1], [0, 0, 1, 1], [], []>} : vector<256x24xf32>, vector<24x24xf32>, vector<256x24xf32> -> vector<256x24xf32>
    %c17_i32 = arith.constant 17 : i32
    %14 = tpu.dynamic_rotate %9 by %c17_i32 dim 0 : vector<256x24xf32>, i32 -> vector<256x24xf32>
    %c0_10 = arith.constant 0 : index
    %c0_11 = arith.constant 0 : index
    %c0_12 = arith.constant 0 : index
    %15 = vector.load %arg6[%c0_10, %c0_11, %c0_12] : memref<8x256x1xf32, #tpu.memory_space<vmem>>, vector<1x256x1xf32>
    %16 = vector.shape_cast %15 : vector<1x256x1xf32> to vector<256x1xf32>
    %17 = vector.broadcast %16 : vector<256x1xf32> to vector<256x24xf32>
    %18 = arith.mulf %14, %17 : vector<256x24xf32>
    %c0_13 = arith.constant 0 : index
    %c0_14 = arith.constant 0 : index
    %c0_15 = arith.constant 0 : index
    %19 = vector.load %arg4[%c0_13, %c0_14, %c0_15] : memref<9x24x24xf32, #tpu.memory_space<vmem>>, vector<1x24x24xf32>
    %20 = vector.shape_cast %19 : vector<1x24x24xf32> to vector<24x24xf32>
    %cst_16 = arith.constant dense<0.000000e+00> : vector<256x24xf32>
    %21 = tpu.matmul %18, %20, %cst_16 {dimension_numbers = #tpu.dot_dimension_numbers<[1], [0], [0], [1], [0, 0, 1, 1], [], []>} : vector<256x24xf32>, vector<24x24xf32>, vector<256x24xf32> -> vector<256x24xf32>
    %22 = arith.addf %13, %21 : vector<256x24xf32>
    %c16_i32 = arith.constant 16 : i32
    %23 = tpu.dynamic_rotate %9 by %c16_i32 dim 0 : vector<256x24xf32>, i32 -> vector<256x24xf32>
    %c1 = arith.constant 1 : index
    %c0_17 = arith.constant 0 : index
    %c0_18 = arith.constant 0 : index
    %24 = vector.load %arg6[%c1, %c0_17, %c0_18] : memref<8x256x1xf32, #tpu.memory_space<vmem>>, vector<1x256x1xf32>
    %25 = vector.shape_cast %24 : vector<1x256x1xf32> to vector<256x1xf32>
    %26 = vector.broadcast %25 : vector<256x1xf32> to vector<256x24xf32>
    %27 = arith.mulf %23, %26 : vector<256x24xf32>
    %c1_19 = arith.constant 1 : index
    %c0_20 = arith.constant 0 : index
    %c0_21 = arith.constant 0 : index
    %28 = vector.load %arg4[%c1_19, %c0_20, %c0_21] : memref<9x24x24xf32, #tpu.memory_space<vmem>>, vector<1x24x24xf32>
    %29 = vector.shape_cast %28 : vector<1x24x24xf32> to vector<24x24xf32>
    %cst_22 = arith.constant dense<0.000000e+00> : vector<256x24xf32>
    %30 = tpu.matmul %27, %29, %cst_22 {dimension_numbers = #tpu.dot_dimension_numbers<[1], [0], [0], [1], [0, 0, 1, 1], [], []>} : vector<256x24xf32>, vector<24x24xf32>, vector<256x24xf32> -> vector<256x24xf32>
    %31 = arith.addf %22, %30 : vector<256x24xf32>
    %c15_i32 = arith.constant 15 : i32
    %32 = tpu.dynamic_rotate %9 by %c15_i32 dim 0 : vector<256x24xf32>, i32 -> vector<256x24xf32>
    %c2 = arith.constant 2 : index
    %c0_23 = arith.constant 0 : index
    %c0_24 = arith.constant 0 : index
    %33 = vector.load %arg6[%c2, %c0_23, %c0_24] : memref<8x256x1xf32, #tpu.memory_space<vmem>>, vector<1x256x1xf32>
    %34 = vector.shape_cast %33 : vector<1x256x1xf32> to vector<256x1xf32>
    %35 = vector.broadcast %34 : vector<256x1xf32> to vector<256x24xf32>
    %36 = arith.mulf %32, %35 : vector<256x24xf32>
    %c2_25 = arith.constant 2 : index
    %c0_26 = arith.constant 0 : index
    %c0_27 = arith.constant 0 : index
    %37 = vector.load %arg4[%c2_25, %c0_26, %c0_27] : memref<9x24x24xf32, #tpu.memory_space<vmem>>, vector<1x24x24xf32>
    %38 = vector.shape_cast %37 : vector<1x24x24xf32> to vector<24x24xf32>
    %cst_28 = arith.constant dense<0.000000e+00> : vector<256x24xf32>
    %39 = tpu.matmul %36, %38, %cst_28 {dimension_numbers = #tpu.dot_dimension_numbers<[1], [0], [0], [1], [0, 0, 1, 1], [], []>} : vector<256x24xf32>, vector<24x24xf32>, vector<256x24xf32> -> vector<256x24xf32>
    %40 = arith.addf %31, %39 : vector<256x24xf32>
    %c1_i32 = arith.constant 1 : i32
    %41 = tpu.dynamic_rotate %9 by %c1_i32 dim 0 : vector<256x24xf32>, i32 -> vector<256x24xf32>
    %c3 = arith.constant 3 : index
    %c0_29 = arith.constant 0 : index
    %c0_30 = arith.constant 0 : index
    %42 = vector.load %arg6[%c3, %c0_29, %c0_30] : memref<8x256x1xf32, #tpu.memory_space<vmem>>, vector<1x256x1xf32>
    %43 = vector.shape_cast %42 : vector<1x256x1xf32> to vector<256x1xf32>
    %44 = vector.broadcast %43 : vector<256x1xf32> to vector<256x24xf32>
    %45 = arith.mulf %41, %44 : vector<256x24xf32>
    %c3_31 = arith.constant 3 : index
    %c0_32 = arith.constant 0 : index
    %c0_33 = arith.constant 0 : index
    %46 = vector.load %arg4[%c3_31, %c0_32, %c0_33] : memref<9x24x24xf32, #tpu.memory_space<vmem>>, vector<1x24x24xf32>
    %47 = vector.shape_cast %46 : vector<1x24x24xf32> to vector<24x24xf32>
    %cst_34 = arith.constant dense<0.000000e+00> : vector<256x24xf32>
    %48 = tpu.matmul %45, %47, %cst_34 {dimension_numbers = #tpu.dot_dimension_numbers<[1], [0], [0], [1], [0, 0, 1, 1], [], []>} : vector<256x24xf32>, vector<24x24xf32>, vector<256x24xf32> -> vector<256x24xf32>
    %49 = arith.addf %40, %48 : vector<256x24xf32>
    %c255_i32 = arith.constant 255 : i32
    %50 = tpu.dynamic_rotate %9 by %c255_i32 dim 0 : vector<256x24xf32>, i32 -> vector<256x24xf32>
    %c4_35 = arith.constant 4 : index
    %c0_36 = arith.constant 0 : index
    %c0_37 = arith.constant 0 : index
    %51 = vector.load %arg6[%c4_35, %c0_36, %c0_37] : memref<8x256x1xf32, #tpu.memory_space<vmem>>, vector<1x256x1xf32>
    %52 = vector.shape_cast %51 : vector<1x256x1xf32> to vector<256x1xf32>
    %53 = vector.broadcast %52 : vector<256x1xf32> to vector<256x24xf32>
    %54 = arith.mulf %50, %53 : vector<256x24xf32>
    %c5 = arith.constant 5 : index
    %c0_38 = arith.constant 0 : index
    %c0_39 = arith.constant 0 : index
    %55 = vector.load %arg4[%c5, %c0_38, %c0_39] : memref<9x24x24xf32, #tpu.memory_space<vmem>>, vector<1x24x24xf32>
    %56 = vector.shape_cast %55 : vector<1x24x24xf32> to vector<24x24xf32>
    %cst_40 = arith.constant dense<0.000000e+00> : vector<256x24xf32>
    %57 = tpu.matmul %54, %56, %cst_40 {dimension_numbers = #tpu.dot_dimension_numbers<[1], [0], [0], [1], [0, 0, 1, 1], [], []>} : vector<256x24xf32>, vector<24x24xf32>, vector<256x24xf32> -> vector<256x24xf32>
    %58 = arith.addf %49, %57 : vector<256x24xf32>
    %c241_i32 = arith.constant 241 : i32
    %59 = tpu.dynamic_rotate %9 by %c241_i32 dim 0 : vector<256x24xf32>, i32 -> vector<256x24xf32>
    %c5_41 = arith.constant 5 : index
    %c0_42 = arith.constant 0 : index
    %c0_43 = arith.constant 0 : index
    %60 = vector.load %arg6[%c5_41, %c0_42, %c0_43] : memref<8x256x1xf32, #tpu.memory_space<vmem>>, vector<1x256x1xf32>
    %61 = vector.shape_cast %60 : vector<1x256x1xf32> to vector<256x1xf32>
    %62 = vector.broadcast %61 : vector<256x1xf32> to vector<256x24xf32>
    %63 = arith.mulf %59, %62 : vector<256x24xf32>
    %c6 = arith.constant 6 : index
    %c0_44 = arith.constant 0 : index
    %c0_45 = arith.constant 0 : index
    %64 = vector.load %arg4[%c6, %c0_44, %c0_45] : memref<9x24x24xf32, #tpu.memory_space<vmem>>, vector<1x24x24xf32>
    %65 = vector.shape_cast %64 : vector<1x24x24xf32> to vector<24x24xf32>
    %cst_46 = arith.constant dense<0.000000e+00> : vector<256x24xf32>
    %66 = tpu.matmul %63, %65, %cst_46 {dimension_numbers = #tpu.dot_dimension_numbers<[1], [0], [0], [1], [0, 0, 1, 1], [], []>} : vector<256x24xf32>, vector<24x24xf32>, vector<256x24xf32> -> vector<256x24xf32>
    %67 = arith.addf %58, %66 : vector<256x24xf32>
    %c240_i32 = arith.constant 240 : i32
    %68 = tpu.dynamic_rotate %9 by %c240_i32 dim 0 : vector<256x24xf32>, i32 -> vector<256x24xf32>
    %c6_47 = arith.constant 6 : index
    %c0_48 = arith.constant 0 : index
    %c0_49 = arith.constant 0 : index
    %69 = vector.load %arg6[%c6_47, %c0_48, %c0_49] : memref<8x256x1xf32, #tpu.memory_space<vmem>>, vector<1x256x1xf32>
    %70 = vector.shape_cast %69 : vector<1x256x1xf32> to vector<256x1xf32>
    %71 = vector.broadcast %70 : vector<256x1xf32> to vector<256x24xf32>
    %72 = arith.mulf %68, %71 : vector<256x24xf32>
    %c7 = arith.constant 7 : index
    %c0_50 = arith.constant 0 : index
    %c0_51 = arith.constant 0 : index
    %73 = vector.load %arg4[%c7, %c0_50, %c0_51] : memref<9x24x24xf32, #tpu.memory_space<vmem>>, vector<1x24x24xf32>
    %74 = vector.shape_cast %73 : vector<1x24x24xf32> to vector<24x24xf32>
    %cst_52 = arith.constant dense<0.000000e+00> : vector<256x24xf32>
    %75 = tpu.matmul %72, %74, %cst_52 {dimension_numbers = #tpu.dot_dimension_numbers<[1], [0], [0], [1], [0, 0, 1, 1], [], []>} : vector<256x24xf32>, vector<24x24xf32>, vector<256x24xf32> -> vector<256x24xf32>
    %76 = arith.addf %67, %75 : vector<256x24xf32>
    %c239_i32 = arith.constant 239 : i32
    %77 = tpu.dynamic_rotate %9 by %c239_i32 dim 0 : vector<256x24xf32>, i32 -> vector<256x24xf32>
    %c7_53 = arith.constant 7 : index
    %c0_54 = arith.constant 0 : index
    %c0_55 = arith.constant 0 : index
    %78 = vector.load %arg6[%c7_53, %c0_54, %c0_55] : memref<8x256x1xf32, #tpu.memory_space<vmem>>, vector<1x256x1xf32>
    %79 = vector.shape_cast %78 : vector<1x256x1xf32> to vector<256x1xf32>
    %80 = vector.broadcast %79 : vector<256x1xf32> to vector<256x24xf32>
    %81 = arith.mulf %77, %80 : vector<256x24xf32>
    %c8 = arith.constant 8 : index
    %c0_56 = arith.constant 0 : index
    %c0_57 = arith.constant 0 : index
    %82 = vector.load %arg4[%c8, %c0_56, %c0_57] : memref<9x24x24xf32, #tpu.memory_space<vmem>>, vector<1x24x24xf32>
    %83 = vector.shape_cast %82 : vector<1x24x24xf32> to vector<24x24xf32>
    %cst_58 = arith.constant dense<0.000000e+00> : vector<256x24xf32>
    %84 = tpu.matmul %81, %83, %cst_58 {dimension_numbers = #tpu.dot_dimension_numbers<[1], [0], [0], [1], [0, 0, 1, 1], [], []>} : vector<256x24xf32>, vector<24x24xf32>, vector<256x24xf32> -> vector<256x24xf32>
    %85 = arith.addf %76, %84 : vector<256x24xf32>
    %c0_59 = arith.constant 0 : index
    %c0_60 = arith.constant 0 : index
    %86 = vector.load %arg5[%c0_59, %c0_60] : memref<1x24xf32, #tpu.memory_space<vmem>>, vector<1x24xf32>
    %87 = vector.broadcast %86 : vector<1x24xf32> to vector<256x24xf32>
    %88 = arith.addf %85, %87 : vector<256x24xf32>
    %cst_61 = arith.constant 0.000000e+00 : f32
    %89 = vector.broadcast %cst_61 : f32 to vector<256x24xf32>
    %90 = arith.maximumf %88, %89 : vector<256x24xf32>
    %91 = arith.addf %90, %10 : vector<256x24xf32>
    %cst_62 = arith.constant 0.000000e+00 : f32
    %92 = vector.broadcast %cst_62 : f32 to vector<256x24xf32>
    %93 = arith.maximumf %91, %92 : vector<256x24xf32>
    %c255_i32_63 = arith.constant 255 : i32
    %94 = tpu.dynamic_rotate %93 by %c255_i32_63 dim 0 : vector<256x24xf32>, i32 -> vector<256x24xf32>
    %95 = arith.maximumf %93, %94 : vector<256x24xf32>
    %c240_i32_64 = arith.constant 240 : i32
    %96 = tpu.dynamic_rotate %93 by %c240_i32_64 dim 0 : vector<256x24xf32>, i32 -> vector<256x24xf32>
    %c239_i32_65 = arith.constant 239 : i32
    %97 = tpu.dynamic_rotate %93 by %c239_i32_65 dim 0 : vector<256x24xf32>, i32 -> vector<256x24xf32>
    %98 = arith.maximumf %96, %97 : vector<256x24xf32>
    %99 = arith.maximumf %95, %98 : vector<256x24xf32>
    %c0_66 = arith.constant 0 : index
    %c0_67 = arith.constant 0 : index
    %100 = vector.load %arg7[%c0_66, %c0_67] : memref<64x256xf32, #tpu.memory_space<vmem>>, vector<64x256xf32>
    %cst_68 = arith.constant dense<0.000000e+00> : vector<64x24xf32>
    %101 = tpu.matmul %100, %99, %cst_68 {dimension_numbers = #tpu.dot_dimension_numbers<[1], [0], [0], [1], [0, 0, 1, 1], [], []>} : vector<64x256xf32>, vector<256x24xf32>, vector<64x24xf32> -> vector<64x24xf32>
    %c0_69 = arith.constant 0 : index
    %c0_70 = arith.constant 0 : index
    %102 = vector.load %arg8[%c0_69, %c0_70] : memref<24x96xf32, #tpu.memory_space<vmem>>, vector<24x96xf32>
    %cst_71 = arith.constant dense<0.000000e+00> : vector<64x96xf32>
    %103 = tpu.matmul %101, %102, %cst_71 {dimension_numbers = #tpu.dot_dimension_numbers<[1], [0], [0], [1], [0, 0, 1, 1], [], []>} : vector<64x24xf32>, vector<24x96xf32>, vector<64x96xf32> -> vector<64x96xf32>
    %c0_72 = arith.constant 0 : index
    %c0_73 = arith.constant 0 : index
    %104 = vector.load %arg9[%c0_72, %c0_73] : memref<1x96xf32, #tpu.memory_space<vmem>>, vector<1x96xf32>
    %105 = vector.broadcast %104 : vector<1x96xf32> to vector<64x96xf32>
    %106 = arith.addf %103, %105 : vector<64x96xf32>
    %cst_74 = arith.constant 0.000000e+00 : f32
    %107 = vector.broadcast %cst_74 : f32 to vector<64x96xf32>
    %108 = arith.maximumf %106, %107 : vector<64x96xf32>
    %109 = vector.extract_strided_slice %108 {offsets = [0, 0], sizes = [64, 48], strides = [1, 1]} : vector<64x96xf32> to vector<64x48xf32>
    %110 = vector.extract_strided_slice %108 {offsets = [0, 48], sizes = [64, 48], strides = [1, 1]} : vector<64x96xf32> to vector<64x48xf32>
    %c4_75 = arith.constant 4 : index
    %c0_76 = arith.constant 0 : index
    %c0_77 = arith.constant 0 : index
    %111 = vector.load %arg10[%c4_75, %c0_76, %c0_77] : memref<9x48x48xf32, #tpu.memory_space<vmem>>, vector<1x48x48xf32>
    %112 = vector.shape_cast %111 : vector<1x48x48xf32> to vector<48x48xf32>
    %cst_78 = arith.constant dense<0.000000e+00> : vector<64x48xf32>
    %113 = tpu.matmul %109, %112, %cst_78 {dimension_numbers = #tpu.dot_dimension_numbers<[1], [0], [0], [1], [0, 0, 1, 1], [], []>} : vector<64x48xf32>, vector<48x48xf32>, vector<64x48xf32> -> vector<64x48xf32>
    %c9_i32 = arith.constant 9 : i32
    %114 = tpu.dynamic_rotate %109 by %c9_i32 dim 0 : vector<64x48xf32>, i32 -> vector<64x48xf32>
    %c0_79 = arith.constant 0 : index
    %c0_80 = arith.constant 0 : index
    %c0_81 = arith.constant 0 : index
    %115 = vector.load %arg12[%c0_79, %c0_80, %c0_81] : memref<8x64x1xf32, #tpu.memory_space<vmem>>, vector<1x64x1xf32>
    %116 = vector.shape_cast %115 : vector<1x64x1xf32> to vector<64x1xf32>
    %117 = vector.broadcast %116 : vector<64x1xf32> to vector<64x48xf32>
    %118 = arith.mulf %114, %117 : vector<64x48xf32>
    %c0_82 = arith.constant 0 : index
    %c0_83 = arith.constant 0 : index
    %c0_84 = arith.constant 0 : index
    %119 = vector.load %arg10[%c0_82, %c0_83, %c0_84] : memref<9x48x48xf32, #tpu.memory_space<vmem>>, vector<1x48x48xf32>
    %120 = vector.shape_cast %119 : vector<1x48x48xf32> to vector<48x48xf32>
    %cst_85 = arith.constant dense<0.000000e+00> : vector<64x48xf32>
    %121 = tpu.matmul %118, %120, %cst_85 {dimension_numbers = #tpu.dot_dimension_numbers<[1], [0], [0], [1], [0, 0, 1, 1], [], []>} : vector<64x48xf32>, vector<48x48xf32>, vector<64x48xf32> -> vector<64x48xf32>
    %122 = arith.addf %113, %121 : vector<64x48xf32>
    %c8_i32 = arith.constant 8 : i32
    %123 = tpu.dynamic_rotate %109 by %c8_i32 dim 0 : vector<64x48xf32>, i32 -> vector<64x48xf32>
    %c1_86 = arith.constant 1 : index
    %c0_87 = arith.constant 0 : index
    %c0_88 = arith.constant 0 : index
    %124 = vector.load %arg12[%c1_86, %c0_87, %c0_88] : memref<8x64x1xf32, #tpu.memory_space<vmem>>, vector<1x64x1xf32>
    %125 = vector.shape_cast %124 : vector<1x64x1xf32> to vector<64x1xf32>
    %126 = vector.broadcast %125 : vector<64x1xf32> to vector<64x48xf32>
    %127 = arith.mulf %123, %126 : vector<64x48xf32>
    %c1_89 = arith.constant 1 : index
    %c0_90 = arith.constant 0 : index
    %c0_91 = arith.constant 0 : index
    %128 = vector.load %arg10[%c1_89, %c0_90, %c0_91] : memref<9x48x48xf32, #tpu.memory_space<vmem>>, vector<1x48x48xf32>
    %129 = vector.shape_cast %128 : vector<1x48x48xf32> to vector<48x48xf32>
    %cst_92 = arith.constant dense<0.000000e+00> : vector<64x48xf32>
    %130 = tpu.matmul %127, %129, %cst_92 {dimension_numbers = #tpu.dot_dimension_numbers<[1], [0], [0], [1], [0, 0, 1, 1], [], []>} : vector<64x48xf32>, vector<48x48xf32>, vector<64x48xf32> -> vector<64x48xf32>
    %131 = arith.addf %122, %130 : vector<64x48xf32>
    %c7_i32 = arith.constant 7 : i32
    %132 = tpu.dynamic_rotate %109 by %c7_i32 dim 0 : vector<64x48xf32>, i32 -> vector<64x48xf32>
    %c2_93 = arith.constant 2 : index
    %c0_94 = arith.constant 0 : index
    %c0_95 = arith.constant 0 : index
    %133 = vector.load %arg12[%c2_93, %c0_94, %c0_95] : memref<8x64x1xf32, #tpu.memory_space<vmem>>, vector<1x64x1xf32>
    %134 = vector.shape_cast %133 : vector<1x64x1xf32> to vector<64x1xf32>
    %135 = vector.broadcast %134 : vector<64x1xf32> to vector<64x48xf32>
    %136 = arith.mulf %132, %135 : vector<64x48xf32>
    %c2_96 = arith.constant 2 : index
    %c0_97 = arith.constant 0 : index
    %c0_98 = arith.constant 0 : index
    %137 = vector.load %arg10[%c2_96, %c0_97, %c0_98] : memref<9x48x48xf32, #tpu.memory_space<vmem>>, vector<1x48x48xf32>
    %138 = vector.shape_cast %137 : vector<1x48x48xf32> to vector<48x48xf32>
    %cst_99 = arith.constant dense<0.000000e+00> : vector<64x48xf32>
    %139 = tpu.matmul %136, %138, %cst_99 {dimension_numbers = #tpu.dot_dimension_numbers<[1], [0], [0], [1], [0, 0, 1, 1], [], []>} : vector<64x48xf32>, vector<48x48xf32>, vector<64x48xf32> -> vector<64x48xf32>
    %140 = arith.addf %131, %139 : vector<64x48xf32>
    %c1_i32_100 = arith.constant 1 : i32
    %141 = tpu.dynamic_rotate %109 by %c1_i32_100 dim 0 : vector<64x48xf32>, i32 -> vector<64x48xf32>
    %c3_101 = arith.constant 3 : index
    %c0_102 = arith.constant 0 : index
    %c0_103 = arith.constant 0 : index
    %142 = vector.load %arg12[%c3_101, %c0_102, %c0_103] : memref<8x64x1xf32, #tpu.memory_space<vmem>>, vector<1x64x1xf32>
    %143 = vector.shape_cast %142 : vector<1x64x1xf32> to vector<64x1xf32>
    %144 = vector.broadcast %143 : vector<64x1xf32> to vector<64x48xf32>
    %145 = arith.mulf %141, %144 : vector<64x48xf32>
    %c3_104 = arith.constant 3 : index
    %c0_105 = arith.constant 0 : index
    %c0_106 = arith.constant 0 : index
    %146 = vector.load %arg10[%c3_104, %c0_105, %c0_106] : memref<9x48x48xf32, #tpu.memory_space<vmem>>, vector<1x48x48xf32>
    %147 = vector.shape_cast %146 : vector<1x48x48xf32> to vector<48x48xf32>
    %cst_107 = arith.constant dense<0.000000e+00> : vector<64x48xf32>
    %148 = tpu.matmul %145, %147, %cst_107 {dimension_numbers = #tpu.dot_dimension_numbers<[1], [0], [0], [1], [0, 0, 1, 1], [], []>} : vector<64x48xf32>, vector<48x48xf32>, vector<64x48xf32> -> vector<64x48xf32>
    %149 = arith.addf %140, %148 : vector<64x48xf32>
    %c63_i32 = arith.constant 63 : i32
    %150 = tpu.dynamic_rotate %109 by %c63_i32 dim 0 : vector<64x48xf32>, i32 -> vector<64x48xf32>
    %c4_108 = arith.constant 4 : index
    %c0_109 = arith.constant 0 : index
    %c0_110 = arith.constant 0 : index
    %151 = vector.load %arg12[%c4_108, %c0_109, %c0_110] : memref<8x64x1xf32, #tpu.memory_space<vmem>>, vector<1x64x1xf32>
    %152 = vector.shape_cast %151 : vector<1x64x1xf32> to vector<64x1xf32>
    %153 = vector.broadcast %152 : vector<64x1xf32> to vector<64x48xf32>
    %154 = arith.mulf %150, %153 : vector<64x48xf32>
    %c5_111 = arith.constant 5 : index
    %c0_112 = arith.constant 0 : index
    %c0_113 = arith.constant 0 : index
    %155 = vector.load %arg10[%c5_111, %c0_112, %c0_113] : memref<9x48x48xf32, #tpu.memory_space<vmem>>, vector<1x48x48xf32>
    %156 = vector.shape_cast %155 : vector<1x48x48xf32> to vector<48x48xf32>
    %cst_114 = arith.constant dense<0.000000e+00> : vector<64x48xf32>
    %157 = tpu.matmul %154, %156, %cst_114 {dimension_numbers = #tpu.dot_dimension_numbers<[1], [0], [0], [1], [0, 0, 1, 1], [], []>} : vector<64x48xf32>, vector<48x48xf32>, vector<64x48xf32> -> vector<64x48xf32>
    %158 = arith.addf %149, %157 : vector<64x48xf32>
    %c57_i32 = arith.constant 57 : i32
    %159 = tpu.dynamic_rotate %109 by %c57_i32 dim 0 : vector<64x48xf32>, i32 -> vector<64x48xf32>
    %c5_115 = arith.constant 5 : index
    %c0_116 = arith.constant 0 : index
    %c0_117 = arith.constant 0 : index
    %160 = vector.load %arg12[%c5_115, %c0_116, %c0_117] : memref<8x64x1xf32, #tpu.memory_space<vmem>>, vector<1x64x1xf32>
    %161 = vector.shape_cast %160 : vector<1x64x1xf32> to vector<64x1xf32>
    %162 = vector.broadcast %161 : vector<64x1xf32> to vector<64x48xf32>
    %163 = arith.mulf %159, %162 : vector<64x48xf32>
    %c6_118 = arith.constant 6 : index
    %c0_119 = arith.constant 0 : index
    %c0_120 = arith.constant 0 : index
    %164 = vector.load %arg10[%c6_118, %c0_119, %c0_120] : memref<9x48x48xf32, #tpu.memory_space<vmem>>, vector<1x48x48xf32>
    %165 = vector.shape_cast %164 : vector<1x48x48xf32> to vector<48x48xf32>
    %cst_121 = arith.constant dense<0.000000e+00> : vector<64x48xf32>
    %166 = tpu.matmul %163, %165, %cst_121 {dimension_numbers = #tpu.dot_dimension_numbers<[1], [0], [0], [1], [0, 0, 1, 1], [], []>} : vector<64x48xf32>, vector<48x48xf32>, vector<64x48xf32> -> vector<64x48xf32>
    %167 = arith.addf %158, %166 : vector<64x48xf32>
    %c56_i32 = arith.constant 56 : i32
    %168 = tpu.dynamic_rotate %109 by %c56_i32 dim 0 : vector<64x48xf32>, i32 -> vector<64x48xf32>
    %c6_122 = arith.constant 6 : index
    %c0_123 = arith.constant 0 : index
    %c0_124 = arith.constant 0 : index
    %169 = vector.load %arg12[%c6_122, %c0_123, %c0_124] : memref<8x64x1xf32, #tpu.memory_space<vmem>>, vector<1x64x1xf32>
    %170 = vector.shape_cast %169 : vector<1x64x1xf32> to vector<64x1xf32>
    %171 = vector.broadcast %170 : vector<64x1xf32> to vector<64x48xf32>
    %172 = arith.mulf %168, %171 : vector<64x48xf32>
    %c7_125 = arith.constant 7 : index
    %c0_126 = arith.constant 0 : index
    %c0_127 = arith.constant 0 : index
    %173 = vector.load %arg10[%c7_125, %c0_126, %c0_127] : memref<9x48x48xf32, #tpu.memory_space<vmem>>, vector<1x48x48xf32>
    %174 = vector.shape_cast %173 : vector<1x48x48xf32> to vector<48x48xf32>
    %cst_128 = arith.constant dense<0.000000e+00> : vector<64x48xf32>
    %175 = tpu.matmul %172, %174, %cst_128 {dimension_numbers = #tpu.dot_dimension_numbers<[1], [0], [0], [1], [0, 0, 1, 1], [], []>} : vector<64x48xf32>, vector<48x48xf32>, vector<64x48xf32> -> vector<64x48xf32>
    %176 = arith.addf %167, %175 : vector<64x48xf32>
    %c55_i32 = arith.constant 55 : i32
    %177 = tpu.dynamic_rotate %109 by %c55_i32 dim 0 : vector<64x48xf32>, i32 -> vector<64x48xf32>
    %c7_129 = arith.constant 7 : index
    %c0_130 = arith.constant 0 : index
    %c0_131 = arith.constant 0 : index
    %178 = vector.load %arg12[%c7_129, %c0_130, %c0_131] : memref<8x64x1xf32, #tpu.memory_space<vmem>>, vector<1x64x1xf32>
    %179 = vector.shape_cast %178 : vector<1x64x1xf32> to vector<64x1xf32>
    %180 = vector.broadcast %179 : vector<64x1xf32> to vector<64x48xf32>
    %181 = arith.mulf %177, %180 : vector<64x48xf32>
    %c8_132 = arith.constant 8 : index
    %c0_133 = arith.constant 0 : index
    %c0_134 = arith.constant 0 : index
    %182 = vector.load %arg10[%c8_132, %c0_133, %c0_134] : memref<9x48x48xf32, #tpu.memory_space<vmem>>, vector<1x48x48xf32>
    %183 = vector.shape_cast %182 : vector<1x48x48xf32> to vector<48x48xf32>
    %cst_135 = arith.constant dense<0.000000e+00> : vector<64x48xf32>
    %184 = tpu.matmul %181, %183, %cst_135 {dimension_numbers = #tpu.dot_dimension_numbers<[1], [0], [0], [1], [0, 0, 1, 1], [], []>} : vector<64x48xf32>, vector<48x48xf32>, vector<64x48xf32> -> vector<64x48xf32>
    %185 = arith.addf %176, %184 : vector<64x48xf32>
    %c0_136 = arith.constant 0 : index
    %c0_137 = arith.constant 0 : index
    %186 = vector.load %arg11[%c0_136, %c0_137] : memref<1x48xf32, #tpu.memory_space<vmem>>, vector<1x48xf32>
    %187 = vector.broadcast %186 : vector<1x48xf32> to vector<64x48xf32>
    %188 = arith.addf %185, %187 : vector<64x48xf32>
    %cst_138 = arith.constant 0.000000e+00 : f32
    %189 = vector.broadcast %cst_138 : f32 to vector<64x48xf32>
    %190 = arith.maximumf %188, %189 : vector<64x48xf32>
    %191 = arith.addf %190, %110 : vector<64x48xf32>
    %cst_139 = arith.constant 0.000000e+00 : f32
    %192 = vector.broadcast %cst_139 : f32 to vector<64x48xf32>
    %193 = arith.maximumf %191, %192 : vector<64x48xf32>
    %c63_i32_140 = arith.constant 63 : i32
    %194 = tpu.dynamic_rotate %193 by %c63_i32_140 dim 0 : vector<64x48xf32>, i32 -> vector<64x48xf32>
    %195 = arith.maximumf %193, %194 : vector<64x48xf32>
    %c56_i32_141 = arith.constant 56 : i32
    %196 = tpu.dynamic_rotate %193 by %c56_i32_141 dim 0 : vector<64x48xf32>, i32 -> vector<64x48xf32>
    %c55_i32_142 = arith.constant 55 : i32
    %197 = tpu.dynamic_rotate %193 by %c55_i32_142 dim 0 : vector<64x48xf32>, i32 -> vector<64x48xf32>
    %198 = arith.maximumf %196, %197 : vector<64x48xf32>
    %199 = arith.maximumf %195, %198 : vector<64x48xf32>
    %c0_143 = arith.constant 0 : index
    %c0_144 = arith.constant 0 : index
    %200 = vector.load %arg13[%c0_143, %c0_144] : memref<16x64xf32, #tpu.memory_space<vmem>>, vector<16x64xf32>
    %cst_145 = arith.constant dense<0.000000e+00> : vector<16x48xf32>
    %201 = tpu.matmul %200, %199, %cst_145 {dimension_numbers = #tpu.dot_dimension_numbers<[1], [0], [0], [1], [0, 0, 1, 1], [], []>} : vector<16x64xf32>, vector<64x48xf32>, vector<16x48xf32> -> vector<16x48xf32>
    %c0_146 = arith.constant 0 : index
    %c0_147 = arith.constant 0 : index
    %202 = vector.load %arg14[%c0_146, %c0_147] : memref<48x128xf32, #tpu.memory_space<vmem>>, vector<48x128xf32>
    %cst_148 = arith.constant dense<0.000000e+00> : vector<16x128xf32>
    %203 = tpu.matmul %201, %202, %cst_148 {dimension_numbers = #tpu.dot_dimension_numbers<[1], [0], [0], [1], [0, 0, 1, 1], [], []>} : vector<16x48xf32>, vector<48x128xf32>, vector<16x128xf32> -> vector<16x128xf32>
    %c0_149 = arith.constant 0 : index
    %c0_150 = arith.constant 0 : index
    %204 = vector.load %arg15[%c0_149, %c0_150] : memref<1x128xf32, #tpu.memory_space<vmem>>, vector<1x128xf32>
    %205 = vector.broadcast %204 : vector<1x128xf32> to vector<16x128xf32>
    %206 = arith.addf %203, %205 : vector<16x128xf32>
    %cst_151 = arith.constant 0.000000e+00 : f32
    %207 = vector.broadcast %cst_151 : f32 to vector<16x128xf32>
    %208 = arith.maximumf %206, %207 : vector<16x128xf32>
    %209 = vector.extract_strided_slice %208 {offsets = [0, 0], sizes = [16, 64], strides = [1, 1]} : vector<16x128xf32> to vector<16x64xf32>
    %210 = vector.extract_strided_slice %208 {offsets = [0, 64], sizes = [16, 64], strides = [1, 1]} : vector<16x128xf32> to vector<16x64xf32>
    %c4_152 = arith.constant 4 : index
    %c0_153 = arith.constant 0 : index
    %c0_154 = arith.constant 0 : index
    %211 = vector.load %arg16[%c4_152, %c0_153, %c0_154] : memref<9x64x64xf32, #tpu.memory_space<vmem>>, vector<1x64x64xf32>
    %212 = vector.shape_cast %211 : vector<1x64x64xf32> to vector<64x64xf32>
    %cst_155 = arith.constant dense<0.000000e+00> : vector<16x64xf32>
    %213 = tpu.matmul %209, %212, %cst_155 {dimension_numbers = #tpu.dot_dimension_numbers<[1], [0], [0], [1], [0, 0, 1, 1], [], []>} : vector<16x64xf32>, vector<64x64xf32>, vector<16x64xf32> -> vector<16x64xf32>
    %c5_i32 = arith.constant 5 : i32
    %214 = tpu.dynamic_rotate %209 by %c5_i32 dim 0 : vector<16x64xf32>, i32 -> vector<16x64xf32>
    %c0_156 = arith.constant 0 : index
    %c0_157 = arith.constant 0 : index
    %c0_158 = arith.constant 0 : index
    %215 = vector.load %arg18[%c0_156, %c0_157, %c0_158] : memref<8x16x1xf32, #tpu.memory_space<vmem>>, vector<1x16x1xf32>
    %216 = vector.shape_cast %215 : vector<1x16x1xf32> to vector<16x1xf32>
    %217 = vector.broadcast %216 : vector<16x1xf32> to vector<16x64xf32>
    %218 = arith.mulf %214, %217 : vector<16x64xf32>
    %c0_159 = arith.constant 0 : index
    %c0_160 = arith.constant 0 : index
    %c0_161 = arith.constant 0 : index
    %219 = vector.load %arg16[%c0_159, %c0_160, %c0_161] : memref<9x64x64xf32, #tpu.memory_space<vmem>>, vector<1x64x64xf32>
    %220 = vector.shape_cast %219 : vector<1x64x64xf32> to vector<64x64xf32>
    %cst_162 = arith.constant dense<0.000000e+00> : vector<16x64xf32>
    %221 = tpu.matmul %218, %220, %cst_162 {dimension_numbers = #tpu.dot_dimension_numbers<[1], [0], [0], [1], [0, 0, 1, 1], [], []>} : vector<16x64xf32>, vector<64x64xf32>, vector<16x64xf32> -> vector<16x64xf32>
    %222 = arith.addf %213, %221 : vector<16x64xf32>
    %c4_i32 = arith.constant 4 : i32
    %223 = tpu.dynamic_rotate %209 by %c4_i32 dim 0 : vector<16x64xf32>, i32 -> vector<16x64xf32>
    %c1_163 = arith.constant 1 : index
    %c0_164 = arith.constant 0 : index
    %c0_165 = arith.constant 0 : index
    %224 = vector.load %arg18[%c1_163, %c0_164, %c0_165] : memref<8x16x1xf32, #tpu.memory_space<vmem>>, vector<1x16x1xf32>
    %225 = vector.shape_cast %224 : vector<1x16x1xf32> to vector<16x1xf32>
    %226 = vector.broadcast %225 : vector<16x1xf32> to vector<16x64xf32>
    %227 = arith.mulf %223, %226 : vector<16x64xf32>
    %c1_166 = arith.constant 1 : index
    %c0_167 = arith.constant 0 : index
    %c0_168 = arith.constant 0 : index
    %228 = vector.load %arg16[%c1_166, %c0_167, %c0_168] : memref<9x64x64xf32, #tpu.memory_space<vmem>>, vector<1x64x64xf32>
    %229 = vector.shape_cast %228 : vector<1x64x64xf32> to vector<64x64xf32>
    %cst_169 = arith.constant dense<0.000000e+00> : vector<16x64xf32>
    %230 = tpu.matmul %227, %229, %cst_169 {dimension_numbers = #tpu.dot_dimension_numbers<[1], [0], [0], [1], [0, 0, 1, 1], [], []>} : vector<16x64xf32>, vector<64x64xf32>, vector<16x64xf32> -> vector<16x64xf32>
    %231 = arith.addf %222, %230 : vector<16x64xf32>
    %c3_i32 = arith.constant 3 : i32
    %232 = tpu.dynamic_rotate %209 by %c3_i32 dim 0 : vector<16x64xf32>, i32 -> vector<16x64xf32>
    %c2_170 = arith.constant 2 : index
    %c0_171 = arith.constant 0 : index
    %c0_172 = arith.constant 0 : index
    %233 = vector.load %arg18[%c2_170, %c0_171, %c0_172] : memref<8x16x1xf32, #tpu.memory_space<vmem>>, vector<1x16x1xf32>
    %234 = vector.shape_cast %233 : vector<1x16x1xf32> to vector<16x1xf32>
    %235 = vector.broadcast %234 : vector<16x1xf32> to vector<16x64xf32>
    %236 = arith.mulf %232, %235 : vector<16x64xf32>
    %c2_173 = arith.constant 2 : index
    %c0_174 = arith.constant 0 : index
    %c0_175 = arith.constant 0 : index
    %237 = vector.load %arg16[%c2_173, %c0_174, %c0_175] : memref<9x64x64xf32, #tpu.memory_space<vmem>>, vector<1x64x64xf32>
    %238 = vector.shape_cast %237 : vector<1x64x64xf32> to vector<64x64xf32>
    %cst_176 = arith.constant dense<0.000000e+00> : vector<16x64xf32>
    %239 = tpu.matmul %236, %238, %cst_176 {dimension_numbers = #tpu.dot_dimension_numbers<[1], [0], [0], [1], [0, 0, 1, 1], [], []>} : vector<16x64xf32>, vector<64x64xf32>, vector<16x64xf32> -> vector<16x64xf32>
    %240 = arith.addf %231, %239 : vector<16x64xf32>
    %c1_i32_177 = arith.constant 1 : i32
    %241 = tpu.dynamic_rotate %209 by %c1_i32_177 dim 0 : vector<16x64xf32>, i32 -> vector<16x64xf32>
    %c3_178 = arith.constant 3 : index
    %c0_179 = arith.constant 0 : index
    %c0_180 = arith.constant 0 : index
    %242 = vector.load %arg18[%c3_178, %c0_179, %c0_180] : memref<8x16x1xf32, #tpu.memory_space<vmem>>, vector<1x16x1xf32>
    %243 = vector.shape_cast %242 : vector<1x16x1xf32> to vector<16x1xf32>
    %244 = vector.broadcast %243 : vector<16x1xf32> to vector<16x64xf32>
    %245 = arith.mulf %241, %244 : vector<16x64xf32>
    %c3_181 = arith.constant 3 : index
    %c0_182 = arith.constant 0 : index
    %c0_183 = arith.constant 0 : index
    %246 = vector.load %arg16[%c3_181, %c0_182, %c0_183] : memref<9x64x64xf32, #tpu.memory_space<vmem>>, vector<1x64x64xf32>
    %247 = vector.shape_cast %246 : vector<1x64x64xf32> to vector<64x64xf32>
    %cst_184 = arith.constant dense<0.000000e+00> : vector<16x64xf32>
    %248 = tpu.matmul %245, %247, %cst_184 {dimension_numbers = #tpu.dot_dimension_numbers<[1], [0], [0], [1], [0, 0, 1, 1], [], []>} : vector<16x64xf32>, vector<64x64xf32>, vector<16x64xf32> -> vector<16x64xf32>
    %249 = arith.addf %240, %248 : vector<16x64xf32>
    %c15_i32_185 = arith.constant 15 : i32
    %250 = tpu.dynamic_rotate %209 by %c15_i32_185 dim 0 : vector<16x64xf32>, i32 -> vector<16x64xf32>
    %c4_186 = arith.constant 4 : index
    %c0_187 = arith.constant 0 : index
    %c0_188 = arith.constant 0 : index
    %251 = vector.load %arg18[%c4_186, %c0_187, %c0_188] : memref<8x16x1xf32, #tpu.memory_space<vmem>>, vector<1x16x1xf32>
    %252 = vector.shape_cast %251 : vector<1x16x1xf32> to vector<16x1xf32>
    %253 = vector.broadcast %252 : vector<16x1xf32> to vector<16x64xf32>
    %254 = arith.mulf %250, %253 : vector<16x64xf32>
    %c5_189 = arith.constant 5 : index
    %c0_190 = arith.constant 0 : index
    %c0_191 = arith.constant 0 : index
    %255 = vector.load %arg16[%c5_189, %c0_190, %c0_191] : memref<9x64x64xf32, #tpu.memory_space<vmem>>, vector<1x64x64xf32>
    %256 = vector.shape_cast %255 : vector<1x64x64xf32> to vector<64x64xf32>
    %cst_192 = arith.constant dense<0.000000e+00> : vector<16x64xf32>
    %257 = tpu.matmul %254, %256, %cst_192 {dimension_numbers = #tpu.dot_dimension_numbers<[1], [0], [0], [1], [0, 0, 1, 1], [], []>} : vector<16x64xf32>, vector<64x64xf32>, vector<16x64xf32> -> vector<16x64xf32>
    %258 = arith.addf %249, %257 : vector<16x64xf32>
    %c13_i32 = arith.constant 13 : i32
    %259 = tpu.dynamic_rotate %209 by %c13_i32 dim 0 : vector<16x64xf32>, i32 -> vector<16x64xf32>
    %c5_193 = arith.constant 5 : index
    %c0_194 = arith.constant 0 : index
    %c0_195 = arith.constant 0 : index
    %260 = vector.load %arg18[%c5_193, %c0_194, %c0_195] : memref<8x16x1xf32, #tpu.memory_space<vmem>>, vector<1x16x1xf32>
    %261 = vector.shape_cast %260 : vector<1x16x1xf32> to vector<16x1xf32>
    %262 = vector.broadcast %261 : vector<16x1xf32> to vector<16x64xf32>
    %263 = arith.mulf %259, %262 : vector<16x64xf32>
    %c6_196 = arith.constant 6 : index
    %c0_197 = arith.constant 0 : index
    %c0_198 = arith.constant 0 : index
    %264 = vector.load %arg16[%c6_196, %c0_197, %c0_198] : memref<9x64x64xf32, #tpu.memory_space<vmem>>, vector<1x64x64xf32>
    %265 = vector.shape_cast %264 : vector<1x64x64xf32> to vector<64x64xf32>
    %cst_199 = arith.constant dense<0.000000e+00> : vector<16x64xf32>
    %266 = tpu.matmul %263, %265, %cst_199 {dimension_numbers = #tpu.dot_dimension_numbers<[1], [0], [0], [1], [0, 0, 1, 1], [], []>} : vector<16x64xf32>, vector<64x64xf32>, vector<16x64xf32> -> vector<16x64xf32>
    %267 = arith.addf %258, %266 : vector<16x64xf32>
    %c12_i32 = arith.constant 12 : i32
    %268 = tpu.dynamic_rotate %209 by %c12_i32 dim 0 : vector<16x64xf32>, i32 -> vector<16x64xf32>
    %c6_200 = arith.constant 6 : index
    %c0_201 = arith.constant 0 : index
    %c0_202 = arith.constant 0 : index
    %269 = vector.load %arg18[%c6_200, %c0_201, %c0_202] : memref<8x16x1xf32, #tpu.memory_space<vmem>>, vector<1x16x1xf32>
    %270 = vector.shape_cast %269 : vector<1x16x1xf32> to vector<16x1xf32>
    %271 = vector.broadcast %270 : vector<16x1xf32> to vector<16x64xf32>
    %272 = arith.mulf %268, %271 : vector<16x64xf32>
    %c7_203 = arith.constant 7 : index
    %c0_204 = arith.constant 0 : index
    %c0_205 = arith.constant 0 : index
    %273 = vector.load %arg16[%c7_203, %c0_204, %c0_205] : memref<9x64x64xf32, #tpu.memory_space<vmem>>, vector<1x64x64xf32>
    %274 = vector.shape_cast %273 : vector<1x64x64xf32> to vector<64x64xf32>
    %cst_206 = arith.constant dense<0.000000e+00> : vector<16x64xf32>
    %275 = tpu.matmul %272, %274, %cst_206 {dimension_numbers = #tpu.dot_dimension_numbers<[1], [0], [0], [1], [0, 0, 1, 1], [], []>} : vector<16x64xf32>, vector<64x64xf32>, vector<16x64xf32> -> vector<16x64xf32>
    %276 = arith.addf %267, %275 : vector<16x64xf32>
    %c11_i32 = arith.constant 11 : i32
    %277 = tpu.dynamic_rotate %209 by %c11_i32 dim 0 : vector<16x64xf32>, i32 -> vector<16x64xf32>
    %c7_207 = arith.constant 7 : index
    %c0_208 = arith.constant 0 : index
    %c0_209 = arith.constant 0 : index
    %278 = vector.load %arg18[%c7_207, %c0_208, %c0_209] : memref<8x16x1xf32, #tpu.memory_space<vmem>>, vector<1x16x1xf32>
    %279 = vector.shape_cast %278 : vector<1x16x1xf32> to vector<16x1xf32>
    %280 = vector.broadcast %279 : vector<16x1xf32> to vector<16x64xf32>
    %281 = arith.mulf %277, %280 : vector<16x64xf32>
    %c8_210 = arith.constant 8 : index
    %c0_211 = arith.constant 0 : index
    %c0_212 = arith.constant 0 : index
    %282 = vector.load %arg16[%c8_210, %c0_211, %c0_212] : memref<9x64x64xf32, #tpu.memory_space<vmem>>, vector<1x64x64xf32>
    %283 = vector.shape_cast %282 : vector<1x64x64xf32> to vector<64x64xf32>
    %cst_213 = arith.constant dense<0.000000e+00> : vector<16x64xf32>
    %284 = tpu.matmul %281, %283, %cst_213 {dimension_numbers = #tpu.dot_dimension_numbers<[1], [0], [0], [1], [0, 0, 1, 1], [], []>} : vector<16x64xf32>, vector<64x64xf32>, vector<16x64xf32> -> vector<16x64xf32>
    %285 = arith.addf %276, %284 : vector<16x64xf32>
    %c0_214 = arith.constant 0 : index
    %c0_215 = arith.constant 0 : index
    %286 = vector.load %arg17[%c0_214, %c0_215] : memref<1x64xf32, #tpu.memory_space<vmem>>, vector<1x64xf32>
    %287 = vector.broadcast %286 : vector<1x64xf32> to vector<16x64xf32>
    %288 = arith.addf %285, %287 : vector<16x64xf32>
    %cst_216 = arith.constant 0.000000e+00 : f32
    %289 = vector.broadcast %cst_216 : f32 to vector<16x64xf32>
    %290 = arith.maximumf %288, %289 : vector<16x64xf32>
    %291 = arith.addf %290, %210 : vector<16x64xf32>
    %cst_217 = arith.constant 0.000000e+00 : f32
    %292 = vector.broadcast %cst_217 : f32 to vector<16x64xf32>
    %293 = arith.maximumf %291, %292 : vector<16x64xf32>
    %c15_i32_218 = arith.constant 15 : i32
    %294 = tpu.dynamic_rotate %293 by %c15_i32_218 dim 0 : vector<16x64xf32>, i32 -> vector<16x64xf32>
    %295 = arith.maximumf %293, %294 : vector<16x64xf32>
    %c12_i32_219 = arith.constant 12 : i32
    %296 = tpu.dynamic_rotate %293 by %c12_i32_219 dim 0 : vector<16x64xf32>, i32 -> vector<16x64xf32>
    %c11_i32_220 = arith.constant 11 : i32
    %297 = tpu.dynamic_rotate %293 by %c11_i32_220 dim 0 : vector<16x64xf32>, i32 -> vector<16x64xf32>
    %298 = arith.maximumf %296, %297 : vector<16x64xf32>
    %299 = arith.maximumf %295, %298 : vector<16x64xf32>
    %c0_221 = arith.constant 0 : index
    %c0_222 = arith.constant 0 : index
    %300 = vector.load %arg19[%c0_221, %c0_222] : memref<4x16xf32, #tpu.memory_space<vmem>>, vector<4x16xf32>
    %cst_223 = arith.constant dense<0.000000e+00> : vector<4x64xf32>
    %301 = tpu.matmul %300, %299, %cst_223 {dimension_numbers = #tpu.dot_dimension_numbers<[1], [0], [0], [1], [0, 0, 1, 1], [], []>} : vector<4x16xf32>, vector<16x64xf32>, vector<4x64xf32> -> vector<4x64xf32>
    %c0_224 = arith.constant 0 : index
    %c0_225 = arith.constant 0 : index
    %302 = vector.load %arg20[%c0_224, %c0_225] : memref<64x100xf32, #tpu.memory_space<vmem>>, vector<64x100xf32>
    %cst_226 = arith.constant dense<0.000000e+00> : vector<4x100xf32>
    %303 = tpu.matmul %301, %302, %cst_226 {dimension_numbers = #tpu.dot_dimension_numbers<[1], [0], [0], [1], [0, 0, 1, 1], [], []>} : vector<4x64xf32>, vector<64x100xf32>, vector<4x100xf32> -> vector<4x100xf32>
    %c0_227 = arith.constant 0 : index
    %c0_228 = arith.constant 0 : index
    %304 = vector.load %arg21[%c0_227, %c0_228] : memref<1x100xf32, #tpu.memory_space<vmem>>, vector<1x100xf32>
    %305 = vector.broadcast %304 : vector<1x100xf32> to vector<4x100xf32>
    %306 = arith.addf %303, %305 : vector<4x100xf32>
    %cst_229 = arith.constant 0.000000e+00 : f32
    %307 = vector.broadcast %cst_229 : f32 to vector<4x100xf32>
    %308 = arith.maximumf %306, %307 : vector<4x100xf32>
    %cst_230 = arith.constant dense<0.000000e+00> : vector<100xf32>
    %309 = vector.multi_reduction <add>, %308, %cst_230 [0] : vector<4x100xf32> to vector<100xf32>
    %310 = vector.shape_cast %309 : vector<100xf32> to vector<1x100xf32>
    %cst_231 = arith.constant 2.500000e-01 : f32
    %311 = vector.broadcast %cst_231 : f32 to vector<1x100xf32>
    %312 = arith.mulf %310, %311 : vector<1x100xf32>
    %cst_232 = arith.constant dense<0xFF800000> : vector<1xf32>
    %313 = vector.multi_reduction <maximumf>, %312, %cst_232 [1] : vector<1x100xf32> to vector<1xf32>
    %314 = vector.shape_cast %313 : vector<1xf32> to vector<1x1xf32>
    %315 = vector.broadcast %314 : vector<1x1xf32> to vector<1x100xf32>
    %316 = arith.subf %312, %315 : vector<1x100xf32>
    %317 = math.exp %316 : vector<1x100xf32>
    %cst_233 = arith.constant dense<0.000000e+00> : vector<1xf32>
    %318 = vector.multi_reduction <add>, %317, %cst_233 [1] : vector<1x100xf32> to vector<1xf32>
    %319 = vector.shape_cast %318 : vector<1xf32> to vector<1x1xf32>
    %320 = math.log %319 : vector<1x1xf32>
    %321 = vector.broadcast %320 : vector<1x1xf32> to vector<1x100xf32>
    %322 = arith.subf %316, %321 : vector<1x100xf32>
    %c0_234 = arith.constant 0 : index
    %c0_235 = arith.constant 0 : index
    %c0_236 = arith.constant 0 : index
    %323 = vector.load %arg22[%c0_234, %c0_235, %c0_236] : memref<1x1x100xf32, #tpu.memory_space<vmem>>, vector<1x1x100xf32>
    %324 = vector.shape_cast %323 : vector<1x1x100xf32> to vector<1x100xf32>
    %325 = vector.shape_cast %322 : vector<1x100xf32> to vector<1x1x100xf32>
    tpu.vector_store %arg22[%c0_234, %c0_235, %c0_236], %325 {strides = array<i32>} : memref<1x1x100xf32, #tpu.memory_space<vmem>>, vector<1x1x100xf32>,
    return
  }
  func.func @transform_0(%arg0: i32) -> (i32, i32, i32) {
    %c0_i32 = arith.constant 0 : i32
    %c0_i32_0 = arith.constant 0 : i32
    %c0_i32_1 = arith.constant 0 : i32
    return %arg0, %c0_i32, %c0_i32_0 : i32, i32, i32
  }
  func.func @transform_1(%arg0: i32) -> (i32, i32) {
    %c0_i32 = arith.constant 0 : i32
    %c0_i32_0 = arith.constant 0 : i32
    %c0_i32_1 = arith.constant 0 : i32
    return %c0_i32, %c0_i32_0 : i32, i32
  }
  func.func @transform_2(%arg0: i32) -> (i32, i32) {
    %c0_i32 = arith.constant 0 : i32
    %c0_i32_0 = arith.constant 0 : i32
    %c0_i32_1 = arith.constant 0 : i32
    return %c0_i32, %c0_i32_0 : i32, i32
  }
  func.func @transform_3(%arg0: i32) -> (i32, i32, i32) {
    %c0_i32 = arith.constant 0 : i32
    %c0_i32_0 = arith.constant 0 : i32
    %c0_i32_1 = arith.constant 0 : i32
    %c0_i32_2 = arith.constant 0 : i32
    return %c0_i32, %c0_i32_0, %c0_i32_1 : i32, i32, i32
  }
  func.func @transform_4(%arg0: i32) -> (i32, i32) {
    %c0_i32 = arith.constant 0 : i32
    %c0_i32_0 = arith.constant 0 : i32
    %c0_i32_1 = arith.constant 0 : i32
    return %c0_i32, %c0_i32_0 : i32, i32
  }
  func.func @transform_5(%arg0: i32) -> (i32, i32, i32) {
    %c0_i32 = arith.constant 0 : i32
    %c0_i32_0 = arith.constant 0 : i32
    %c0_i32_1 = arith.constant 0 : i32
    %c0_i32_2 = arith.constant 0 : i32
    return %c0_i32, %c0_i32_0, %c0_i32_1 : i32, i32, i32
  }
  func.func @transform_6(%arg0: i32) -> (i32, i32) {
    %c0_i32 = arith.constant 0 : i32
    %c0_i32_0 = arith.constant 0 : i32
    %c0_i32_1 = arith.constant 0 : i32
    return %c0_i32, %c0_i32_0 : i32, i32
  }
  func.func @transform_7(%arg0: i32) -> (i32, i32) {
    %c0_i32 = arith.constant 0 : i32
    %c0_i32_0 = arith.constant 0 : i32
    %c0_i32_1 = arith.constant 0 : i32
    return %c0_i32, %c0_i32_0 : i32, i32
  }
  func.func @transform_8(%arg0: i32) -> (i32, i32) {
    %c0_i32 = arith.constant 0 : i32
    %c0_i32_0 = arith.constant 0 : i32
    %c0_i32_1 = arith.constant 0 : i32
    return %c0_i32, %c0_i32_0 : i32, i32
  }
  func.func @transform_9(%arg0: i32) -> (i32, i32, i32) {
    %c0_i32 = arith.constant 0 : i32
    %c0_i32_0 = arith.constant 0 : i32
    %c0_i32_1 = arith.constant 0 : i32
    %c0_i32_2 = arith.constant 0 : i32
    return %c0_i32, %c0_i32_0, %c0_i32_1 : i32, i32, i32
  }
  func.func @transform_10(%arg0: i32) -> (i32, i32) {
    %c0_i32 = arith.constant 0 : i32
    %c0_i32_0 = arith.constant 0 : i32
    %c0_i32_1 = arith.constant 0 : i32
    return %c0_i32, %c0_i32_0 : i32, i32
  }
  func.func @transform_11(%arg0: i32) -> (i32, i32, i32) {
    %c0_i32 = arith.constant 0 : i32
    %c0_i32_0 = arith.constant 0 : i32
    %c0_i32_1 = arith.constant 0 : i32
    %c0_i32_2 = arith.constant 0 : i32
    return %c0_i32, %c0_i32_0, %c0_i32_1 : i32, i32, i32
  }
  func.func @transform_12(%arg0: i32) -> (i32, i32) {
    %c0_i32 = arith.constant 0 : i32
    %c0_i32_0 = arith.constant 0 : i32
    %c0_i32_1 = arith.constant 0 : i32
    return %c0_i32, %c0_i32_0 : i32, i32
  }
  func.func @transform_13(%arg0: i32) -> (i32, i32) {
    %c0_i32 = arith.constant 0 : i32
    %c0_i32_0 = arith.constant 0 : i32
    %c0_i32_1 = arith.constant 0 : i32
    return %c0_i32, %c0_i32_0 : i32, i32
  }
  func.func @transform_14(%arg0: i32) -> (i32, i32) {
    %c0_i32 = arith.constant 0 : i32
    %c0_i32_0 = arith.constant 0 : i32
    %c0_i32_1 = arith.constant 0 : i32
    return %c0_i32, %c0_i32_0 : i32, i32
  }
  func.func @transform_15(%arg0: i32) -> (i32, i32, i32) {
    %c0_i32 = arith.constant 0 : i32
    %c0_i32_0 = arith.constant 0 : i32
    %c0_i32_1 = arith.constant 0 : i32
    %c0_i32_2 = arith.constant 0 : i32
    return %c0_i32, %c0_i32_0, %c0_i32_1 : i32, i32, i32
  }
  func.func @transform_16(%arg0: i32) -> (i32, i32) {
    %c0_i32 = arith.constant 0 : i32
    %c0_i32_0 = arith.constant 0 : i32
    %c0_i32_1 = arith.constant 0 : i32
    return %c0_i32, %c0_i32_0 : i32, i32
  }
  func.func @transform_17(%arg0: i32) -> (i32, i32, i32) {
    %c0_i32 = arith.constant 0 : i32
    %c0_i32_0 = arith.constant 0 : i32
    %c0_i32_1 = arith.constant 0 : i32
    %c0_i32_2 = arith.constant 0 : i32
    return %c0_i32, %c0_i32_0, %c0_i32_1 : i32, i32, i32
  }
  func.func @transform_18(%arg0: i32) -> (i32, i32) {
    %c0_i32 = arith.constant 0 : i32
    %c0_i32_0 = arith.constant 0 : i32
    %c0_i32_1 = arith.constant 0 : i32
    return %c0_i32, %c0_i32_0 : i32, i32
  }
  func.func @transform_19(%arg0: i32) -> (i32, i32) {
    %c0_i32 = arith.constant 0 : i32
    %c0_i32_0 = arith.constant 0 : i32
    %c0_i32_1 = arith.constant 0 : i32
    return %c0_i32, %c0_i32_0 : i32, i32
  }
  func.func @transform_20(%arg0: i32) -> (i32, i32) {
    %c0_i32 = arith.constant 0 : i32
    %c0_i32_0 = arith.constant 0 : i32
    %c0_i32_1 = arith.constant 0 : i32
    return %c0_i32, %c0_i32_0 : i32, i32
  }
  func.func @transform_21(%arg0: i32) -> (i32, i32, i32) {
    %c0_i32 = arith.constant 0 : i32
    %c0_i32_0 = arith.constant 0 : i32
    %c0_i32_1 = arith.constant 0 : i32
    return %arg0, %c0_i32, %c0_i32_0 : i32, i32, i32
  }
}

</mosaic_0001>

<bundles_post_ra>
// kernel: _lambda_.1
= control target key start
LH: loop header
LB: loop body
LE: loop exit
PB: predicated region body
PF: predicated region fallthrough
CT: control target
= control target key end

     0   :  { %s13612_s0 = inlined_call_operand.vmem [shape: f32[2,256,8], index: 0, kind: input, shape index: {}]   ;;  %s13613_s1 = inlined_call_operand.hbm [shape: f32[8,48], index: 1, kind: input, shape index: {}]   ;;  %s13614_s2 = inlined_call_operand.hbm [shape: f32[1,48], index: 2, kind: input, shape index: {}]   ;;  %s13615_s3 = inlined_call_operand.hbm [shape: f32[9,24,24], index: 3, kind: input, shape index: {}]   ;;  %s13616_s4 = inlined_call_operand.hbm [shape: f32[1,24], index: 4, kind: input, shape index: {}]   ;;  %s13617_s5 = inlined_call_operand.hbm [shape: f32[8,256,1], index: 5, kind: input, shape index: {}]   ;;  %s13618_s6 = inlined_call_operand.hbm [shape: f32[64,256], index: 6, kind: input, shape index: {}]   ;;  %s13619_s7 = inlined_call_operand.hbm [shape: f32[24,96], index: 7, kind: input, shape index: {}]   ;;  %s13620_s8 = inlined_call_operand.hbm [shape: f32[1,96], index: 8, kind: input, shape index: {}]   ;;  %s13621_s9 = inlined_call_operand.vmem [shape: f32[9,48,48], index: 9, kind: input, shape index: {}]   ;;  %s13622_s10 = inlined_call_operand.hbm [shape: f32[1,48], index: 10, kind: input, shape index: {}]   ;;  %s13623_s11 = inlined_call_operand.vmem [shape: f32[8,64,1], index: 11, kind: input, shape index: {}]   ;;  %s13624_s12 = inlined_call_operand.hbm [shape: f32[16,64], index: 12, kind: input, shape index: {}]   ;;  %s13625_s13 = inlined_call_operand.hbm [shape: f32[48,128], index: 13, kind: input, shape index: {}]   ;;  %s13626_s14 = inlined_call_operand.vmem [shape: f32[1,128], index: 14, kind: input, shape index: {}]   ;;  %s13627_s15 = inlined_call_operand.vmem [shape: f32[9,64,64], index: 15, kind: input, shape index: {}]   ;;  %s13628_s16 = inlined_call_operand.vmem [shape: f32[1,64], index: 16, kind: input, shape index: {}]   ;;  %s13629_s17 = inlined_call_operand.vmem [shape: f32[8,16,1], index: 17, kind: input, shape index: {}]   ;;  %s13630_s18 = inlined_call_operand.hbm [shape: f32[4,16], index: 18, kind: input, shape index: {}]   ;;  %s13631_s19 = inlined_call_operand.hbm [shape: f32[64,100], index: 19, kind: input, shape index: {}]   ;;  %s13632_s20 = inlined_call_operand.vmem [shape: f32[1,100], index: 20, kind: input, shape index: {}]   ;;  %s13633_s21 = inlined_call_operand.hbm [shape: f32[2,1,100], index: 21, kind: output, shape index: {}]  }
   0x1   :  { %13811 = sst [smem:[#allocation272_spill]] %s13612_s0 }
   0x2   :  { %13812 = sst [smem:[#allocation273_spill]] %s13613_s1 }
   0x3   :  { %13813 = sst [smem:[#allocation274_spill]] %s13614_s2 }
   0x4   :  { %13814 = sst [smem:[#allocation275_spill]] %s13615_s3 }
   0x5   :  { %13815 = sst [smem:[#allocation276_spill]] %s13616_s4 }
   0x6   :  { %13816 = sst [smem:[#allocation277_spill]] %s13617_s5 }
   0x7   :  { %13817 = sst [smem:[#allocation278_spill]] %s13618_s6 }
   0x8   :  { %13818 = sst [smem:[#allocation279_spill]] %s13620_s8 }
   0x9   :  { %13819 = sst [smem:[#allocation280_spill]] %s13624_s12 }
   0xa   :  { %13820 = sst [smem:[#allocation281_spill]] %s13632_s20 }
   0xb   :  { %13821 = sst [smem:[#allocation282_spill]] %s13633_s21 }
   0xc   :  { %26 = vsyncpa [#allocation3], 0 }
   0xd   :  { %27 = vsyncpa [#allocation6], 0 }
   0xe   :  { %28 = vsyncpa [#allocation9], 0 }
   0xf   :  { %29 = vsyncpa [#allocation12], 0 }
  0x10   :  { %30 = vsyncpa [#allocation15], 0 }
  0x11   :  { %31 = vsyncpa [#allocation18], 0 }
  0x12   :  { %32 = vsyncpa [#allocation21], 0 }
  0x13   :  { %33 = vsyncpa [#allocation4], 0 }
  0x14   :  { %35 = vsyncpa [#allocation4 + $0x1], 0  ;;  %s9357_s2 = smov 0   ;;  %s9359_s25 = smov 0  }
  0x15   :  { %s9361_s26 = smov 0   ;;  %s9363_s27 = smov 0  }
  0x16 LB: > { %13822 = sst [smem:[#allocation32_spill]] %s9212_s2  ;;  %s9378_s3 = sadd.s32 4294967295, %s9224_s27   ;;  %s9224_s27 = sphi %s9363_s27, %s14714_s27   ;;  %s9220_s26 = sphi %s9361_s26, %s14717_s26   ;;  %s9216_s25 = sphi %s9359_s25, %s14716_s25   ;;  %s9212_s2 = sphi %s9357_s2, %s14715_s2  }
  0x17   : > { %13823 = sst [smem:[#allocation33_spill]] %s9216_s25  ;;  %s7910_s28 = sadd.s32 4294967294, %s9224_s27  }
  0x18   : > { %13824 = sst [smem:[#allocation34_spill]] %s9220_s26  ;;  %s9382_s29 = sadd.s32 1, %s9224_s27  }
  0x19   : > { %13825 = sst [smem:[#allocation35_spill]] %s9224_s27  ;;  %s494_s0 = sadd.s32 1, %s9220_s26 }
  0x1a   : > { %13826 = sst [smem:[#allocation36_spill]] %s9382_s29  ;;  %s491_s4 = ssub.s32 %s9224_s27, %s9382_s29 }
  0x1b   : > { %p504_p0 = scmp.ne.s32.totalorder %s9220_s26, %s9216_s25  ;;  %p492_p1 = scmp.eq.s32.totalorder %s491_s4, 0 }
  0x1c   : > { %p505_p2 = scmp.eq.s32.totalorder %s9378_s3, 1  ;;  %p510_p3 = scmp.ne.s32.totalorder %s9216_s25, %s9212_s2 }
  0x1d   : > { %p511_p4 = scmp.eq.s32.totalorder %s7910_s28, 1  ;;  %p7911_p7 = scmp.ge.s32.totalorder %s9224_s27, 1 }
  0x1e   : > { %s9393_s30 = scalar_select %p492_p1, %s9220_s26, %s494_s0  }
  0x1f   : > { %p9395_p5 = por %p505_p2, %p504_p0  ;;  %p9399_p6 = por %p511_p4, %p510_p3 }
  0x20   : > { %13827 = sst [smem:[#allocation37_spill]] %s9393_s30  ;;  %p518_p8 = scmp.lt.s32.totalorder %s9224_s27, 3 }
  0x21   : > { %s13828_s5 = scalar_select %p9395_p5, 1, 0 }
  0x22   : > { %s13830_s22 = scalar_select %p9399_p6, 1, 0 }
  0x23   : > { %13829 = sst [smem:[#allocation38_spill]] %s13828_s5  ;;  %p8649_p9 = scmp.eq.s32.totalorder %s9378_s3, 0 }
  0x24   : > { %13831 = sst [smem:[#allocation39_spill]] %s13830_s22  ;;  %p9406_p10 = pnand %p7911_p7, %p518_p8 }
  0x25   : > { %s13833_s28 = sld [smem:[#allocation274_spill]]  ;;  %s9226_s4 = smov [#allocation5]  }
  0x26   : > { %p8605_p11 = pneg %p9406_p10  ;;  %s544_s30 = sshll.u32 %s9226_s4, 4  ;;  %s545_s30 = int_to_ptr.vmem [resolvable:$true] %s544_s30 }
  0x27   : > { %s13834_s22 = sld [smem:[#allocation276_spill]]  ;;  %s9227_s5 = smov [#allocation8]  }
  0x28   : > { %p9420_p12 = pnand %p8649_p9, %p8605_p11  ;;  %s13836_s6 = sld [smem:[#allocation278_spill]] }
  0x29   : > { %s570_s4 = sshll.u32 %s9227_s5, 4  ;;  %s9228_s26 = smov [#allocation11]   ;;  %s571_s4 = int_to_ptr.vmem [resolvable:$true] %s570_s4 }
  0x2a   : > { %s595_s29 = sshll.u32 %s9228_s26, 4  ;;  %s13837_s8 = sld [smem:[#allocation279_spill]]  ;;  %s596_s29 = int_to_ptr.vmem [resolvable:$true] %s595_s29 }
  0x2b   : > { %s542_s0 = sshll.u32 %s13833_s28, 4  ;;  %s9229_s20 = smov 256   ;;  %s543_s0 = int_to_ptr.hbm [resolvable:$true] %s542_s0 }
  0x2c   : > { %8611 = dma.hbm_to_vmem [thread:$0]  (!%p9420_p12), %s543_s0, 16, %s545_s30, [#allocation6]  }
  0x2d   : > { %s568_s2 = sshll.u32 %s13834_s22, 4  ;;  %s9230_s1 = smov 16   ;;  %s569_s2 = int_to_ptr.hbm [resolvable:$true] %s568_s2 }
  0x2e   : > { %s593_s28 = sshll.u32 %s13836_s6, 4  ;;  %s9231_s5 = smov [#allocation14]   ;;  %s594_s28 = int_to_ptr.hbm [resolvable:$true] %s593_s28 }
  0x2f   : > { %8617 = dma.hbm_to_vmem [thread:$0]  (!%p9420_p12), %s569_s2, 16, %s571_s4, [#allocation9]  }
  0x30   : > { %s622_s25 = sshll.u32 %s13837_s8, 4  ;;  %s624_s24 = sshll.u32 %s9231_s5, 4  ;;  %s623_s25 = int_to_ptr.hbm [resolvable:$true] %s622_s25  ;;  %s625_s24 = int_to_ptr.vmem [resolvable:$true] %s624_s24 }
  0x31   : > { %8623 = dma.hbm_to_vmem [thread:$0]  (!%p9420_p12), %s594_s28, 2048, %s596_s29, [#allocation12], %s9229_s20, %s9229_s20, %s9230_s1  }
  0x32   : > { %8629 = dma.hbm_to_vmem [thread:$0]  (!%p9420_p12), %s623_s25, 16, %s625_s24, [#allocation15]  }
  0x33   : > { %s13838_s12 = sld [smem:[#allocation280_spill]]  ;;  %s9232_s4 = smov [#allocation17]  }
  0x34   : > { %s653_s21 = sshll.u32 %s9232_s4, 4  ;;  %s692_s6 = sshll.u32 %s13630_s18, 4  ;;  %s654_s21 = int_to_ptr.vmem [resolvable:$true] %s653_s21  ;;  %s693_s6 = int_to_ptr.hbm [resolvable:$true] %s692_s6 }
  0x35   : > { %s9233_s20 = smov 128   ;;  %s9234_s28 = smov 8  }
  0x36   : > { %s9235_s25 = smov [#allocation20]   ;;  %s13839_s24 = sld [smem:[#allocation273_spill]] }
  0x37   : > { %s694_s29 = sshll.u32 %s9235_s25, 4  ;;  %s13840_s26 = sld [smem:[#allocation275_spill]]  ;;  %s695_s29 = int_to_ptr.vmem [resolvable:$true] %s694_s29 }
  0x38   : > { %8641 = dma.hbm_to_vmem [thread:$0]  (!%p9420_p12), %s693_s6, 64, %s695_s29, [#allocation21]  }
  0x39   : > { %s651_s0 = sshll.u32 %s13838_s12, 4  ;;  %s9236_s8 = smov [#allocation2]   ;;  %s652_s0 = int_to_ptr.hbm [resolvable:$true] %s651_s0 }
  0x3a   : > { %8635 = dma.hbm_to_vmem [thread:$0]  (!%p9420_p12), %s652_s0, 256, %s654_s21, [#allocation18], %s9233_s20, %s9233_s20, %s9234_s28  }
  0x3b   : > { %s532_s12 = sshll.u32 %s9236_s8, 4  ;;  %s9237_s0 = smov [#allocation7]   ;;  %s533_s12 = int_to_ptr.vmem [resolvable:$true] %s532_s12 }
  0x3c   : > { %s530_s30 = sshll.u32 %s13839_s24, 4  ;;  %s555_s21 = sshll.u32 %s9237_s0, 4  ;;  %s531_s30 = int_to_ptr.hbm [resolvable:$true] %s530_s30  ;;  %s556_s21 = int_to_ptr.vmem [resolvable:$true] %s555_s21 }
  0x3d   : > { %s553_s22 = sshll.u32 %s13840_s26, 4  ;;  %s13841_s5 = sld [smem:[#allocation277_spill]]  ;;  %s554_s22 = int_to_ptr.hbm [resolvable:$true] %s553_s22 }
  0x3e   : > { %8608 = dma.hbm_to_vmem [thread:$0]  (!%p9420_p12), %s531_s30, 128, %s533_s12, [#allocation3]  }
  0x3f   : > { %8614 = dma.hbm_to_vmem [thread:$0]  (!%p9420_p12), %s554_s22, 3456, %s556_s21, [#allocation6], %s9233_s20, %s9233_s20, %s9234_s28  }
  0x40   : > { %s607_s29 = sshll.u32 %s13619_s7, 4  ;;  %s9238_s2 = smov [#allocation10]   ;;  %s608_s29 = int_to_ptr.hbm [resolvable:$true] %s607_s29 }
  0x41   : > { %s581_s12 = sshll.u32 %s9238_s2, 4  ;;  %s9239_s30 = smov [#allocation13]   ;;  %s582_s12 = int_to_ptr.vmem [resolvable:$true] %s581_s12 }
  0x42   : > { %s609_s4 = sshll.u32 %s9239_s30, 4  ;;  %s637_s22 = sshll.u32 %s13622_s10, 4  ;;  %s610_s4 = int_to_ptr.vmem [resolvable:$true] %s609_s4  ;;  %s638_s22 = int_to_ptr.hbm [resolvable:$true] %s637_s22 }
  0x43   : > { %s579_s24 = sshll.u32 %s13841_s5, 4  ;;  %s665_s1 = sshll.u32 %s13625_s13, 4  ;;  %s580_s24 = int_to_ptr.hbm [resolvable:$true] %s579_s24  ;;  %s666_s1 = int_to_ptr.hbm [resolvable:$true] %s665_s1 }
  0x44   : > { %8620 = dma.hbm_to_vmem [thread:$0]  (!%p9420_p12), %s580_s24, 32768, %s582_s12, [#allocation9], %s9233_s20, %s9233_s20, %s9234_s28  }
  0x45   : > { %8626 = dma.hbm_to_vmem [thread:$0]  (!%p9420_p12), %s608_s29, 384, %s610_s4, [#allocation12], %s9233_s20, %s9233_s20, %s9234_s28  }
  0x46   : > { %s9240_s5 = smov [#allocation16]   ;;  %s9241_s6 = smov [#allocation19]  }
  0x47   : > { %s639_s24 = sshll.u32 %s9240_s5, 4  ;;  %s667_s8 = sshll.u32 %s9241_s6, 4  ;;  %s640_s24 = int_to_ptr.vmem [resolvable:$true] %s639_s24  ;;  %s668_s8 = int_to_ptr.vmem [resolvable:$true] %s667_s8 }
  0x48   : > { %8632 = dma.hbm_to_vmem [thread:$0]  (!%p9420_p12), %s638_s22, 16, %s640_s24, [#allocation15]  }
  0x49   : > { %s703_s30 = sshll.u32 %s13631_s19, 4  ;;  %s9242_s29 = smov [#allocation22]   ;;  %s704_s30 = int_to_ptr.hbm [resolvable:$true] %s703_s30 }
  0x4a   : > { %8638 = dma.hbm_to_vmem [thread:$0]  (!%p9420_p12), %s666_s1, 768, %s668_s8, [#allocation18], %s9233_s20, %s9233_s20, %s9234_s28  }
  0x4b   : > { %s705_s4 = sshll.u32 %s9242_s29, 4  ;;  %732 = sbr.rel (%p9406_p10) target bundleno = 3150 (0xc4e), region = 104  ;;  %s706_s4 = int_to_ptr.vmem [resolvable:$true] %s705_s4 }
  0x4c   : > { %8644 = dma.hbm_to_vmem [thread:$0]  (!%p9420_p12), %s704_s30, 1024, %s706_s4, [#allocation21], %s9233_s20, %s9233_s20, %s9234_s28  }
  0x50   : > { %9179 = dma.done.wait (%p8649_p9), [#allocation3], 128  }
  0x51   : > { %9181 = vsyncadd (%p8649_p9), [#allocation3], 4294967168 }
  0x52   : > { %9183 = dma.done.wait (%p8649_p9), [#allocation6], 3472  }
  0x53   : > { %9185 = vsyncadd (%p8649_p9), [#allocation6], 4294963824 }
  0x54   : > { %9187 = dma.done.wait (%p8649_p9), [#allocation9], 32784  }
  0x55   : > { %9189 = vsyncadd (%p8649_p9), [#allocation9], 4294934512 }
  0x56   : > { %9191 = dma.done.wait (%p8649_p9), [#allocation12], 2432  }
  0x57   : > { %9193 = vsyncadd (%p8649_p9), [#allocation12], 4294964864 }
  0x58   : > { %9195 = dma.done.wait (%p8649_p9), [#allocation15], 32  }
  0x59   : > { %9197 = vsyncadd (%p8649_p9), [#allocation15], 4294967264 }
  0x5a   : > { %9199 = dma.done.wait (%p8649_p9), [#allocation18], 1024  }
  0x5b   : > { %9201 = vsyncadd (%p8649_p9), [#allocation18], 4294966272 }
  0x5c   : > { %9203 = dma.done.wait (%p8649_p9), [#allocation21], 1088  }
  0x5d   : > { %9205 = vsyncadd (%p8649_p9), [#allocation21], 4294966208  ;;  %p852_p13 = scmp.lt.s32.totalorder %s9378_s3, 1  ;;  %v9243_v0 = vmov 0   ;;  %s13842_s26 = sld [smem:[#allocation272_spill]]  ;;  %v1211_v1 = vld [vmem:[#allocation10 + $0x20] sm:$0xff] }
  0x5e   : > { %8731 = vset.pattern.permute.xlu2 %v9243_v0  ;;  %8730 = vset.pattern.permute.xlu1 %v9243_v0  ;;  %v1209_v2 = vld [vmem:[#allocation10 + $0x10] sm:$0xff]  ;;  %v1207_v3 = vld [vmem:[#allocation10] sm:$0xff]  ;;  %vm894_vm0 = vcmask 64512   ;;  %v1212_v6 = vld [vmem:[#allocation10 + $0x28] sm:$0xff]  ;;  %vm1434_vm1 = vcmask 195584   ;;  %s9244_s22 = smov 104  }
  0x5f   : > { %8729 = vset.pattern.permute.xlu0 %v9243_v0  ;;  %s853_s27 = scalar_select %p852_p13, %s9378_s3, 1  ;;  %1261 = vperm.xlu2 %8731, %v1211_v1   ;;  %v889_v4 = vld [vmem:[#allocation2] sm:$0xff]  ;;  %v1208_v8 = vld [vmem:[#allocation10 + $0x8] sm:$0xff]  ;;  %v1213_v12 = vld [vmem:[#allocation10 + $0x30] sm:$0xff]  ;;  %vm5827_vm4 = vcmask 392192   ;;  %vm7027_vm5 = vcmask 523264  }
  0x60   : > { %1251 = vperm.xlu1 %8730, %v1209_v2   ;;  %1241 = vperm.xlu0 %8729, %v1207_v3   ;;  %v1210_v7 = vld [vmem:[#allocation10 + $0x18] sm:$0xff]  ;;  %v1215_v10 = vld [vmem:[#allocation10 + $0x40] sm:$0xff]  ;;  %v1217_v15 = vld [vmem:[#allocation10 + $0x50] sm:$0xff]  ;;  %s9246_s25 = smov 64   ;;  %vm7632_vm9 = vcmask 130048   ;;  %s14706_s5 = sld [smem:[#allocation281_spill]] }
  0x61   : > { %s8550_s23 = sshll.u32 %s853_s27, 8  ;;  %1006 = vmatpush.msra.mxu0 %v889_v4  ;;  %v1214_v11 = vld [vmem:[#allocation10 + $0x38] sm:$0xff]  ;;  %v1216_v16 = vld [vmem:[#allocation10 + $0x48] sm:$0xff]  ;;  %v1221_v18 = vld [vmem:[#allocation10 + $0x70] sm:$0xff]  ;;  %s9245_s27 = smov 80   ;;  %vm7692_vm10 = vcmask 814080  }
  0x62   : > { %v1218_v14 = vld [vmem:[#allocation10 + $0x58] sm:$0xff]  ;;  %v1220_v19 = vld [vmem:[#allocation10 + $0x68] sm:$0xff]  ;;  %v1219_v20 = vld [vmem:[#allocation10 + $0x60] sm:$0xff]  ;;  %s14707_s24 = sld [smem:[#allocation33_spill]]  ;;  %vm7701_vm11 = vcmask 818176   ;;  %vm7714_vm12 = vcmask 811008  }
  0x63   : > { %s9536_s0 = scalar_lea.vmem %s13842_s26, %s8550_s23  ;;  %v1224_v22 = vld [vmem:[#allocation10 + $0x88] sm:$0xff]  ;;  %v1223_v23 = vld [vmem:[#allocation10 + $0x80] sm:$0xff]  ;;  %v1222_v24 = vld [vmem:[#allocation10 + $0x78] sm:$0xff]  ;;  %s14708_s2 = sld [smem:[#allocation282_spill]] }
  0x64   : > { %v857_v5 = vld [vmem:[%s9536_s0] sm:$0xff]  ;;  %v858_v9 = vld [vmem:[%s9536_s0 + $0x8] sm:$0xff]  ;;  %v859_v13 = vld [vmem:[%s9536_s0 + $0x10] sm:$0xff] }
  0x65   : > { %7942 = vmatmul.msk.f32.vlgmr.msra.gmra.mxu0 %vm894_vm0, %v857_v5  ;;  %v860_v17 = vld [vmem:[%s9536_s0 + $0x18] sm:$0xff]  ;;  %v861_v21 = vld [vmem:[%s9536_s0 + $0x20] sm:$0xff]  ;;  %v862_v25 = vld [vmem:[%s9536_s0 + $0x28] sm:$0xff] }
  0x66   : > { %v1227_v26 = vld [vmem:[#allocation10 + $0xa0] sm:$0xff]  ;;  %v1226_v27 = vld [vmem:[#allocation10 + $0x98] sm:$0xff]  ;;  %v1225_v28 = vld [vmem:[#allocation10 + $0x90] sm:$0xff] }
  0x67   : > { %1266 = vperm.xlu2 %8731, %v1212_v6   ;;  %v863_v29 = vld [vmem:[%s9536_s0 + $0x30] sm:$0xff]  ;;  %v1230_v30 = vld [vmem:[#allocation10 + $0xb8] sm:$0xff]  ;;  %v1231_v36 = vld [vmem:[#allocation10 + $0xc0] sm:$0xff] }
  0x68   : > { %1256 = vperm.xlu1 %8730, %v1210_v7   ;;  %1246 = vperm.xlu0 %8729, %v1208_v8   ;;  %v1229_v31 = vld [vmem:[#allocation10 + $0xb0] sm:$0xff]  ;;  %v1228_v32 = vld [vmem:[#allocation10 + $0xa8] sm:$0xff]  ;;  %v865_v37 = vld [vmem:[%s9536_s0 + $0x40] sm:$0xff]  ;;  %s850_s6 = sand.u32 1, %s14707_s24  }
  0x69   : > { %v864_v33 = vld [vmem:[%s9536_s0 + $0x38] sm:$0xff]  ;;  %v1232_v35 = vld [vmem:[#allocation10 + $0xc8] sm:$0xff]  ;;  %v1235_v39 = vld [vmem:[#allocation10 + $0xe0] sm:$0xff]  ;;  %s14709_s12 = smov %s14708_s2  ;;  %s7725_s30 = scalar_lea.hbm %s14708_s2, %s9378_s3 }
  0x6a   : > { %v1233_v34 = vld [vmem:[#allocation10 + $0xd0] sm:$0xff]  ;;  %v1236_v38 = vld [vmem:[#allocation10 + $0xe8] sm:$0xff]  ;;  %v1234_v40 = vld [vmem:[#allocation10 + $0xd8] sm:$0xff]  ;;  %s851_s4 = scalar_lea.vmem [#allocation23], %s850_s6  ;;  %s7729_s20 = sshll.u32 %s7725_s30, 4  ;;  %s7730_s20 = int_to_ptr.hbm [resolvable:$true] %s7729_s20 }
  0x6b   : > { %v866_v41 = vld [vmem:[%s9536_s0 + $0x48] sm:$0xff]  ;;  %v1238_v42 = vld [vmem:[#allocation10 + $0xf8] sm:$0xff]  ;;  %v1237_v44 = vld [vmem:[#allocation10 + $0xf0] sm:$0xff]  ;;  %s7727_s23 = sshll.u32 %s851_s4, 4  ;;  %s7717_s28 = scalar_lea.sflag [#allocation4], %s850_s6  ;;  %s7728_s23 = int_to_ptr.vmem [resolvable:$true] %s7727_s23 }
  0x6c   : > { %v1854_v43 = vld [vmem:[#allocation10 + $0x100] sm:$0xff]  ;;  %v867_v45 = vld [vmem:[%s9536_s0 + $0x50] sm:$0xff]  ;;  %v868_v49 = vld [vmem:[%s9536_s0 + $0x58] sm:$0xff]  ;;  %s9148_s26 = sshra.s32 %s7730_s20, 4  ;;  %s9154_s21 = scalar_lea.hbm %s14709_s12, 2  ;;  %s9149_s26 = int_to_ptr.hbm [resolvable:$true] %s9148_s26 }
  0x6d   : > { %7943 = vmatmul.msk.f32.gmra.mxu0 %vm894_vm0, %v858_v9  ;;  %v2859_v46 = vld [vmem:[#allocation10 + $0x300] sm:$0xff]  ;;  %v1855_v48 = vld [vmem:[#allocation10 + $0x108] sm:$0xff]  ;;  %v1856_v53 = vld [vmem:[#allocation10 + $0x110] sm:$0xff]  ;;  %p9155_p3 = scmp.lt.s32.totalorder %s9149_s26, %s14709_s12 }
  0x6e   : > { %v2389_v47 = vld [vmem:[#allocation10 + $0x200] sm:$0xff]  ;;  %v2860_v51 = vld [vmem:[#allocation10 + $0x308] sm:$0xff]  ;;  %v1139_v54 = vld [vmem:[#allocation7 + $0x70] sm:$0xff] }
  0x6f   : > { %1281 = vperm.xlu2 %8731, %v1215_v10   ;;  %v2390_v52 = vld [vmem:[#allocation10 + $0x208] sm:$0xff]  ;;  %v869_v55 = vld [vmem:[%s9536_s0 + $0x60] sm:$0xff]  ;;  %1753 = vmatpush.msra.mxu2 %v1139_v54  ;;  %v2861_v59 = vld [vmem:[#allocation10 + $0x310] sm:$0xff] }
  0x70   : > { %1276 = vperm.xlu1 %8730, %v1214_v11   ;;  %1271 = vperm.xlu0 %8729, %v1213_v12   ;;  %v1138_v56 = vld [vmem:[#allocation7 + $0x68] sm:$0xff]  ;;  %v1137_v58 = vld [vmem:[#allocation7 + $0x60] sm:$0xff]  ;;  %v1857_v61 = vld [vmem:[#allocation10 + $0x118] sm:$0xff] }
  0x71   : > { %1754 = vmatpush.msra.mxu2 %v1138_v56  ;;  %v2391_v60 = vld [vmem:[#allocation10 + $0x210] sm:$0xff]  ;;  %v870_v62 = vld [vmem:[%s9536_s0 + $0x68] sm:$0xff]  ;;  %v2862_v0 = vld [vmem:[#allocation10 + $0x318] sm:$0xff] }
  0x72   : > { %v2392_v1 = vld [vmem:[#allocation10 + $0x218] sm:$0xff]  ;;  %v1858_v2 = vld [vmem:[#allocation10 + $0x120] sm:$0xff]  ;;  %v871_v3 = vld [vmem:[%s9536_s0 + $0x70] sm:$0xff] }
  0x73   : > { %1755 = vmatpush.msra.mxu2 %v1137_v58  ;;  %v2863_v7 = vld [vmem:[#allocation10 + $0x320] sm:$0xff]  ;;  %v1859_v9 = vld [vmem:[#allocation10 + $0x128] sm:$0xff]  ;;  %v872_v10 = vld [vmem:[%s9536_s0 + $0x78] sm:$0xff] }
  0x74   : > { %v2393_v8 = vld [vmem:[#allocation10 + $0x220] sm:$0xff]  ;;  %v2868_v56 = vld [vmem:[#allocation10 + $0x348] sm:$0xff] }
  0x75   : > { %7944 = vmatmul.msk.f32.gmra.mxu0 %vm894_vm0, %v859_v13  ;;  %v2398_v58 = vld [vmem:[#allocation10 + $0x248] sm:$0xff] }
  0x77   : > { %1296 = vperm.xlu2 %8731, %v1218_v14   ;;  %v9588_v14 = vld [vmem:[#allocation5] ss:$0 sm:$0xff] }
  0x78   : > { %1291 = vperm.xlu1 %8730, %v1217_v15   ;;  %1286 = vperm.xlu0 %8729, %v1216_v16   ;;  %v2864_v15 = vld [vmem:[#allocation10 + $0x328] sm:$0xff] }
  0x79   : > { %v2394_v16 = vld [vmem:[#allocation10 + $0x228] sm:$0xff] }
  0x7d   : > { %7945 = vmatmul.msk.f32.gmra.mxu0 %vm894_vm0, %v860_v17  ;;  %v1860_v17 = vld [vmem:[#allocation10 + $0x130] sm:$0xff] }
  0x7f   : > { %1311 = vperm.xlu2 %8731, %v1221_v18  }
  0x80   : > { %1306 = vperm.xlu1 %8730, %v1220_v19   ;;  %1301 = vperm.xlu0 %8729, %v1219_v20   ;;  %v873_v19 = vld [vmem:[%s9536_s0 + $0x80] sm:$0xff] }
  0x85   : > { %7946 = vmatmul.msk.f32.gmra.mxu0 %vm894_vm0, %v861_v21 }
  0x87   : > { %1326 = vperm.xlu2 %8731, %v1224_v22  }
  0x88   : > { %1321 = vperm.xlu1 %8730, %v1223_v23   ;;  %1316 = vperm.xlu0 %8729, %v1222_v24  }
  0x8d   : > { %7947 = vmatmul.msk.f32.gmra.mxu0 %vm894_vm0, %v862_v25  ;;  %v2865_v25 = vld [vmem:[#allocation10 + $0x330] sm:$0xff] }
  0x8f   : > { %1341 = vperm.xlu2 %8731, %v1227_v26   ;;  %v2395_v26 = vld [vmem:[#allocation10 + $0x230] sm:$0xff] }
  0x90   : > { %1336 = vperm.xlu1 %8730, %v1226_v27   ;;  %1331 = vperm.xlu0 %8729, %v1225_v28   ;;  %v1861_v27 = vld [vmem:[#allocation10 + $0x138] sm:$0xff] }
  0x95   : > { %7948 = vmatmul.msk.f32.gmra.mxu0 %vm894_vm0, %v863_v29  ;;  %v874_v29 = vld [vmem:[%s9536_s0 + $0x88] sm:$0xff] }
  0x97   : > { %1356 = vperm.xlu2 %8731, %v1230_v30  }
  0x98   : > { %1351 = vperm.xlu1 %8730, %v1229_v31   ;;  %1346 = vperm.xlu0 %8729, %v1228_v32  }
  0x9d   : > { %7949 = vmatmul.msk.f32.gmra.mxu0 %vm894_vm0, %v864_v33 }
  0x9f   : > { %1371 = vperm.xlu2 %8731, %v1233_v34  }
  0xa0   : > { %1366 = vperm.xlu1 %8730, %v1232_v35   ;;  %1361 = vperm.xlu0 %8729, %v1231_v36   ;;  %v2866_v35 = vld [vmem:[#allocation10 + $0x338] sm:$0xff] }
  0xa1   : > { %v2396_v36 = vld [vmem:[#allocation10 + $0x238] sm:$0xff] }
  0xa5   : > { %7950 = vmatmul.msk.f32.gmra.mxu0 %vm894_vm0, %v865_v37  ;;  %v1862_v37 = vld [vmem:[#allocation10 + $0x140] sm:$0xff] }
  0xa7   : > { %1386 = vperm.xlu2 %8731, %v1236_v38  }
  0xa8   : > { %1381 = vperm.xlu1 %8730, %v1235_v39   ;;  %1376 = vperm.xlu0 %8729, %v1234_v40   ;;  %v875_v39 = vld [vmem:[%s9536_s0 + $0x90] sm:$0xff] }
  0xad   : > { %7951 = vmatmul.msk.f32.gmra.mxu0 %vm894_vm0, %v866_v41 }
  0xaf   : > { %1396 = vperm.xlu2 %8731, %v1238_v42  }
  0xb0   : > { %1888 = vperm.xlu1 %8730, %v1854_v43   ;;  %1391 = vperm.xlu0 %8729, %v1237_v44  }
  0xb5   : > { %7952 = vmatmul.msk.f32.gmra.mxu0 %vm894_vm0, %v867_v45  ;;  %v2867_v45 = vld [vmem:[#allocation10 + $0x340] sm:$0xff] }
  0xb7   : > { %2893 = vperm.xlu2 %8731, %v2859_v46   ;;  %v2397_v46 = vld [vmem:[#allocation10 + $0x240] sm:$0xff] }
  0xb8   : > { %2423 = vperm.xlu1 %8730, %v2389_v47   ;;  %1893 = vperm.xlu0 %8729, %v1855_v48   ;;  %v1863_v47 = vld [vmem:[#allocation10 + $0x148] sm:$0xff] }
  0xb9   : > { %v9562_v50 = vpop.permute.xlu2 %1261 }
  0xbd   : > { %7953 = vmatmul.msk.f32.gmra.mxu0 %vm894_vm0, %v868_v49  ;;  %v876_v49 = vld [vmem:[%s9536_s0 + $0x98] sm:$0xff] }
  0xbf   : > { %2898 = vperm.xlu2 %8731, %v2860_v51  }
  0xc0   : > { %2428 = vperm.xlu1 %8730, %v2390_v52   ;;  %1898 = vperm.xlu0 %8729, %v1856_v53  }
  0xc1   : > { %v9566_v57 = vpop.permute.xlu2 %1266 }
  0xc5   : > { %7954 = vmatmul.msk.f32.gmra.mxu0 %vm894_vm0, %v869_v55 }
  0xc7   : > { %2903 = vperm.xlu2 %8731, %v2861_v59   ;;  %v1864_v59 = vld [vmem:[#allocation10 + $0x150] sm:$0xff] }
  0xc8   : > { %2433 = vperm.xlu1 %8730, %v2391_v60   ;;  %1903 = vperm.xlu0 %8729, %v1857_v61   ;;  %v877_v61 = vld [vmem:[%s9536_s0 + $0xa0] sm:$0xff] }
  0xc9   : > { %v9570_v63 = vpop.permute.xlu2 %1281 }
  0xcd   : > { %7955 = vmatmul.msk.f32.gmra.mxu0 %vm894_vm0, %v870_v62 }
  0xcf   : > { %2908 = vperm.xlu2 %8731, %v2862_v0  }
  0xd0   : > { %2438 = vperm.xlu1 %8730, %v2392_v1   ;;  %1908 = vperm.xlu0 %8729, %v1858_v2  }
  0xd1   : > { %v9574_v4 = vpop.permute.xlu2 %1296 }
  0xd2   : > { %v9576_v5 = vpop.permute.xlu1 %1251  ;;  %v9578_v6 = vpop.permute.xlu0 %1241 }
  0xd5   : > { %7956 = vmatmul.msk.f32.gmra.mxu0 %vm894_vm0, %v871_v3 }
  0xd7   : > { %2913 = vperm.xlu2 %8731, %v2863_v7   ;;  %v2869_v7 = vld [vmem:[#allocation10 + $0x350] sm:$0xff] }
  0xd8   : > { %2443 = vperm.xlu1 %8730, %v2393_v8   ;;  %1913 = vperm.xlu0 %8729, %v1859_v9   ;;  %v2399_v8 = vld [vmem:[#allocation10 + $0x250] sm:$0xff]  ;;  %v1865_v9 = vld [vmem:[#allocation10 + $0x158] sm:$0xff] }
  0xd9   : > { %v9582_v11 = vpop.permute.xlu2 %1311 }
  0xda   : > { %13843 = vst [vmem:[#allocation40_spill] sm:$0xff] %v9582_v11  ;;  %v9584_v12 = vpop.permute.xlu1 %1256  ;;  %v9586_v13 = vpop.permute.xlu0 %1246 }
  0xdd   : > { %7957 = vmatmul.msk.f32.gmra.mxu0 %vm894_vm0, %v872_v10 }
  0xdf   : > { %2918 = vperm.xlu2 %8731, %v2864_v15   ;;  %v878_v15 = vld [vmem:[%s9536_s0 + $0xa8] sm:$0xff] }
  0xe0   : > { %2448 = vperm.xlu1 %8730, %v2394_v16   ;;  %1918 = vperm.xlu0 %8729, %v1860_v17  }
  0xe1   : > { %v9595_v22 = vpop.permute.xlu2 %1326 }
  0xe2   : > { %v1008_v18 = vpop.f32.mrf.mxu0  ;;  %13845 = vst [vmem:[#allocation42_spill] sm:$0xff] %v9595_v22  ;;  %v9597_v23 = vpop.permute.xlu1 %1276 }
  0xe3   : > { %v1009_v20 = vadd.f32 %v9588_v14, %v1008_v18  ;;  %v9599_v24 = vpop.permute.xlu0 %1271 }
  0xe5   : > { %v9592_v21 = vmax.f32 %v1009_v20, 0.0  ;;  %7958 = vmatmul.msk.f32.gmra.mxu0 %vm894_vm0, %v873_v19 }
  0xe7   : > { %13844 = vst [vmem:[#allocation41_spill] sm:$0xff] %v9592_v21  ;;  %8006 = vmatmul.msk.f32.vlgmr.msra.gmra.mxu2 %vm1434_vm1, %v9592_v21  ;;  %2923 = vperm.xlu2 %8731, %v2865_v25   ;;  %v2870_v25 = vld [vmem:[#allocation10 + $0x358] sm:$0xff] }
  0xe8   : > { %2453 = vperm.xlu1 %8730, %v2395_v26   ;;  %1923 = vperm.xlu0 %8729, %v1861_v27   ;;  %v2400_v26 = vld [vmem:[#allocation10 + $0x258] sm:$0xff]  ;;  %v1866_v27 = vld [vmem:[#allocation10 + $0x160] sm:$0xff] }
  0xe9   : > { %v9608_v32 = vpop.permute.xlu2 %1341 }
  0xea   : > { %v1011_v28 = vpop.f32.mrf.mxu0  ;;  %13847 = vst [vmem:[#allocation44_spill] sm:$0xff] %v9608_v32  ;;  %v9610_v33 = vpop.permute.xlu1 %1291  ;;  %v1877_v32 = vld [vmem:[#allocation10 + $0x1b8] sm:$0xff] }
  0xeb   : > { %v1012_v30 = vadd.f32 %v9588_v14, %v1011_v28  ;;  %v9612_v34 = vpop.permute.xlu0 %1286 }
  0xed   : > { %v9605_v31 = vmax.f32 %v1012_v30, 0.0  ;;  %7959 = vmatmul.msk.f32.gmra.mxu0 %vm894_vm0, %v874_v29  ;;  %v879_v29 = vld [vmem:[%s9536_s0 + $0xb0] sm:$0xff] }
  0xef   : > { %13846 = vst [vmem:[#allocation43_spill] sm:$0xff] %v9605_v31  ;;  %8007 = vmatmul.msk.f32.gmra.mxu2 %vm1434_vm1, %v9605_v31  ;;  %2928 = vperm.xlu2 %8731, %v2866_v35  }
  0xf0   : > { %2458 = vperm.xlu1 %8730, %v2396_v36   ;;  %1928 = vperm.xlu0 %8729, %v1862_v37  }
  0xf1   : > { %v9621_v42 = vpop.permute.xlu2 %1356 }
  0xf2   : > { %v1014_v38 = vpop.f32.mrf.mxu0  ;;  %13848 = vst [vmem:[#allocation45_spill] sm:$0xff] %v9621_v42  ;;  %v9623_v43 = vpop.permute.xlu1 %1306  ;;  %v2410_v42 = vld [vmem:[#allocation10 + $0x2a8] sm:$0xff] }
  0xf3   : > { %v1015_v40 = vadd.f32 %v9588_v14, %v1014_v38  ;;  %13849 = vst [vmem:[#allocation46_spill] sm:$0xff] %v9623_v43  ;;  %v9625_v44 = vpop.permute.xlu0 %1301 }
  0xf5   : > { %v9618_v41 = vmax.f32 %v1015_v40, 0.0  ;;  %7960 = vmatmul.msk.f32.gmra.mxu0 %vm894_vm0, %v875_v39  ;;  %v2871_v39 = vld [vmem:[#allocation10 + $0x360] sm:$0xff] }
  0xf6   : > { %v2401_v40 = vld [vmem:[#allocation10 + $0x260] sm:$0xff] }
  0xf7   : > { %8008 = vmatmul.msk.f32.gmra.mxu2 %vm1434_vm1, %v9618_v41  ;;  %2933 = vperm.xlu2 %8731, %v2867_v45   ;;  %v1867_v45 = vld [vmem:[#allocation10 + $0x168] sm:$0xff] }
  0xf8   : > { %2463 = vperm.xlu1 %8730, %v2397_v46   ;;  %1933 = vperm.xlu0 %8729, %v1863_v47   ;;  %v880_v47 = vld [vmem:[%s9536_s0 + $0xb8] sm:$0xff] }
  0xf9   : > { %v9634_v53 = vpop.permute.xlu2 %1371 }
  0xfa   : > { %v1017_v48 = vpop.f32.mrf.mxu0  ;;  %13850 = vst [vmem:[#allocation47_spill] sm:$0xff] %v9634_v53  ;;  %v9636_v54 = vpop.permute.xlu1 %1321  ;;  %v2409_v53 = vld [vmem:[#allocation10 + $0x2a0] sm:$0xff] }
  0xfb   : > { %v1018_v51 = vadd.f32 %v9588_v14, %v1017_v48  ;;  %13851 = vst [vmem:[#allocation48_spill] sm:$0xff] %v9636_v54  ;;  %v9638_v55 = vpop.permute.xlu0 %1316 }
  0xfc   : > { %13852 = vst [vmem:[#allocation49_spill] sm:$0xff] %v9638_v55 }
  0xfd   : > { %v9631_v52 = vmax.f32 %v1018_v51, 0.0  ;;  %7961 = vmatmul.msk.f32.gmra.mxu0 %vm894_vm0, %v876_v49 }
  0xff   : > { %8009 = vmatmul.msk.f32.gmra.mxu2 %vm1434_vm1, %v9631_v52  ;;  %2938 = vperm.xlu2 %8731, %v2868_v56  }
 0x100   : > { %2468 = vperm.xlu1 %8730, %v2398_v58   ;;  %1938 = vperm.xlu0 %8729, %v1864_v59   ;;  %v2872_v59 = vld [vmem:[#allocation10 + $0x368] sm:$0xff] }
 0x101   : > { %v9647_v1 = vpop.permute.xlu2 %1386 }
 0x102   : > { %v1020_v60 = vpop.f32.mrf.mxu0  ;;  %13854 = vst [vmem:[#allocation51_spill] sm:$0xff] %v9647_v1  ;;  %v9649_v2 = vpop.permute.xlu1 %1336  ;;  %v2408_v1 = vld [vmem:[#allocation10 + $0x298] sm:$0xff] }
 0x103   : > { %v1021_v62 = vadd.f32 %v9588_v14, %v1020_v60  ;;  %13855 = vst [vmem:[#allocation52_spill] sm:$0xff] %v9649_v2  ;;  %v9651_v3 = vpop.permute.xlu0 %1331  ;;  %v2402_v60 = vld [vmem:[#allocation10 + $0x268] sm:$0xff] }
 0x104   : > { %13856 = vst [vmem:[#allocation53_spill] sm:$0xff] %v9651_v3  ;;  %v2412_v3 = vld [vmem:[#allocation10 + $0x2b8] sm:$0xff] }
 0x105   : > { %v9644_v0 = vmax.f32 %v1021_v62, 0.0  ;;  %7962 = vmatmul.msk.f32.gmra.mxu0 %vm894_vm0, %v877_v61  ;;  %v1868_v61 = vld [vmem:[#allocation10 + $0x170] sm:$0xff] }
 0x107   : > { %13853 = vst [vmem:[#allocation50_spill] sm:$0xff] %v9644_v0  ;;  %8010 = vmatmul.msk.f32.gmra.mxu2 %vm1434_vm1, %v9644_v0  ;;  %2943 = vperm.xlu2 %8731, %v2869_v7   ;;  %v881_v7 = vld [vmem:[%s9536_s0 + $0xc0] sm:$0xff] }
 0x108   : > { %2473 = vperm.xlu1 %8730, %v2399_v8   ;;  %1943 = vperm.xlu0 %8729, %v1865_v9  }
 0x109   : > { %v9660_v18 = vpop.permute.xlu2 %1396 }
 0x10a   : > { %v1023_v10 = vpop.f32.mrf.mxu0  ;;  %13858 = vst [vmem:[#allocation55_spill] sm:$0xff] %v9660_v18  ;;  %v9662_v19 = vpop.permute.xlu1 %1351  ;;  %v1873_v18 = vld [vmem:[#allocation10 + $0x198] sm:$0xff] }
 0x10b   : > { %v1024_v16 = vadd.f32 %v9588_v14, %v1023_v10  ;;  %13859 = vst [vmem:[#allocation56_spill] sm:$0xff] %v9662_v19  ;;  %v9664_v20 = vpop.permute.xlu0 %1346  ;;  %v1876_v19 = vld [vmem:[#allocation10 + $0x1b0] sm:$0xff] }
 0x10c   : > { %13860 = vst [vmem:[#allocation57_spill] sm:$0xff] %v9664_v20  ;;  %v2411_v20 = vld [vmem:[#allocation10 + $0x2b0] sm:$0xff] }
 0x10d   : > { %v9657_v17 = vmax.f32 %v1024_v16, 0.0  ;;  %7963 = vmatmul.msk.f32.gmra.mxu0 %vm894_vm0, %v878_v15 }
 0x10f   : > { %13857 = vst [vmem:[#allocation54_spill] sm:$0xff] %v9657_v17  ;;  %8011 = vmatmul.msk.f32.gmra.mxu2 %vm1434_vm1, %v9657_v17  ;;  %2948 = vperm.xlu2 %8731, %v2870_v25   ;;  %v2873_v25 = vld [vmem:[#allocation10 + $0x370] sm:$0xff] }
 0x110   : > { %2478 = vperm.xlu1 %8730, %v2400_v26   ;;  %1948 = vperm.xlu0 %8729, %v1866_v27   ;;  %v2403_v26 = vld [vmem:[#allocation10 + $0x270] sm:$0xff]  ;;  %v1869_v27 = vld [vmem:[#allocation10 + $0x178] sm:$0xff] }
 0x111   : > { %v9673_v36 = vpop.permute.xlu2 %2893 }
 0x112   : > { %v1026_v28 = vpop.f32.mrf.mxu0  ;;  %13862 = vst [vmem:[#allocation59_spill] sm:$0xff] %v9673_v36  ;;  %v9675_v37 = vpop.permute.xlu1 %1366  ;;  %v2407_v36 = vld [vmem:[#allocation10 + $0x290] sm:$0xff] }
 0x113   : > { %v1027_v30 = vadd.f32 %v9588_v14, %v1026_v28  ;;  %13863 = vst [vmem:[#allocation60_spill] sm:$0xff] %v9675_v37  ;;  %v9677_v38 = vpop.permute.xlu0 %1361  ;;  %v1875_v37 = vld [vmem:[#allocation10 + $0x1a8] sm:$0xff] }
 0x114   : > { %13864 = vst [vmem:[#allocation61_spill] sm:$0xff] %v9677_v38  ;;  %v2880_v38 = vld [vmem:[#allocation10 + $0x3a8] sm:$0xff] }
 0x115   : > { %v9670_v35 = vmax.f32 %v1027_v30, 0.0  ;;  %7964 = vmatmul.msk.f32.gmra.mxu0 %vm894_vm0, %v879_v29  ;;  %v882_v29 = vld [vmem:[%s9536_s0 + $0xc8] sm:$0xff] }
 0x117   : > { %13861 = vst [vmem:[#allocation58_spill] sm:$0xff] %v9670_v35  ;;  %8012 = vmatmul.msk.f32.gmra.mxu2 %vm1434_vm1, %v9670_v35  ;;  %2953 = vperm.xlu2 %8731, %v2871_v39  }
 0x118   : > { %2483 = vperm.xlu1 %8730, %v2401_v40   ;;  %1953 = vperm.xlu0 %8729, %v1867_v45  }
 0x119   : > { %v9686_v51 = vpop.permute.xlu2 %2898 }
 0x11a   : > { %v1029_v46 = vpop.f32.mrf.mxu0  ;;  %13866 = vst [vmem:[#allocation63_spill] sm:$0xff] %v9686_v51  ;;  %v9688_v56 = vpop.permute.xlu1 %1381  ;;  %v2877_v51 = vld [vmem:[#allocation10 + $0x390] sm:$0xff] }
 0x11b   : > { %v1030_v48 = vadd.f32 %v9588_v14, %v1029_v46  ;;  %13867 = vst [vmem:[#allocation64_spill] sm:$0xff] %v9688_v56  ;;  %v9690_v58 = vpop.permute.xlu0 %1376  ;;  %v1874_v56 = vld [vmem:[#allocation10 + $0x1a0] sm:$0xff] }
 0x11c   : > { %13868 = vst [vmem:[#allocation65_spill] sm:$0xff] %v9690_v58  ;;  %v2879_v58 = vld [vmem:[#allocation10 + $0x3a0] sm:$0xff] }
 0x11d   : > { %v9683_v49 = vmax.f32 %v1030_v48, 0.0  ;;  %7965 = vmatmul.msk.f32.gmra.mxu0 %vm894_vm0, %v880_v47  ;;  %v2874_v47 = vld [vmem:[#allocation10 + $0x378] sm:$0xff] }
 0x11e   : > { %v2404_v48 = vld [vmem:[#allocation10 + $0x278] sm:$0xff] }
 0x11f   : > { %13865 = vst [vmem:[#allocation62_spill] sm:$0xff] %v9683_v49  ;;  %8013 = vmatmul.msk.f32.gmra.mxu2 %vm1434_vm1, %v9683_v49  ;;  %2958 = vperm.xlu2 %8731, %v2872_v59   ;;  %v1870_v59 = vld [vmem:[#allocation10 + $0x180] sm:$0xff] }
 0x120   : > { %2488 = vperm.xlu1 %8730, %v2402_v60   ;;  %1958 = vperm.xlu0 %8729, %v1868_v61   ;;  %v883_v61 = vld [vmem:[%s9536_s0 + $0xd0] sm:$0xff] }
 0x121   : > { %v9699_v10 = vpop.permute.xlu2 %2903 }
 0x122   : > { %v1032_v62 = vpop.f32.mrf.mxu0  ;;  %13870 = vst [vmem:[#allocation67_spill] sm:$0xff] %v9699_v10  ;;  %v9701_v15 = vpop.permute.xlu1 %1888  ;;  %v1872_v10 = vld [vmem:[#allocation10 + $0x190] sm:$0xff] }
 0x123   : > { %v1033_v8 = vadd.f32 %v9588_v14, %v1032_v62  ;;  %v9703_v16 = vpop.permute.xlu0 %1391 }
 0x124   : > { %13871 = vst [vmem:[#allocation68_spill] sm:$0xff] %v9703_v16  ;;  %v2878_v16 = vld [vmem:[#allocation10 + $0x398] sm:$0xff] }
 0x125   : > { %v9696_v9 = vmax.f32 %v1033_v8, 0.0  ;;  %7966 = vmatmul.msk.f32.gmra.mxu0 %vm894_vm0, %v881_v7 }
 0x127   : > { %13869 = vst [vmem:[#allocation66_spill] sm:$0xff] %v9696_v9  ;;  %8014 = vmatmul.msk.f32.gmra.mxu2 %vm1434_vm1, %v9696_v9  ;;  %2963 = vperm.xlu2 %8731, %v2873_v25  }
 0x128   : > { %2493 = vperm.xlu1 %8730, %v2403_v26   ;;  %1963 = vperm.xlu0 %8729, %v1869_v27   ;;  %v2875_v27 = vld [vmem:[#allocation10 + $0x380] sm:$0xff] }
 0x129   : > { %v9712_v40 = vpop.permute.xlu2 %2908 }
 0x12a   : > { %v1035_v28 = vpop.f32.mrf.mxu0  ;;  %13873 = vst [vmem:[#allocation70_spill] sm:$0xff] %v9712_v40  ;;  %v9714_v45 = vpop.permute.xlu1 %2423  ;;  %v2406_v40 = vld [vmem:[#allocation10 + $0x288] sm:$0xff] }
 0x12b   : > { %v1036_v30 = vadd.f32 %v9588_v14, %v1035_v28  ;;  %v9716_v46 = vpop.permute.xlu0 %1893  ;;  %v2405_v28 = vld [vmem:[#allocation10 + $0x280] sm:$0xff] }
 0x12d   : > { %v9709_v39 = vmax.f32 %v1036_v30, 0.0  ;;  %7967 = vmatmul.msk.f32.gmra.mxu0 %vm894_vm0, %v882_v29  ;;  %v1871_v29 = vld [vmem:[#allocation10 + $0x188] sm:$0xff] }
 0x12f   : > { %13872 = vst [vmem:[#allocation69_spill] sm:$0xff] %v9709_v39  ;;  %8015 = vmatmul.msk.f32.gmra.mxu2 %vm1434_vm1, %v9709_v39  ;;  %2968 = vperm.xlu2 %8731, %v2874_v47   ;;  %v884_v47 = vld [vmem:[%s9536_s0 + $0xd8] sm:$0xff] }
 0x130   : > { %2498 = vperm.xlu1 %8730, %v2404_v48   ;;  %1968 = vperm.xlu0 %8729, %v1870_v59  }
 0x131   : > { %v9725_v8 = vpop.permute.xlu2 %2913 }
 0x132   : > { %v1038_v60 = vpop.f32.mrf.mxu0  ;;  %13875 = vst [vmem:[#allocation72_spill] sm:$0xff] %v9725_v8  ;;  %v9727_v25 = vpop.permute.xlu1 %2428  ;;  %v2876_v8 = vld [vmem:[#allocation10 + $0x388] sm:$0xff] }
 0x133   : > { %v1039_v62 = vadd.f32 %v9588_v14, %v1038_v60  ;;  %v9729_v26 = vpop.permute.xlu0 %1898 }
 0x135   : > { %v9722_v7 = vmax.f32 %v1039_v62, 0.0  ;;  %7968 = vmatmul.msk.f32.gmra.mxu0 %vm894_vm0, %v883_v61 }
 0x137   : > { %13874 = vst [vmem:[#allocation71_spill] sm:$0xff] %v9722_v7  ;;  %8016 = vmatmul.msk.f32.gmra.mxu2 %vm1434_vm1, %v9722_v7  ;;  %2973 = vperm.xlu2 %8731, %v2875_v27   ;;  %v885_v27 = vld [vmem:[%s9536_s0 + $0xe0] sm:$0xff] }
 0x138   : > { %2503 = vperm.xlu1 %8730, %v2405_v28   ;;  %1973 = vperm.xlu0 %8729, %v1871_v29  }
 0x139   : > { %v9738_v60 = vpop.permute.xlu2 %2918 }
 0x13a   : > { %v1041_v30 = vpop.f32.mrf.mxu0  ;;  %13877 = vst [vmem:[#allocation74_spill] sm:$0xff] %v9738_v60  ;;  %v9740_v61 = vpop.permute.xlu1 %2433 }
 0x13b   : > { %v1042_v48 = vadd.f32 %v9588_v14, %v1041_v30  ;;  %v9742_v62 = vpop.permute.xlu0 %1903 }
 0x13d   : > { %v9735_v59 = vmax.f32 %v1042_v48, 0.0  ;;  %7969 = vmatmul.msk.f32.gmra.mxu0 %vm894_vm0, %v884_v47 }
 0x13f   : > { %13876 = vst [vmem:[#allocation73_spill] sm:$0xff] %v9735_v59  ;;  %8017 = vmatmul.msk.f32.gmra.mxu2 %vm1434_vm1, %v9735_v59  ;;  %2978 = vperm.xlu2 %8731, %v2876_v8  }
 0x140   : > { %2508 = vperm.xlu1 %8730, %v2406_v40   ;;  %1978 = vperm.xlu0 %8729, %v1872_v10   ;;  %v886_v40 = vld [vmem:[%s9536_s0 + $0xe8] sm:$0xff] }
 0x141   : > { %v9751_v47 = vpop.permute.xlu2 %2923 }
 0x142   : > { %v1044_v30 = vpop.f32.mrf.mxu0  ;;  %13879 = vst [vmem:[#allocation76_spill] sm:$0xff] %v9751_v47  ;;  %v9753_v48 = vpop.permute.xlu1 %2438 }
 0x143   : > { %v1045_v28 = vadd.f32 %v9588_v14, %v1044_v30  ;;  %v9755_v60 = vpop.permute.xlu0 %1908 }
 0x145   : > { %v9748_v29 = vmax.f32 %v1045_v28, 0.0  ;;  %7970 = vmatmul.msk.f32.gmra.mxu0 %vm894_vm0, %v885_v27 }
 0x147   : > { %13878 = vst [vmem:[#allocation75_spill] sm:$0xff] %v9748_v29  ;;  %8018 = vmatmul.msk.f32.gmra.mxu2 %vm1434_vm1, %v9748_v29  ;;  %2983 = vperm.xlu2 %8731, %v2877_v51   ;;  %v1882_v29 = vld [vmem:[#allocation10 + $0x1e0] sm:$0xff] }
 0x148   : > { %2513 = vperm.xlu1 %8730, %v2407_v36   ;;  %1983 = vperm.xlu0 %8729, %v1873_v18   ;;  %v887_v36 = vld [vmem:[%s9536_s0 + $0xf0] sm:$0xff] }
 0x149   : > { %v9764_v27 = vpop.permute.xlu2 %2928 }
 0x14a   : > { %v1047_v30 = vpop.f32.mrf.mxu0  ;;  %13881 = vst [vmem:[#allocation78_spill] sm:$0xff] %v9764_v27  ;;  %v9766_v28 = vpop.permute.xlu1 %2443 }
 0x14b   : > { %v1048_v10 = vadd.f32 %v9588_v14, %v1047_v30  ;;  %v9768_v47 = vpop.permute.xlu0 %1913 }
 0x14d   : > { %v9761_v8 = vmax.f32 %v1048_v10, 0.0  ;;  %7971 = vmatmul.msk.f32.gmra.mxu0 %vm894_vm0, %v886_v40 }
 0x14f   : > { %13880 = vst [vmem:[#allocation77_spill] sm:$0xff] %v9761_v8  ;;  %8019 = vmatmul.msk.f32.gmra.mxu2 %vm1434_vm1, %v9761_v8  ;;  %2988 = vperm.xlu2 %8731, %v2878_v16   ;;  %v888_v16 = vld [vmem:[%s9536_s0 + $0xf8] sm:$0xff]  ;;  %s9150_s0 = scalar_lea.hbm %s9149_s26, 1 }
 0x150   : > { %2518 = vperm.xlu1 %8730, %v2408_v1   ;;  %1988 = vperm.xlu0 %8729, %v1874_v56   ;;  %v1881_v8 = vld [vmem:[#allocation10 + $0x1d8] sm:$0xff]  ;;  %p9151_p0 = scmp.ne.s32.totalorder %s9149_s26, %s9150_s0  ;;  %p9156_p4 = scmp.lt.s32.totalorder %s9154_s21, %s9150_s0 }
 0x151   : > { %v9777_v40 = vpop.permute.xlu2 %2933 }
 0x152   : > { %v1050_v30 = vpop.f32.mrf.mxu0  ;;  %13883 = vst [vmem:[#allocation80_spill] sm:$0xff] %v9777_v40  ;;  %v9779_v10 = vpop.permute.xlu1 %2448  ;;  %p9152_p1 = pnand %p9151_p0, %p9395_p5  ;;  %p9157_p7 = por %p9156_p4, %p9155_p3 }
 0x153   : > { %v1051_v18 = vadd.f32 %v9588_v14, %v1050_v30  ;;  %v9781_v27 = vpop.permute.xlu0 %1918 }
 0x154   : > { %p9153_p2 = pneg %p9152_p1 }
 0x155   : > { %v9774_v51 = vmax.f32 %v1051_v18, 0.0  ;;  %7972 = vmatmul.msk.f32.gmra.mxu0 %vm894_vm0, %v887_v36 }
 0x156   : > { %p9158_p8 = pnand %p9157_p7, %p9153_p2 }
 0x157   : > { %13882 = vst [vmem:[#allocation79_spill] sm:$0xff] %v9774_v51  ;;  %8020 = vmatmul.msk.f32.gmra.mxu2 %vm1434_vm1, %v9774_v51  ;;  %2993 = vperm.xlu2 %8731, %v2879_v58   ;;  %v1880_v51 = vld [vmem:[#allocation10 + $0x1d0] sm:$0xff] }
 0x158   : > { %2523 = vperm.xlu1 %8730, %v2409_v53   ;;  %1993 = vperm.xlu0 %8729, %v1875_v37  }
 0x159   : > { %v9790_v36 = vpop.permute.xlu2 %2938 }
 0x15a   : > { %v1053_v30 = vpop.f32.mrf.mxu0  ;;  %13885 = vst [vmem:[#allocation82_spill] sm:$0xff] %v9790_v36  ;;  %v9792_v18 = vpop.permute.xlu1 %2453  ;;  %v2881_v36 = vld [vmem:[#allocation10 + $0x3b0] sm:$0xff] }
 0x15b   : > { %v1054_v1 = vadd.f32 %v9588_v14, %v1053_v30  ;;  %v9794_v40 = vpop.permute.xlu0 %1923 }
 0x15d   : > { %v9787_v56 = vmax.f32 %v1054_v1, 0.0  ;;  %7973 = vmatmul.msk.f32.gmra.mxu0 %vm894_vm0, %v888_v16 }
 0x15f   : > { %13884 = vst [vmem:[#allocation81_spill] sm:$0xff] %v9787_v56  ;;  %8021 = vmatmul.msk.f32.gmra.mxu2 %vm1434_vm1, %v9787_v56  ;;  %2998 = vperm.xlu2 %8731, %v2880_v38   ;;  %v1879_v56 = vld [vmem:[#allocation10 + $0x1c8] sm:$0xff] }
 0x160   : > { %2528 = vperm.xlu1 %8730, %v2410_v42   ;;  %1998 = vperm.xlu0 %8729, %v1876_v19  }
 0x161   : > { %v9801_v58 = vpop.permute.xlu2 %2943 }
 0x162   : > { %v1056_v30 = vpop.f32.mrf.mxu0  ;;  %13887 = vst [vmem:[#allocation84_spill] sm:$0xff] %v9801_v58  ;;  %v9803_v16 = vpop.permute.xlu1 %2458  ;;  %v2882_v58 = vld [vmem:[#allocation10 + $0x3b8] sm:$0xff] }
 0x163   : > { %v1057_v53 = vadd.f32 %v9588_v14, %v1056_v30  ;;  %v9805_v1 = vpop.permute.xlu0 %1928 }
 0x165   : > { %v9799_v37 = vmax.f32 %v1057_v53, 0.0 }
 0x167   : > { %13886 = vst [vmem:[#allocation83_spill] sm:$0xff] %v9799_v37  ;;  %8022 = vmatmul.msk.f32.gmra.mxu2 %vm1434_vm1, %v9799_v37  ;;  %3003 = vperm.xlu2 %8731, %v2881_v36   ;;  %v1878_v37 = vld [vmem:[#allocation10 + $0x1c0] sm:$0xff] }
 0x168   : > { %2533 = vperm.xlu1 %8730, %v2411_v20   ;;  %2003 = vperm.xlu0 %8729, %v1877_v32  }
 0x169   : > { %v9812_v19 = vpop.permute.xlu2 %2948 }
 0x16a   : > { %v1059_v2 = vpop.f32.mrf.mxu0  ;;  %13889 = vst [vmem:[#allocation86_spill] sm:$0xff] %v9812_v19  ;;  %v9814_v38 = vpop.permute.xlu1 %2463  ;;  %v2883_v19 = vld [vmem:[#allocation10 + $0x3c0] sm:$0xff] }
 0x16b   : > { %v1060_v30 = vadd.f32 %v9588_v14, %v1059_v2  ;;  %v9816_v53 = vpop.permute.xlu0 %1933 }
 0x16d   : > { %v9810_v42 = vmax.f32 %v1060_v30, 0.0 }
 0x16f   : > { %13888 = vst [vmem:[#allocation85_spill] sm:$0xff] %v9810_v42  ;;  %8023 = vmatmul.msk.f32.gmra.mxu2 %vm1434_vm1, %v9810_v42  ;;  %3008 = vperm.xlu2 %8731, %v2882_v58   ;;  %v2413_v42 = vld [vmem:[#allocation10 + $0x2c0] sm:$0xff] }
 0x170   : > { %2538 = vperm.xlu1 %8730, %v2412_v3   ;;  %2008 = vperm.xlu0 %8729, %v1878_v37  }
 0x171   : > { %v9823_v20 = vpop.permute.xlu2 %2953 }
 0x172   : > { %v1062_v22 = vpop.f32.mrf.mxu0  ;;  %13891 = vst [vmem:[#allocation88_spill] sm:$0xff] %v9823_v20  ;;  %v9825_v36 = vpop.permute.xlu1 %2468  ;;  %v2884_v20 = vld [vmem:[#allocation10 + $0x3c8] sm:$0xff] }
 0x173   : > { %v1063_v2 = vadd.f32 %v9588_v14, %v1062_v22  ;;  %v9827_v30 = vpop.permute.xlu0 %1938 }
 0x175   : > { %v9821_v32 = vmax.f32 %v1063_v2, 0.0 }
 0x177   : > { %13890 = vst [vmem:[#allocation87_spill] sm:$0xff] %v9821_v32  ;;  %8024 = vmatmul.msk.f32.gmra.mxu2 %vm1434_vm1, %v9821_v32  ;;  %3013 = vperm.xlu2 %8731, %v2883_v19   ;;  %v2414_v32 = vld [vmem:[#allocation10 + $0x2c8] sm:$0xff] }
 0x178   : > { %2543 = vperm.xlu1 %8730, %v2413_v42   ;;  %2013 = vperm.xlu0 %8729, %v1879_v56  }
 0x179   : > { %v9834_v37 = vpop.permute.xlu2 %2958 }
 0x17a   : > { %v1065_v54 = vpop.f32.mrf.mxu0  ;;  %13893 = vst [vmem:[#allocation90_spill] sm:$0xff] %v9834_v37  ;;  %v9836_v58 = vpop.permute.xlu1 %2473  ;;  %v2885_v37 = vld [vmem:[#allocation10 + $0x3d0] sm:$0xff] }
 0x17b   : > { %v1066_v22 = vadd.f32 %v9588_v14, %v1065_v54  ;;  %v9838_v2 = vpop.permute.xlu0 %1943 }
 0x17d   : > { %v9832_v3 = vmax.f32 %v1066_v22, 0.0 }
 0x17f   : > { %13892 = vst [vmem:[#allocation89_spill] sm:$0xff] %v9832_v3  ;;  %8025 = vmatmul.msk.f32.gmra.mxu2 %vm1434_vm1, %v9832_v3  ;;  %3018 = vperm.xlu2 %8731, %v2884_v20   ;;  %v2415_v3 = vld [vmem:[#allocation10 + $0x2d0] sm:$0xff] }
 0x180   : > { %2548 = vperm.xlu1 %8730, %v2414_v32   ;;  %2018 = vperm.xlu0 %8729, %v1880_v51  }
 0x181   : > { %v9845_v42 = vpop.permute.xlu2 %2963 }
 0x182   : > { %v1068_v55 = vpop.f32.mrf.mxu0  ;;  %13895 = vst [vmem:[#allocation92_spill] sm:$0xff] %v9845_v42  ;;  %v9847_v19 = vpop.permute.xlu1 %2478  ;;  %v2886_v42 = vld [vmem:[#allocation10 + $0x3d8] sm:$0xff] }
 0x183   : > { %v1069_v54 = vadd.f32 %v9588_v14, %v1068_v55  ;;  %13896 = vst [vmem:[#allocation93_spill] sm:$0xff] %v9847_v19  ;;  %v9849_v22 = vpop.permute.xlu0 %1948 }
 0x185   : > { %v9843_v56 = vmax.f32 %v1069_v54, 0.0 }
 0x187   : > { %13894 = vst [vmem:[#allocation91_spill] sm:$0xff] %v9843_v56  ;;  %8026 = vmatmul.msk.f32.gmra.mxu2 %vm1434_vm1, %v9843_v56  ;;  %3023 = vperm.xlu2 %8731, %v2885_v37   ;;  %v2416_v56 = vld [vmem:[#allocation10 + $0x2d8] sm:$0xff] }
 0x188   : > { %2553 = vperm.xlu1 %8730, %v2415_v3   ;;  %2023 = vperm.xlu0 %8729, %v1881_v8  }
 0x189   : > { %v9856_v32 = vpop.permute.xlu2 %2968 }
 0x18a   : > { %v1071_v11 = vpop.f32.mrf.mxu0  ;;  %13898 = vst [vmem:[#allocation95_spill] sm:$0xff] %v9856_v32  ;;  %v9858_v20 = vpop.permute.xlu1 %2483 }
 0x18b   : > { %v1072_v55 = vadd.f32 %v9588_v14, %v1071_v11  ;;  %13899 = vst [vmem:[#allocation96_spill] sm:$0xff] %v9858_v20  ;;  %v9860_v54 = vpop.permute.xlu0 %1953  ;;  %v9875_v32 = vpop.f32.mrf.mxu2  ;;  %v2417_v20 = vld [vmem:[#allocation10 + $0x2e0] sm:$0xff] }
 0x18c   : > { %13900 = vst [vmem:[#allocation97_spill] sm:$0xff] %v9860_v54  ;;  %v1883_v54 = vld [vmem:[#allocation10 + $0x1e8] sm:$0xff] }
 0x18d   : > { %v9854_v51 = vmax.f32 %v1072_v55, 0.0  ;;  %13905 = vst [vmem:[#allocation102_spill] sm:$0xff] %v9875_v32  ;;  %v2888_v32 = vld [vmem:[#allocation10 + $0x3e8] sm:$0xff] }
 0x18f   : > { %13897 = vst [vmem:[#allocation94_spill] sm:$0xff] %v9854_v51  ;;  %8027 = vmatmul.msk.f32.gmra.mxu2 %vm1434_vm1, %v9854_v51  ;;  %3028 = vperm.xlu2 %8731, %v2886_v42   ;;  %v2887_v51 = vld [vmem:[#allocation10 + $0x3e0] sm:$0xff] }
 0x190   : > { %2558 = vperm.xlu1 %8730, %v2416_v56   ;;  %2028 = vperm.xlu0 %8729, %v1882_v29  }
 0x191   : > { %v9867_v3 = vpop.permute.xlu2 %2973 }
 0x192   : > { %v1074_v43 = vpop.f32.mrf.mxu0  ;;  %13902 = vst [vmem:[#allocation99_spill] sm:$0xff] %v9867_v3  ;;  %v9869_v37 = vpop.permute.xlu1 %2488 }
 0x193   : > { %v1075_v11 = vadd.f32 %v9588_v14, %v1074_v43  ;;  %13903 = vst [vmem:[#allocation100_spill] sm:$0xff] %v9869_v37  ;;  %v9871_v55 = vpop.permute.xlu0 %1958  ;;  %v1884_v37 = vld [vmem:[#allocation10 + $0x1f0] sm:$0xff] }
 0x194   : > { %13904 = vst [vmem:[#allocation101_spill] sm:$0xff] %v9871_v55  ;;  %v9888_v55 = vpop.f32.mrf.mxu2 }
 0x195   : > { %v9865_v8 = vmax.f32 %v1075_v11, 0.0  ;;  %13910 = vst [vmem:[#allocation107_spill] sm:$0xff] %v9888_v55  ;;  %v1885_v55 = vld [vmem:[#allocation10 + $0x1f8] sm:$0xff] }
 0x197   : > { %13901 = vst [vmem:[#allocation98_spill] sm:$0xff] %v9865_v8  ;;  %8028 = vmatmul.msk.f32.gmra.mxu2 %vm1434_vm1, %v9865_v8  ;;  %3033 = vperm.xlu2 %8731, %v2887_v51   ;;  %v2418_v8 = vld [vmem:[#allocation10 + $0x2e8] sm:$0xff] }
 0x198   : > { %2563 = vperm.xlu1 %8730, %v2417_v20   ;;  %2033 = vperm.xlu0 %8729, %v1883_v54  }
 0x199   : > { %v9880_v42 = vpop.permute.xlu2 %2978 }
 0x19a   : > { %v1077_v43 = vpop.f32.mrf.mxu0  ;;  %13907 = vst [vmem:[#allocation104_spill] sm:$0xff] %v9880_v42  ;;  %v9882_v11 = vpop.permute.xlu1 %2493 }
 0x19b   : > { %v1078_v56 = vadd.f32 %v9588_v14, %v1077_v43  ;;  %13908 = vst [vmem:[#allocation105_spill] sm:$0xff] %v9882_v11  ;;  %v9884_v3 = vpop.permute.xlu0 %1963  ;;  %v2419_v11 = vld [vmem:[#allocation10 + $0x2f0] sm:$0xff] }
 0x19c   : > { %13909 = vst [vmem:[#allocation106_spill] sm:$0xff] %v9884_v3 }
 0x19d   : > { %v9878_v29 = vmax.f32 %v1078_v56, 0.0 }
 0x19f   : > { %13906 = vst [vmem:[#allocation103_spill] sm:$0xff] %v9878_v29  ;;  %8029 = vmatmul.msk.f32.gmra.mxu2 %vm1434_vm1, %v9878_v29  ;;  %3038 = vperm.xlu2 %8731, %v2888_v32   ;;  %v2889_v29 = vld [vmem:[#allocation10 + $0x3f0] sm:$0xff]  ;;  %v9902_v32 = vpop.f32.mrf.mxu2 }
 0x1a0   : > { %2568 = vperm.xlu1 %8730, %v2418_v8   ;;  %2038 = vperm.xlu0 %8729, %v1884_v37   ;;  %13915 = vst [vmem:[#allocation112_spill] sm:$0xff] %v9902_v32  ;;  %v2080_v32 = vld [vmem:[#allocation7 + $0x20] sm:$0xff] }
 0x1a1   : > { %v9893_v54 = vpop.permute.xlu2 %2983 }
 0x1a2   : > { %v1080_v43 = vpop.f32.mrf.mxu0  ;;  %13912 = vst [vmem:[#allocation109_spill] sm:$0xff] %v9893_v54  ;;  %v9895_v56 = vpop.permute.xlu1 %2498 }
 0x1a3   : > { %v1081_v51 = vadd.f32 %v9588_v14, %v1080_v43  ;;  %13913 = vst [vmem:[#allocation110_spill] sm:$0xff] %v9895_v56  ;;  %v9897_v42 = vpop.permute.xlu0 %1968  ;;  %v2420_v56 = vld [vmem:[#allocation10 + $0x2f8] sm:$0xff] }
 0x1a4   : > { %13914 = vst [vmem:[#allocation111_spill] sm:$0xff] %v9897_v42  ;;  %v3329_v42 = vld [vmem:[#allocation10 + $0x400] sm:$0xff] }
 0x1a5   : > { %v9891_v20 = vmax.f32 %v1081_v51, 0.0 }
 0x1a7   : > { %13911 = vst [vmem:[#allocation108_spill] sm:$0xff] %v9891_v20  ;;  %8030 = vmatmul.msk.f32.gmra.mxu2 %vm1434_vm1, %v9891_v20  ;;  %3043 = vperm.xlu2 %8731, %v2889_v29   ;;  %v3799_v20 = vld [vmem:[#allocation10 + $0x500] sm:$0xff] }
 0x1a8   : > { %2573 = vperm.xlu1 %8730, %v2419_v11   ;;  %2043 = vperm.xlu0 %8729, %v1885_v55   ;;  %v2081_v55 = vld [vmem:[#allocation7 + $0x28] sm:$0xff] }
 0x1a9   : > { %v9906_v37 = vpop.permute.xlu2 %2988  ;;  %2191 = vmatpush.msra.mxu3 %v2081_v55 }
 0x1aa   : > { %v1083_v3 = vpop.f32.mrf.mxu0  ;;  %13917 = vst [vmem:[#allocation114_spill] sm:$0xff] %v9906_v37  ;;  %v9908_v51 = vpop.permute.xlu1 %2503 }
 0x1ab   : > { %v1084_v43 = vadd.f32 %v9588_v14, %v1083_v3  ;;  %13918 = vst [vmem:[#allocation115_spill] sm:$0xff] %v9908_v51  ;;  %v9910_v54 = vpop.permute.xlu0 %1973  ;;  %v9921_v51 = vpop.f32.mrf.mxu2  ;;  %2192 = vmatpush.msra.mxu3 %v2080_v32 }
 0x1ac   : > { %13919 = vst [vmem:[#allocation116_spill] sm:$0xff] %v9910_v54  ;;  %v1433_v54 = vld [vmem:[#allocation7 + $0x10] sm:$0xff] }
 0x1ad   : > { %v9904_v8 = vmax.f32 %v1084_v43, 0.0  ;;  %13923 = vst [vmem:[#allocation120_spill] sm:$0xff] %v9921_v51  ;;  %1544 = vmatpush.msra.mxu1 %v1433_v54 }
 0x1af   : > { %13916 = vst [vmem:[#allocation113_spill] sm:$0xff] %v9904_v8  ;;  %8031 = vmatmul.msk.f32.gmra.mxu2 %vm1434_vm1, %v9904_v8  ;;  %3833 = vperm.xlu2 %8731, %v3799_v20   ;;  %v2079_v20 = vld [vmem:[#allocation7 + $0x18] sm:$0xff] }
 0x1b0   : > { %2578 = vperm.xlu1 %8730, %v2420_v56   ;;  %3363 = vperm.xlu0 %8729, %v3329_v42   ;;  %v1432_v42 = vld [vmem:[#allocation7 + $0x8] sm:$0xff] }
 0x1b1   : > { %v9917_v43 = vpop.permute.xlu2 %2993  ;;  %v3800_v56 = vld [vmem:[#allocation10 + $0x508] sm:$0xff]  ;;  %2193 = vmatpush.msra.mxu3 %v2079_v20  ;;  %1545 = vmatpush.msra.mxu1 %v1432_v42  ;;  %v3331_v42 = vld [vmem:[#allocation10 + $0x410] sm:$0xff] }
 0x1b2   : > { %v1086_v3 = vpop.f32.mrf.mxu0  ;;  %13921 = vst [vmem:[#allocation118_spill] sm:$0xff] %v9917_v43  ;;  %v9919_v37 = vpop.permute.xlu1 %2508  ;;  %v1431_v43 = vld [vmem:[#allocation7] sm:$0xff] }
 0x1b3   : > { %v1087_v29 = vadd.f32 %v9588_v14, %v1086_v3  ;;  %13922 = vst [vmem:[#allocation119_spill] sm:$0xff] %v9919_v37  ;;  %v9923_v8 = vpop.permute.xlu0 %1978  ;;  %v3330_v3 = vld [vmem:[#allocation10 + $0x408] sm:$0xff]  ;;  %1546 = vmatpush.msra.mxu1 %v1431_v43  ;;  %v9938_v20 = vpop.f32.mrf.mxu2  ;;  %v2614_v43 = vld [vmem:[#allocation7 + $0x30] sm:$0xff] }
 0x1b4   : > { %13924 = vst [vmem:[#allocation121_spill] sm:$0xff] %v9923_v8  ;;  %v2616_v8 = vld [vmem:[#allocation7 + $0x40] sm:$0xff] }
 0x1b5   : > { %v9915_v11 = vmax.f32 %v1087_v29, 0.0  ;;  %v2890_v29 = vld [vmem:[#allocation10 + $0x3f8] sm:$0xff]  ;;  %2726 = vmatpush.msrb.mxu0 %v2616_v8  ;;  %13929 = vst [vmem:[#allocation126_spill] sm:$0xff] %v9938_v20 }
 0x1b7   : > { %13920 = vst [vmem:[#allocation117_spill] sm:$0xff] %v9915_v11  ;;  %8032 = vmatmul.msk.f32.gmra.mxu2 %vm1434_vm1, %v9915_v11  ;;  %3838 = vperm.xlu2 %8731, %v3800_v56   ;;  %v4739_v56 = vld [vmem:[#allocation10 + $0x700] sm:$0xff] }
 0x1b8   : > { %3368 = vperm.xlu1 %8730, %v3330_v3   ;;  %3048 = vperm.xlu0 %8729, %v2890_v29   ;;  %v2615_v3 = vld [vmem:[#allocation7 + $0x38] sm:$0xff] }
 0x1b9   : > { %v9930_v51 = vpop.permute.xlu2 %2998  ;;  %v4269_v29 = vld [vmem:[#allocation10 + $0x600] sm:$0xff]  ;;  %2727 = vmatpush.msrb.mxu0 %v2615_v3  ;;  %v4740_v3 = vld [vmem:[#allocation10 + $0x708] sm:$0xff] }
 0x1ba   : > { %v1089_v55 = vpop.f32.mrf.mxu0  ;;  %13926 = vst [vmem:[#allocation123_spill] sm:$0xff] %v9930_v51  ;;  %v9932_v54 = vpop.permute.xlu1 %2513 }
 0x1bb   : > { %v1090_v37 = vadd.f32 %v9588_v14, %v1089_v55  ;;  %13927 = vst [vmem:[#allocation124_spill] sm:$0xff] %v9932_v54  ;;  %v9934_v11 = vpop.permute.xlu0 %1983  ;;  %2728 = vmatpush.msrb.mxu0 %v2614_v43  ;;  %v9951_v19 = vpop.f32.mrf.mxu2 }
 0x1bc   : > { %13928 = vst [vmem:[#allocation125_spill] sm:$0xff] %v9934_v11  ;;  %v3801_v11 = vld [vmem:[#allocation10 + $0x510] sm:$0xff] }
 0x1bd   : > { %v9928_v32 = vmax.f32 %v1090_v37, 0.0  ;;  %13934 = vst [vmem:[#allocation131_spill] sm:$0xff] %v9951_v19  ;;  %v3802_v19 = vld [vmem:[#allocation10 + $0x518] sm:$0xff] }
 0x1bf   : > { %13925 = vst [vmem:[#allocation122_spill] sm:$0xff] %v9928_v32  ;;  %8033 = vmatmul.msk.f32.gmra.mxu2 %vm1434_vm1, %v9928_v32  ;;  %3373 = vperm.xlu2 %8731, %v3331_v42   ;;  %v4270_v32 = vld [vmem:[#allocation10 + $0x608] sm:$0xff] }
 0x1c0   : > { %4773 = vperm.xlu1 %8730, %v4739_v56   ;;  %4303 = vperm.xlu0 %8729, %v4269_v29  }
 0x1c1   : > { %v9943_v54 = vpop.permute.xlu2 %3003 }
 0x1c2   : > { %v1092_v37 = vpop.f32.mrf.mxu0  ;;  %13931 = vst [vmem:[#allocation128_spill] sm:$0xff] %v9943_v54  ;;  %v9945_v8 = vpop.permute.xlu1 %2518  ;;  %v1172_v54 = vlaneseq }
 0x1c3   : > { %v1093_v55 = vadd.f32 %v9588_v14, %v1092_v37  ;;  %13932 = vst [vmem:[#allocation129_spill] sm:$0xff] %v9945_v8  ;;  %v9947_v20 = vpop.permute.xlu0 %1988  ;;  %v3332_v8 = vld [vmem:[#allocation10 + $0x418] sm:$0xff] }
 0x1c4   : > { %13933 = vst [vmem:[#allocation130_spill] sm:$0xff] %v9947_v20 }
 0x1c5   : > { %v9941_v51 = vmax.f32 %v1093_v55, 0.0 }
 0x1c7   : > { %13930 = vst [vmem:[#allocation127_spill] sm:$0xff] %v9941_v51  ;;  %8034 = vmatmul.msk.f32.gmra.mxu2 %vm1434_vm1, %v9941_v51  ;;  %4778 = vperm.xlu2 %8731, %v4740_v3   ;;  %v4271_v51 = vld [vmem:[#allocation10 + $0x610] sm:$0xff] }
 0x1c8   : > { %4308 = vperm.xlu1 %8730, %v4270_v32   ;;  %3843 = vperm.xlu0 %8729, %v3801_v11   ;;  %v9965_v11 = vshrl.u32 %v1172_v54, 7  ;;  %v9967_v32 = vpop.f32.mrf.mxu2 }
 0x1c9   : > { %v9956_v37 = vpop.permute.xlu2 %3008  ;;  %13940 = vst [vmem:[#allocation137_spill] sm:$0xff] %v9967_v32 }
 0x1ca   : > { %v1095_v42 = vpop.f32.mrf.mxu0  ;;  %13936 = vst [vmem:[#allocation133_spill] sm:$0xff] %v9956_v37  ;;  %v9958_v43 = vpop.permute.xlu1 %2523  ;;  %vm1174_vm2 = vcmp.lt.s32.totalorder %v9965_v11, 1  ;;  %vm2355_vm3 = vcmp.lt.s32.totalorder %v9965_v11, 7 }
 0x1cb   : > { %v1096_v56 = vadd.f32 %v9588_v14, %v1095_v42  ;;  %13937 = vst [vmem:[#allocation134_spill] sm:$0xff] %v9958_v43  ;;  %v9960_v55 = vpop.permute.xlu0 %1993 }
 0x1cc   : > { %13938 = vst [vmem:[#allocation135_spill] sm:$0xff] %v9960_v55 }
 0x1cd   : > { %v9954_v29 = vmax.f32 %v1096_v56, 0.0  ;;  %13939 = vst [vmem:[#allocation136_spill] sm:$0xff] %v9965_v11  ;;  %v14197_v11 = vld [vmem:[#allocation54_spill] sm:$0xff] }
 0x1cf   : > { %13935 = vst [vmem:[#allocation132_spill] sm:$0xff] %v9954_v29  ;;  %8035 = vmatmul.msk.f32.gmra.mxu2 %vm1434_vm1, %v9954_v29  ;;  %4313 = vperm.xlu2 %8731, %v4271_v51  }
 0x1d0   : > { %3848 = vperm.xlu1 %8730, %v3802_v19   ;;  %3378 = vperm.xlu0 %8729, %v3332_v8   ;;  %v13680_v19 = vrot.slane %v9954_v29, 7  ;;  %v3333_v8 = vld [vmem:[#allocation10 + $0x420] sm:$0xff] }
 0x1d1   : > { %v9971_v56 = vpop.permute.xlu2 %3013 }
 0x1d2   : > { %v1098_v20 = vpop.f32.mrf.mxu0  ;;  %13942 = vst [vmem:[#allocation139_spill] sm:$0xff] %v9971_v56  ;;  %v9973_v37 = vpop.permute.xlu1 %2528 }
 0x1d3   : > { %v1099_v3 = vadd.f32 %v9588_v14, %v1098_v20  ;;  %13943 = vst [vmem:[#allocation140_spill] sm:$0xff] %v9973_v37  ;;  %v9975_v43 = vpop.permute.xlu0 %1998  ;;  %v3803_v20 = vld [vmem:[#allocation10 + $0x520] sm:$0xff] }
 0x1d4   : > { %13944 = vst [vmem:[#allocation141_spill] sm:$0xff] %v9975_v43 }
 0x1d5   : > { %v9969_v42 = vmax.f32 %v1099_v3, 0.0  ;;  %v4741_v3 = vld [vmem:[#allocation10 + $0x710] sm:$0xff] }
 0x1d7   : > { %13941 = vst [vmem:[#allocation138_spill] sm:$0xff] %v9969_v42  ;;  %8036 = vmatmul.msk.f32.gmra.mxu2 %vm1434_vm1, %v9969_v42  ;;  %v2046_v51 = vmul.f32 %v9701_v15, %v9969_v42  ;;  %v1170_v54 = vrot.slane %v9969_v42, 7  ;;  %3853 = vperm.xlu2 %8731, %v3803_v20   ;;  %v3334_v20 = vld [vmem:[#allocation10 + $0x428] sm:$0xff] }
 0x1d8   : > { %3383 = vperm.xlu1 %8730, %v3333_v8   ;;  %4783 = vperm.xlu0 %8729, %v4741_v3   ;;  %v4742_v8 = vld [vmem:[#allocation10 + $0x718] sm:$0xff] }
 0x1d9   : > { %8038 = vmatmul.msk.f32.vlgmr.msra.gmra.mxu3 %vm1434_vm1, %v2046_v51  ;;  %v9989_v56 = vsel %vm1174_vm2, %v13680_v19, %v1170_v54  ;;  %v9997_v51 = vpop.permute.xlu2 %3018  ;;  %v10003_v19 = vpop.f32.mrf.mxu2  ;;  %v4272_v3 = vld [vmem:[#allocation10 + $0x618] sm:$0xff] }
 0x1da   : > { %13945 = vst [vmem:[#allocation142_spill] sm:$0xff] %v9989_v56  ;;  %v1101_v32 = vpop.f32.mrf.mxu0  ;;  %v1399_v15 = vmul.f32 %v9578_v6, %v9989_v56  ;;  %v9999_v29 = vpop.permute.xlu1 %2533 }
 0x1db   : > { %v1102_v37 = vadd.f32 %v9588_v14, %v1101_v32  ;;  %13947 = vst [vmem:[#allocation144_spill] sm:$0xff] %v9997_v51  ;;  %v10001_v55 = vpop.permute.xlu0 %2003  ;;  %v13683_v32 = vrot.slane %v9969_v42, 1 }
 0x1dc   : > { %7974 = vmatmul.msk.f32.vlgmr.msra.gmra.mxu1 %vm1434_vm1, %v1399_v15  ;;  %13948 = vst [vmem:[#allocation145_spill] sm:$0xff] %v10003_v19 }
 0x1dd   : > { %v9995_v43 = vmax.f32 %v1102_v37, 0.0 }
 0x1df   : > { %13946 = vst [vmem:[#allocation143_spill] sm:$0xff] %v9995_v43  ;;  %8037 = vmatmul.msk.f32.gmra.mxu2 %vm1434_vm1, %v9995_v43  ;;  %v2047_v6 = vmul.f32 %v9716_v46, %v9995_v43  ;;  %v1171_v14 = vrot.slane %v9995_v43, 7  ;;  %v2354_v37 = vrot.slane %v9995_v43, 1  ;;  %3388 = vperm.xlu2 %8731, %v3334_v20   ;;  %v4273_v20 = vld [vmem:[#allocation10 + $0x620] sm:$0xff] }
 0x1e0   : > { %4788 = vperm.xlu1 %8730, %v4742_v8   ;;  %4318 = vperm.xlu0 %8729, %v4272_v3   ;;  %v3804_v8 = vld [vmem:[#allocation10 + $0x528] sm:$0xff] }
 0x1e1   : > { %8039 = vmatmul.msk.f32.gmra.mxu3 %vm1434_vm1, %v2047_v6  ;;  %v10016_v15 = vsel %vm1174_vm2, %v1170_v54, %v1171_v14  ;;  %v10022_v46 = vsel %vm2355_vm3, %v13683_v32, %v2354_v37  ;;  %v1140_v54 = vrot.slane %v9592_v21, 7  ;;  %v10031_v6 = vpop.permute.xlu2 %3023  ;;  %v2323_v32 = vrot.slane %v9592_v21, 1 }
 0x1e2   : > { %13949 = vst [vmem:[#allocation146_spill] sm:$0xff] %v10016_v15  ;;  %v1400_v56 = vmul.f32 %v9586_v13, %v10016_v15  ;;  %v2581_v51 = vmul.f32 %v9714_v45, %v10022_v46  ;;  %v10033_v19 = vpop.permute.xlu1 %2538  ;;  %v2048_v13 = vmul.f32 %v9729_v26, %v9592_v21  ;;  %v1141_v15 = vrot.slane %v9605_v31, 7 }
 0x1e3   : > { %13950 = vst [vmem:[#allocation147_spill] sm:$0xff] %v10022_v46  ;;  %v10036_v43 = vpop.permute.xlu0 %2008  ;;  %v10042_v45 = vsel %vm1174_vm2, %v1171_v14, %v1140_v54 }
 0x1e4   : > { %7975 = vmatmul.msk.f32.gmra.mxu1 %vm1434_vm1, %v1400_v56  ;;  %8070 = vmatmul.msk.f32.vlgmr.msrb.gmra.mxu0 %vm1434_vm1, %v2581_v51  ;;  %13951 = vst [vmem:[#allocation148_spill] sm:$0xff] %v10031_v6  ;;  %v4743_v56 = vld [vmem:[#allocation10 + $0x720] sm:$0xff]  ;;  %v10046_v51 = vsel %vm2355_vm3, %v2354_v37, %v2323_v32  ;;  %v1401_v3 = vmul.f32 %v9576_v5, %v10042_v45 }
 0x1e5   : > { %13952 = vst [vmem:[#allocation149_spill] sm:$0xff] %v10042_v45  ;;  %v2582_v26 = vmul.f32 %v9727_v25, %v10046_v51  ;;  %v10065_v5 = vsel %vm1174_vm2, %v1140_v54, %v1141_v15  ;;  %v2049_v25 = vmul.f32 %v9742_v62, %v9605_v31 }
 0x1e6   : > { %13953 = vst [vmem:[#allocation150_spill] sm:$0xff] %v10046_v51 }
 0x1e7   : > { %4793 = vperm.xlu2 %8731, %v4743_v56   ;;  %13955 = vst [vmem:[#allocation152_spill] sm:$0xff] %v10065_v5  ;;  %v4274_v56 = vld [vmem:[#allocation10 + $0x628] sm:$0xff] }
 0x1e8   : > { %4323 = vperm.xlu1 %8730, %v4273_v20   ;;  %3858 = vperm.xlu0 %8729, %v3804_v8   ;;  %v3805_v20 = vld [vmem:[#allocation10 + $0x530] sm:$0xff] }
 0x1e9   : > { %8040 = vmatmul.msk.f32.gmra.mxu3 %vm1434_vm1, %v2048_v13  ;;  %v10056_v14 = vpop.permute.xlu2 %3028  ;;  %v2324_v13 = vrot.slane %v9605_v31, 1  ;;  %v3335_v8 = vld [vmem:[#allocation10 + $0x430] sm:$0xff]  ;;  %v3555_v31 = vld [vmem:[#allocation7 + $0x80] sm:$0xff] }
 0x1ea   : > { %13954 = vst [vmem:[#allocation151_spill] sm:$0xff] %v10056_v14  ;;  %v10058_v37 = vpop.permute.xlu1 %2543  ;;  %v1142_v14 = vrot.slane %v9618_v41, 7 }
 0x1eb   : > { %v10061_v6 = vpop.permute.xlu0 %2013 }
 0x1ec   : > { %7976 = vmatmul.msk.f32.gmra.mxu1 %vm1434_vm1, %v1401_v3  ;;  %8071 = vmatmul.msk.f32.gmra.mxu0 %vm1434_vm1, %v2582_v26  ;;  %v10072_v3 = vsel %vm2355_vm3, %v2323_v32, %v2324_v13  ;;  %v1402_v26 = vmul.f32 %v9584_v12, %v10065_v5  ;;  %v2325_v32 = vrot.slane %v9618_v41, 1  ;;  %v10090_v12 = vsel %vm1174_vm2, %v1141_v15, %v1142_v14 }
 0x1ed   : > { %13956 = vst [vmem:[#allocation153_spill] sm:$0xff] %v10072_v3  ;;  %v2583_v54 = vmul.f32 %v9740_v61, %v10072_v3  ;;  %v2050_v61 = vmul.f32 %v9755_v60, %v9618_v41 }
 0x1ef   : > { %4328 = vperm.xlu2 %8731, %v4274_v56   ;;  %v3806_v56 = vld [vmem:[#allocation10 + $0x538] sm:$0xff] }
 0x1f0   : > { %3863 = vperm.xlu1 %8730, %v3805_v20   ;;  %3393 = vperm.xlu0 %8729, %v3335_v8   ;;  %v3336_v20 = vld [vmem:[#allocation10 + $0x438] sm:$0xff]  ;;  %v4744_v8 = vld [vmem:[#allocation10 + $0x728] sm:$0xff] }
 0x1f1   : > { %8041 = vmatmul.msk.f32.gmra.mxu3 %vm1434_vm1, %v2049_v25  ;;  %v10081_v62 = vpop.permute.xlu2 %3033 }
 0x1f2   : > { %13957 = vst [vmem:[#allocation154_spill] sm:$0xff] %v10081_v62  ;;  %v10083_v25 = vpop.permute.xlu1 %2548  ;;  %v1143_v62 = vrot.slane %v9631_v52, 7 }
 0x1f3   : > { %v10086_v51 = vpop.permute.xlu0 %2018 }
 0x1f4   : > { %7977 = vmatmul.msk.f32.gmra.mxu1 %vm1434_vm1, %v1402_v26  ;;  %8072 = vmatmul.msk.f32.gmra.mxu0 %vm1434_vm1, %v2583_v54  ;;  %v10097_v26 = vsel %vm2355_vm3, %v2324_v13, %v2325_v32  ;;  %v1403_v54 = vmul.f32 %v9562_v50, %v10090_v12  ;;  %v2326_v13 = vrot.slane %v9631_v52, 1  ;;  %v10115_v50 = vsel %vm1174_vm2, %v1142_v14, %v1143_v62 }
 0x1f5   : > { %13958 = vst [vmem:[#allocation155_spill] sm:$0xff] %v10097_v26  ;;  %v2584_v15 = vmul.f32 %v9753_v48, %v10097_v26  ;;  %v2051_v48 = vmul.f32 %v9768_v47, %v9631_v52  ;;  %v3556_v47 = vld [vmem:[#allocation7 + $0x88] sm:$0xff] }
 0x1f6   : > { %3666 = vmatpush.msrb.mxu2 %v3556_v47 }
 0x1f7   : > { %3868 = vperm.xlu2 %8731, %v3806_v56   ;;  %v3337_v56 = vld [vmem:[#allocation10 + $0x440] sm:$0xff] }
 0x1f8   : > { %3398 = vperm.xlu1 %8730, %v3336_v20   ;;  %4798 = vperm.xlu0 %8729, %v4744_v8   ;;  %v4745_v20 = vld [vmem:[#allocation10 + $0x730] sm:$0xff] }
 0x1f9   : > { %8042 = vmatmul.msk.f32.gmra.mxu3 %vm1434_vm1, %v2050_v61  ;;  %v10106_v60 = vpop.permute.xlu2 %3038  ;;  %v4275_v8 = vld [vmem:[#allocation10 + $0x630] sm:$0xff]  ;;  %3667 = vmatpush.msrb.mxu2 %v3555_v31 }
 0x1fa   : > { %13959 = vst [vmem:[#allocation156_spill] sm:$0xff] %v10106_v60  ;;  %v10108_v61 = vpop.permute.xlu1 %2553  ;;  %v1144_v60 = vrot.slane %v9644_v0, 7 }
 0x1fb   : > { %v10111_v46 = vpop.permute.xlu0 %2023 }
 0x1fc   : > { %7978 = vmatmul.msk.f32.gmra.mxu1 %vm1434_vm1, %v1403_v54  ;;  %8073 = vmatmul.msk.f32.gmra.mxu0 %vm1434_vm1, %v2584_v15  ;;  %v10122_v54 = vsel %vm2355_vm3, %v2325_v32, %v2326_v13  ;;  %v1404_v15 = vmul.f32 %v9566_v57, %v10115_v50  ;;  %v2327_v57 = vrot.slane %v9644_v0, 1 }
 0x1fd   : > { %13960 = vst [vmem:[#allocation157_spill] sm:$0xff] %v10122_v54  ;;  %v2585_v14 = vmul.f32 %v9766_v28, %v10122_v54  ;;  %v10140_v28 = vsel %vm1174_vm2, %v1143_v62, %v1144_v60  ;;  %v1145_v62 = vrot.slane %v9657_v17, 7 }
 0x1fe   : > { %v10147_v47 = vsel %vm2355_vm3, %v2326_v13, %v2327_v57  ;;  %v2328_v13 = vrot.slane %v9657_v17, 1 }
 0x1ff   : > { %3403 = vperm.xlu2 %8731, %v3337_v56   ;;  %v2052_v56 = vmul.f32 %v9781_v27, %v9644_v0  ;;  %13962 = vst [vmem:[#allocation159_spill] sm:$0xff] %v10147_v47  ;;  %v2586_v27 = vmul.f32 %v9779_v10, %v10147_v47  ;;  %v2053_v10 = vmul.f32 %v9794_v40, %v9657_v17  ;;  %v1146_v0 = vrot.slane %v9670_v35, 7 }
 0x200   : > { %4803 = vperm.xlu1 %8730, %v4745_v20   ;;  %4333 = vperm.xlu0 %8729, %v4275_v8   ;;  %v3554_v20 = vld [vmem:[#allocation7 + $0x78] sm:$0xff] }
 0x201   : > { %8043 = vmatmul.msk.f32.gmra.mxu3 %vm1434_vm1, %v2051_v48  ;;  %v10131_v48 = vpop.permute.xlu2 %3043  ;;  %v4746_v8 = vld [vmem:[#allocation10 + $0x738] sm:$0xff]  ;;  %3668 = vmatpush.msrb.mxu2 %v3554_v20 }
 0x202   : > { %13961 = vst [vmem:[#allocation158_spill] sm:$0xff] %v10131_v48  ;;  %v10133_v32 = vpop.permute.xlu1 %2558  ;;  %v1405_v48 = vmul.f32 %v9599_v24, %v10140_v28  ;;  %v10165_v24 = vsel %vm1174_vm2, %v1144_v60, %v1145_v62 }
 0x203   : > { %v10136_v21 = vpop.permute.xlu0 %2028  ;;  %13963 = vst [vmem:[#allocation160_spill] sm:$0xff] %v10165_v24 }
 0x204   : > { %7979 = vmatmul.msk.f32.gmra.mxu1 %vm1434_vm1, %v1404_v15  ;;  %8074 = vmatmul.msk.f32.gmra.mxu0 %vm1434_vm1, %v2585_v14  ;;  %v4276_v15 = vld [vmem:[#allocation10 + $0x638] sm:$0xff]  ;;  %v3807_v14 = vld [vmem:[#allocation10 + $0x540] sm:$0xff] }
 0x207   : > { %4808 = vperm.xlu2 %8731, %v4746_v8   ;;  %v4277_v8 = vld [vmem:[#allocation10 + $0x640] sm:$0xff] }
 0x208   : > { %4338 = vperm.xlu1 %8730, %v4276_v15   ;;  %3873 = vperm.xlu0 %8729, %v3807_v14   ;;  %v3808_v15 = vld [vmem:[#allocation10 + $0x548] sm:$0xff]  ;;  %v10172_v14 = vsel %vm2355_vm3, %v2327_v57, %v2328_v13  ;;  %v2329_v57 = vrot.slane %v9670_v35, 1 }
 0x209   : > { %8044 = vmatmul.msk.f32.gmra.mxu3 %vm1434_vm1, %v2052_v56  ;;  %v10156_v31 = vpop.permute.xlu2 %3833  ;;  %13964 = vst [vmem:[#allocation161_spill] sm:$0xff] %v10172_v14  ;;  %v2587_v60 = vmul.f32 %v9792_v18, %v10172_v14  ;;  %v2054_v18 = vmul.f32 %v9805_v1, %v9670_v35 }
 0x20a   : > { %v10158_v56 = vpop.permute.xlu1 %2563 }
 0x20b   : > { %v10161_v20 = vpop.permute.xlu0 %2033 }
 0x20c   : > { %7980 = vmatmul.msk.f32.gmra.mxu1 %vm1434_vm1, %v1405_v48  ;;  %8075 = vmatmul.msk.f32.gmra.mxu0 %vm1434_vm1, %v2586_v27  ;;  %v3338_v48 = vld [vmem:[#allocation10 + $0x448] sm:$0xff]  ;;  %v1406_v27 = vmul.f32 %v9597_v23, %v10165_v24  ;;  %v10190_v23 = vsel %vm1174_vm2, %v1145_v62, %v1146_v0  ;;  %v1147_v24 = vrot.slane %v9683_v49, 7 }
 0x20d   : > { %13965 = vst [vmem:[#allocation162_spill] sm:$0xff] %v10190_v23 }
 0x20f   : > { %4343 = vperm.xlu2 %8731, %v4277_v8   ;;  %v3809_v8 = vld [vmem:[#allocation10 + $0x550] sm:$0xff] }
 0x210   : > { %3878 = vperm.xlu1 %8730, %v3808_v15   ;;  %3408 = vperm.xlu0 %8729, %v3338_v48   ;;  %v3339_v15 = vld [vmem:[#allocation10 + $0x450] sm:$0xff]  ;;  %v4747_v48 = vld [vmem:[#allocation10 + $0x740] sm:$0xff] }
 0x211   : > { %8045 = vmatmul.msk.f32.gmra.mxu3 %vm1434_vm1, %v2053_v10  ;;  %v10181_v40 = vpop.permute.xlu2 %3838 }
 0x212   : > { %v10183_v10 = vpop.permute.xlu1 %2568 }
 0x213   : > { %v10186_v17 = vpop.permute.xlu0 %2038 }
 0x214   : > { %7981 = vmatmul.msk.f32.gmra.mxu1 %vm1434_vm1, %v1406_v27  ;;  %8076 = vmatmul.msk.f32.gmra.mxu0 %vm1434_vm1, %v2587_v60  ;;  %v10197_v27 = vsel %vm2355_vm3, %v2328_v13, %v2329_v57  ;;  %v1407_v60 = vmul.f32 %v9570_v63, %v10190_v23  ;;  %v2330_v13 = vrot.slane %v9683_v49, 1  ;;  %v10215_v63 = vsel %vm1174_vm2, %v1146_v0, %v1147_v24 }
 0x215   : > { %13966 = vst [vmem:[#allocation163_spill] sm:$0xff] %v10197_v27  ;;  %v2588_v62 = vmul.f32 %v9803_v16, %v10197_v27  ;;  %v2055_v16 = vmul.f32 %v9816_v53, %v9683_v49  ;;  %v1148_v23 = vrot.slane %v9696_v9, 7  ;;  %v10229_v53 = vpop.f32.mrf.mxu2 }
 0x216   : > { %13967 = vst [vmem:[#allocation164_spill] sm:$0xff] %v10215_v63 }
 0x217   : > { %3883 = vperm.xlu2 %8731, %v3809_v8   ;;  %v3340_v8 = vld [vmem:[#allocation10 + $0x458] sm:$0xff]  ;;  %13969 = vst [vmem:[#allocation166_spill] sm:$0xff] %v10229_v53  ;;  %v1149_v53 = vrot.slane %v9709_v39, 7 }
 0x218   : > { %3413 = vperm.xlu1 %8730, %v3339_v15   ;;  %4813 = vperm.xlu0 %8729, %v4747_v48   ;;  %v4748_v15 = vld [vmem:[#allocation10 + $0x748] sm:$0xff] }
 0x219   : > { %8046 = vmatmul.msk.f32.gmra.mxu3 %vm1434_vm1, %v2054_v18  ;;  %v10206_v1 = vpop.permute.xlu2 %3373  ;;  %v4278_v48 = vld [vmem:[#allocation10 + $0x648] sm:$0xff] }
 0x21a   : > { %v10208_v18 = vpop.permute.xlu1 %2573 }
 0x21b   : > { %v10211_v35 = vpop.permute.xlu0 %2043 }
 0x21c   : > { %7982 = vmatmul.msk.f32.gmra.mxu1 %vm1434_vm1, %v1407_v60  ;;  %8077 = vmatmul.msk.f32.gmra.mxu0 %vm1434_vm1, %v2588_v62  ;;  %v10222_v60 = vsel %vm2355_vm3, %v2329_v57, %v2330_v13  ;;  %v1408_v62 = vmul.f32 %v9612_v34, %v10215_v63  ;;  %v2331_v34 = vrot.slane %v9696_v9, 1  ;;  %v10240_v63 = vsel %vm1174_vm2, %v1147_v24, %v1148_v23 }
 0x21d   : > { %13968 = vst [vmem:[#allocation165_spill] sm:$0xff] %v10222_v60  ;;  %v2589_v0 = vmul.f32 %v9814_v38, %v10222_v60  ;;  %v2056_v38 = vmul.f32 %v9827_v30, %v9696_v9  ;;  %v1409_v24 = vmul.f32 %v9610_v33, %v10240_v63 }
 0x21e   : > { %13971 = vst [vmem:[#allocation168_spill] sm:$0xff] %v10240_v63  ;;  %v14025_v63 = vld [vmem:[#allocation83_spill] sm:$0xff] }
 0x21f   : > { %3418 = vperm.xlu2 %8731, %v3340_v8  }
 0x220   : > { %4818 = vperm.xlu1 %8730, %v4748_v15   ;;  %4348 = vperm.xlu0 %8729, %v4278_v48   ;;  %v4749_v15 = vld [vmem:[#allocation10 + $0x750] sm:$0xff] }
 0x221   : > { %8047 = vmatmul.msk.f32.gmra.mxu3 %vm1434_vm1, %v2055_v16  ;;  %v10233_v16 = vpop.permute.xlu2 %4778  ;;  %v4279_v48 = vld [vmem:[#allocation10 + $0x650] sm:$0xff] }
 0x222   : > { %13970 = vst [vmem:[#allocation167_spill] sm:$0xff] %v10233_v16  ;;  %v10235_v57 = vpop.permute.xlu1 %2578 }
 0x223   : > { %v3364_v49 = vpop.permute.xlu0 %3363 }
 0x224   : > { %7983 = vmatmul.msk.f32.gmra.mxu1 %vm1434_vm1, %v1408_v62  ;;  %8078 = vmatmul.msk.f32.gmra.mxu0 %vm1434_vm1, %v2589_v0  ;;  %v3521_v8 = vmul.f32 %v3364_v49, %v10072_v3  ;;  %v3810_v62 = vld [vmem:[#allocation10 + $0x558] sm:$0xff]  ;;  %v10249_v0 = vsel %vm2355_vm3, %v2330_v13, %v2331_v34  ;;  %v2332_v13 = vrot.slane %v9709_v39, 1  ;;  %v10266_v3 = vsel %vm1174_vm2, %v1148_v23, %v1149_v53 }
 0x225   : > { %13972 = vst [vmem:[#allocation169_spill] sm:$0xff] %v10249_v0  ;;  %v2590_v30 = vmul.f32 %v9825_v36, %v10249_v0  ;;  %v2057_v36 = vmul.f32 %v9838_v2, %v9709_v39  ;;  %v1410_v23 = vmul.f32 %v9574_v4, %v10266_v3 }
 0x226   : > { %8134 = vmatmul.msk.f32.vlgmr.msrb.gmra.mxu2 %vm1434_vm1, %v3521_v8  ;;  %13974 = vst [vmem:[#allocation171_spill] sm:$0xff] %v10266_v3 }
 0x227   : > { %4823 = vperm.xlu2 %8731, %v4749_v15   ;;  %v10270_v15 = vpop.f32.mrf.mxu2 }
 0x228   : > { %4353 = vperm.xlu1 %8730, %v4279_v48   ;;  %3888 = vperm.xlu0 %8729, %v3810_v62   ;;  %13975 = vst [vmem:[#allocation172_spill] sm:$0xff] %v10270_v15  ;;  %v4280_v48 = vld [vmem:[#allocation10 + $0x658] sm:$0xff]  ;;  %v3811_v62 = vld [vmem:[#allocation10 + $0x560] sm:$0xff] }
 0x229   : > { %8048 = vmatmul.msk.f32.gmra.mxu3 %vm1434_vm1, %v2056_v38  ;;  %v10258_v49 = vpop.permute.xlu2 %4313 }
 0x22a   : > { %v3369_v38 = vpop.permute.xlu1 %3368 }
 0x22b   : > { %v3522_v8 = vmul.f32 %v3369_v38, %v10097_v26  ;;  %v10262_v33 = vpop.permute.xlu0 %3048  ;;  %v1150_v38 = vrot.slane %v9722_v7, 7 }
 0x22c   : > { %7984 = vmatmul.msk.f32.gmra.mxu1 %vm1434_vm1, %v1409_v24  ;;  %8079 = vmatmul.msk.f32.gmra.mxu0 %vm1434_vm1, %v2590_v30  ;;  %13973 = vst [vmem:[#allocation170_spill] sm:$0xff] %v10262_v33  ;;  %v3341_v24 = vld [vmem:[#allocation10 + $0x460] sm:$0xff]  ;;  %v10276_v30 = vsel %vm2355_vm3, %v2331_v34, %v2332_v13  ;;  %v2333_v34 = vrot.slane %v9722_v7, 1 }
 0x22d   : > { %13976 = vst [vmem:[#allocation173_spill] sm:$0xff] %v10276_v30  ;;  %v2591_v2 = vmul.f32 %v9836_v58, %v10276_v30  ;;  %v10294_v4 = vsel %vm1174_vm2, %v1149_v53, %v1150_v38  ;;  %v2058_v58 = vmul.f32 %v9849_v22, %v9722_v7  ;;  %v1151_v22 = vrot.slane %v9735_v59, 7  ;;  %v13986_v33 = vld [vmem:[#allocation75_spill] sm:$0xff] }
 0x22e   : > { %8135 = vmatmul.msk.f32.gmra.mxu2 %vm1434_vm1, %v3522_v8  ;;  %13978 = vst [vmem:[#allocation175_spill] sm:$0xff] %v10294_v4  ;;  %v10306_v15 = vsel %vm2355_vm3, %v2332_v13, %v2333_v34  ;;  %v1411_v53 = vmul.f32 %v9625_v44, %v10294_v4  ;;  %v2334_v13 = vrot.slane %v9735_v59, 1  ;;  %v1152_v7 = vrot.slane %v13986_v33, 7  ;;  %v13994_v4 = vld [vmem:[#allocation77_spill] sm:$0xff] }
 0x22f   : > { %4358 = vperm.xlu2 %8731, %v4280_v48   ;;  %v3523_v48 = vmul.f32 %v10206_v1, %v10122_v54  ;;  %13980 = vst [vmem:[#allocation177_spill] sm:$0xff] %v10306_v15  ;;  %v13981_v1 = vld [vmem:[#allocation93_spill] sm:$0xff]  ;;  %v10324_v44 = vsel %vm1174_vm2, %v1150_v38, %v1151_v22  ;;  %v13987_v38 = vld [vmem:[#allocation96_spill] sm:$0xff]  ;;  %v1153_v9 = vrot.slane %v13994_v4, 7 }
 0x230   : > { %3893 = vperm.xlu1 %8730, %v3811_v62   ;;  %3423 = vperm.xlu0 %8729, %v3341_v24   ;;  %v3812_v62 = vld [vmem:[#allocation10 + $0x568] sm:$0xff]  ;;  %v2592_v16 = vmul.f32 %v13981_v1, %v10306_v15  ;;  %13982 = vst [vmem:[#allocation93_spill] sm:$0xff] %v10324_v44  ;;  %v4751_v1 = vld [vmem:[#allocation10 + $0x760] sm:$0xff] }
 0x231   : > { %8049 = vmatmul.msk.f32.gmra.mxu3 %vm1434_vm1, %v2057_v36  ;;  %v10285_v8 = vpop.permute.xlu2 %3853  ;;  %v3342_v24 = vld [vmem:[#allocation10 + $0x468] sm:$0xff] }
 0x232   : > { %v10287_v36 = vpop.permute.xlu1 %4773 }
 0x233   : > { %13977 = vst [vmem:[#allocation174_spill] sm:$0xff] %v10287_v36  ;;  %v10290_v26 = vpop.permute.xlu0 %4303  ;;  %v13985_v36 = vld [vmem:[#allocation46_spill] sm:$0xff] }
 0x234   : > { %7985 = vmatmul.msk.f32.gmra.mxu1 %vm1434_vm1, %v1410_v23  ;;  %8080 = vmatmul.msk.f32.gmra.mxu0 %vm1434_vm1, %v2591_v2  ;;  %v10300_v23 = vpop.f32.mrf.mxu2  ;;  %v4750_v2 = vld [vmem:[#allocation10 + $0x758] sm:$0xff]  ;;  %v1412_v54 = vmul.f32 %v13985_v36, %v10324_v44  ;;  %v2335_v36 = vrot.slane %v13986_v33, 1  ;;  %v10349_v44 = vsel %vm1174_vm2, %v1151_v22, %v1152_v7 }
 0x235   : > { %13979 = vst [vmem:[#allocation176_spill] sm:$0xff] %v10300_v23 }
 0x236   : > { %8136 = vmatmul.msk.f32.gmra.mxu2 %vm1434_vm1, %v3523_v48  ;;  %13990 = vst [vmem:[#allocation178_spill] sm:$0xff] %v10349_v44 }
 0x237   : > { %3898 = vperm.xlu2 %8731, %v3812_v62   ;;  %v13983_v62 = vld [vmem:[#allocation97_spill] sm:$0xff] }
 0x238   : > { %3428 = vperm.xlu1 %8730, %v3342_v24   ;;  %4828 = vperm.xlu0 %8729, %v4750_v2   ;;  %v2059_v24 = vmul.f32 %v13983_v62, %v9735_v59  ;;  %v3343_v2 = vld [vmem:[#allocation10 + $0x470] sm:$0xff] }
 0x239   : > { %8050 = vmatmul.msk.f32.gmra.mxu3 %vm1434_vm1, %v2058_v58  ;;  %v10315_v58 = vpop.permute.xlu2 %3388 }
 0x23a   : > { %v10317_v48 = vpop.permute.xlu1 %4308 }
 0x23b   : > { %v10320_v23 = vpop.permute.xlu0 %3843 }
 0x23c   : > { %7986 = vmatmul.msk.f32.gmra.mxu1 %vm1434_vm1, %v1411_v53  ;;  %8081 = vmatmul.msk.f32.gmra.mxu0 %vm1434_vm1, %v2592_v16  ;;  %v4281_v16 = vld [vmem:[#allocation10 + $0x660] sm:$0xff]  ;;  %v10331_v53 = vsel %vm2355_vm3, %v2333_v34, %v2334_v13  ;;  %v10338_v62 = vpop.f32.mrf.mxu2 }
 0x23d   : > { %13984 = vst [vmem:[#allocation97_spill] sm:$0xff] %v10331_v53  ;;  %v2593_v39 = vmul.f32 %v13987_v38, %v10331_v53  ;;  %v4752_v38 = vld [vmem:[#allocation10 + $0x768] sm:$0xff] }
 0x23e   : > { %13988 = vst [vmem:[#allocation46_spill] sm:$0xff] %v10338_v62  ;;  %v10358_v62 = vsel %vm2355_vm3, %v2334_v13, %v2335_v36  ;;  %v2336_v13 = vrot.slane %v13994_v4, 1 }
 0x23f   : > { %3433 = vperm.xlu2 %8731, %v3343_v2   ;;  %v13991_v2 = vld [vmem:[#allocation101_spill] sm:$0xff] }
 0x240   : > { %4833 = vperm.xlu1 %8730, %v4751_v1   ;;  %4363 = vperm.xlu0 %8729, %v4281_v16   ;;  %v2060_v1 = vmul.f32 %v13991_v2, %v13986_v33  ;;  %13992 = vst [vmem:[#allocation101_spill] sm:$0xff] %v10358_v62  ;;  %v13995_v2 = vld [vmem:[#allocation100_spill] sm:$0xff] }
 0x241   : > { %8051 = vmatmul.msk.f32.gmra.mxu3 %vm1434_vm1, %v2059_v24  ;;  %v10342_v24 = vpop.permute.xlu2 %4793  ;;  %v2594_v33 = vmul.f32 %v13995_v2, %v10358_v62  ;;  %v3344_v2 = vld [vmem:[#allocation10 + $0x478] sm:$0xff] }
 0x242   : > { %13989 = vst [vmem:[#allocation96_spill] sm:$0xff] %v10342_v24  ;;  %v10344_v34 = vpop.permute.xlu1 %3848  ;;  %v13993_v24 = vld [vmem:[#allocation40_spill] sm:$0xff] }
 0x243   : > { %v3379_v59 = vpop.permute.xlu0 %3378  ;;  %v1413_v22 = vmul.f32 %v13993_v24, %v10349_v44 }
 0x244   : > { %7987 = vmatmul.msk.f32.gmra.mxu1 %vm1434_vm1, %v1412_v54  ;;  %8082 = vmatmul.msk.f32.gmra.mxu0 %vm1434_vm1, %v2593_v39  ;;  %v3524_v16 = vmul.f32 %v3379_v59, %v10147_v47  ;;  %v4282_v54 = vld [vmem:[#allocation10 + $0x668] sm:$0xff]  ;;  %v3813_v39 = vld [vmem:[#allocation10 + $0x570] sm:$0xff]  ;;  %v10375_v47 = vsel %vm1174_vm2, %v1152_v7, %v1153_v9 }
 0x245   : > { %13998 = vst [vmem:[#allocation179_spill] sm:$0xff] %v10375_v47 }
 0x246   : > { %8137 = vmatmul.msk.f32.gmra.mxu2 %vm1434_vm1, %v3524_v16 }
 0x247   : > { %4838 = vperm.xlu2 %8731, %v4752_v38   ;;  %v13999_v38 = vld [vmem:[#allocation106_spill] sm:$0xff] }
 0x248   : > { %4368 = vperm.xlu1 %8730, %v4282_v54   ;;  %3903 = vperm.xlu0 %8729, %v3813_v39   ;;  %v2061_v54 = vmul.f32 %v13999_v38, %v13994_v4  ;;  %v10379_v39 = vpop.f32.mrf.mxu2  ;;  %v14004_v38 = vld [vmem:[#allocation105_spill] sm:$0xff] }
 0x249   : > { %8052 = vmatmul.msk.f32.gmra.mxu3 %vm1434_vm1, %v2060_v1  ;;  %v10367_v59 = vpop.permute.xlu2 %4328  ;;  %14000 = vst [vmem:[#allocation106_spill] sm:$0xff] %v10379_v39 }
 0x24a   : > { %13996 = vst [vmem:[#allocation40_spill] sm:$0xff] %v10367_v59  ;;  %v3384_v1 = vpop.permute.xlu1 %3383  ;;  %v14024_v59 = vld [vmem:[#allocation42_spill] sm:$0xff] }
 0x24b   : > { %v3525_v16 = vmul.f32 %v3384_v1, %v10172_v14  ;;  %v10371_v24 = vpop.permute.xlu0 %4783  ;;  %v10385_v1 = vsel %vm2355_vm3, %v2335_v36, %v2336_v13  ;;  %v14003_v14 = vld [vmem:[#allocation79_spill] sm:$0xff] }
 0x24c   : > { %7988 = vmatmul.msk.f32.gmra.mxu1 %vm1434_vm1, %v1413_v22  ;;  %8083 = vmatmul.msk.f32.gmra.mxu0 %vm1434_vm1, %v2594_v33  ;;  %13997 = vst [vmem:[#allocation100_spill] sm:$0xff] %v10371_v24  ;;  %v4283_v22 = vld [vmem:[#allocation10 + $0x670] sm:$0xff]  ;;  %v3814_v33 = vld [vmem:[#allocation10 + $0x578] sm:$0xff]  ;;  %v1154_v44 = vrot.slane %v14003_v14, 7  ;;  %v2595_v4 = vmul.f32 %v14004_v38, %v10385_v1  ;;  %v2337_v36 = vrot.slane %v14003_v14, 1 }
 0x24d   : > { %14001 = vst [vmem:[#allocation180_spill] sm:$0xff] %v10385_v1  ;;  %v14002_v24 = vld [vmem:[#allocation49_spill] sm:$0xff] }
 0x24e   : > { %8138 = vmatmul.msk.f32.gmra.mxu2 %vm1434_vm1, %v3525_v16  ;;  %v1414_v7 = vmul.f32 %v14002_v24, %v10375_v47  ;;  %v10403_v24 = vsel %vm1174_vm2, %v1153_v9, %v1154_v44  ;;  %v10417_v9 = vsel %vm2355_vm3, %v2336_v13, %v2337_v36 }
 0x24f   : > { %4373 = vperm.xlu2 %8731, %v4283_v22   ;;  %14008 = vst [vmem:[#allocation182_spill] sm:$0xff] %v10403_v24  ;;  %v14009_v22 = vld [vmem:[#allocation111_spill] sm:$0xff] }
 0x250   : > { %3908 = vperm.xlu1 %8730, %v3814_v33   ;;  %3438 = vperm.xlu0 %8729, %v3344_v2   ;;  %v2062_v33 = vmul.f32 %v14009_v22, %v14003_v14  ;;  %v3526_v2 = vmul.f32 %v10315_v58, %v10197_v27  ;;  %v10409_v38 = vpop.f32.mrf.mxu2  ;;  %14012 = vst [vmem:[#allocation184_spill] sm:$0xff] %v10417_v9  ;;  %v14013_v22 = vld [vmem:[#allocation48_spill] sm:$0xff]  ;;  %v14015_v27 = vld [vmem:[#allocation110_spill] sm:$0xff] }
 0x251   : > { %8053 = vmatmul.msk.f32.gmra.mxu3 %vm1434_vm1, %v2061_v54  ;;  %v10394_v16 = vpop.permute.xlu2 %3868  ;;  %14010 = vst [vmem:[#allocation111_spill] sm:$0xff] %v10409_v38  ;;  %v1415_v14 = vmul.f32 %v14013_v22, %v10403_v24  ;;  %v2596_v3 = vmul.f32 %v14015_v27, %v10417_v9 }
 0x252   : > { %14005 = vst [vmem:[#allocation49_spill] sm:$0xff] %v10394_v16  ;;  %v10396_v54 = vpop.permute.xlu1 %4788  ;;  %v14014_v16 = vld [vmem:[#allocation81_spill] sm:$0xff] }
 0x253   : > { %14006 = vst [vmem:[#allocation105_spill] sm:$0xff] %v10396_v54  ;;  %v10399_v39 = vpop.permute.xlu0 %4318  ;;  %v4753_v54 = vld [vmem:[#allocation10 + $0x770] sm:$0xff]  ;;  %v1155_v58 = vrot.slane %v14014_v16, 7  ;;  %v2338_v22 = vrot.slane %v14014_v16, 1 }
 0x254   : > { %7989 = vmatmul.msk.f32.gmra.mxu1 %vm1434_vm1, %v1414_v7  ;;  %8084 = vmatmul.msk.f32.gmra.mxu0 %vm1434_vm1, %v2595_v4  ;;  %14007 = vst [vmem:[#allocation181_spill] sm:$0xff] %v10399_v39  ;;  %v3815_v7 = vld [vmem:[#allocation10 + $0x580] sm:$0xff] }
 0x255   : > { %v3345_v4 = vld [vmem:[#allocation10 + $0x480] sm:$0xff]  ;;  %v10437_v27 = vsel %vm1174_vm2, %v1154_v44, %v1155_v58 }
 0x256   : > { %8139 = vmatmul.msk.f32.gmra.mxu2 %vm1434_vm1, %v3526_v2  ;;  %14019 = vst [vmem:[#allocation186_spill] sm:$0xff] %v10437_v27  ;;  %v1416_v44 = vmul.f32 %v14024_v59, %v10437_v27  ;;  %v2339_v59 = vrot.slane %v14025_v63, 1 }
 0x257   : > { %3913 = vperm.xlu2 %8731, %v3815_v7  }
 0x258   : > { %3443 = vperm.xlu1 %8730, %v3345_v4   ;;  %4843 = vperm.xlu0 %8729, %v4753_v54   ;;  %v14020_v54 = vld [vmem:[#allocation116_spill] sm:$0xff]  ;;  %v4754_v4 = vld [vmem:[#allocation10 + $0x778] sm:$0xff] }
 0x259   : > { %v10411_v47 = vpop.f32.mrf.mxu1  ;;  %8054 = vmatmul.msk.f32.gmra.mxu3 %vm1434_vm1, %v2062_v33  ;;  %v10428_v2 = vpop.permute.xlu2 %3403  ;;  %v2063_v7 = vmul.f32 %v14020_v54, %v14014_v16  ;;  %v14026_v54 = vld [vmem:[#allocation115_spill] sm:$0xff] }
 0x25a   : > { %14011 = vst [vmem:[#allocation183_spill] sm:$0xff] %v10411_v47  ;;  %v10430_v13 = vpop.permute.xlu1 %4323  ;;  %v10446_v47 = vsel %vm2355_vm3, %v2337_v36, %v2338_v22 }
 0x25b   : > { %14017 = vst [vmem:[#allocation110_spill] sm:$0xff] %v10430_v13  ;;  %v10433_v38 = vpop.permute.xlu0 %3858  ;;  %v1156_v13 = vrot.slane %v14025_v63, 7  ;;  %v2597_v16 = vmul.f32 %v14026_v54, %v10446_v47  ;;  %v4755_v54 = vld [vmem:[#allocation10 + $0x780] sm:$0xff] }
 0x25c   : > { %7990 = vmatmul.msk.f32.gmra.mxu1 %vm1434_vm1, %v1415_v14  ;;  %v10425_v33 = vpop.f32.mrf.mxu3  ;;  %8085 = vmatmul.msk.f32.gmra.mxu0 %vm1434_vm1, %v2596_v3  ;;  %14018 = vst [vmem:[#allocation185_spill] sm:$0xff] %v10433_v38  ;;  %v3346_v14 = vld [vmem:[#allocation10 + $0x488] sm:$0xff]  ;;  %v4284_v3 = vld [vmem:[#allocation10 + $0x678] sm:$0xff] }
 0x25d   : > { %14016 = vst [vmem:[#allocation48_spill] sm:$0xff] %v10425_v33 }
 0x25e   : > { %14022 = vst [vmem:[#allocation187_spill] sm:$0xff] %v10446_v47 }
 0x25f   : > { %3448 = vperm.xlu2 %8731, %v3346_v14   ;;  %v10468_v14 = vsel %vm1174_vm2, %v1155_v58, %v1156_v13 }
 0x260   : > { %4848 = vperm.xlu1 %8730, %v4754_v4   ;;  %4378 = vperm.xlu0 %8729, %v4284_v3   ;;  %14031 = vst [vmem:[#allocation191_spill] sm:$0xff] %v10468_v14  ;;  %v14032_v4 = vld [vmem:[#allocation121_spill] sm:$0xff] }
 0x261   : > { %v10441_v33 = vpop.f32.mrf.mxu1  ;;  %8055 = vmatmul.msk.f32.gmra.mxu3 %vm1434_vm1, %v2063_v7  ;;  %v10448_v24 = vpop.f32.mrf.mxu0  ;;  %v2064_v3 = vmul.f32 %v14032_v4, %v14025_v63  ;;  %v14037_v63 = vld [vmem:[#allocation85_spill] sm:$0xff] }
 0x262   : > { %14021 = vst [vmem:[#allocation116_spill] sm:$0xff] %v10441_v33  ;;  %v10455_v33 = vpop.f32.mrf.mxu2  ;;  %v10461_v36 = vpop.permute.xlu2 %4808 }
 0x263   : > { %14023 = vst [vmem:[#allocation188_spill] sm:$0xff] %v10448_v24  ;;  %v10463_v24 = vpop.permute.xlu1 %3863  ;;  %v3394_v27 = vpop.permute.xlu0 %3393 }
 0x264   : > { %14027 = vst [vmem:[#allocation42_spill] sm:$0xff] %v10455_v33  ;;  %7991 = vmatmul.msk.f32.gmra.mxu1 %vm1434_vm1, %v1416_v44  ;;  %v10458_v7 = vpop.f32.mrf.mxu3  ;;  %8086 = vmatmul.msk.f32.gmra.mxu0 %vm1434_vm1, %v2597_v16  ;;  %v3527_v44 = vmul.f32 %v3394_v27, %v10222_v60  ;;  %v4285_v33 = vld [vmem:[#allocation10 + $0x680] sm:$0xff]  ;;  %v3816_v16 = vld [vmem:[#allocation10 + $0x588] sm:$0xff]  ;;  %v1157_v27 = vrot.slane %v14037_v63, 7 }
 0x265   : > { %14028 = vst [vmem:[#allocation115_spill] sm:$0xff] %v10458_v7  ;;  %v14038_v60 = vld [vmem:[#allocation119_spill] sm:$0xff] }
 0x266   : > { %14029 = vst [vmem:[#allocation189_spill] sm:$0xff] %v10461_v36  ;;  %8140 = vmatmul.msk.f32.gmra.mxu2 %vm1434_vm1, %v3527_v44  ;;  %v10479_v36 = vsel %vm2355_vm3, %v2338_v22, %v2339_v59 }
 0x267   : > { %14030 = vst [vmem:[#allocation190_spill] sm:$0xff] %v10463_v24  ;;  %v14036_v24 = vld [vmem:[#allocation53_spill] sm:$0xff]  ;;  %v2598_v38 = vmul.f32 %v14038_v60, %v10479_v36  ;;  %4853 = vperm.xlu2 %8731, %v4755_v54   ;;  %v10500_v60 = vsel %vm1174_vm2, %v1156_v13, %v1157_v27 }
 0x268   : > { %14034 = vst [vmem:[#allocation192_spill] sm:$0xff] %v10479_v36  ;;  %v1417_v4 = vmul.f32 %v14036_v24, %v10468_v14  ;;  %4383 = vperm.xlu1 %8730, %v4285_v33   ;;  %3918 = vperm.xlu0 %8729, %v3816_v16   ;;  %v14043_v33 = vld [vmem:[#allocation125_spill] sm:$0xff]  ;;  %v14049_v14 = vld [vmem:[#allocation87_spill] sm:$0xff] }
 0x269   : > { %v10473_v7 = vpop.f32.mrf.mxu1  ;;  %8056 = vmatmul.msk.f32.gmra.mxu3 %vm1434_vm1, %v2064_v3  ;;  %v10481_v58 = vpop.f32.mrf.mxu0  ;;  %14042 = vst [vmem:[#allocation195_spill] sm:$0xff] %v10500_v60  ;;  %v2065_v54 = vmul.f32 %v14043_v33, %v14037_v63 }
 0x26a   : > { %14033 = vst [vmem:[#allocation121_spill] sm:$0xff] %v10473_v7  ;;  %v10492_v22 = vpop.permute.xlu2 %4343  ;;  %v2340_v7 = vrot.slane %v14037_v63, 1  ;;  %v10504_v16 = vpop.f32.mrf.mxu2 }
 0x26b   : > { %14035 = vst [vmem:[#allocation193_spill] sm:$0xff] %v10481_v58  ;;  %v3399_v44 = vpop.permute.xlu1 %3398  ;;  %v10496_v58 = vpop.permute.xlu0 %4798 }
 0x26c   : > { %7992 = vmatmul.msk.f32.gmra.mxu1 %vm1434_vm1, %v1417_v4  ;;  %v10489_v3 = vpop.f32.mrf.mxu3  ;;  %8087 = vmatmul.msk.f32.gmra.mxu0 %vm1434_vm1, %v2598_v38  ;;  %14040 = vst [vmem:[#allocation119_spill] sm:$0xff] %v10492_v22  ;;  %v3528_v24 = vmul.f32 %v3399_v44, %v10249_v0  ;;  %v4286_v4 = vld [vmem:[#allocation10 + $0x688] sm:$0xff]  ;;  %v3817_v38 = vld [vmem:[#allocation10 + $0x590] sm:$0xff] }
 0x26d   : > { %14039 = vst [vmem:[#allocation53_spill] sm:$0xff] %v10489_v3  ;;  %v3347_v44 = vld [vmem:[#allocation10 + $0x490] sm:$0xff]  ;;  %v14048_v0 = vld [vmem:[#allocation52_spill] sm:$0xff] }
 0x26e   : > { %14041 = vst [vmem:[#allocation194_spill] sm:$0xff] %v10496_v58  ;;  %8141 = vmatmul.msk.f32.gmra.mxu2 %vm1434_vm1, %v3528_v24  ;;  %v10512_v58 = vsel %vm2355_vm3, %v2339_v59, %v2340_v7  ;;  %v1418_v33 = vmul.f32 %v14048_v0, %v10500_v60  ;;  %v14050_v22 = vld [vmem:[#allocation124_spill] sm:$0xff]  ;;  %v2341_v0 = vrot.slane %v14049_v14, 1 }
 0x26f   : > { %14044 = vst [vmem:[#allocation125_spill] sm:$0xff] %v10504_v16  ;;  %v1158_v16 = vrot.slane %v14049_v14, 7  ;;  %v2599_v63 = vmul.f32 %v14050_v22, %v10512_v58  ;;  %4388 = vperm.xlu2 %8731, %v4286_v4   ;;  %v14056_v4 = vld [vmem:[#allocation130_spill] sm:$0xff] }
 0x270   : > { %14046 = vst [vmem:[#allocation197_spill] sm:$0xff] %v10512_v58  ;;  %3923 = vperm.xlu1 %8730, %v3817_v38   ;;  %3453 = vperm.xlu0 %8729, %v3347_v44   ;;  %v2066_v38 = vmul.f32 %v14056_v4, %v14049_v14  ;;  %v3529_v44 = vmul.f32 %v10428_v2, %v10276_v30  ;;  %v14061_v4 = vld [vmem:[#allocation44_spill] sm:$0xff]  ;;  %v14062_v30 = vld [vmem:[#allocation89_spill] sm:$0xff] }
 0x271   : > { %v10506_v3 = vpop.f32.mrf.mxu1  ;;  %8057 = vmatmul.msk.f32.gmra.mxu3 %vm1434_vm1, %v2065_v54  ;;  %v10514_v13 = vpop.f32.mrf.mxu0  ;;  %v10534_v22 = vsel %vm1174_vm2, %v1157_v27, %v1158_v16  ;;  %v10548_v27 = vsel %vm2355_vm3, %v2340_v7, %v2341_v0 }
 0x272   : > { %14045 = vst [vmem:[#allocation196_spill] sm:$0xff] %v10506_v3  ;;  %v10525_v59 = vpop.permute.xlu2 %3883  ;;  %v1419_v2 = vmul.f32 %v14061_v4, %v10534_v22  ;;  %v2342_v4 = vrot.slane %v14062_v30, 1 }
 0x273   : > { %14047 = vst [vmem:[#allocation198_spill] sm:$0xff] %v10514_v13  ;;  %v10527_v54 = vpop.permute.xlu1 %4803  ;;  %v10530_v3 = vpop.permute.xlu0 %4333 }
 0x274   : > { %7993 = vmatmul.msk.f32.gmra.mxu1 %vm1434_vm1, %v1418_v33  ;;  %v10522_v24 = vpop.f32.mrf.mxu3  ;;  %8088 = vmatmul.msk.f32.gmra.mxu0 %vm1434_vm1, %v2599_v63  ;;  %14052 = vst [vmem:[#allocation124_spill] sm:$0xff] %v10525_v59  ;;  %v3818_v33 = vld [vmem:[#allocation10 + $0x598] sm:$0xff]  ;;  %v1159_v59 = vrot.slane %v14062_v30, 7 }
 0x275   : > { %14051 = vst [vmem:[#allocation52_spill] sm:$0xff] %v10522_v24  ;;  %v3348_v63 = vld [vmem:[#allocation10 + $0x498] sm:$0xff]  ;;  %v10540_v24 = vpop.f32.mrf.mxu2 }
 0x276   : > { %14053 = vst [vmem:[#allocation199_spill] sm:$0xff] %v10527_v54  ;;  %8142 = vmatmul.msk.f32.gmra.mxu2 %vm1434_vm1, %v3529_v44  ;;  %v4756_v54 = vld [vmem:[#allocation10 + $0x788] sm:$0xff] }
 0x277   : > { %14054 = vst [vmem:[#allocation200_spill] sm:$0xff] %v10530_v3  ;;  %3928 = vperm.xlu2 %8731, %v3818_v33  }
 0x278   : > { %14055 = vst [vmem:[#allocation201_spill] sm:$0xff] %v10534_v22  ;;  %3458 = vperm.xlu1 %8730, %v3348_v63   ;;  %4858 = vperm.xlu0 %8729, %v4756_v54   ;;  %v14068_v54 = vld [vmem:[#allocation135_spill] sm:$0xff] }
 0x279   : > { %14057 = vst [vmem:[#allocation130_spill] sm:$0xff] %v10540_v24  ;;  %v10542_v13 = vpop.f32.mrf.mxu1  ;;  %8058 = vmatmul.msk.f32.gmra.mxu3 %vm1434_vm1, %v2066_v38  ;;  %v10550_v60 = vpop.f32.mrf.mxu0  ;;  %v14063_v24 = vld [vmem:[#allocation129_spill] sm:$0xff]  ;;  %v2067_v33 = vmul.f32 %v14068_v54, %v14062_v30  ;;  %v3349_v63 = vld [vmem:[#allocation10 + $0x4a0] sm:$0xff]  ;;  %v14074_v54 = vld [vmem:[#allocation134_spill] sm:$0xff] }
 0x27a   : > { %14058 = vst [vmem:[#allocation202_spill] sm:$0xff] %v10542_v13  ;;  %v2600_v14 = vmul.f32 %v14063_v24, %v10548_v27  ;;  %v10561_v7 = vpop.permute.xlu2 %3418  ;;  %v10570_v24 = vsel %vm1174_vm2, %v1158_v16, %v1159_v59 }
 0x27b   : > { %14059 = vst [vmem:[#allocation203_spill] sm:$0xff] %v10548_v27  ;;  %v10563_v44 = vpop.permute.xlu1 %4338  ;;  %v10566_v13 = vpop.permute.xlu0 %3873 }
 0x27c   : > { %14060 = vst [vmem:[#allocation204_spill] sm:$0xff] %v10550_v60  ;;  %7994 = vmatmul.msk.f32.gmra.mxu1 %vm1434_vm1, %v1419_v2  ;;  %v10558_v38 = vpop.f32.mrf.mxu3  ;;  %8089 = vmatmul.msk.f32.gmra.mxu0 %vm1434_vm1, %v2600_v14  ;;  %v4757_v2 = vld [vmem:[#allocation10 + $0x790] sm:$0xff]  ;;  %v10579_v60 = vsel %vm2355_vm3, %v2341_v0, %v2342_v4 }
 0x27d   : > { %14064 = vst [vmem:[#allocation44_spill] sm:$0xff] %v10558_v38  ;;  %v4287_v14 = vld [vmem:[#allocation10 + $0x690] sm:$0xff]  ;;  %v2601_v30 = vmul.f32 %v14074_v54, %v10579_v60  ;;  %v4758_v54 = vld [vmem:[#allocation10 + $0x798] sm:$0xff] }
 0x27e   : > { %14065 = vst [vmem:[#allocation129_spill] sm:$0xff] %v10563_v44  ;;  %v14072_v44 = vld [vmem:[#allocation57_spill] sm:$0xff] }
 0x27f   : > { %14066 = vst [vmem:[#allocation205_spill] sm:$0xff] %v10566_v13  ;;  %v1420_v16 = vmul.f32 %v14072_v44, %v10570_v24  ;;  %v14073_v13 = vld [vmem:[#allocation91_spill] sm:$0xff]  ;;  %3463 = vperm.xlu2 %8731, %v3349_v63  }
 0x280   : > { %14067 = vst [vmem:[#allocation206_spill] sm:$0xff] %v10570_v24  ;;  %v1160_v3 = vrot.slane %v14073_v13, 7  ;;  %4863 = vperm.xlu1 %8730, %v4757_v2   ;;  %4393 = vperm.xlu0 %8729, %v4287_v14   ;;  %v2343_v44 = vrot.slane %v14073_v13, 1  ;;  %v14080_v2 = vld [vmem:[#allocation141_spill] sm:$0xff] }
 0x281   : > { %v10574_v38 = vpop.f32.mrf.mxu1  ;;  %8059 = vmatmul.msk.f32.gmra.mxu3 %vm1434_vm1, %v2067_v33  ;;  %14070 = vst [vmem:[#allocation207_spill] sm:$0xff] %v10579_v60  ;;  %v10581_v22 = vpop.f32.mrf.mxu0  ;;  %v2068_v14 = vmul.f32 %v14080_v2, %v14073_v13  ;;  %v14085_v13 = vld [vmem:[#allocation94_spill] sm:$0xff] }
 0x282   : > { %14069 = vst [vmem:[#allocation135_spill] sm:$0xff] %v10574_v38  ;;  %v10588_v38 = vpop.f32.mrf.mxu2  ;;  %v10594_v0 = vpop.permute.xlu2 %4823  ;;  %v10601_v63 = vsel %vm1174_vm2, %v1159_v59, %v1160_v3 }
 0x283   : > { %14071 = vst [vmem:[#allocation208_spill] sm:$0xff] %v10581_v22  ;;  %v10596_v22 = vpop.permute.xlu1 %3878  ;;  %v3409_v24 = vpop.permute.xlu0 %3408 }
 0x284   : > { %14075 = vst [vmem:[#allocation57_spill] sm:$0xff] %v10588_v38  ;;  %7995 = vmatmul.msk.f32.gmra.mxu1 %vm1434_vm1, %v1420_v16  ;;  %v10591_v33 = vpop.f32.mrf.mxu3  ;;  %8090 = vmatmul.msk.f32.gmra.mxu0 %vm1434_vm1, %v2601_v30  ;;  %v3530_v16 = vmul.f32 %v3409_v24, %v10306_v15  ;;  %v4288_v38 = vld [vmem:[#allocation10 + $0x698] sm:$0xff]  ;;  %v3819_v30 = vld [vmem:[#allocation10 + $0x5a0] sm:$0xff]  ;;  %v1161_v24 = vrot.slane %v14085_v13, 7 }
 0x285   : > { %14076 = vst [vmem:[#allocation134_spill] sm:$0xff] %v10591_v33  ;;  %v14086_v15 = vld [vmem:[#allocation140_spill] sm:$0xff] }
 0x286   : > { %14077 = vst [vmem:[#allocation209_spill] sm:$0xff] %v10594_v0  ;;  %8143 = vmatmul.msk.f32.gmra.mxu2 %vm1434_vm1, %v3530_v16  ;;  %v10612_v0 = vsel %vm2355_vm3, %v2342_v4, %v2343_v44 }
 0x287   : > { %14078 = vst [vmem:[#allocation210_spill] sm:$0xff] %v10596_v22  ;;  %v14084_v22 = vld [vmem:[#allocation56_spill] sm:$0xff]  ;;  %v2602_v39 = vmul.f32 %v14086_v15, %v10612_v0  ;;  %4868 = vperm.xlu2 %8731, %v4758_v54   ;;  %v10633_v15 = vsel %vm1174_vm2, %v1160_v3, %v1161_v24 }
 0x288   : > { %14079 = vst [vmem:[#allocation211_spill] sm:$0xff] %v10601_v63  ;;  %v1421_v2 = vmul.f32 %v14084_v22, %v10601_v63  ;;  %4398 = vperm.xlu1 %8730, %v4288_v38   ;;  %3933 = vperm.xlu0 %8729, %v3819_v30   ;;  %v2069_v38 = vmul.f32 %v10001_v55, %v14085_v13  ;;  %v4289_v30 = vld [vmem:[#allocation10 + $0x6a0] sm:$0xff] }
 0x289   : > { %v10606_v33 = vpop.f32.mrf.mxu1  ;;  %8060 = vmatmul.msk.f32.gmra.mxu3 %vm1434_vm1, %v2068_v14  ;;  %14082 = vst [vmem:[#allocation212_spill] sm:$0xff] %v10612_v0  ;;  %v10614_v59 = vpop.f32.mrf.mxu0 }
 0x28a   : > { %14081 = vst [vmem:[#allocation141_spill] sm:$0xff] %v10606_v33  ;;  %v10625_v4 = vpop.permute.xlu2 %4358  ;;  %v2344_v33 = vrot.slane %v14085_v13, 1  ;;  %v10637_v54 = vpop.f32.mrf.mxu2 }
 0x28b   : > { %14083 = vst [vmem:[#allocation213_spill] sm:$0xff] %v10614_v59  ;;  %v3414_v16 = vpop.permute.xlu1 %3413  ;;  %v10629_v59 = vpop.permute.xlu0 %4813 }
 0x28c   : > { %7996 = vmatmul.msk.f32.gmra.mxu1 %vm1434_vm1, %v1421_v2  ;;  %v10622_v14 = vpop.f32.mrf.mxu3  ;;  %8091 = vmatmul.msk.f32.gmra.mxu0 %vm1434_vm1, %v2602_v39  ;;  %v3531_v22 = vmul.f32 %v3414_v16, %v10331_v53  ;;  %14088 = vst [vmem:[#allocation140_spill] sm:$0xff] %v10629_v59  ;;  %v3820_v39 = vld [vmem:[#allocation10 + $0x5a8] sm:$0xff]  ;;  %v10645_v59 = vsel %vm2355_vm3, %v2343_v44, %v2344_v33 }
 0x28d   : > { %14087 = vst [vmem:[#allocation56_spill] sm:$0xff] %v10622_v14  ;;  %v3350_v16 = vld [vmem:[#allocation10 + $0x4a8] sm:$0xff]  ;;  %v14095_v14 = vld [vmem:[#allocation98_spill] sm:$0xff]  ;;  %v2603_v63 = vmul.f32 %v9999_v29, %v10645_v59 }
 0x28e   : > { %14089 = vst [vmem:[#allocation214_spill] sm:$0xff] %v10633_v15  ;;  %8144 = vmatmul.msk.f32.gmra.mxu2 %vm1434_vm1, %v3531_v22  ;;  %v14094_v53 = vld [vmem:[#allocation45_spill] sm:$0xff] }
 0x28f   : > { %14090 = vst [vmem:[#allocation215_spill] sm:$0xff] %v10637_v54  ;;  %v1422_v55 = vmul.f32 %v14094_v53, %v10633_v15  ;;  %v1162_v54 = vrot.slane %v14095_v14, 7  ;;  %4403 = vperm.xlu2 %8731, %v4289_v30   ;;  %v2345_v53 = vrot.slane %v14095_v14, 1  ;;  %v2070_v30 = vmul.f32 %v10036_v43, %v14095_v14 }
 0x290   : > { %14092 = vst [vmem:[#allocation217_spill] sm:$0xff] %v10645_v59  ;;  %3938 = vperm.xlu1 %8730, %v3820_v39   ;;  %3468 = vperm.xlu0 %8729, %v3350_v16   ;;  %v3532_v39 = vmul.f32 %v10561_v7, %v10358_v62  ;;  %v3821_v16 = vld [vmem:[#allocation10 + $0x5b0] sm:$0xff]  ;;  %v14104_v7 = vld [vmem:[#allocation103_spill] sm:$0xff] }
 0x291   : > { %v10639_v2 = vpop.f32.mrf.mxu1  ;;  %8061 = vmatmul.msk.f32.gmra.mxu3 %vm1434_vm1, %v2069_v38  ;;  %v10647_v3 = vpop.f32.mrf.mxu0  ;;  %v10667_v29 = vsel %vm1174_vm2, %v1161_v24, %v1162_v54  ;;  %v14101_v24 = vld [vmem:[#allocation61_spill] sm:$0xff]  ;;  %v10683_v43 = vsel %vm2355_vm3, %v2344_v33, %v2345_v53  ;;  %v1163_v62 = vrot.slane %v14104_v7, 7 }
 0x292   : > { %14091 = vst [vmem:[#allocation216_spill] sm:$0xff] %v10639_v2  ;;  %v10658_v44 = vpop.permute.xlu2 %3898 }
 0x293   : > { %14093 = vst [vmem:[#allocation218_spill] sm:$0xff] %v10647_v3  ;;  %v10660_v38 = vpop.permute.xlu1 %4818  ;;  %v10663_v2 = vpop.permute.xlu0 %4348  ;;  %v1423_v3 = vmul.f32 %v14101_v24, %v10667_v29  ;;  %v3086_v24 = vld [vmem:[#allocation7 + $0x58] sm:$0xff] }
 0x294   : > { %7997 = vmatmul.msk.f32.gmra.mxu1 %vm1434_vm1, %v1422_v55  ;;  %v10655_v22 = vpop.f32.mrf.mxu3  ;;  %8092 = vmatmul.msk.f32.gmra.mxu0 %vm1434_vm1, %v2603_v63  ;;  %14097 = vst [vmem:[#allocation219_spill] sm:$0xff] %v10660_v38  ;;  %v3351_v63 = vld [vmem:[#allocation10 + $0x4b0] sm:$0xff]  ;;  %v10673_v55 = vpop.f32.mrf.mxu2  ;;  %v4759_v38 = vld [vmem:[#allocation10 + $0x7a0] sm:$0xff] }
 0x295   : > { %14096 = vst [vmem:[#allocation45_spill] sm:$0xff] %v10655_v22  ;;  %3196 = vmatpush.msrb.mxu1 %v3086_v24 }
 0x296   : > { %14098 = vst [vmem:[#allocation220_spill] sm:$0xff] %v10667_v29  ;;  %8145 = vmatmul.msk.f32.gmra.mxu2 %vm1434_vm1, %v3532_v39 }
 0x297   : > { %14099 = vst [vmem:[#allocation221_spill] sm:$0xff] %v10673_v55  ;;  %v2604_v55 = vmul.f32 %v10033_v19, %v10683_v43  ;;  %3943 = vperm.xlu2 %8731, %v3821_v16   ;;  %v10703_v19 = vsel %vm1174_vm2, %v1162_v54, %v1163_v62  ;;  %v4760_v16 = vld [vmem:[#allocation10 + $0x7a8] sm:$0xff] }
 0x298   : > { %14102 = vst [vmem:[#allocation61_spill] sm:$0xff] %v10683_v43  ;;  %3473 = vperm.xlu1 %8730, %v3351_v63   ;;  %4873 = vperm.xlu0 %8729, %v4759_v38   ;;  %v3352_v38 = vld [vmem:[#allocation10 + $0x4b8] sm:$0xff]  ;;  %v14111_v54 = vld [vmem:[#allocation108_spill] sm:$0xff] }
 0x299   : > { %v10675_v22 = vpop.f32.mrf.mxu1  ;;  %8062 = vmatmul.msk.f32.gmra.mxu3 %vm1434_vm1, %v2070_v30  ;;  %v10685_v15 = vpop.f32.mrf.mxu0  ;;  %14106 = vst [vmem:[#allocation225_spill] sm:$0xff] %v10703_v19  ;;  %v1164_v14 = vrot.slane %v14111_v54, 7 }
 0x29a   : > { %14100 = vst [vmem:[#allocation222_spill] sm:$0xff] %v10675_v22  ;;  %v10694_v39 = vpop.permute.xlu2 %3433  ;;  %v2346_v22 = vrot.slane %v14104_v7, 1 }
 0x29b   : > { %14103 = vst [vmem:[#allocation223_spill] sm:$0xff] %v10685_v15  ;;  %v10696_v33 = vpop.permute.xlu1 %4353  ;;  %v10699_v15 = vpop.permute.xlu0 %3888 }
 0x29c   : > { %7998 = vmatmul.msk.f32.gmra.mxu1 %vm1434_vm1, %v1423_v3  ;;  %v10691_v30 = vpop.f32.mrf.mxu3  ;;  %8093 = vmatmul.msk.f32.gmra.mxu0 %vm1434_vm1, %v2604_v55  ;;  %v2071_v3 = vmul.f32 %v10061_v6, %v14104_v7  ;;  %v4290_v55 = vld [vmem:[#allocation10 + $0x6a8] sm:$0xff]  ;;  %v10714_v24 = vsel %vm2355_vm3, %v2345_v53, %v2346_v22 }
 0x29d   : > { %14105 = vst [vmem:[#allocation224_spill] sm:$0xff] %v10691_v30  ;;  %v14108_v30 = vld [vmem:[#allocation60_spill] sm:$0xff]  ;;  %v2605_v6 = vmul.f32 %v10058_v37, %v10714_v24  ;;  %v10734_v37 = vsel %vm1174_vm2, %v1163_v62, %v1164_v14 }
 0x29e   : > { %v1424_v29 = vmul.f32 %v14108_v30, %v10703_v19  ;;  %14109 = vst [vmem:[#allocation60_spill] sm:$0xff] %v10714_v24 }
 0x29f   : > { %3478 = vperm.xlu2 %8731, %v3352_v38   ;;  %14115 = vst [vmem:[#allocation230_spill] sm:$0xff] %v10734_v37  ;;  %v2072_v38 = vmul.f32 %v10086_v51, %v14111_v54  ;;  %v14120_v51 = vld [vmem:[#allocation113_spill] sm:$0xff] }
 0x2a0   : > { %4878 = vperm.xlu1 %8730, %v4760_v16   ;;  %4408 = vperm.xlu0 %8729, %v4290_v55   ;;  %v4761_v16 = vld [vmem:[#allocation10 + $0x7b0] sm:$0xff] }
 0x2a1   : > { %v10707_v63 = vpop.f32.mrf.mxu1  ;;  %8063 = vmatmul.msk.f32.gmra.mxu3 %vm1434_vm1, %v2071_v3  ;;  %v10716_v13 = vpop.f32.mrf.mxu0  ;;  %v4291_v55 = vld [vmem:[#allocation10 + $0x6b0] sm:$0xff] }
 0x2a2   : > { %14107 = vst [vmem:[#allocation226_spill] sm:$0xff] %v10707_v63  ;;  %v10721_v63 = vpop.f32.mrf.mxu2  ;;  %v10727_v53 = vpop.permute.xlu2 %4838 }
 0x2a3   : > { %14110 = vst [vmem:[#allocation227_spill] sm:$0xff] %v10716_v13  ;;  %v10729_v30 = vpop.permute.xlu1 %3893  ;;  %v2347_v13 = vrot.slane %v14111_v54, 1  ;;  %v3424_v19 = vpop.permute.xlu0 %3423 }
 0x2a4   : > { %14112 = vst [vmem:[#allocation108_spill] sm:$0xff] %v10721_v63  ;;  %7999 = vmatmul.msk.f32.gmra.mxu1 %vm1434_vm1, %v1424_v29  ;;  %v10724_v3 = vpop.f32.mrf.mxu3  ;;  %8094 = vmatmul.msk.f32.gmra.mxu0 %vm1434_vm1, %v2605_v6  ;;  %v3533_v29 = vmul.f32 %v3424_v19, %v10385_v1  ;;  %v3822_v6 = vld [vmem:[#allocation10 + $0x5b8] sm:$0xff]  ;;  %v1165_v19 = vrot.slane %v14120_v51, 7 }
 0x2a5   : > { %14113 = vst [vmem:[#allocation228_spill] sm:$0xff] %v10724_v3  ;;  %v14117_v3 = vld [vmem:[#allocation47_spill] sm:$0xff]  ;;  %v10747_v62 = vsel %vm2355_vm3, %v2346_v22, %v2347_v13 }
 0x2a6   : > { %14114 = vst [vmem:[#allocation229_spill] sm:$0xff] %v10727_v53  ;;  %8146 = vmatmul.msk.f32.gmra.mxu2 %vm1434_vm1, %v3533_v29  ;;  %v1425_v53 = vmul.f32 %v14117_v3, %v10734_v37  ;;  %v2606_v1 = vmul.f32 %v10083_v25, %v10747_v62  ;;  %v2348_v29 = vrot.slane %v14120_v51, 1  ;;  %v10766_v25 = vsel %vm1174_vm2, %v1164_v14, %v1165_v19 }
 0x2a7   : > { %14118 = vst [vmem:[#allocation47_spill] sm:$0xff] %v10747_v62  ;;  %4883 = vperm.xlu2 %8731, %v4761_v16  }
 0x2a8   : > { %4413 = vperm.xlu1 %8730, %v4291_v55   ;;  %3948 = vperm.xlu0 %8729, %v3822_v6   ;;  %14124 = vst [vmem:[#allocation235_spill] sm:$0xff] %v10766_v25  ;;  %v4292_v55 = vld [vmem:[#allocation10 + $0x6b8] sm:$0xff]  ;;  %v10780_v14 = vsel %vm2355_vm3, %v2347_v13, %v2348_v29 }
 0x2a9   : > { %v10739_v63 = vpop.f32.mrf.mxu1  ;;  %8064 = vmatmul.msk.f32.gmra.mxu3 %vm1434_vm1, %v2072_v38  ;;  %v10749_v7 = vpop.f32.mrf.mxu0  ;;  %v2607_v37 = vmul.f32 %v10108_v61, %v10780_v14 }
 0x2aa   : > { %14116 = vst [vmem:[#allocation231_spill] sm:$0xff] %v10739_v63  ;;  %v10758_v3 = vpop.permute.xlu2 %4373  ;;  %v10770_v16 = vpop.f32.mrf.mxu2 }
 0x2ab   : > { %14119 = vst [vmem:[#allocation232_spill] sm:$0xff] %v10749_v7  ;;  %v3429_v22 = vpop.permute.xlu1 %3428  ;;  %v10762_v7 = vpop.permute.xlu0 %4828 }
 0x2ac   : > { %8000 = vmatmul.msk.f32.gmra.mxu1 %vm1434_vm1, %v1425_v53  ;;  %v10755_v38 = vpop.f32.mrf.mxu3  ;;  %8095 = vmatmul.msk.f32.gmra.mxu0 %vm1434_vm1, %v2606_v1  ;;  %14122 = vst [vmem:[#allocation233_spill] sm:$0xff] %v10758_v3  ;;  %v3534_v63 = vmul.f32 %v3429_v22, %v10417_v9  ;;  %v2073_v53 = vmul.f32 %v10111_v46, %v14120_v51  ;;  %v3823_v1 = vld [vmem:[#allocation10 + $0x5c0] sm:$0xff]  ;;  %v14130_v46 = vld [vmem:[#allocation117_spill] sm:$0xff] }
 0x2ad   : > { %14121 = vst [vmem:[#allocation113_spill] sm:$0xff] %v10755_v38  ;;  %v3353_v22 = vld [vmem:[#allocation10 + $0x4c0] sm:$0xff]  ;;  %v14127_v38 = vld [vmem:[#allocation65_spill] sm:$0xff] }
 0x2ae   : > { %14123 = vst [vmem:[#allocation234_spill] sm:$0xff] %v10762_v7  ;;  %8147 = vmatmul.msk.f32.gmra.mxu2 %vm1434_vm1, %v3534_v63  ;;  %v1426_v7 = vmul.f32 %v14127_v38, %v10766_v25 }
 0x2af   : > { %14125 = vst [vmem:[#allocation236_spill] sm:$0xff] %v10770_v16  ;;  %v1166_v16 = vrot.slane %v14130_v46, 7  ;;  %4418 = vperm.xlu2 %8731, %v4292_v55   ;;  %v4024_v55 = vld [vmem:[#allocation7 + $0x90] sm:$0xff] }
 0x2b0   : > { %14128 = vst [vmem:[#allocation65_spill] sm:$0xff] %v10780_v14  ;;  %3953 = vperm.xlu1 %8730, %v3823_v1   ;;  %3483 = vperm.xlu0 %8729, %v3353_v22   ;;  %v3824_v1 = vld [vmem:[#allocation10 + $0x5c8] sm:$0xff] }
 0x2b1   : > { %v10772_v6 = vpop.f32.mrf.mxu1  ;;  %8065 = vmatmul.msk.f32.gmra.mxu3 %vm1434_vm1, %v2073_v53  ;;  %v10782_v9 = vpop.f32.mrf.mxu0  ;;  %v4026_v53 = vld [vmem:[#allocation7 + $0xa0] sm:$0xff]  ;;  %v10800_v61 = vsel %vm1174_vm2, %v1165_v19, %v1166_v16  ;;  %v4762_v19 = vld [vmem:[#allocation10 + $0x7b8] sm:$0xff] }
 0x2b2   : > { %14126 = vst [vmem:[#allocation237_spill] sm:$0xff] %v10772_v6  ;;  %v10791_v38 = vpop.permute.xlu2 %3913  ;;  %4136 = vmatpush.msrb.mxu3 %v4026_v53  ;;  %v4025_v6 = vld [vmem:[#allocation7 + $0x98] sm:$0xff]  ;;  %v3354_v22 = vld [vmem:[#allocation10 + $0x4c8] sm:$0xff]  ;;  %v10806_v53 = vpop.f32.mrf.mxu2 }
 0x2b3   : > { %14129 = vst [vmem:[#allocation238_spill] sm:$0xff] %v10782_v9  ;;  %v10793_v13 = vpop.permute.xlu1 %4833  ;;  %v2349_v9 = vrot.slane %v14130_v46, 1  ;;  %v10796_v25 = vpop.permute.xlu0 %4363 }
 0x2b4   : > { %8001 = vmatmul.msk.f32.gmra.mxu1 %vm1434_vm1, %v1426_v7  ;;  %v10788_v63 = vpop.f32.mrf.mxu3  ;;  %8096 = vmatmul.msk.f32.gmra.mxu0 %vm1434_vm1, %v2607_v37  ;;  %14132 = vst [vmem:[#allocation239_spill] sm:$0xff] %v10791_v38  ;;  %v2074_v7 = vmul.f32 %v10136_v21, %v14130_v46  ;;  %v3535_v37 = vmul.f32 %v10694_v39, %v10446_v47  ;;  %v14137_v38 = vld [vmem:[#allocation64_spill] sm:$0xff] }
 0x2b5   : > { %14131 = vst [vmem:[#allocation117_spill] sm:$0xff] %v10788_v63  ;;  %4137 = vmatpush.msrb.mxu3 %v4025_v6  ;;  %v1427_v21 = vmul.f32 %v14137_v38, %v10800_v61  ;;  %v10816_v39 = vsel %vm2355_vm3, %v2348_v29, %v2349_v9 }
 0x2b6   : > { %14133 = vst [vmem:[#allocation240_spill] sm:$0xff] %v10793_v13  ;;  %8148 = vmatmul.msk.f32.gmra.mxu2 %vm1434_vm1, %v3535_v37  ;;  %v3085_v13 = vld [vmem:[#allocation7 + $0x50] sm:$0xff]  ;;  %v3084_v37 = vld [vmem:[#allocation7 + $0x48] sm:$0xff] }
 0x2b7   : > { %14134 = vst [vmem:[#allocation241_spill] sm:$0xff] %v10800_v61  ;;  %4138 = vmatpush.msrb.mxu3 %v4024_v55  ;;  %3197 = vmatpush.msrb.mxu1 %v3085_v13 }
 0x2b8   : > { %14135 = vst [vmem:[#allocation242_spill] sm:$0xff] %v10806_v53  ;;  %v14139_v53 = vld [vmem:[#allocation122_spill] sm:$0xff]  ;;  %3958 = vperm.xlu2 %8731, %v3824_v1   ;;  %3488 = vperm.xlu1 %8730, %v3354_v22   ;;  %v4496_v22 = vld [vmem:[#allocation7 + $0xb8] sm:$0xff] }
 0x2b9   : > { %v10808_v63 = vpop.f32.mrf.mxu1  ;;  %8066 = vmatmul.msk.f32.gmra.mxu3 %vm1434_vm1, %v2074_v7  ;;  %v10818_v6 = vpop.f32.mrf.mxu0  ;;  %v1167_v47 = vrot.slane %v14139_v53, 7  ;;  %v2608_v7 = vmul.f32 %v10133_v32, %v10816_v39  ;;  %4888 = vperm.xlu0 %8729, %v4762_v19   ;;  %v2350_v13 = vrot.slane %v14139_v53, 1  ;;  %v2075_v1 = vmul.f32 %v10161_v20, %v14139_v53  ;;  %v3355_v19 = vld [vmem:[#allocation10 + $0x4d0] sm:$0xff]  ;;  %v14146_v20 = vld [vmem:[#allocation127_spill] sm:$0xff] }
 0x2ba   : > { %14136 = vst [vmem:[#allocation243_spill] sm:$0xff] %v10808_v63  ;;  %v10827_v29 = vpop.permute.xlu2 %3448  ;;  %3198 = vmatpush.msrb.mxu1 %v3084_v37  ;;  %4606 = vmatpush.msra.mxu0 %v4496_v22  ;;  %v4293_v37 = vld [vmem:[#allocation10 + $0x6c0] sm:$0xff] }
 0x2bb   : > { %14138 = vst [vmem:[#allocation64_spill] sm:$0xff] %v10818_v6  ;;  %v10829_v63 = vpop.permute.xlu1 %4368  ;;  %v10832_v55 = vpop.permute.xlu0 %3903  ;;  %v10836_v32 = vsel %vm1174_vm2, %v1166_v16, %v1167_v47  ;;  %v14144_v6 = vld [vmem:[#allocation51_spill] sm:$0xff]  ;;  %v10847_v16 = vsel %vm2355_vm3, %v2349_v9, %v2350_v13 }
 0x2bc   : > { %8002 = vmatmul.msk.f32.gmra.mxu1 %vm1434_vm1, %v1427_v21  ;;  %v10824_v38 = vpop.f32.mrf.mxu3  ;;  %8097 = vmatmul.msk.f32.gmra.mxu0 %vm1434_vm1, %v2608_v7  ;;  %14141 = vst [vmem:[#allocation244_spill] sm:$0xff] %v10829_v63  ;;  %v4763_v21 = vld [vmem:[#allocation10 + $0x7c0] sm:$0xff]  ;;  %v1428_v61 = vmul.f32 %v14144_v6, %v10836_v32  ;;  %v1168_v63 = vrot.slane %v14146_v20, 7  ;;  %v2609_v22 = vmul.f32 %v10158_v56, %v10847_v16 }
 0x2bd   : > { %14140 = vst [vmem:[#allocation122_spill] sm:$0xff] %v10824_v38  ;;  %v4495_v38 = vld [vmem:[#allocation7 + $0xb0] sm:$0xff] }
 0x2be   : > { %14142 = vst [vmem:[#allocation245_spill] sm:$0xff] %v10836_v32  ;;  %4607 = vmatpush.msra.mxu0 %v4495_v38  ;;  %v10867_v56 = vsel %vm1174_vm2, %v1167_v47, %v1168_v63 }
 0x2bf   : > { %14150 = vst [vmem:[#allocation249_spill] sm:$0xff] %v10867_v56 }
 0x2c0   : > { %3493 = vperm.xlu2 %8731, %v3355_v19   ;;  %4893 = vperm.xlu1 %8730, %v4763_v21   ;;  %v2076_v19 = vmul.f32 %v10186_v17, %v14146_v20  ;;  %v4764_v21 = vld [vmem:[#allocation10 + $0x7c8] sm:$0xff] }
 0x2c1   : > { %v10840_v7 = vpop.f32.mrf.mxu1  ;;  %8067 = vmatmul.msk.f32.gmra.mxu3 %vm1434_vm1, %v2075_v1  ;;  %v10849_v3 = vpop.f32.mrf.mxu0  ;;  %v4494_v1 = vld [vmem:[#allocation7 + $0xa8] sm:$0xff]  ;;  %4423 = vperm.xlu0 %8729, %v4293_v37  }
 0x2c2   : > { %14143 = vst [vmem:[#allocation246_spill] sm:$0xff] %v10840_v7  ;;  %v10854_v7 = vpop.f32.mrf.mxu2  ;;  %v10860_v9 = vpop.permute.xlu2 %4853  ;;  %4608 = vmatpush.msra.mxu0 %v4494_v1  ;;  %v4294_v37 = vld [vmem:[#allocation10 + $0x6c8] sm:$0xff] }
 0x2c3   : > { %14145 = vst [vmem:[#allocation51_spill] sm:$0xff] %v10849_v3  ;;  %v10862_v38 = vpop.permute.xlu1 %3908  ;;  %v2351_v3 = vrot.slane %v14146_v20, 1  ;;  %v3439_v32 = vpop.permute.xlu0 %3438  ;;  %v14152_v1 = vld [vmem:[#allocation68_spill] sm:$0xff] }
 0x2c4   : > { %14147 = vst [vmem:[#allocation127_spill] sm:$0xff] %v10854_v7  ;;  %8003 = vmatmul.msk.f32.gmra.mxu1 %vm1434_vm1, %v1428_v61  ;;  %v10857_v6 = vpop.f32.mrf.mxu3  ;;  %8098 = vmatmul.msk.f32.gmra.mxu0 %vm1434_vm1, %v2609_v22  ;;  %v3536_v61 = vmul.f32 %v3439_v32, %v10479_v36 }
 0x2c5   : > { %14148 = vst [vmem:[#allocation247_spill] sm:$0xff] %v10857_v6  ;;  %v3825_v6 = vld [vmem:[#allocation10 + $0x5d0] sm:$0xff]  ;;  %v10880_v47 = vsel %vm2355_vm3, %v2350_v13, %v2351_v3 }
 0x2c6   : > { %14149 = vst [vmem:[#allocation248_spill] sm:$0xff] %v10860_v9  ;;  %8149 = vmatmul.msk.f32.gmra.mxu2 %vm1434_vm1, %v3536_v61  ;;  %v1429_v9 = vmul.f32 %v14152_v1, %v10867_v56  ;;  %v2610_v17 = vmul.f32 %v10183_v10, %v10880_v47  ;;  %v14155_v1 = vld [vmem:[#allocation132_spill] sm:$0xff] }
 0x2c7   : > { %v2352_v13 = vrot.slane %v14155_v1, 1  ;;  %v14157_v10 = vrot.slane %v14155_v1, 7 }
 0x2c8   : > { %4898 = vperm.xlu2 %8731, %v4764_v21   ;;  %4428 = vperm.xlu1 %8730, %v4294_v37   ;;  %v4295_v37 = vld [vmem:[#allocation10 + $0x6d0] sm:$0xff] }
 0x2c9   : > { %v10872_v22 = vpop.f32.mrf.mxu1  ;;  %8068 = vmatmul.msk.f32.gmra.mxu3 %vm1434_vm1, %v2076_v19  ;;  %v10882_v7 = vpop.f32.mrf.mxu0  ;;  %3963 = vperm.xlu0 %8729, %v3825_v6   ;;  %v10900_v6 = vsel %vm1174_vm2, %v1168_v63, %v14157_v10  ;;  %v10914_v63 = vsel %vm2355_vm3, %v2351_v3, %v2352_v13 }
 0x2ca   : > { %14151 = vst [vmem:[#allocation250_spill] sm:$0xff] %v10872_v22  ;;  %v10890_v19 = vpop.permute.xlu2 %4388  ;;  %v10904_v21 = vpop.f32.mrf.mxu2 }
 0x2cb   : > { %14153 = vst [vmem:[#allocation68_spill] sm:$0xff] %v10882_v7  ;;  %v3444_v61 = vpop.permute.xlu1 %3443  ;;  %v10894_v7 = vpop.permute.xlu0 %4843 }
 0x2cc   : > { %8004 = vmatmul.msk.f32.gmra.mxu1 %vm1434_vm1, %v1429_v9  ;;  %v10887_v32 = vpop.f32.mrf.mxu3  ;;  %8099 = vmatmul.msk.f32.gmra.mxu0 %vm1434_vm1, %v2610_v17  ;;  %v3537_v22 = vmul.f32 %v3444_v61, %v10512_v58  ;;  %14156 = vst [vmem:[#allocation132_spill] sm:$0xff] %v10894_v7  ;;  %v2077_v9 = vmul.f32 %v10211_v35, %v14155_v1  ;;  %v3826_v17 = vld [vmem:[#allocation10 + $0x5d8] sm:$0xff] }
 0x2cd   : > { %14154 = vst [vmem:[#allocation251_spill] sm:$0xff] %v10887_v32  ;;  %v3356_v61 = vld [vmem:[#allocation10 + $0x4d8] sm:$0xff]  ;;  %v2611_v35 = vmul.f32 %v10208_v18, %v10914_v63  ;;  %v3538_v18 = vmul.f32 %v10827_v29, %v10548_v27 }
 0x2ce   : > { %14158 = vst [vmem:[#allocation252_spill] sm:$0xff] %v10900_v6  ;;  %8150 = vmatmul.msk.f32.gmra.mxu2 %vm1434_vm1, %v3537_v22  ;;  %v14161_v7 = vld [vmem:[#allocation55_spill] sm:$0xff] }
 0x2cf   : > { %14159 = vst [vmem:[#allocation253_spill] sm:$0xff] %v10904_v21  ;;  %v1430_v58 = vmul.f32 %v14161_v7, %v10900_v6  ;;  %v14254_v6 = vld [vmem:[#allocation77_spill] sm:$0xff] }
 0x2d0   : > { %14162 = vst [vmem:[#allocation55_spill] sm:$0xff] %v10914_v63  ;;  %4433 = vperm.xlu2 %8731, %v4295_v37   ;;  %3968 = vperm.xlu1 %8730, %v3826_v17   ;;  %v3827_v37 = vld [vmem:[#allocation10 + $0x5e0] sm:$0xff] }
 0x2d1   : > { %v10906_v32 = vpop.f32.mrf.mxu1  ;;  %8069 = vmatmul.msk.f32.gmra.mxu3 %vm1434_vm1, %v2077_v9  ;;  %v10916_v10 = vpop.f32.mrf.mxu0  ;;  %3498 = vperm.xlu0 %8729, %v3356_v61   ;;  %v3357_v17 = vld [vmem:[#allocation10 + $0x4e0] sm:$0xff] }
 0x2d2   : > { %14160 = vst [vmem:[#allocation254_spill] sm:$0xff] %v10906_v32  ;;  %v10924_v22 = vpop.permute.xlu2 %3928  ;;  %v3991_v32 = vmul.f32 %v10156_v31, %v10090_v12  ;;  %v10934_v61 = vpop.f32.mrf.mxu2 }
 0x2d3   : > { %14163 = vst [vmem:[#allocation255_spill] sm:$0xff] %v10916_v10  ;;  %v10926_v7 = vpop.permute.xlu1 %4848  ;;  %v10928_v3 = vpop.permute.xlu0 %4378 }
 0x2d4   : > { %8005 = vmatmul.msk.f32.gmra.mxu1 %vm1434_vm1, %v1430_v58  ;;  %v10921_v9 = vpop.f32.mrf.mxu3  ;;  %8100 = vmatmul.msk.f32.gmra.mxu0 %vm1434_vm1, %v2611_v35  ;;  %14165 = vst [vmem:[#allocation257_spill] sm:$0xff] %v10926_v7  ;;  %v4765_v35 = vld [vmem:[#allocation10 + $0x7d0] sm:$0xff]  ;;  %v14169_v7 = vrot.slane %v9969_v42, 1 }
 0x2d5   : > { %14164 = vst [vmem:[#allocation256_spill] sm:$0xff] %v10921_v9  ;;  %v14168_v9 = vld [vmem:[#allocation59_spill] sm:$0xff] }
 0x2d6   : > { %14166 = vst [vmem:[#allocation258_spill] sm:$0xff] %v10934_v61  ;;  %8151 = vmatmul.msk.f32.gmra.mxu2 %vm1434_vm1, %v3538_v18  ;;  %v3051_v10 = vmul.f32 %v14168_v9, %v10042_v45  ;;  %v10946_v31 = vsel %vm2355_vm3, %v2352_v13, %v14169_v7  ;;  %v3992_v7 = vmul.f32 %v10181_v40, %v10115_v50 }
 0x2d7   : > { %14170 = vst [vmem:[#allocation59_spill] sm:$0xff] %v10946_v31  ;;  %v2612_v61 = vmul.f32 %v10235_v57, %v10946_v31  ;;  %v4766_v57 = vld [vmem:[#allocation10 + $0x7d8] sm:$0xff] }
 0x2d8   : > { %3973 = vperm.xlu2 %8731, %v3827_v37   ;;  %3503 = vperm.xlu1 %8730, %v3357_v17   ;;  %v4296_v17 = vld [vmem:[#allocation10 + $0x6d8] sm:$0xff] }
 0x2d9   : > { %v10936_v58 = vpop.f32.mrf.mxu1  ;;  %8166 = vmatmul.msk.f32.vlgmr.msrb.gmra.mxu3 %vm1434_vm1, %v3991_v32  ;;  %v10948_v29 = vpop.f32.mrf.mxu0  ;;  %4903 = vperm.xlu0 %8729, %v4765_v35  }
 0x2da   : > { %14167 = vst [vmem:[#allocation259_spill] sm:$0xff] %v10936_v58  ;;  %v10956_v32 = vpop.permute.xlu2 %3463  ;;  %v3358_v58 = vld [vmem:[#allocation10 + $0x4e8] sm:$0xff]  ;;  %v10976_v40 = vpop.f32.mrf.mxu2 }
 0x2db   : > { %14171 = vst [vmem:[#allocation260_spill] sm:$0xff] %v10948_v29  ;;  %v10958_v9 = vpop.permute.xlu1 %4383  ;;  %v10960_v13 = vpop.permute.xlu0 %3918 }
 0x2dc   : > { %v10952_v18 = vpop.f32.mrf.mxu3  ;;  %8102 = vmatmul.msk.f32.vlgmr.msrb.gmra.mxu1 %vm1434_vm1, %v3051_v10  ;;  %8101 = vmatmul.msk.f32.gmra.mxu0 %vm1434_vm1, %v2612_v61  ;;  %v14174_v10 = vld [vmem:[#allocation63_spill] sm:$0xff]  ;;  %14177 = vst [vmem:[#allocation264_spill] sm:$0xff] %v10976_v40 }
 0x2dd   : > { %14172 = vst [vmem:[#allocation261_spill] sm:$0xff] %v10952_v18  ;;  %v3052_v35 = vmul.f32 %v14174_v10, %v10065_v5  ;;  %v4461_v18 = vmul.f32 %v10290_v26, %v9618_v41 }
 0x2e0   : > { %3508 = vperm.xlu2 %8731, %v3358_v58   ;;  %4908 = vperm.xlu1 %8730, %v4766_v57   ;;  %v4767_v58 = vld [vmem:[#allocation10 + $0x7e0] sm:$0xff] }
 0x2e1   : > { %v10964_v37 = vpop.f32.mrf.mxu1  ;;  %8167 = vmatmul.msk.f32.gmra.mxu3 %vm1434_vm1, %v3992_v7  ;;  %v10969_v61 = vpop.f32.mrf.mxu0  ;;  %4438 = vperm.xlu0 %8729, %v4296_v17   ;;  %v4297_v57 = vld [vmem:[#allocation10 + $0x6e0] sm:$0xff] }
 0x2e2   : > { %14173 = vst [vmem:[#allocation262_spill] sm:$0xff] %v10964_v37  ;;  %v10981_v37 = vpop.permute.xlu2 %4868 }
 0x2e3   : > { %14175 = vst [vmem:[#allocation63_spill] sm:$0xff] %v10969_v61  ;;  %v10979_v7 = vpop.permute.xlu1 %3923  ;;  %v3454_v10 = vpop.permute.xlu0 %3453  ;;  %v3993_v61 = vmul.f32 %v10320_v23, %v10140_v28 }
 0x2e4   : > { %v10973_v29 = vpop.f32.mrf.mxu3  ;;  %8103 = vmatmul.msk.f32.gmra.mxu1 %vm1434_vm1, %v3052_v35  ;;  %8198 = vmatmul.msk.f32.vlgmr.msra.gmra.mxu0 %vm1434_vm1, %v4461_v18  ;;  %14178 = vst [vmem:[#allocation265_spill] sm:$0xff] %v10981_v37  ;;  %v3539_v26 = vmul.f32 %v3454_v10, %v10579_v60  ;;  %v3828_v35 = vld [vmem:[#allocation10 + $0x5e8] sm:$0xff]  ;;  %v14180_v18 = vld [vmem:[#allocation67_spill] sm:$0xff]  ;;  %v4462_v37 = vmul.f32 %v10317_v48, %v9631_v52 }
 0x2e5   : > { %14176 = vst [vmem:[#allocation263_spill] sm:$0xff] %v10973_v29  ;;  %v3053_v40 = vmul.f32 %v14180_v18, %v10090_v12  ;;  %v11003_v12 = vpop.f32.mrf.mxu2  ;;  %v14185_v18 = vld [vmem:[#allocation160_spill] sm:$0xff] }
 0x2e6   : > { %8152 = vmatmul.msk.f32.gmra.mxu2 %vm1434_vm1, %v3539_v26  ;;  %14184 = vst [vmem:[#allocation269_spill] sm:$0xff] %v11003_v12  ;;  %v14189_v12 = vld [vmem:[#allocation50_spill] sm:$0xff] }
 0x2e8   : > { %4913 = vperm.xlu2 %8731, %v4767_v58   ;;  %4443 = vperm.xlu1 %8730, %v4297_v57   ;;  %v4298_v58 = vld [vmem:[#allocation10 + $0x6e8] sm:$0xff]  ;;  %v3829_v57 = vld [vmem:[#allocation10 + $0x5f0] sm:$0xff] }
 0x2e9   : > { %v10986_v17 = vpop.f32.mrf.mxu1  ;;  %8168 = vmatmul.msk.f32.gmra.mxu3 %vm1434_vm1, %v3993_v61  ;;  %v10992_v29 = vpop.f32.mrf.mxu0  ;;  %3978 = vperm.xlu0 %8729, %v3828_v35  }
 0x2ea   : > { %14179 = vst [vmem:[#allocation266_spill] sm:$0xff] %v10986_v17  ;;  %v3994_v17 = vmul.f32 %v10344_v34, %v14185_v18  ;;  %v11007_v48 = vpop.permute.xlu2 %4403 }
 0x2eb   : > { %14181 = vst [vmem:[#allocation67_spill] sm:$0xff] %v10992_v29  ;;  %v3459_v10 = vpop.permute.xlu1 %3458  ;;  %v11001_v26 = vpop.permute.xlu0 %4858  ;;  %v4463_v29 = vmul.f32 %v10258_v49, %v14189_v12  ;;  %v3830_v49 = vld [vmem:[#allocation10 + $0x5f8] sm:$0xff] }
 0x2ec   : > { %v10996_v23 = vpop.f32.mrf.mxu3  ;;  %8104 = vmatmul.msk.f32.gmra.mxu1 %vm1434_vm1, %v3053_v40  ;;  %8199 = vmatmul.msk.f32.gmra.mxu0 %vm1434_vm1, %v4462_v37  ;;  %v3540_v61 = vmul.f32 %v3459_v10, %v10612_v0  ;;  %14183 = vst [vmem:[#allocation268_spill] sm:$0xff] %v11001_v26  ;;  %v3359_v37 = vld [vmem:[#allocation10 + $0x4f0] sm:$0xff] }
 0x2ed   : > { %14182 = vst [vmem:[#allocation267_spill] sm:$0xff] %v10996_v23  ;;  %v14187_v40 = vld [vmem:[#allocation70_spill] sm:$0xff] }
 0x2ee   : > { %8153 = vmatmul.msk.f32.gmra.mxu2 %vm1434_vm1, %v3540_v61  ;;  %v3054_v10 = vmul.f32 %v14187_v40, %v10115_v50  ;;  %v3541_v40 = vmul.f32 %v10956_v32, %v10645_v59  ;;  %v14198_v32 = vld [vmem:[#allocation181_spill] sm:$0xff] }
 0x2ef   : > { %v4769_v59 = vld [vmem:[#allocation10 + $0x7f0] sm:$0xff] }
 0x2f0   : > { %4448 = vperm.xlu2 %8731, %v4298_v58   ;;  %3983 = vperm.xlu1 %8730, %v3829_v57   ;;  %v3360_v58 = vld [vmem:[#allocation10 + $0x4f8] sm:$0xff]  ;;  %v11031_v57 = vpop.f32.mrf.mxu2 }
 0x2f1   : > { %v11009_v35 = vpop.f32.mrf.mxu1  ;;  %8169 = vmatmul.msk.f32.gmra.mxu3 %vm1434_vm1, %v3994_v17  ;;  %v11015_v23 = vpop.f32.mrf.mxu0  ;;  %3513 = vperm.xlu0 %8729, %v3359_v37  }
 0x2f2   : > { %14186 = vst [vmem:[#allocation160_spill] sm:$0xff] %v11009_v35  ;;  %v14192_v35 = vld [vmem:[#allocation162_spill] sm:$0xff] }
 0x2f3   : > { %14188 = vst [vmem:[#allocation70_spill] sm:$0xff] %v11015_v23  ;;  %v11023_v61 = vpop.permute.xlu1 %4863  ;;  %v11025_v17 = vpop.permute.xlu0 %4393  ;;  %v3995_v50 = vmul.f32 %v10285_v8, %v14192_v35 }
 0x2f4   : > { %v11019_v34 = vpop.f32.mrf.mxu3  ;;  %8105 = vmatmul.msk.f32.gmra.mxu1 %vm1434_vm1, %v3054_v10  ;;  %8200 = vmatmul.msk.f32.gmra.mxu0 %vm1434_vm1, %v4463_v29  ;;  %14191 = vst [vmem:[#allocation270_spill] sm:$0xff] %v11023_v61  ;;  %v4768_v29 = vld [vmem:[#allocation10 + $0x7e8] sm:$0xff]  ;;  %v11039_v23 = vpop.permute.xlu2 %3943  ;;  %v4464_v61 = vmul.f32 %v14198_v32, %v14197_v11  ;;  %v14206_v32 = vld [vmem:[#allocation110_spill] sm:$0xff] }
 0x2f5   : > { %14190 = vst [vmem:[#allocation50_spill] sm:$0xff] %v11019_v34  ;;  %v14195_v10 = vld [vmem:[#allocation72_spill] sm:$0xff] }
 0x2f6   : > { %14193 = vst [vmem:[#allocation162_spill] sm:$0xff] %v11031_v57  ;;  %8154 = vmatmul.msk.f32.gmra.mxu2 %vm1434_vm1, %v3541_v40  ;;  %v3055_v34 = vmul.f32 %v14195_v10, %v10140_v28  ;;  %v14200_v28 = vld [vmem:[#allocation164_spill] sm:$0xff]  ;;  %v14201_v10 = vld [vmem:[#allocation185_spill] sm:$0xff] }
 0x2f8   : > { %3988 = vperm.xlu2 %8731, %v3830_v49   ;;  %3518 = vperm.xlu1 %8730, %v3360_v58   ;;  %v4299_v49 = vld [vmem:[#allocation10 + $0x6f0] sm:$0xff] }
 0x2f9   : > { %v11033_v37 = vpop.f32.mrf.mxu1  ;;  %8170 = vmatmul.msk.f32.gmra.mxu3 %vm1434_vm1, %v3995_v50  ;;  %v11041_v8 = vpop.f32.mrf.mxu0  ;;  %4918 = vperm.xlu0 %8729, %v4768_v29   ;;  %v14203_v58 = vld [vmem:[#allocation74_spill] sm:$0xff] }
 0x2fa   : > { %14194 = vst [vmem:[#allocation271_spill] sm:$0xff] %v11033_v37  ;;  %v3996_v37 = vmul.f32 %v14201_v10, %v14200_v28  ;;  %v3056_v29 = vmul.f32 %v14203_v58, %v14185_v18  ;;  %v14209_v58 = vld [vmem:[#allocation168_spill] sm:$0xff] }
 0x2fb   : > { %14196 = vst [vmem:[#allocation72_spill] sm:$0xff] %v11041_v8  ;;  %v11049_v50 = vpop.permute.xlu1 %4398  ;;  %v11051_v40 = vpop.permute.xlu0 %3933  ;;  %v4300_v8 = vld [vmem:[#allocation10 + $0x6f8] sm:$0xff] }
 0x2fc   : > { %v11045_v57 = vpop.f32.mrf.mxu3  ;;  %8106 = vmatmul.msk.f32.gmra.mxu1 %vm1434_vm1, %v3055_v34  ;;  %8201 = vmatmul.msk.f32.gmra.mxu0 %vm1434_vm1, %v4464_v61  ;;  %v14205_v61 = vld [vmem:[#allocation58_spill] sm:$0xff]  ;;  %v3479_v0 = vpop.permute.xlu2 %3478 }
 0x2fd   : > { %14199 = vst [vmem:[#allocation54_spill] sm:$0xff] %v11045_v57  ;;  %v4465_v57 = vmul.f32 %v14206_v32, %v14205_v61 }
 0x300   : > { %4458 = vperm.xlu2 %8731, %v4300_v8   ;;  %4923 = vperm.xlu1 %8730, %v4769_v59   ;;  %v4770_v59 = vld [vmem:[#allocation10 + $0x7f8] sm:$0xff] }
 0x301   : > { %v11055_v26 = vpop.f32.mrf.mxu1  ;;  %8171 = vmatmul.msk.f32.gmra.mxu3 %vm1434_vm1, %v3996_v37  ;;  %v11060_v34 = vpop.f32.mrf.mxu0  ;;  %4453 = vperm.xlu0 %8729, %v4299_v49   ;;  %v14212_v49 = vld [vmem:[#allocation76_spill] sm:$0xff] }
 0x302   : > { %14202 = vst [vmem:[#allocation181_spill] sm:$0xff] %v11055_v26  ;;  %v11067_v26 = vpop.f32.mrf.mxu2 }
 0x303   : > { %14204 = vst [vmem:[#allocation164_spill] sm:$0xff] %v11060_v34  ;;  %v11070_v37 = vpop.permute.xlu1 %3938  ;;  %v3469_v18 = vpop.permute.xlu0 %3468  ;;  %v14210_v34 = vld [vmem:[#allocation190_spill] sm:$0xff] }
 0x304   : > { %v11064_v10 = vpop.f32.mrf.mxu3  ;;  %8107 = vmatmul.msk.f32.gmra.mxu1 %vm1434_vm1, %v3056_v29  ;;  %14208 = vst [vmem:[#allocation74_spill] sm:$0xff] %v11067_v26  ;;  %8202 = vmatmul.msk.f32.gmra.mxu0 %vm1434_vm1, %v4465_v57  ;;  %v3997_v60 = vmul.f32 %v14210_v34, %v14209_v58  ;;  %v3542_v32 = vmul.f32 %v3469_v18, %v10683_v43  ;;  %v14214_v57 = vld [vmem:[#allocation62_spill] sm:$0xff]  ;;  %v14216_v34 = vld [vmem:[#allocation43_spill] sm:$0xff]  ;;  %v14217_v18 = vld [vmem:[#allocation41_spill] sm:$0xff] }
 0x305   : > { %14207 = vst [vmem:[#allocation185_spill] sm:$0xff] %v11064_v10  ;;  %v3057_v29 = vmul.f32 %v14212_v49, %v14192_v35  ;;  %v14215_v10 = vld [vmem:[#allocation40_spill] sm:$0xff]  ;;  %v11093_v35 = vpop.permute.xlu2 %4883 }
 0x306   : > { %8155 = vmatmul.msk.f32.gmra.mxu2 %vm1434_vm1, %v3542_v32  ;;  %v4466_v27 = vmul.f32 %v14215_v10, %v14214_v57  ;;  %14219 = vst [vmem:[#allocation190_spill] sm:$0xff] %v11093_v35 }
 0x308   : > { %5278 = vrot.lane.b32.xlu2 %v14216_v34, %s9244_s22  ;;  %5276 = vrot.lane.b32.xlu1 %v14217_v18, %s9244_s22  ;;  %v14241_v34 = vld [vmem:[#allocation129_spill] sm:$0xff]  ;;  %v14249_v18 = vld [vmem:[#allocation82_spill] sm:$0xff] }
 0x309   : > { %v11075_v8 = vpop.f32.mrf.mxu1  ;;  %8172 = vmatmul.msk.f32.gmra.mxu3 %vm1434_vm1, %v3997_v60  ;;  %v11081_v26 = vpop.f32.mrf.mxu0  ;;  %4928 = vperm.xlu0 %8729, %v4770_v59  }
 0x30a   : > { %14211 = vst [vmem:[#allocation58_spill] sm:$0xff] %v11075_v8  ;;  %v14221_v8 = vld [vmem:[#allocation171_spill] sm:$0xff]  ;;  %v11100_v36 = vpop.f32.mrf.mxu2 }
 0x30b   : > { %14213 = vst [vmem:[#allocation110_spill] sm:$0xff] %v11081_v26  ;;  %v3474_v60 = vpop.permute.xlu1 %3473  ;;  %v11096_v10 = vpop.permute.xlu0 %4873  ;;  %v14222_v26 = vld [vmem:[#allocation49_spill] sm:$0xff]  ;;  %v3060_v5 = vmul.f32 %v14249_v18, %v14221_v8 }
 0x30c   : > { %v11089_v32 = vpop.f32.mrf.mxu3  ;;  %8108 = vmatmul.msk.f32.gmra.mxu1 %vm1434_vm1, %v3057_v29  ;;  %8203 = vmatmul.msk.f32.gmra.mxu0 %vm1434_vm1, %v4466_v27  ;;  %v3543_v49 = vmul.f32 %v3474_v60, %v10714_v24  ;;  %14220 = vst [vmem:[#allocation76_spill] sm:$0xff] %v11096_v10  ;;  %v3998_v43 = vmul.f32 %v14222_v26, %v14221_v8  ;;  %v14225_v27 = vld [vmem:[#allocation78_spill] sm:$0xff]  ;;  %v14228_v60 = vld [vmem:[#allocation200_spill] sm:$0xff]  ;;  %v14229_v10 = vld [vmem:[#allocation83_spill] sm:$0xff] }
 0x30d   : > { %14218 = vst [vmem:[#allocation168_spill] sm:$0xff] %v11089_v32  ;;  %v3058_v59 = vmul.f32 %v14225_v27, %v14200_v28  ;;  %v14227_v32 = vld [vmem:[#allocation66_spill] sm:$0xff]  ;;  %v14230_v26 = vld [vmem:[#allocation81_spill] sm:$0xff]  ;;  %v14233_v27 = vld [vmem:[#allocation175_spill] sm:$0xff]  ;;  %v11129_v24 = vpop.permute.xlu2 %4418 }
 0x30e   : > { %14223 = vst [vmem:[#allocation62_spill] sm:$0xff] %v11100_v36  ;;  %8156 = vmatmul.msk.f32.gmra.mxu2 %vm1434_vm1, %v3543_v49  ;;  %v4467_v35 = vmul.f32 %v14228_v60, %v14227_v32  ;;  %v14234_v60 = vld [vmem:[#allocation205_spill] sm:$0xff] }
 0x30f   : > { %v3999_v36 = vmul.f32 %v14234_v60, %v14233_v27  ;;  %14235 = vst [vmem:[#allocation66_spill] sm:$0xff] %v11129_v24 }
 0x310   : > { %5308 = vrot.lane.b32.xlu2 %v14229_v10, %s9244_s22  ;;  %5306 = vrot.lane.b32.xlu1 %v14230_v26, %s9244_s22 }
 0x311   : > { %v11102_v21 = vpop.f32.mrf.mxu1  ;;  %8173 = vmatmul.msk.f32.gmra.mxu3 %vm1434_vm1, %v3998_v43  ;;  %v11108_v29 = vpop.f32.mrf.mxu0  ;;  %5280 = vrot.lane.b32.xlu0 %v9618_v41, %s9244_s22 }
 0x312   : > { %14224 = vst [vmem:[#allocation40_spill] sm:$0xff] %v11102_v21  ;;  %v11131_v21 = vpop.f32.mrf.mxu2 }
 0x313   : > { %14226 = vst [vmem:[#allocation171_spill] sm:$0xff] %v11108_v29  ;;  %v11122_v43 = vpop.permute.xlu1 %4878  ;;  %v11124_v28 = vpop.permute.xlu0 %4408  ;;  %v3544_v29 = vmul.f32 %v3479_v0, %v10747_v62  ;;  %v14242_v0 = vld [vmem:[#allocation143_spill] sm:$0xff] }
 0x314   : > { %v11118_v49 = vpop.f32.mrf.mxu3  ;;  %8109 = vmatmul.msk.f32.gmra.mxu1 %vm1434_vm1, %v3058_v59  ;;  %8204 = vmatmul.msk.f32.gmra.mxu0 %vm1434_vm1, %v4467_v35  ;;  %14232 = vst [vmem:[#allocation78_spill] sm:$0xff] %v11122_v43  ;;  %v14238_v35 = vld [vmem:[#allocation80_spill] sm:$0xff]  ;;  %v14243_v62 = vld [vmem:[#allocation87_spill] sm:$0xff] }
 0x315   : > { %14231 = vst [vmem:[#allocation49_spill] sm:$0xff] %v11118_v49  ;;  %v3059_v59 = vmul.f32 %v14238_v35, %v14209_v58  ;;  %v14240_v49 = vld [vmem:[#allocation69_spill] sm:$0xff]  ;;  %v14247_v35 = vld [vmem:[#allocation210_spill] sm:$0xff] }
 0x316   : > { %14236 = vst [vmem:[#allocation200_spill] sm:$0xff] %v11131_v21  ;;  %8157 = vmatmul.msk.f32.gmra.mxu2 %vm1434_vm1, %v3544_v29  ;;  %v4468_v60 = vmul.f32 %v14241_v34, %v14240_v49  ;;  %v14244_v21 = vld [vmem:[#allocation85_spill] sm:$0xff] }
 0x317   : > { %v14246_v34 = vld [vmem:[#allocation93_spill] sm:$0xff] }
 0x318   : > { %5338 = vrot.lane.b32.xlu2 %v14242_v0, %s9244_s22  ;;  %5312 = vrot.lane.b32.xlu1 %v14243_v62, %s9244_s22  ;;  %v11164_v0 = vpop.permute.xlu2 %3958 }
 0x319   : > { %v11133_v41 = vpop.f32.mrf.mxu1  ;;  %8174 = vmatmul.msk.f32.gmra.mxu3 %vm1434_vm1, %v3999_v36  ;;  %v11139_v43 = vpop.f32.mrf.mxu0  ;;  %5310 = vrot.lane.b32.xlu0 %v14244_v21, %s9244_s22  ;;  %14250 = vst [vmem:[#allocation80_spill] sm:$0xff] %v11164_v0 }
 0x31a   : > { %14237 = vst [vmem:[#allocation83_spill] sm:$0xff] %v11133_v41  ;;  %v4000_v41 = vmul.f32 %v14247_v35, %v14246_v34  ;;  %v14255_v35 = vld [vmem:[#allocation79_spill] sm:$0xff]  ;;  %v11179_v8 = vpop.f32.mrf.mxu2 }
 0x31b   : > { %14239 = vst [vmem:[#allocation81_spill] sm:$0xff] %v11139_v43  ;;  %v11153_v36 = vpop.permute.xlu1 %4413  ;;  %v11155_v58 = vpop.permute.xlu0 %3948 }
 0x31c   : > { %v11149_v29 = vpop.f32.mrf.mxu3  ;;  %8110 = vmatmul.msk.f32.gmra.mxu1 %vm1434_vm1, %v3059_v59  ;;  %8205 = vmatmul.msk.f32.gmra.mxu0 %vm1434_vm1, %v4468_v60  ;;  %v14252_v59 = vld [vmem:[#allocation71_spill] sm:$0xff] }
 0x31d   : > { %14245 = vst [vmem:[#allocation175_spill] sm:$0xff] %v11149_v29  ;;  %v14253_v60 = vld [vmem:[#allocation119_spill] sm:$0xff] }
 0x31e   : > { %v4469_v45 = vmul.f32 %v14253_v60, %v14252_v59 }
 0x320   : > { %5302 = vrot.lane.b32.xlu2 %v14254_v6, %s9244_s22  ;;  %5336 = vrot.lane.b32.xlu1 %v9969_v42, %s9244_s22 }
 0x321   : > { %v11159_v43 = vpop.f32.mrf.mxu1  ;;  %8175 = vmatmul.msk.f32.gmra.mxu3 %vm1434_vm1, %v4000_v41  ;;  %v11166_v29 = vpop.f32.mrf.mxu0  ;;  %5304 = vrot.lane.b32.xlu0 %v14255_v35, %s9244_s22 }
 0x322   : > { %14248 = vst [vmem:[#allocation205_spill] sm:$0xff] %v11159_v43  ;;  %v14258_v43 = vld [vmem:[#allocation178_spill] sm:$0xff] }
 0x323   : > { %14251 = vst [vmem:[#allocation69_spill] sm:$0xff] %v11166_v29  ;;  %v11182_v18 = vpop.permute.xlu1 %3953  ;;  %v3484_v60 = vpop.permute.xlu0 %3483  ;;  %v14259_v29 = vld [vmem:[#allocation124_spill] sm:$0xff] }
 0x324   : > { %v11176_v41 = vpop.f32.mrf.mxu3  ;;  %8111 = vmatmul.msk.f32.gmra.mxu1 %vm1434_vm1, %v3060_v5  ;;  %8206 = vmatmul.msk.f32.gmra.mxu0 %vm1434_vm1, %v4469_v45  ;;  %14257 = vst [vmem:[#allocation87_spill] sm:$0xff] %v11182_v18  ;;  %v4001_v56 = vmul.f32 %v14259_v29, %v14258_v43  ;;  %v3545_v0 = vmul.f32 %v3484_v60, %v10780_v14  ;;  %v14261_v5 = vld [vmem:[#allocation84_spill] sm:$0xff]  ;;  %v14263_v45 = vld [vmem:[#allocation73_spill] sm:$0xff]  ;;  %v14264_v29 = vld [vmem:[#allocation75_spill] sm:$0xff]  ;;  %v3494_v60 = vpop.permute.xlu2 %3493 }
 0x325   : > { %14256 = vst [vmem:[#allocation129_spill] sm:$0xff] %v11176_v41  ;;  %v3061_v41 = vmul.f32 %v14261_v5, %v14233_v27  ;;  %v4470_v18 = vmul.f32 %v10663_v2, %v14263_v45  ;;  %v14266_v5 = vld [vmem:[#allocation179_spill] sm:$0xff] }
 0x326   : > { %8158 = vmatmul.msk.f32.gmra.mxu2 %vm1434_vm1, %v3545_v0 }
 0x328   : > { %5332 = vrot.lane.b32.xlu2 %v14146_v20, %s9244_s22  ;;  %5300 = vrot.lane.b32.xlu1 %v14264_v29, %s9244_s22 }
 0x329   : > { %v11187_v42 = vpop.f32.mrf.mxu1  ;;  %8176 = vmatmul.msk.f32.gmra.mxu3 %vm1434_vm1, %v4001_v56  ;;  %v11193_v24 = vpop.f32.mrf.mxu0  ;;  %5334 = vrot.lane.b32.xlu0 %v14155_v1, %s9244_s22 }
 0x32a   : > { %14260 = vst [vmem:[#allocation85_spill] sm:$0xff] %v11187_v42  ;;  %v4002_v42 = vmul.f32 %v10699_v15, %v14266_v5 }
 0x32b   : > { %14262 = vst [vmem:[#allocation93_spill] sm:$0xff] %v11193_v24  ;;  %v3489_v56 = vpop.permute.xlu1 %3488  ;;  %v11208_v2 = vpop.permute.xlu0 %4888 }
 0x32c   : > { %v11203_v0 = vpop.f32.mrf.mxu3  ;;  %8112 = vmatmul.msk.f32.gmra.mxu1 %vm1434_vm1, %v3061_v41  ;;  %8207 = vmatmul.msk.f32.gmra.mxu0 %vm1434_vm1, %v4470_v18  ;;  %v3546_v27 = vmul.f32 %v3489_v56, %v10816_v39  ;;  %v11212_v24 = vpop.f32.mrf.mxu2  ;;  %v14268_v41 = vld [vmem:[#allocation86_spill] sm:$0xff]  ;;  %v4471_v56 = vmul.f32 %v10696_v33, %v14264_v29 }
 0x32d   : > { %14265 = vst [vmem:[#allocation210_spill] sm:$0xff] %v11203_v0  ;;  %v3062_v0 = vmul.f32 %v14268_v41, %v14246_v34  ;;  %v11236_v34 = vpop.permute.xlu2 %4898  ;;  %v14272_v29 = vld [vmem:[#allocation182_spill] sm:$0xff] }
 0x32e   : > { %8159 = vmatmul.msk.f32.gmra.mxu2 %vm1434_vm1, %v3546_v27  ;;  %14271 = vst [vmem:[#allocation77_spill] sm:$0xff] %v11236_v34  ;;  %v3547_v27 = vmul.f32 %v3494_v60, %v10847_v16 }
 0x330   : > { %5296 = vrot.lane.b32.xlu2 %v14252_v59, %s9244_s22  ;;  %5330 = vrot.lane.b32.xlu1 %v14139_v53, %s9244_s22  ;;  %v4003_v59 = vmul.f32 %v10729_v30, %v14272_v29 }
 0x331   : > { %v11214_v14 = vpop.f32.mrf.mxu1  ;;  %8177 = vmatmul.msk.f32.gmra.mxu3 %vm1434_vm1, %v4002_v42  ;;  %v11220_v18 = vpop.f32.mrf.mxu0  ;;  %5298 = vrot.lane.b32.xlu0 %v14263_v45, %s9244_s22 }
 0x332   : > { %14267 = vst [vmem:[#allocation82_spill] sm:$0xff] %v11214_v14  ;;  %v4472_v14 = vmul.f32 %v10625_v4, %v14254_v6  ;;  %v14277_v4 = vld [vmem:[#allocation186_spill] sm:$0xff] }
 0x333   : > { %14269 = vst [vmem:[#allocation71_spill] sm:$0xff] %v11220_v18  ;;  %v11234_v42 = vpop.permute.xlu1 %4893  ;;  %v11238_v33 = vpop.permute.xlu0 %4423  ;;  %v4004_v6 = vmul.f32 %v10658_v44, %v14277_v4 }
 0x334   : > { %v11230_v15 = vpop.f32.mrf.mxu3  ;;  %8113 = vmatmul.msk.f32.gmra.mxu1 %vm1434_vm1, %v3062_v0  ;;  %8208 = vmatmul.msk.f32.gmra.mxu0 %vm1434_vm1, %v4471_v56  ;;  %v11243_v41 = vpop.f32.mrf.mxu2  ;;  %v14274_v0 = vld [vmem:[#allocation88_spill] sm:$0xff] }
 0x335   : > { %14270 = vst [vmem:[#allocation119_spill] sm:$0xff] %v11230_v15  ;;  %v3063_v56 = vmul.f32 %v14274_v0, %v14258_v43 }
 0x336   : > { %8160 = vmatmul.msk.f32.gmra.mxu2 %vm1434_vm1, %v3547_v27 }
 0x338   : > { %5326 = vrot.lane.b32.xlu2 %v14120_v51, %s9244_s22  ;;  %5294 = vrot.lane.b32.xlu1 %v14240_v49, %s9244_s22  ;;  %v14279_v49 = vld [vmem:[#allocation90_spill] sm:$0xff] }
 0x339   : > { %v11245_v45 = vpop.f32.mrf.mxu1  ;;  %8178 = vmatmul.msk.f32.gmra.mxu3 %vm1434_vm1, %v4003_v59  ;;  %v11251_v15 = vpop.f32.mrf.mxu0  ;;  %5328 = vrot.lane.b32.xlu0 %v14130_v46, %s9244_s22  ;;  %v3064_v0 = vmul.f32 %v14279_v49, %v14266_v5 }
 0x33a   : > { %14273 = vst [vmem:[#allocation79_spill] sm:$0xff] %v11245_v45  ;;  %v11271_v59 = vpop.permute.xlu2 %4433 }
 0x33b   : > { %14275 = vst [vmem:[#allocation178_spill] sm:$0xff] %v11251_v15  ;;  %v11265_v43 = vpop.permute.xlu1 %4428  ;;  %v11267_v60 = vpop.permute.xlu0 %3963  ;;  %v14297_v15 = vld [vmem:[#allocation233_spill] sm:$0xff] }
 0x33c   : > { %v11261_v30 = vpop.f32.mrf.mxu3  ;;  %8114 = vmatmul.msk.f32.gmra.mxu1 %vm1434_vm1, %v3063_v56  ;;  %8209 = vmatmul.msk.f32.gmra.mxu0 %vm1434_vm1, %v4472_v14  ;;  %v4473_v14 = vmul.f32 %v10796_v25, %v14255_v35  ;;  %v11291_v56 = vpop.f32.mrf.mxu2  ;;  %v14282_v35 = vld [vmem:[#allocation191_spill] sm:$0xff]  ;;  %v4475_v18 = vmul.f32 %v14297_v15, %v14229_v10 }
 0x33d   : > { %14276 = vst [vmem:[#allocation124_spill] sm:$0xff] %v11261_v30 }
 0x340   : > { %5290 = vrot.lane.b32.xlu2 %v14214_v57, %s9244_s22  ;;  %5324 = vrot.lane.b32.xlu1 %v14111_v54, %s9244_s22  ;;  %v4005_v57 = vmul.f32 %v10832_v55, %v14282_v35  ;;  %v14287_v55 = vld [vmem:[#allocation98_spill] sm:$0xff] }
 0x341   : > { %v11273_v27 = vpop.f32.mrf.mxu1  ;;  %8179 = vmatmul.msk.f32.gmra.mxu3 %vm1434_vm1, %v4004_v6  ;;  %v11278_v30 = vpop.f32.mrf.mxu0  ;;  %5292 = vrot.lane.b32.xlu0 %v14227_v32, %s9244_s22  ;;  %v14284_v32 = vld [vmem:[#allocation92_spill] sm:$0xff] }
 0x342   : > { %14278 = vst [vmem:[#allocation84_spill] sm:$0xff] %v11273_v27  ;;  %v14286_v27 = vld [vmem:[#allocation244_spill] sm:$0xff] }
 0x343   : > { %14280 = vst [vmem:[#allocation73_spill] sm:$0xff] %v11278_v30  ;;  %v11294_v5 = vpop.permute.xlu1 %3968  ;;  %v3499_v25 = vpop.permute.xlu0 %3498  ;;  %v4474_v30 = vmul.f32 %v14286_v27, %v14230_v26  ;;  %v14291_v26 = vld [vmem:[#allocation195_spill] sm:$0xff] }
 0x344   : > { %v11288_v44 = vpop.f32.mrf.mxu3  ;;  %8115 = vmatmul.msk.f32.gmra.mxu1 %vm1434_vm1, %v3064_v0  ;;  %8210 = vmatmul.msk.f32.gmra.mxu0 %vm1434_vm1, %v4473_v14  ;;  %v3548_v6 = vmul.f32 %v3499_v25, %v10880_v47  ;;  %v3065_v0 = vmul.f32 %v14284_v32, %v14272_v29  ;;  %v14288_v25 = vld [vmem:[#allocation103_spill] sm:$0xff]  ;;  %v4006_v27 = vmul.f32 %v10862_v38, %v14291_v26  ;;  %v14298_v38 = vld [vmem:[#allocation94_spill] sm:$0xff] }
 0x345   : > { %14281 = vst [vmem:[#allocation75_spill] sm:$0xff] %v11288_v44  ;;  %v11305_v44 = vpop.permute.xlu2 %3973 }
 0x346   : > { %8161 = vmatmul.msk.f32.gmra.mxu2 %vm1434_vm1, %v3548_v6 }
 0x348   : > { %5320 = vrot.lane.b32.xlu2 %v14287_v55, %s9244_s22  ;;  %5288 = vrot.lane.b32.xlu1 %v14205_v61, %s9244_s22 }
 0x349   : > { %v11299_v49 = vpop.f32.mrf.mxu1  ;;  %8180 = vmatmul.msk.f32.gmra.mxu3 %vm1434_vm1, %v4005_v57  ;;  %v11307_v14 = vpop.f32.mrf.mxu0  ;;  %5322 = vrot.lane.b32.xlu0 %v14288_v25, %s9244_s22 }
 0x34a   : > { %14283 = vst [vmem:[#allocation179_spill] sm:$0xff] %v11299_v49  ;;  %v11326_v49 = vpop.f32.mrf.mxu2 }
 0x34b   : > { %14285 = vst [vmem:[#allocation86_spill] sm:$0xff] %v11307_v14  ;;  %v3504_v29 = vpop.permute.xlu1 %3503  ;;  %v11322_v32 = vpop.permute.xlu0 %4903  ;;  %v14295_v14 = vld [vmem:[#allocation102_spill] sm:$0xff] }
 0x34c   : > { %v11317_v57 = vpop.f32.mrf.mxu3  ;;  %8116 = vmatmul.msk.f32.gmra.mxu1 %vm1434_vm1, %v3065_v0  ;;  %8211 = vmatmul.msk.f32.gmra.mxu0 %vm1434_vm1, %v4474_v30  ;;  %v3549_v6 = vmul.f32 %v3504_v29, %v10914_v63  ;;  %14290 = vst [vmem:[#allocation88_spill] sm:$0xff] %v11322_v32  ;;  %v14293_v0 = vld [vmem:[#allocation95_spill] sm:$0xff] }
 0x34d   : > { %14289 = vst [vmem:[#allocation182_spill] sm:$0xff] %v11317_v57  ;;  %v3066_v57 = vmul.f32 %v14293_v0, %v14277_v4  ;;  %v14294_v30 = vld [vmem:[#allocation183_spill] sm:$0xff] }
 0x34e   : > { %8162 = vmatmul.msk.f32.gmra.mxu2 %vm1434_vm1, %v3549_v6  ;;  %v1758_v45 = vadd.f32 %v14295_v14, %v14294_v30  ;;  %v3509_v6 = vpop.permute.xlu2 %3508  ;;  %v14301_v14 = vld [vmem:[#allocation48_spill] sm:$0xff]  ;;  %v14303_v0 = vld [vmem:[#allocation239_spill] sm:$0xff] }
 0x350   : > { %5284 = vrot.lane.b32.xlu2 %v14189_v12, %s9244_s22  ;;  %5318 = vrot.lane.b32.xlu1 %v14298_v38, %s9244_s22  ;;  %v2291_v10 = vadd.f32 %v14301_v14, %v1758_v45  ;;  %v14302_v12 = vld [vmem:[#allocation201_spill] sm:$0xff]  ;;  %v14306_v45 = vld [vmem:[#allocation116_spill] sm:$0xff]  ;;  %v14307_v14 = vld [vmem:[#allocation107_spill] sm:$0xff] }
 0x351   : > { %v11328_v61 = vpop.f32.mrf.mxu1  ;;  %8181 = vmatmul.msk.f32.gmra.mxu3 %vm1434_vm1, %v4006_v27  ;;  %v11336_v29 = vpop.f32.mrf.mxu0  ;;  %5286 = vrot.lane.b32.xlu0 %v14197_v11, %s9244_s22  ;;  %v4007_v30 = vmul.f32 %v14303_v0, %v14302_v12 }
 0x352   : > { %14292 = vst [vmem:[#allocation186_spill] sm:$0xff] %v11328_v61  ;;  %v3550_v61 = vmul.f32 %v3509_v6, %v10946_v31  ;;  %v11359_v11 = vpop.f32.mrf.mxu2  ;;  %v4476_v6 = vmul.f32 %v10928_v3, %v14244_v21 }
 0x353   : > { %14296 = vst [vmem:[#allocation90_spill] sm:$0xff] %v11336_v29  ;;  %v11350_v4 = vpop.permute.xlu1 %4908  ;;  %v11353_v15 = vpop.permute.xlu0 %4438  ;;  %v14304_v29 = vld [vmem:[#allocation188_spill] sm:$0xff] }
 0x354   : > { %v11346_v27 = vpop.f32.mrf.mxu3  ;;  %8117 = vmatmul.msk.f32.gmra.mxu1 %vm1434_vm1, %v3066_v57  ;;  %8212 = vmatmul.msk.f32.gmra.mxu0 %vm1434_vm1, %v4475_v18  ;;  %14300 = vst [vmem:[#allocation92_spill] sm:$0xff] %v11350_v4  ;;  %v2826_v32 = vadd.f32 %v14304_v29, %v2291_v10  ;;  %v14305_v18 = vld [vmem:[#allocation99_spill] sm:$0xff]  ;;  %v1761_v4 = vadd.f32 %v14307_v14, %v14306_v45  ;;  %v14309_v29 = vld [vmem:[#allocation89_spill] sm:$0xff] }
 0x355   : > { %14299 = vst [vmem:[#allocation191_spill] sm:$0xff] %v11346_v27  ;;  %v3067_v57 = vmul.f32 %v14305_v18, %v14282_v35  ;;  %v14312_v18 = vld [vmem:[#allocation206_spill] sm:$0xff]  ;;  %v14313_v45 = vld [vmem:[#allocation193_spill] sm:$0xff] }
 0x356   : > { %8163 = vmatmul.msk.f32.gmra.mxu2 %vm1434_vm1, %v3550_v61  ;;  %v14310_v61 = vld [vmem:[#allocation91_spill] sm:$0xff] }
 0x358   : > { %5314 = vrot.lane.b32.xlu2 %v14309_v29, %s9244_s22  ;;  %5282 = vrot.lane.b32.xlu1 %v9631_v52, %s9244_s22  ;;  %v4008_v52 = vmul.f32 %v10960_v13, %v14312_v18 }
 0x359   : > { %v3200_v27 = vpop.f32.mrf.mxu1  ;;  %8182 = vmatmul.msk.f32.gmra.mxu3 %vm1434_vm1, %v4007_v30  ;;  %v11367_v63 = vpop.f32.mrf.mxu0  ;;  %5316 = vrot.lane.b32.xlu0 %v14310_v61, %s9244_s22 }
 0x35a   : > { %14308 = vst [vmem:[#allocation244_spill] sm:$0xff] %v11367_v63  ;;  %v3296_v0 = vadd.f32 %v3200_v27, %v2826_v32  ;;  %v14311_v27 = vld [vmem:[#allocation115_spill] sm:$0xff]  ;;  %v4477_v63 = vmul.f32 %v10958_v9, %v14243_v62  ;;  %v11418_v9 = vpop.f32.mrf.mxu2 }
 0x35b   : > { %v11380_v32 = vpop.permute.xlu1 %4443  ;;  %v2292_v21 = vadd.f32 %v14311_v27, %v1761_v4  ;;  %v11385_v30 = vpop.permute.xlu0 %3978  ;;  %v5765_v4 = vld [vmem:[%s13623_s11] sm:$0xff] }
 0x35c   : > { %8118 = vmatmul.msk.f32.gmra.mxu1 %vm1434_vm1, %v3067_v57  ;;  %v3766_v35 = vadd.f32 %v11179_v8, %v3296_v0  ;;  %v4140_v10 = vpop.f32.mrf.mxu3  ;;  %8213 = vmatmul.msk.f32.gmra.mxu0 %vm1434_vm1, %v4476_v6  ;;  %v5767_v8 = vld [vmem:[%s13623_s11 + $0x10] sm:$0xff]  ;;  %v5766_v57 = vld [vmem:[%s13623_s11 + $0x8] sm:$0xff] }
 0x35d   : > { %v2827_v14 = vadd.f32 %v14313_v45, %v2292_v21  ;;  %v14314_v6 = vld [vmem:[#allocation104_spill] sm:$0xff] }
 0x35e   : > { %v11383_v3 = vadd.f32 %v4140_v10, %v3766_v35  ;;  %v3068_v13 = vmul.f32 %v14314_v6, %v14291_v26  ;;  %v14315_v35 = vld [vmem:[#allocation121_spill] sm:$0xff]  ;;  %v14316_v10 = vld [vmem:[#allocation112_spill] sm:$0xff] }
 0x35f   : > { %v1764_v27 = vadd.f32 %v14316_v10, %v14315_v35  ;;  %v14317_v6 = vld [vmem:[#allocation53_spill] sm:$0xff]  ;;  %v14318_v10 = vld [vmem:[#allocation211_spill] sm:$0xff] }
 0x360   : > { %5785 = vperm.xlu2 %8731, %v5767_v8   ;;  %5780 = vperm.xlu1 %8730, %v5766_v57   ;;  %v4009_v62 = vmul.f32 %v10979_v7, %v14318_v10  ;;  %v14319_v8 = vld [vmem:[#allocation147_spill] sm:$0xff] }
 0x361   : > { %v3203_v0 = vpop.f32.mrf.mxu1  ;;  %8183 = vmatmul.msk.f32.gmra.mxu3 %vm1434_vm1, %v4008_v52  ;;  %v11404_v45 = vpop.f32.mrf.mxu0  ;;  %5775 = vperm.xlu0 %8729, %v5765_v4   ;;  %v2293_v35 = vadd.f32 %v14317_v6, %v1764_v27  ;;  %v14320_v4 = vld [vmem:[#allocation198_spill] sm:$0xff]  ;;  %v14321_v27 = vld [vmem:[#allocation109_spill] sm:$0xff]  ;;  %v14323_v6 = vld [vmem:[#allocation120_spill] sm:$0xff] }
 0x362   : > { %v3297_v21 = vadd.f32 %v3203_v0, %v2827_v14  ;;  %v5768_v7 = vld [vmem:[%s13623_s11 + $0x18] sm:$0xff] }
 0x363   : > { %v11411_v26 = vpop.permute.xlu1 %3983  ;;  %v3514_v0 = vpop.permute.xlu0 %3513 }
 0x364   : > { %8119 = vmatmul.msk.f32.gmra.mxu1 %vm1434_vm1, %v3068_v13  ;;  %v3767_v52 = vadd.f32 %v11212_v24, %v3297_v21  ;;  %v4143_v31 = vpop.f32.mrf.mxu3  ;;  %8214 = vmatmul.msk.f32.gmra.mxu0 %vm1434_vm1, %v4477_v63  ;;  %v3551_v57 = vmul.f32 %v3514_v0, %v14319_v8  ;;  %v2828_v13 = vadd.f32 %v14320_v4, %v2293_v35  ;;  %v5770_v24 = vld [vmem:[%s13623_s11 + $0x28] sm:$0xff]  ;;  %v5769_v63 = vld [vmem:[%s13623_s11 + $0x20] sm:$0xff] }
 0x365   : > { %v3069_v21 = vmul.f32 %v14321_v27, %v14302_v12  ;;  %v4478_v8 = vmul.f32 %v10890_v19, %v14309_v29  ;;  %v14324_v27 = vld [vmem:[#allocation52_spill] sm:$0xff] }
 0x366   : > { %v11414_v14 = vadd.f32 %v4143_v31, %v3767_v52  ;;  %8164 = vmatmul.msk.f32.gmra.mxu2 %vm1434_vm1, %v3551_v57  ;;  %v14322_v52 = vld [vmem:[#allocation196_spill] sm:$0xff] }
 0x367   : > { %v1767_v35 = vadd.f32 %v14323_v6, %v14322_v52  ;;  %v14326_v6 = vld [vmem:[#allocation214_spill] sm:$0xff]  ;;  %v14327_v29 = vld [vmem:[#allocation204_spill] sm:$0xff] }
 0x368   : > { %5800 = vperm.xlu2 %8731, %v5770_v24   ;;  %5795 = vperm.xlu1 %8730, %v5769_v63   ;;  %v4010_v19 = vmul.f32 %v10924_v22, %v14326_v6  ;;  %v8292_v63 = vld [vmem:[%s13623_s11 + $0x40] sm:$0xff]  ;;  %v5771_v22 = vld [vmem:[%s13623_s11 + $0x30] sm:$0xff] }
 0x369   : > { %v3206_v31 = vpop.f32.mrf.mxu1  ;;  %8184 = vmatmul.msk.f32.gmra.mxu3 %vm1434_vm1, %v4009_v62  ;;  %v11437_v4 = vpop.f32.mrf.mxu0  ;;  %5790 = vperm.xlu0 %8729, %v5768_v7   ;;  %v2294_v34 = vadd.f32 %v14324_v27, %v1767_v35  ;;  %v14329_v35 = vld [vmem:[#allocation202_spill] sm:$0xff]  ;;  %v4479_v27 = vmul.f32 %v11025_v17, %v14310_v61 }
 0x36a   : > { %v3298_v0 = vadd.f32 %v3206_v31, %v2828_v13  ;;  %v14325_v13 = vld [vmem:[#allocation150_spill] sm:$0xff] }
 0x36b   : > { %v3519_v12 = vpop.permute.xlu1 %3518  ;;  %v2829_v24 = vadd.f32 %v14327_v29, %v2294_v34  ;;  %v14328_v34 = vld [vmem:[#allocation114_spill] sm:$0xff] }
 0x36c   : > { %8120 = vmatmul.msk.f32.gmra.mxu1 %vm1434_vm1, %v3069_v21  ;;  %v3768_v62 = vadd.f32 %v11243_v41, %v3298_v0  ;;  %v4146_v57 = vpop.f32.mrf.mxu3  ;;  %8215 = vmatmul.msk.f32.gmra.mxu0 %vm1434_vm1, %v4478_v8  ;;  %v3552_v31 = vmul.f32 %v3519_v12, %v14325_v13  ;;  %v5772_v41 = vld [vmem:[%s13623_s11 + $0x38] sm:$0xff]  ;;  %v11457_v8 = vpop.f32.mrf.mxu2  ;;  %v3070_v21 = vmul.f32 %v14328_v34, %v14312_v18  ;;  %v14331_v18 = vld [vmem:[#allocation44_spill] sm:$0xff]  ;;  %v14435_v13 = vld [vmem:[#allocation189_spill] sm:$0xff] }
 0x36d   : > { %v14330_v0 = vld [vmem:[#allocation126_spill] sm:$0xff] }
 0x36e   : > { %v11445_v52 = vadd.f32 %v4146_v57, %v3768_v62  ;;  %8165 = vmatmul.msk.f32.gmra.mxu2 %vm1434_vm1, %v3552_v31  ;;  %v1770_v62 = vadd.f32 %v14330_v0, %v14329_v35  ;;  %v14333_v35 = vld [vmem:[#allocation208_spill] sm:$0xff]  ;;  %v8295_v17 = vld [vmem:[%s13623_s11 + $0x58] sm:$0xff] }
 0x370   : > { %5969 = vperm.xlu2 %8731, %v8292_v63   ;;  %5810 = vperm.xlu1 %8730, %v5772_v41   ;;  %v2295_v29 = vadd.f32 %v14331_v18, %v1770_v62  ;;  %v8293_v63 = vld [vmem:[%s13623_s11 + $0x48] sm:$0xff]  ;;  %v14334_v41 = vld [vmem:[#allocation118_spill] sm:$0xff] }
 0x371   : > { %v3209_v7 = vpop.f32.mrf.mxu1  ;;  %8185 = vmatmul.msk.f32.gmra.mxu3 %vm1434_vm1, %v4010_v19  ;;  %v11468_v12 = vpop.f32.mrf.mxu0  ;;  %5805 = vperm.xlu0 %8729, %v5771_v22   ;;  %v14335_v22 = vld [vmem:[#allocation135_spill] sm:$0xff] }
 0x372   : > { %v3299_v57 = vadd.f32 %v3209_v7, %v2829_v24  ;;  %v14332_v24 = vld [vmem:[#allocation220_spill] sm:$0xff]  ;;  %v2830_v0 = vadd.f32 %v14333_v35, %v2295_v29  ;;  %v14338_v35 = vld [vmem:[#allocation225_spill] sm:$0xff] }
 0x373   : > { %v4011_v7 = vmul.f32 %v11051_v40, %v14332_v24  ;;  %v3071_v40 = vmul.f32 %v14334_v41, %v14318_v10  ;;  %v14337_v10 = vld [vmem:[#allocation134_spill] sm:$0xff] }
 0x374   : > { %8121 = vmatmul.msk.f32.gmra.mxu1 %vm1434_vm1, %v3070_v21  ;;  %v3769_v31 = vadd.f32 %v11291_v56, %v3299_v57  ;;  %v4149_v19 = vpop.f32.mrf.mxu3  ;;  %8216 = vmatmul.msk.f32.gmra.mxu0 %vm1434_vm1, %v4479_v27  ;;  %v8294_v56 = vld [vmem:[%s13623_s11 + $0x50] sm:$0xff]  ;;  %v14336_v21 = vld [vmem:[#allocation131_spill] sm:$0xff] }
 0x375   : > { %v1773_v62 = vadd.f32 %v14336_v21, %v14335_v22 }
 0x376   : > { %v11476_v34 = vadd.f32 %v4149_v19, %v3769_v31  ;;  %v4480_v31 = vmul.f32 %v11049_v50, %v14298_v38  ;;  %v8298_v50 = vld [vmem:[%s13623_s11 + $0x70] sm:$0xff] }
 0x377   : > { %v2296_v29 = vadd.f32 %v14337_v10, %v1773_v62 }
 0x378   : > { %5984 = vperm.xlu2 %8731, %v8295_v17   ;;  %5979 = vperm.xlu1 %8730, %v8294_v56   ;;  %v8296_v17 = vld [vmem:[%s13623_s11 + $0x60] sm:$0xff] }
 0x379   : > { %v3212_v61 = vpop.f32.mrf.mxu1  ;;  %8186 = vmatmul.msk.f32.gmra.mxu3 %vm1434_vm1, %v4011_v7  ;;  %v11495_v27 = vpop.f32.mrf.mxu0  ;;  %5974 = vperm.xlu0 %8729, %v8293_v63   ;;  %v14340_v56 = vld [vmem:[#allocation123_spill] sm:$0xff]  ;;  %v14341_v63 = vld [vmem:[#allocation141_spill] sm:$0xff] }
 0x37a   : > { %v3300_v57 = vadd.f32 %v3212_v61, %v2830_v0  ;;  %v4012_v0 = vmul.f32 %v11070_v37, %v14338_v35  ;;  %v14339_v61 = vld [vmem:[#allocation213_spill] sm:$0xff]  ;;  %v3072_v37 = vmul.f32 %v14340_v56, %v14326_v6  ;;  %v14343_v6 = vld [vmem:[#allocation56_spill] sm:$0xff] }
 0x37b   : > { %v2831_v41 = vadd.f32 %v14339_v61, %v2296_v29  ;;  %v14344_v29 = vld [vmem:[#allocation230_spill] sm:$0xff]  ;;  %v14348_v56 = vld [vmem:[#allocation145_spill] sm:$0xff] }
 0x37c   : > { %8122 = vmatmul.msk.f32.gmra.mxu1 %vm1434_vm1, %v3071_v40  ;;  %v3770_v19 = vadd.f32 %v11326_v49, %v3300_v57  ;;  %v4152_v18 = vpop.f32.mrf.mxu3  ;;  %8217 = vmatmul.msk.f32.gmra.mxu0 %vm1434_vm1, %v4480_v31  ;;  %v8297_v49 = vld [vmem:[%s13623_s11 + $0x68] sm:$0xff]  ;;  %v4481_v57 = vmul.f32 %v11007_v48, %v14287_v55  ;;  %v14345_v61 = vld [vmem:[#allocation218_spill] sm:$0xff]  ;;  %v11535_v48 = vpop.f32.mrf.mxu2  ;;  %v8336_v55 = vld [vmem:[%s13623_s11 + $0xc0] sm:$0xff] }
 0x37d   : > { %v14342_v40 = vld [vmem:[#allocation137_spill] sm:$0xff] }
 0x37e   : > { %v11503_v7 = vadd.f32 %v4152_v18, %v3770_v19  ;;  %v1776_v22 = vadd.f32 %v14342_v40, %v14341_v63 }
 0x380   : > { %5999 = vperm.xlu2 %8731, %v8298_v50   ;;  %5994 = vperm.xlu1 %8730, %v8297_v49   ;;  %v2297_v18 = vadd.f32 %v14343_v6, %v1776_v22  ;;  %v8299_v49 = vld [vmem:[%s13623_s11 + $0x78] sm:$0xff]  ;;  %v4482_v22 = vmul.f32 %v11124_v28, %v14288_v25  ;;  %v8316_v25 = vld [vmem:[%s13623_s11 + $0x90] sm:$0xff] }
 0x381   : > { %v3215_v38 = vpop.f32.mrf.mxu1  ;;  %8187 = vmatmul.msk.f32.gmra.mxu3 %vm1434_vm1, %v4012_v0  ;;  %v11522_v62 = vpop.f32.mrf.mxu0  ;;  %5989 = vperm.xlu0 %8729, %v8296_v17   ;;  %v4013_v0 = vmul.f32 %v11039_v23, %v14344_v29  ;;  %v14346_v23 = vld [vmem:[#allocation128_spill] sm:$0xff]  ;;  %v14350_v6 = vld [vmem:[#allocation235_spill] sm:$0xff] }
 0x382   : > { %v3301_v21 = vadd.f32 %v3215_v38, %v2831_v41  ;;  %v2832_v41 = vadd.f32 %v14345_v61, %v2297_v18  ;;  %v3073_v38 = vmul.f32 %v14346_v23, %v14332_v24  ;;  %v14347_v17 = vld [vmem:[#allocation216_spill] sm:$0xff]  ;;  %v14349_v24 = vld [vmem:[#allocation45_spill] sm:$0xff]  ;;  %v4014_v18 = vmul.f32 %v11155_v58, %v14350_v6 }
 0x383   : > { %v14352_v58 = vld [vmem:[#allocation133_spill] sm:$0xff]  ;;  %v4483_v23 = vmul.f32 %v11153_v36, %v14111_v54  ;;  %v8317_v54 = vld [vmem:[%s13623_s11 + $0x98] sm:$0xff] }
 0x384   : > { %8123 = vmatmul.msk.f32.gmra.mxu1 %vm1434_vm1, %v3072_v37  ;;  %v3771_v31 = vadd.f32 %v11359_v11, %v3301_v21  ;;  %v4155_v19 = vpop.f32.mrf.mxu3  ;;  %8218 = vmatmul.msk.f32.gmra.mxu0 %vm1434_vm1, %v4481_v57  ;;  %v8314_v11 = vld [vmem:[%s13623_s11 + $0x80] sm:$0xff]  ;;  %v1779_v37 = vadd.f32 %v14348_v56, %v14347_v17  ;;  %v11564_v28 = vpop.f32.mrf.mxu2 }
 0x386   : > { %v11530_v10 = vadd.f32 %v4155_v19, %v3771_v31  ;;  %v2298_v31 = vadd.f32 %v14349_v24, %v1779_v37  ;;  %v14353_v37 = vld [vmem:[#allocation241_spill] sm:$0xff] }
 0x388   : > { %6259 = vperm.xlu2 %8731, %v8336_v55   ;;  %6122 = vperm.xlu1 %8730, %v8314_v11   ;;  %v8315_v55 = vld [vmem:[%s13623_s11 + $0x88] sm:$0xff]  ;;  %v3074_v11 = vmul.f32 %v14352_v58, %v14338_v35  ;;  %v14354_v35 = vld [vmem:[#allocation87_spill] sm:$0xff] }
 0x389   : > { %v3218_v50 = vpop.f32.mrf.mxu1  ;;  %8188 = vmatmul.msk.f32.gmra.mxu3 %vm1434_vm1, %v4013_v0  ;;  %v11551_v40 = vpop.f32.mrf.mxu0  ;;  %6004 = vperm.xlu0 %8729, %v8299_v49   ;;  %v14351_v0 = vld [vmem:[#allocation223_spill] sm:$0xff] }
 0x38a   : > { %v3302_v63 = vadd.f32 %v3218_v50, %v2832_v41  ;;  %v2833_v61 = vadd.f32 %v14351_v0, %v2298_v31 }
 0x38c   : > { %8124 = vmatmul.msk.f32.gmra.mxu1 %vm1434_vm1, %v3073_v38  ;;  %v3772_v21 = vadd.f32 %v11418_v9, %v3302_v63  ;;  %v4158_v57 = vpop.f32.mrf.mxu3  ;;  %8219 = vmatmul.msk.f32.gmra.mxu0 %vm1434_vm1, %v4482_v22  ;;  %v8337_v9 = vld [vmem:[%s13623_s11 + $0xc8] sm:$0xff]  ;;  %v4015_v63 = vmul.f32 %v14354_v35, %v14353_v37  ;;  %v8339_v22 = vld [vmem:[%s13623_s11 + $0xd8] sm:$0xff]  ;;  %v11603_v24 = vpop.f32.mrf.mxu2 }
 0x38e   : > { %v11559_v19 = vadd.f32 %v4158_v57, %v3772_v21  ;;  %v14355_v21 = vld [vmem:[#allocation139_spill] sm:$0xff] }
 0x38f   : > { %v3075_v57 = vmul.f32 %v14355_v21, %v14344_v29  ;;  %v14361_v21 = vld [vmem:[#allocation148_spill] sm:$0xff] }
 0x390   : > { %6132 = vperm.xlu2 %8731, %v8316_v25   ;;  %6264 = vperm.xlu1 %8730, %v8337_v9   ;;  %v4966_v25 = vld [vmem:[#allocation7 + $0xd0] sm:$0xff]  ;;  %v14357_v9 = vld [vmem:[#allocation245_spill] sm:$0xff] }
 0x391   : > { %v3221_v41 = vpop.f32.mrf.mxu1  ;;  %8189 = vmatmul.msk.f32.gmra.mxu3 %vm1434_vm1, %v4014_v18  ;;  %v11578_v49 = vpop.f32.mrf.mxu0  ;;  %6127 = vperm.xlu0 %8729, %v8315_v55   ;;  %v14356_v18 = vld [vmem:[#allocation66_spill] sm:$0xff]  ;;  %v8319_v55 = vld [vmem:[%s13623_s11 + $0xa8] sm:$0xff] }
 0x392   : > { %v3303_v50 = vadd.f32 %v3221_v41, %v2833_v61  ;;  %v4484_v0 = vmul.f32 %v14356_v18, %v14120_v51  ;;  %v14358_v41 = vld [vmem:[#allocation80_spill] sm:$0xff]  ;;  %5076 = vmatpush.msra.mxu1 %v4966_v25  ;;  %v4486_v18 = vmul.f32 %v11265_v43, %v14139_v53  ;;  %v8343_v53 = vld [vmem:[%s13623_s11 + $0xf8] sm:$0xff] }
 0x393   : > { %v4016_v29 = vmul.f32 %v14358_v41, %v14357_v9  ;;  %v8340_v51 = vld [vmem:[%s13623_s11 + $0xe0] sm:$0xff] }
 0x394   : > { %8125 = vmatmul.msk.f32.gmra.mxu1 %vm1434_vm1, %v3074_v11  ;;  %v3773_v38 = vadd.f32 %v11457_v8, %v3303_v50  ;;  %v4161_v17 = vpop.f32.mrf.mxu3  ;;  %8220 = vmatmul.msk.f32.gmra.mxu0 %vm1434_vm1, %v4483_v23  ;;  %v8338_v8 = vld [vmem:[%s13623_s11 + $0xd0] sm:$0xff]  ;;  %v8318_v11 = vld [vmem:[%s13623_s11 + $0xa0] sm:$0xff]  ;;  %v11633_v35 = vpop.f32.mrf.mxu2 }
 0x395   : > { %v14359_v50 = vld [vmem:[#allocation144_spill] sm:$0xff] }
 0x396   : > { %v11585_v56 = vadd.f32 %v4161_v17, %v3773_v38  ;;  %v3076_v23 = vmul.f32 %v14359_v50, %v14350_v6  ;;  %v4485_v17 = vmul.f32 %v11238_v33, %v14130_v46  ;;  %v8342_v6 = vld [vmem:[%s13623_s11 + $0xf0] sm:$0xff]  ;;  %v14362_v41 = vld [vmem:[#allocation252_spill] sm:$0xff]  ;;  %v4487_v50 = vmul.f32 %v11271_v59, %v14146_v20 }
 0x397   : > { %v8320_v46 = vld [vmem:[%s13623_s11 + $0xb0] sm:$0xff]  ;;  %v8380_v20 = vld [vmem:[%s13623_s11 + $0x140] sm:$0xff] }
 0x398   : > { %6274 = vperm.xlu2 %8731, %v8339_v22   ;;  %6137 = vperm.xlu1 %8730, %v8317_v54   ;;  %v14360_v22 = vld [vmem:[#allocation249_spill] sm:$0xff]  ;;  %v8424_v59 = vld [vmem:[%s13623_s11 + $0x1c0] sm:$0xff] }
 0x399   : > { %v11595_v36 = vpop.f32.mrf.mxu1  ;;  %8190 = vmatmul.msk.f32.gmra.mxu3 %vm1434_vm1, %v4015_v63  ;;  %v11605_v31 = vpop.f32.mrf.mxu0  ;;  %6269 = vperm.xlu0 %8729, %v8338_v8   ;;  %v4017_v54 = vmul.f32 %v11267_v60, %v14360_v22  ;;  %v8341_v8 = vld [vmem:[%s13623_s11 + $0xe8] sm:$0xff] }
 0x39c   : > { %8126 = vmatmul.msk.f32.gmra.mxu1 %vm1434_vm1, %v3075_v57  ;;  %v11610_v61 = vpop.f32.mrf.mxu3  ;;  %8221 = vmatmul.msk.f32.gmra.mxu0 %vm1434_vm1, %v4484_v0  ;;  %v3077_v57 = vmul.f32 %v14361_v21, %v14353_v37  ;;  %v11659_v0 = vpop.f32.mrf.mxu2  ;;  %v8402_v37 = vld [vmem:[%s13623_s11 + $0x180] sm:$0xff]  ;;  %v4965_v21 = vld [vmem:[#allocation7 + $0xc8] sm:$0xff] }
 0x39d   : > { %5077 = vmatpush.msra.mxu1 %v4965_v21 }
 0x3a0   : > { %6147 = vperm.xlu2 %8731, %v8319_v55   ;;  %6279 = vperm.xlu1 %8730, %v8340_v51   ;;  %v8321_v55 = vld [vmem:[%s13623_s11 + $0xb8] sm:$0xff] }
 0x3a1   : > { %v11621_v58 = vpop.f32.mrf.mxu1  ;;  %8191 = vmatmul.msk.f32.gmra.mxu3 %vm1434_vm1, %v4016_v29  ;;  %v11629_v38 = vpop.f32.mrf.mxu0  ;;  %6142 = vperm.xlu0 %8729, %v8318_v11   ;;  %v4018_v29 = vmul.f32 %v11294_v5, %v14362_v41  ;;  %v14363_v51 = vld [vmem:[#allocation151_spill] sm:$0xff] }
 0x3a2   : > { %v3078_v11 = vmul.f32 %v14363_v51, %v14357_v9  ;;  %v11693_v9 = vpop.permute.xlu2 %4913 }
 0x3a4   : > { %8127 = vmatmul.msk.f32.gmra.mxu1 %vm1434_vm1, %v3076_v23  ;;  %v11636_v63 = vpop.f32.mrf.mxu3  ;;  %8222 = vmatmul.msk.f32.gmra.mxu0 %vm1434_vm1, %v4485_v17  ;;  %v11689_v17 = vpop.f32.mrf.mxu2 }
 0x3a5   : > { %14364 = vst [vmem:[#allocation98_spill] sm:$0xff] %v11689_v17 }
 0x3a8   : > { %6289 = vperm.xlu2 %8731, %v8342_v6   ;;  %6152 = vperm.xlu1 %8730, %v8320_v46  }
 0x3a9   : > { %v11647_v33 = vpop.f32.mrf.mxu1  ;;  %8192 = vmatmul.msk.f32.gmra.mxu3 %vm1434_vm1, %v4017_v54  ;;  %v11655_v60 = vpop.f32.mrf.mxu0  ;;  %6284 = vperm.xlu0 %8729, %v8341_v8   ;;  %v14365_v54 = vld [vmem:[#allocation142_spill] sm:$0xff]  ;;  %v8358_v8 = vld [vmem:[%s13623_s11 + $0x100] sm:$0xff] }
 0x3aa   : > { %v4019_v6 = vmul.f32 %v11305_v44, %v14365_v54  ;;  %v14366_v44 = vld [vmem:[#allocation154_spill] sm:$0xff] }
 0x3ac   : > { %8128 = vmatmul.msk.f32.gmra.mxu1 %vm1434_vm1, %v3077_v57  ;;  %v11662_v25 = vpop.f32.mrf.mxu3  ;;  %8223 = vmatmul.msk.f32.gmra.mxu0 %vm1434_vm1, %v4486_v18  ;;  %v3079_v57 = vmul.f32 %v14366_v44, %v14360_v22  ;;  %v11719_v51 = vpop.f32.mrf.mxu2 }
 0x3ad   : > { %14368 = vst [vmem:[#allocation103_spill] sm:$0xff] %v11719_v51 }
 0x3b0   : > { %6670 = vperm.xlu2 %8731, %v8402_v37   ;;  %6294 = vperm.xlu1 %8730, %v8343_v53   ;;  %v4964_v37 = vld [vmem:[#allocation7 + $0xc0] sm:$0xff] }
 0x3b1   : > { %v11673_v43 = vpop.f32.mrf.mxu1  ;;  %8193 = vmatmul.msk.f32.gmra.mxu3 %vm1434_vm1, %v4018_v29  ;;  %v11681_v5 = vpop.f32.mrf.mxu0  ;;  %6157 = vperm.xlu0 %8729, %v8321_v55   ;;  %v4488_v29 = vmul.f32 %v11353_v15, %v14155_v1  ;;  %v14367_v55 = vld [vmem:[#allocation146_spill] sm:$0xff]  ;;  %v8425_v1 = vld [vmem:[%s13623_s11 + $0x1c8] sm:$0xff] }
 0x3b2   : > { %5078 = vmatpush.msra.mxu1 %v4964_v37  ;;  %v4020_v22 = vmul.f32 %v11385_v30, %v14367_v55  ;;  %v8359_v15 = vld [vmem:[%s13623_s11 + $0x108] sm:$0xff] }
 0x3b3   : > { %v14369_v30 = vld [vmem:[#allocation156_spill] sm:$0xff] }
 0x3b4   : > { %8129 = vmatmul.msk.f32.gmra.mxu1 %vm1434_vm1, %v3078_v11  ;;  %v11686_v23 = vpop.f32.mrf.mxu3  ;;  %8224 = vmatmul.msk.f32.gmra.mxu0 %vm1434_vm1, %v4487_v50  ;;  %v8403_v50 = vld [vmem:[%s13623_s11 + $0x188] sm:$0xff]  ;;  %v11747_v37 = vpop.f32.mrf.mxu2 }
 0x3b5   : > { %14374 = vst [vmem:[#allocation183_spill] sm:$0xff] %v11747_v37 }
 0x3b8   : > { %6533 = vperm.xlu2 %8731, %v8380_v20   ;;  %6807 = vperm.xlu1 %8730, %v8424_v59   ;;  %v4449_v20 = vpop.permute.xlu2 %4448 }
 0x3b9   : > { %v11701_v46 = vpop.f32.mrf.mxu1  ;;  %8194 = vmatmul.msk.f32.gmra.mxu3 %vm1434_vm1, %v4019_v6  ;;  %v11709_v18 = vpop.f32.mrf.mxu0  ;;  %6396 = vperm.xlu0 %8729, %v8358_v8   ;;  %v3080_v6 = vmul.f32 %v14369_v30, %v14362_v41  ;;  %v14370_v8 = vld [vmem:[#allocation138_spill] sm:$0xff] }
 0x3ba   : > { %v4489_v21 = vmul.f32 %v11380_v32, %v14370_v8  ;;  %v8360_v32 = vld [vmem:[%s13623_s11 + $0x110] sm:$0xff] }
 0x3bc   : > { %8130 = vmatmul.msk.f32.gmra.mxu1 %vm1434_vm1, %v3079_v57  ;;  %v11714_v53 = vpop.f32.mrf.mxu3  ;;  %8225 = vmatmul.msk.f32.gmra.mxu0 %vm1434_vm1, %v4488_v29  ;;  %v11743_v57 = vpop.permute.xlu0 %4918  ;;  %v14373_v29 = vld [vmem:[#allocation149_spill] sm:$0xff] }
 0x3bd   : > { %14372 = vst [vmem:[#allocation95_spill] sm:$0xff] %v11743_v57  ;;  %v4021_v41 = vmul.f32 %v11411_v26, %v14373_v29  ;;  %v14376_v26 = vld [vmem:[#allocation158_spill] sm:$0xff]  ;;  %v14434_v57 = vld [vmem:[#allocation177_spill] sm:$0xff] }
 0x3c0   : > { %6812 = vperm.xlu2 %8731, %v8425_v1   ;;  %6401 = vperm.xlu1 %8730, %v8359_v15   ;;  %v8381_v15 = vld [vmem:[%s13623_s11 + $0x148] sm:$0xff] }
 0x3c1   : > { %v11727_v11 = vpop.f32.mrf.mxu1  ;;  %8195 = vmatmul.msk.f32.gmra.mxu3 %vm1434_vm1, %v4020_v22  ;;  %v11735_v59 = vpop.f32.mrf.mxu0  ;;  %6675 = vperm.xlu0 %8729, %v8403_v50   ;;  %v8404_v22 = vld [vmem:[%s13623_s11 + $0x190] sm:$0xff]  ;;  %v3081_v50 = vmul.f32 %v14376_v26, %v14365_v54  ;;  %v8405_v54 = vld [vmem:[%s13623_s11 + $0x198] sm:$0xff] }
 0x3c4   : > { %8131 = vmatmul.msk.f32.gmra.mxu1 %vm1434_vm1, %v3080_v6  ;;  %v11740_v44 = vpop.f32.mrf.mxu3  ;;  %8226 = vmatmul.msk.f32.gmra.mxu0 %vm1434_vm1, %v4489_v21  ;;  %v14378_v6 = vld [vmem:[#allocation143_spill] sm:$0xff]  ;;  %v3989_v21 = vpop.permute.xlu2 %3988 }
 0x3c5   : > { %14371 = vst [vmem:[#allocation195_spill] sm:$0xff] %v11740_v44  ;;  %v4490_v8 = vmul.f32 %v4449_v20, %v14378_v6  ;;  %v4454_v51 = vpop.permute.xlu0 %4453  ;;  %v8382_v20 = vld [vmem:[%s13623_s11 + $0x150] sm:$0xff] }
 0x3c8   : > { %6406 = vperm.xlu2 %8731, %v8360_v32   ;;  %6680 = vperm.xlu1 %8730, %v8404_v22   ;;  %v8426_v22 = vld [vmem:[%s13623_s11 + $0x1d0] sm:$0xff] }
 0x3c9   : > { %v11755_v1 = vpop.f32.mrf.mxu1  ;;  %8196 = vmatmul.msk.f32.gmra.mxu3 %vm1434_vm1, %v4021_v41  ;;  %v11763_v30 = vpop.f32.mrf.mxu0  ;;  %6538 = vperm.xlu0 %8729, %v8381_v15   ;;  %v14380_v41 = vld [vmem:[#allocation152_spill] sm:$0xff]  ;;  %v14382_v15 = vld [vmem:[#allocation170_spill] sm:$0xff] }
 0x3ca   : > { %14375 = vst [vmem:[#allocation102_spill] sm:$0xff] %v11755_v1  ;;  %v4022_v37 = vmul.f32 %v3989_v21, %v14380_v41  ;;  %v3082_v26 = vmul.f32 %v14382_v15, %v14367_v55  ;;  %v8383_v55 = vld [vmem:[%s13623_s11 + $0x158] sm:$0xff] }
 0x3cb   : > { %14377 = vst [vmem:[#allocation233_spill] sm:$0xff] %v11763_v30  ;;  %v8427_v15 = vld [vmem:[%s13623_s11 + $0x1d8] sm:$0xff]  ;;  %v14437_v30 = vld [vmem:[#allocation253_spill] sm:$0xff] }
 0x3cc   : > { %8132 = vmatmul.msk.f32.gmra.mxu1 %vm1434_vm1, %v3081_v50  ;;  %v11767_v29 = vpop.f32.mrf.mxu3  ;;  %8227 = vmatmul.msk.f32.gmra.mxu0 %vm1434_vm1, %v4490_v8  ;;  %v11785_v50 = vpop.f32.mrf.mxu2  ;;  %v14385_v8 = vld [vmem:[#allocation41_spill] sm:$0xff] }
 0x3cd   : > { %14379 = vst [vmem:[#allocation94_spill] sm:$0xff] %v11767_v29  ;;  %v4491_v21 = vmul.f32 %v4454_v51, %v14385_v8  ;;  %v8361_v51 = vld [vmem:[%s13623_s11 + $0x118] sm:$0xff] }
 0x3ce   : > { %14383 = vst [vmem:[#allocation201_spill] sm:$0xff] %v11785_v50  ;;  %v14391_v8 = vld [vmem:[#allocation43_spill] sm:$0xff] }
 0x3d0   : > { %6685 = vperm.xlu2 %8731, %v8405_v54   ;;  %6543 = vperm.xlu1 %8730, %v8382_v20   ;;  %v14388_v54 = vld [vmem:[#allocation157_spill] sm:$0xff]  ;;  %v14389_v20 = vld [vmem:[#allocation174_spill] sm:$0xff] }
 0x3d1   : > { %v11777_v32 = vpop.f32.mrf.mxu1  ;;  %8197 = vmatmul.msk.f32.gmra.mxu3 %vm1434_vm1, %v4022_v37  ;;  %v11787_v6 = vpop.f32.mrf.mxu0  ;;  %6817 = vperm.xlu0 %8729, %v8426_v22   ;;  %v4931_v22 = vmul.f32 %v14389_v20, %v14388_v54  ;;  %v8362_v54 = vld [vmem:[%s13623_s11 + $0x120] sm:$0xff] }
 0x3d2   : > { %14381 = vst [vmem:[#allocation48_spill] sm:$0xff] %v11777_v32  ;;  %v4459_v37 = vpop.permute.xlu2 %4458 }
 0x3d3   : > { %14384 = vst [vmem:[#allocation239_spill] sm:$0xff] %v11787_v6 }
 0x3d4   : > { %8133 = vmatmul.msk.f32.gmra.mxu1 %vm1434_vm1, %v3082_v26  ;;  %v11791_v41 = vpop.f32.mrf.mxu3  ;;  %8228 = vmatmul.msk.f32.gmra.mxu0 %vm1434_vm1, %v4491_v21  ;;  %v4492_v21 = vmul.f32 %v4459_v37, %v14391_v8 }
 0x3d5   : > { %14386 = vst [vmem:[#allocation188_spill] sm:$0xff] %v11791_v41  ;;  %v11810_v41 = vpop.f32.mrf.mxu2 }
 0x3d6   : > { %14392 = vst [vmem:[#allocation107_spill] sm:$0xff] %v11810_v41  ;;  %v8363_v41 = vld [vmem:[%s13623_s11 + $0x128] sm:$0xff] }
 0x3d8   : > { %6548 = vperm.xlu2 %8731, %v8383_v55   ;;  %6822 = vperm.xlu1 %8730, %v8427_v15   ;;  %v8406_v55 = vld [vmem:[%s13623_s11 + $0x1a0] sm:$0xff] }
 0x3d9   : > { %v11800_v50 = vpop.f32.mrf.mxu1  ;;  %v11807_v26 = vpop.f32.mrf.mxu0  ;;  %6411 = vperm.xlu0 %8729, %v8361_v51   ;;  %v14395_v15 = vld [vmem:[#allocation159_spill] sm:$0xff] }
 0x3da   : > { %14387 = vst [vmem:[#allocation99_spill] sm:$0xff] %v11800_v50  ;;  %v8428_v50 = vld [vmem:[%s13623_s11 + $0x1e0] sm:$0xff] }
 0x3db   : > { %14390 = vst [vmem:[#allocation116_spill] sm:$0xff] %v11807_v26  ;;  %v14396_v51 = vld [vmem:[#allocation167_spill] sm:$0xff] }
 0x3dc   : > { %v11812_v6 = vpop.f32.mrf.mxu3  ;;  %8230 = vmatmul.msk.f32.vlgmr.msra.gmra.mxu1 %vm1434_vm1, %v4931_v22  ;;  %8229 = vmatmul.msk.f32.gmra.mxu0 %vm1434_vm1, %v4492_v21  ;;  %v4932_v20 = vmul.f32 %v14396_v51, %v14395_v15  ;;  %v14426_v26 = vld [vmem:[#allocation199_spill] sm:$0xff] }
 0x3dd   : > { %14393 = vst [vmem:[#allocation89_spill] sm:$0xff] %v11812_v6  ;;  %v11831_v8 = vpop.f32.mrf.mxu2  ;;  %v14425_v6 = vld [vmem:[#allocation173_spill] sm:$0xff] }
 0x3de   : > { %14398 = vst [vmem:[#allocation206_spill] sm:$0xff] %v11831_v8 }
 0x3e0   : > { %6827 = vperm.xlu2 %8731, %v8428_v50   ;;  %6416 = vperm.xlu1 %8730, %v8362_v54   ;;  %v8384_v50 = vld [vmem:[%s13623_s11 + $0x160] sm:$0xff]  ;;  %v14401_v54 = vld [vmem:[#allocation161_spill] sm:$0xff] }
 0x3e1   : > { %v11822_v37 = vpop.f32.mrf.mxu1  ;;  %v11829_v22 = vpop.f32.mrf.mxu0  ;;  %6690 = vperm.xlu0 %8729, %v8406_v55   ;;  %v14402_v55 = vld [vmem:[#allocation100_spill] sm:$0xff] }
 0x3e2   : > { %14394 = vst [vmem:[#allocation91_spill] sm:$0xff] %v11822_v37  ;;  %v8407_v37 = vld [vmem:[%s13623_s11 + $0x1a8] sm:$0xff]  ;;  %v4933_v51 = vmul.f32 %v14402_v55, %v14401_v54 }
 0x3e3   : > { %14397 = vst [vmem:[#allocation115_spill] sm:$0xff] %v11829_v22  ;;  %v8385_v22 = vld [vmem:[%s13623_s11 + $0x168] sm:$0xff] }
 0x3e4   : > { %v11833_v21 = vpop.f32.mrf.mxu3  ;;  %8231 = vmatmul.msk.f32.gmra.mxu1 %vm1434_vm1, %v4932_v20 }
 0x3e5   : > { %14399 = vst [vmem:[#allocation193_spill] sm:$0xff] %v11833_v21  ;;  %v11854_v21 = vpop.f32.mrf.mxu2 }
 0x3e6   : > { %14405 = vst [vmem:[#allocation53_spill] sm:$0xff] %v11854_v21 }
 0x3e8   : > { %6421 = vperm.xlu2 %8731, %v8363_v41   ;;  %6695 = vperm.xlu1 %8730, %v8407_v37   ;;  %v8429_v41 = vld [vmem:[%s13623_s11 + $0x1e8] sm:$0xff]  ;;  %v14407_v37 = vld [vmem:[#allocation163_spill] sm:$0xff] }
 0x3e9   : > { %v11842_v15 = vpop.f32.mrf.mxu1  ;;  %v11849_v8 = vpop.f32.mrf.mxu0  ;;  %6553 = vperm.xlu0 %8729, %v8384_v50   ;;  %v14408_v50 = vld [vmem:[#allocation105_spill] sm:$0xff] }
 0x3ea   : > { %14400 = vst [vmem:[#allocation104_spill] sm:$0xff] %v11842_v15  ;;  %v8408_v15 = vld [vmem:[%s13623_s11 + $0x1b0] sm:$0xff]  ;;  %v4934_v55 = vmul.f32 %v14408_v50, %v14407_v37 }
 0x3eb   : > { %14403 = vst [vmem:[#allocation121_spill] sm:$0xff] %v11849_v8  ;;  %v8430_v8 = vld [vmem:[%s13623_s11 + $0x1f0] sm:$0xff] }
 0x3ec   : > { %v11851_v20 = vpop.f32.mrf.mxu3  ;;  %8232 = vmatmul.msk.f32.gmra.mxu1 %vm1434_vm1, %v4933_v51 }
 0x3ed   : > { %14404 = vst [vmem:[#allocation112_spill] sm:$0xff] %v11851_v20  ;;  %v11874_v20 = vpop.f32.mrf.mxu2 }
 0x3ee   : > { %14411 = vst [vmem:[#allocation196_spill] sm:$0xff] %v11874_v20 }
 0x3f0   : > { %6700 = vperm.xlu2 %8731, %v8408_v15   ;;  %6558 = vperm.xlu1 %8730, %v8385_v22   ;;  %v8364_v22 = vld [vmem:[%s13623_s11 + $0x130] sm:$0xff] }
 0x3f1   : > { %v11862_v54 = vpop.f32.mrf.mxu1  ;;  %v11869_v51 = vpop.f32.mrf.mxu0  ;;  %6832 = vperm.xlu0 %8729, %v8429_v41   ;;  %v14413_v15 = vld [vmem:[#allocation165_spill] sm:$0xff]  ;;  %v14414_v41 = vld [vmem:[#allocation96_spill] sm:$0xff] }
 0x3f2   : > { %14406 = vst [vmem:[#allocation211_spill] sm:$0xff] %v11862_v54  ;;  %v8386_v54 = vld [vmem:[%s13623_s11 + $0x170] sm:$0xff]  ;;  %v4935_v50 = vmul.f32 %v14414_v41, %v14413_v15 }
 0x3f3   : > { %14409 = vst [vmem:[#allocation198_spill] sm:$0xff] %v11869_v51  ;;  %v8365_v51 = vld [vmem:[%s13623_s11 + $0x138] sm:$0xff] }
 0x3f4   : > { %v11871_v21 = vpop.f32.mrf.mxu3  ;;  %8233 = vmatmul.msk.f32.gmra.mxu1 %vm1434_vm1, %v4934_v55 }
 0x3f5   : > { %14410 = vst [vmem:[#allocation109_spill] sm:$0xff] %v11871_v21  ;;  %v11894_v21 = vpop.f32.mrf.mxu2 }
 0x3f6   : > { %14417 = vst [vmem:[#allocation204_spill] sm:$0xff] %v11894_v21 }
 0x3f8   : > { %6563 = vperm.xlu2 %8731, %v8386_v54   ;;  %6837 = vperm.xlu1 %8730, %v8430_v8   ;;  %v8409_v8 = vld [vmem:[%s13623_s11 + $0x1b8] sm:$0xff]  ;;  %v14419_v54 = vld [vmem:[#allocation169_spill] sm:$0xff] }
 0x3f9   : > { %v11882_v37 = vpop.f32.mrf.mxu1  ;;  %v11889_v55 = vpop.f32.mrf.mxu0  ;;  %6426 = vperm.xlu0 %8729, %v8364_v22   ;;  %v14420_v22 = vld [vmem:[#allocation194_spill] sm:$0xff] }
 0x3fa   : > { %14412 = vst [vmem:[#allocation120_spill] sm:$0xff] %v11882_v37  ;;  %v8431_v37 = vld [vmem:[%s13623_s11 + $0x1f8] sm:$0xff]  ;;  %v4936_v41 = vmul.f32 %v14420_v22, %v14419_v54  ;;  %v4937_v54 = vmul.f32 %v14426_v26, %v14425_v6  ;;  %v14427_v22 = vld [vmem:[#allocation40_spill] sm:$0xff]  ;;  %v4938_v6 = vmul.f32 %v14435_v13, %v14434_v57  ;;  %v14441_v13 = vld [vmem:[#allocation97_spill] sm:$0xff] }
 0x3fb   : > { %14415 = vst [vmem:[#allocation52_spill] sm:$0xff] %v11889_v55  ;;  %v14436_v26 = vld [vmem:[#allocation83_spill] sm:$0xff]  ;;  %v14442_v57 = vld [vmem:[#allocation140_spill] sm:$0xff] }
 0x3fc   : > { %v11891_v20 = vpop.f32.mrf.mxu3  ;;  %8234 = vmatmul.msk.f32.gmra.mxu1 %vm1434_vm1, %v4935_v50  ;;  %v4939_v17 = vmul.f32 %v14442_v57, %v14441_v13  ;;  %v14452_v13 = vld [vmem:[#allocation209_spill] sm:$0xff] }
 0x3fd   : > { %14416 = vst [vmem:[#allocation214_spill] sm:$0xff] %v11891_v20  ;;  %v11914_v20 = vpop.permute.xlu1 %4923 }
 0x3fe   : > { %14423 = vst [vmem:[#allocation44_spill] sm:$0xff] %v11914_v20  ;;  %v14433_v20 = vld [vmem:[#allocation81_spill] sm:$0xff] }
 0x400   : > { %6842 = vperm.xlu2 %8731, %v8431_v37   ;;  %6431 = vperm.xlu1 %8730, %v8365_v51   ;;  %v11925_v51 = vpop.f32.mrf.mxu2 }
 0x401   : > { %v11902_v15 = vpop.f32.mrf.mxu1  ;;  %v11909_v50 = vpop.f32.mrf.mxu0  ;;  %6705 = vperm.xlu0 %8729, %v8409_v8   ;;  %14429 = vst [vmem:[#allocation208_spill] sm:$0xff] %v11925_v51 }
 0x402   : > { %14418 = vst [vmem:[#allocation114_spill] sm:$0xff] %v11902_v15  ;;  %v8387_v15 = vld [vmem:[%s13623_s11 + $0x178] sm:$0xff] }
 0x403   : > { %14421 = vst [vmem:[#allocation202_spill] sm:$0xff] %v11909_v50  ;;  %v14428_v50 = vld [vmem:[#allocation127_spill] sm:$0xff] }
 0x404   : > { %v11911_v21 = vpop.f32.mrf.mxu3  ;;  %8235 = vmatmul.msk.f32.gmra.mxu1 %vm1434_vm1, %v4936_v41  ;;  %v1827_v37 = vadd.f32 %v14428_v50, %v14427_v22  ;;  %v1830_v50 = vadd.f32 %v14437_v30, %v14436_v26 }
 0x405   : > { %14422 = vst [vmem:[#allocation126_spill] sm:$0xff] %v11911_v21 }
 0x409   : > { %v11916_v55 = vpop.f32.mrf.mxu1  ;;  %v11927_v8 = vpop.f32.mrf.mxu0  ;;  %6568 = vperm.xlu0 %8729, %v8387_v15  }
 0x40a   : > { %14424 = vst [vmem:[#allocation220_spill] sm:$0xff] %v11916_v55  ;;  %v14432_v55 = vld [vmem:[#allocation49_spill] sm:$0xff]  ;;  %v3739_v15 = vpop.f32.mrf.mxu2 }
 0x40b   : > { %14430 = vst [vmem:[#allocation118_spill] sm:$0xff] %v11927_v8  ;;  %v2314_v21 = vadd.f32 %v14432_v55, %v1827_v37  ;;  %v11940_v8 = vpop.permute.xlu1 %5276  ;;  %v14439_v55 = vld [vmem:[#allocation175_spill] sm:$0xff] }
 0x40c   : > { %v11929_v41 = vpop.f32.mrf.mxu3  ;;  %8236 = vmatmul.msk.f32.gmra.mxu1 %vm1434_vm1, %v4937_v54  ;;  %v2315_v37 = vadd.f32 %v14439_v55, %v1830_v50  ;;  %v14446_v55 = vld [vmem:[#allocation101_spill] sm:$0xff] }
 0x40d   : > { %14431 = vst [vmem:[#allocation135_spill] sm:$0xff] %v11929_v41  ;;  %v2849_v32 = vadd.f32 %v14433_v20, %v2314_v21  ;;  %v14440_v21 = vld [vmem:[#allocation69_spill] sm:$0xff] }
 0x40e   : > { %v2850_v20 = vadd.f32 %v14440_v21, %v2315_v37 }
 0x411   : > { %v3269_v29 = vpop.f32.mrf.mxu1  ;;  %v11938_v51 = vpop.f32.mrf.mxu0 }
 0x412   : > { %v3319_v22 = vadd.f32 %v3269_v29, %v2849_v32  ;;  %14438 = vst [vmem:[#allocation131_spill] sm:$0xff] %v11938_v51  ;;  %v3742_v26 = vpop.f32.mrf.mxu2 }
 0x413   : > { %v11950_v51 = vpop.permute.xlu1 %5306 }
 0x414   : > { %v4209_v41 = vpop.f32.mrf.mxu3  ;;  %8237 = vmatmul.msk.f32.gmra.mxu1 %vm1434_vm1, %v4938_v6  ;;  %v3789_v54 = vadd.f32 %v3739_v15, %v3319_v22  ;;  %14444 = vst [vmem:[#allocation225_spill] sm:$0xff] %v11950_v51 }
 0x416   : > { %v4259_v1 = vadd.f32 %v4209_v41, %v3789_v54  ;;  %v14447_v41 = vld [vmem:[#allocation219_spill] sm:$0xff] }
 0x417   : > { %v4940_v54 = vmul.f32 %v14447_v41, %v14446_v55 }
 0x419   : > { %v3272_v44 = vpop.f32.mrf.mxu1  ;;  %v4679_v29 = vpop.f32.mrf.mxu0 }
 0x41a   : > { %v3320_v30 = vadd.f32 %v3272_v44, %v2850_v20  ;;  %v11947_v32 = vadd.f32 %v4679_v29, %v4259_v1  ;;  %v5279_v44 = vpop.permute.xlu2 %5278 }
 0x41b   : > { %v11959_v1 = vpop.permute.xlu1 %5312 }
 0x41c   : > { %14443 = vst [vmem:[#allocation134_spill] sm:$0xff] %v11947_v32  ;;  %8238 = vmatmul.msk.f32.gmra.mxu1 %vm1434_vm1, %v4939_v17  ;;  %v3790_v6 = vadd.f32 %v3742_v26, %v3320_v30  ;;  %v4212_v22 = vpop.f32.mrf.mxu3  ;;  %v14451_v17 = vld [vmem:[#allocation180_spill] sm:$0xff]  ;;  %v11966_v30 = vpop.permute.xlu0 %4928 }
 0x41d   : > { %14449 = vst [vmem:[#allocation141_spill] sm:$0xff] %v11959_v1  ;;  %v4941_v57 = vmul.f32 %v14452_v13, %v14451_v17  ;;  %v14461_v17 = vld [vmem:[#allocation187_spill] sm:$0xff]  ;;  %v14462_v13 = vld [vmem:[#allocation240_spill] sm:$0xff]  ;;  %v14477_v1 = vld [vmem:[#allocation257_spill] sm:$0xff] }
 0x41e   : > { %v4260_v15 = vadd.f32 %v4212_v22, %v3790_v6  ;;  %14453 = vst [vmem:[#allocation56_spill] sm:$0xff] %v11966_v30  ;;  %v14457_v22 = vld [vmem:[#allocation184_spill] sm:$0xff] }
 0x41f   : > { %v14483_v30 = vld [vmem:[#allocation212_spill] sm:$0xff] }
 0x421   : > { %v11952_v50 = vpop.f32.mrf.mxu1  ;;  %v4682_v37 = vpop.f32.mrf.mxu0 }
 0x422   : > { %14445 = vst [vmem:[#allocation213_spill] sm:$0xff] %v11952_v50  ;;  %v11956_v21 = vadd.f32 %v4682_v37, %v4260_v15  ;;  %v11968_v29 = vpop.permute.xlu2 %5308  ;;  %v14458_v15 = vld [vmem:[#allocation234_spill] sm:$0xff] }
 0x423   : > { %14454 = vst [vmem:[#allocation230_spill] sm:$0xff] %v11968_v29  ;;  %v11970_v26 = vpop.permute.xlu1 %5336  ;;  %v4942_v55 = vmul.f32 %v14458_v15, %v14457_v22  ;;  %v14467_v22 = vld [vmem:[#allocation229_spill] sm:$0xff]  ;;  %v14481_v29 = vld [vmem:[#allocation248_spill] sm:$0xff] }
 0x424   : > { %14448 = vst [vmem:[#allocation123_spill] sm:$0xff] %v11956_v21  ;;  %8239 = vmatmul.msk.f32.gmra.mxu1 %vm1434_vm1, %v4940_v54  ;;  %v5281_v41 = vpop.permute.xlu0 %5280  ;;  %v14466_v21 = vld [vmem:[#allocation192_spill] sm:$0xff] }
 0x425   : > { %14455 = vst [vmem:[#allocation218_spill] sm:$0xff] %v11970_v26  ;;  %v4944_v15 = vmul.f32 %v14467_v22, %v14466_v21  ;;  %v14476_v22 = vld [vmem:[#allocation203_spill] sm:$0xff] }
 0x429   : > { %v11961_v20 = vpop.f32.mrf.mxu1 }
 0x42a   : > { %14450 = vst [vmem:[#allocation137_spill] sm:$0xff] %v11961_v20  ;;  %v11977_v54 = vpop.permute.xlu2 %5338 }
 0x42b   : > { %14459 = vst [vmem:[#allocation216_spill] sm:$0xff] %v11977_v54  ;;  %v11983_v20 = vpop.permute.xlu1 %5300 }
 0x42c   : > { %8240 = vmatmul.msk.f32.gmra.mxu1 %vm1434_vm1, %v4941_v57  ;;  %v4943_v57 = vmul.f32 %v14462_v13, %v14461_v17  ;;  %14463 = vst [vmem:[#allocation45_spill] sm:$0xff] %v11983_v20  ;;  %v11986_v26 = vpop.permute.xlu0 %5310  ;;  %v14471_v17 = vld [vmem:[#allocation197_spill] sm:$0xff]  ;;  %v14472_v13 = vld [vmem:[#allocation132_spill] sm:$0xff] }
 0x42d   : > { %14464 = vst [vmem:[#allocation235_spill] sm:$0xff] %v11986_v26  ;;  %v4945_v50 = vmul.f32 %v14472_v13, %v14471_v17  ;;  %v4706_v17 = vadd.f32 %v11404_v45, %v11383_v3  ;;  %v12019_v13 = vld [vmem:[#allocation8] ss:$0 sm:$0xff] }
 0x42e   : > { %v14480_v26 = vld [vmem:[#allocation207_spill] sm:$0xff] }
 0x431   : > { %v11972_v6 = vpop.f32.mrf.mxu1 }
 0x432   : > { %14456 = vst [vmem:[#allocation128_spill] sm:$0xff] %v11972_v6 }
 0x433   : > { %v11995_v54 = vpop.permute.xlu1 %5330 }
 0x434   : > { %8241 = vmatmul.msk.f32.gmra.mxu1 %vm1434_vm1, %v4942_v55  ;;  %v11992_v55 = vpop.permute.xlu2 %5302  ;;  %14469 = vst [vmem:[#allocation241_spill] sm:$0xff] %v11995_v54  ;;  %v12001_v32 = vpop.permute.xlu0 %5304 }
 0x435   : > { %14468 = vst [vmem:[#allocation133_spill] sm:$0xff] %v11992_v55 }
 0x436   : > { %14473 = vst [vmem:[#allocation139_spill] sm:$0xff] %v12001_v32 }
 0x439   : > { %v11979_v37 = vpop.f32.mrf.mxu1 }
 0x43a   : > { %14460 = vst [vmem:[#allocation145_spill] sm:$0xff] %v11979_v37 }
 0x43c   : > { %8242 = vmatmul.msk.f32.gmra.mxu1 %vm1434_vm1, %v4943_v57  ;;  %v12004_v57 = vpop.permute.xlu2 %5332  ;;  %v12013_v54 = vpop.permute.xlu0 %5334 }
 0x43d   : > { %14474 = vst [vmem:[#allocation66_spill] sm:$0xff] %v12004_v57 }
 0x43e   : > { %14478 = vst [vmem:[#allocation80_spill] sm:$0xff] %v12013_v54 }
 0x441   : > { %v11988_v6 = vpop.f32.mrf.mxu1 }
 0x442   : > { %14465 = vst [vmem:[#allocation223_spill] sm:$0xff] %v11988_v6  ;;  %v12006_v6 = vpop.permute.xlu1 %5294 }
 0x444   : > { %8243 = vmatmul.msk.f32.gmra.mxu1 %vm1434_vm1, %v4944_v15  ;;  %v4946_v15 = vmul.f32 %v14477_v1, %v14476_v22  ;;  %v12027_v22 = vpop.permute.xlu0 %5298 }
 0x449   : > { %v11997_v37 = vpop.f32.mrf.mxu1 }
 0x44a   : > { %14470 = vst [vmem:[#allocation87_spill] sm:$0xff] %v11997_v37  ;;  %v12015_v37 = vpop.permute.xlu2 %5296 }
 0x44c   : > { %8244 = vmatmul.msk.f32.gmra.mxu1 %vm1434_vm1, %v4945_v50  ;;  %v12021_v50 = vpop.permute.xlu1 %5324 }
 0x44d   : > { %14479 = vst [vmem:[#allocation144_spill] sm:$0xff] %v12021_v50  ;;  %v14484_v50 = vld [vmem:[#allocation268_spill] sm:$0xff] }
 0x44e   : > { %v4948_v32 = vmul.f32 %v14484_v50, %v14483_v30  ;;  %v14487_v30 = vld [vmem:[#allocation270_spill] sm:$0xff] }
 0x451   : > { %v12008_v21 = vpop.f32.mrf.mxu1 }
 0x452   : > { %14475 = vst [vmem:[#allocation245_spill] sm:$0xff] %v12008_v21  ;;  %v4947_v21 = vmul.f32 %v14481_v29, %v14480_v26  ;;  %v12031_v3 = vpop.permute.xlu2 %5326 }
 0x453   : > { %14482 = vst [vmem:[#allocation249_spill] sm:$0xff] %v12031_v3 }
 0x454   : > { %8245 = vmatmul.msk.f32.gmra.mxu1 %vm1434_vm1, %v4946_v15  ;;  %v4707_v15 = vadd.f32 %v11437_v4, %v11414_v14  ;;  %v12035_v20 = vpop.permute.xlu1 %5288  ;;  %v4708_v14 = vadd.f32 %v11468_v12, %v11445_v52 }
 0x459   : > { %v5080_v57 = vpop.f32.mrf.mxu1 }
 0x45a   : > { %v5176_v51 = vadd.f32 %v5080_v57, %v4706_v17  ;;  %v12046_v3 = vpop.permute.xlu2 %5290 }
 0x45c   : > { %v5212_v1 = vadd.f32 %v12019_v13, %v5176_v51  ;;  %8246 = vmatmul.msk.f32.gmra.mxu1 %vm1434_vm1, %v4947_v21  ;;  %v12042_v21 = vpop.permute.xlu0 %5328  ;;  %v12052_v52 = vpop.permute.xlu1 %5318 }
 0x45d   : > { %14485 = vst [vmem:[#allocation148_spill] sm:$0xff] %v12042_v21 }
 0x45e   : > { %v5244_v54 = vmax.f32 %v5212_v1, 0.0  ;;  %v14486_v1 = vld [vmem:[#allocation217_spill] sm:$0xff] }
 0x45f   : > { %v4949_v50 = vmul.f32 %v14487_v30, %v14486_v1 }
 0x460   : > { %v5372_v29 = vadd.f32 %v11940_v8, %v5244_v54 }
 0x461   : > { %v5083_v45 = vpop.f32.mrf.mxu1 }
 0x462   : > { %v5177_v55 = vadd.f32 %v5083_v45, %v4707_v15  ;;  %v5404_v4 = vmax.f32 %v5372_v29, 0.0 }
 0x464   : > { %v5213_v51 = vadd.f32 %v12019_v13, %v5177_v55  ;;  %8247 = vmatmul.msk.f32.gmra.mxu1 %vm1434_vm1, %v4948_v32  ;;  %v12048_v8 = vrot.slane %v5404_v4, 1 }
 0x466   : > { %v5245_v26 = vmax.f32 %v5213_v51, 0.0  ;;  %14488 = vst [vmem:[#allocation252_spill] sm:$0xff] %v12048_v8  ;;  %v4709_v51 = vadd.f32 %v11495_v27, %v11476_v34  ;;  %v5283_v27 = vpop.permute.xlu1 %5282 }
 0x468   : > { %v5373_v57 = vadd.f32 %v5279_v44, %v5245_v26  ;;  %v14489_v44 = vld [vmem:[#allocation136_spill] sm:$0xff] }
 0x469   : > { %v5086_v17 = vpop.f32.mrf.mxu1  ;;  %vm7109_vm6 = vcmp.lt.s32.totalorder %v14489_v44, 5  ;;  %vm7194_vm7 = vcmp.lt.s32.totalorder %v14489_v44, 4  ;;  %vm7254_vm8 = vcmp.lt.s32.totalorder %v14489_v44, 3 }
 0x46a   : > { %v5405_v15 = vmax.f32 %v5373_v57, 0.0  ;;  %v5178_v45 = vadd.f32 %v5086_v17, %v4708_v14  ;;  %v14491_v57 = vld [vmem:[#allocation61_spill] sm:$0xff] }
 0x46b   : > { %v14492_v17 = vld [vmem:[#allocation265_spill] sm:$0xff] }
 0x46c   : > { %v5437_v54 = vrot.slane %v5405_v15, 1  ;;  %v5214_v32 = vadd.f32 %v12019_v13, %v5178_v45  ;;  %8248 = vmatmul.msk.f32.gmra.mxu1 %vm1434_vm1, %v4949_v50  ;;  %v4950_v1 = vmul.f32 %v14492_v17, %v14491_v57  ;;  %v12063_v50 = vpop.permute.xlu0 %5292 }
 0x46e   : > { %v5246_v12 = vmax.f32 %v5214_v32, 0.0  ;;  %v5498_v55 = vsel %vm2355_vm3, %v12048_v8, %v5437_v54  ;;  %v12067_v8 = vpop.permute.xlu2 %5320 }
 0x46f   : > { %v12057_v29 = vmax.f32 %v5404_v4, %v5498_v55  ;;  %14493 = vst [vmem:[#allocation142_spill] sm:$0xff] %v12067_v8 }
 0x470   : > { %v5374_v26 = vadd.f32 %v5281_v41, %v5246_v12  ;;  %v4710_v12 = vadd.f32 %v11522_v62, %v11503_v7  ;;  %v4711_v62 = vadd.f32 %v11551_v40, %v11530_v10 }
 0x471   : > { %14490 = vst [vmem:[#allocation151_spill] sm:$0xff] %v12057_v29  ;;  %v5089_v14 = vpop.f32.mrf.mxu1 }
 0x472   : > { %v5406_v30 = vmax.f32 %v5374_v26, 0.0  ;;  %v5179_v45 = vadd.f32 %v5089_v14, %v4709_v51  ;;  %v14495_v26 = vld [vmem:[#allocation60_spill] sm:$0xff] }
 0x473   : > { %v14496_v14 = vld [vmem:[#allocation76_spill] sm:$0xff] }
 0x474   : > { %v5438_v21 = vrot.slane %v5406_v30, 1  ;;  %v5215_v32 = vadd.f32 %v12019_v13, %v5179_v45  ;;  %8249 = vmatmul.msk.f32.gmra.mxu1 %vm1434_vm1, %v4950_v1  ;;  %v4951_v57 = vmul.f32 %v14496_v14, %v14495_v26 }
 0x476   : > { %v5247_v4 = vmax.f32 %v5215_v32, 0.0  ;;  %v5497_v34 = vsel %vm2355_vm3, %v5437_v54, %v5438_v21  ;;  %v12079_v32 = vpop.permute.xlu0 %5322 }
 0x477   : > { %v12071_v41 = vmax.f32 %v5405_v15, %v5497_v34  ;;  %14497 = vst [vmem:[#allocation146_spill] sm:$0xff] %v12079_v32  ;;  %v5285_v34 = vpop.permute.xlu2 %5284 }
 0x478   : > { %v5375_v55 = vadd.f32 %v5283_v27, %v5247_v4 }
 0x479   : > { %14494 = vst [vmem:[#allocation154_spill] sm:$0xff] %v12071_v41  ;;  %v5092_v51 = vpop.f32.mrf.mxu1 }
 0x47a   : > { %v5407_v17 = vmax.f32 %v5375_v55, 0.0  ;;  %v5180_v45 = vadd.f32 %v5092_v51, %v4710_v12  ;;  %v14498_v12 = vld [vmem:[#allocation47_spill] sm:$0xff]  ;;  %v14499_v55 = vld [vmem:[#allocation78_spill] sm:$0xff] }
 0x47b   : > { %v4952_v51 = vmul.f32 %v14499_v55, %v14498_v12  ;;  %v14503_v12 = vld [vmem:[#allocation65_spill] sm:$0xff]  ;;  %v14504_v55 = vld [vmem:[#allocation190_spill] sm:$0xff] }
 0x47c   : > { %v5439_v1 = vrot.slane %v5407_v17, 1  ;;  %v5216_v29 = vadd.f32 %v12019_v13, %v5180_v45  ;;  %8250 = vmatmul.msk.f32.gmra.mxu1 %vm1434_vm1, %v4951_v57 }
 0x47e   : > { %v5248_v54 = vmax.f32 %v5216_v29, 0.0  ;;  %v5496_v15 = vsel %vm2355_vm3, %v5438_v21, %v5439_v1  ;;  %v14500_v29 = vld [vmem:[#allocation222_spill] sm:$0xff]  ;;  %v5287_v10 = vpop.permute.xlu0 %5286 }
 0x47f   : > { %v12083_v7 = vmax.f32 %v5406_v30, %v5496_v15  ;;  %v14501_v21 = vld [vmem:[#allocation166_spill] sm:$0xff] }
 0x480   : > { %v5376_v4 = vadd.f32 %v5285_v34, %v5248_v54  ;;  %v1782_v32 = vadd.f32 %v14501_v21, %v14500_v29  ;;  %v4712_v54 = vadd.f32 %v11578_v49, %v11559_v19  ;;  %v14505_v29 = vld [vmem:[#allocation227_spill] sm:$0xff] }
 0x481   : > { %v5095_v27 = vpop.f32.mrf.mxu1 }
 0x482   : > { %v5408_v26 = vmax.f32 %v5376_v4, 0.0  ;;  %v5181_v14 = vadd.f32 %v5095_v27, %v4711_v62  ;;  %v14502_v4 = vld [vmem:[#allocation224_spill] sm:$0xff] }
 0x483   : > { %v2299_v27 = vadd.f32 %v14502_v4, %v1782_v32 }
 0x484   : > { %v5440_v57 = vrot.slane %v5408_v26, 1  ;;  %v5217_v45 = vadd.f32 %v12019_v13, %v5181_v14  ;;  %8251 = vmatmul.msk.f32.gmra.mxu1 %vm1434_vm1, %v4952_v51  ;;  %v4953_v51 = vmul.f32 %v14504_v55, %v14503_v12 }
 0x486   : > { %v5249_v30 = vmax.f32 %v5217_v45, 0.0  ;;  %v5495_v15 = vsel %vm2355_vm3, %v5439_v1, %v5440_v57  ;;  %v2834_v45 = vadd.f32 %v14505_v29, %v2299_v27 }
 0x487   : > { %v12095_v40 = vmax.f32 %v5407_v17, %v5495_v15  ;;  %v14506_v17 = vld [vmem:[#allocation226_spill] sm:$0xff]  ;;  %v14507_v15 = vld [vmem:[#allocation172_spill] sm:$0xff] }
 0x488   : > { %v5377_v34 = vadd.f32 %v5287_v10, %v5249_v30  ;;  %v1785_v8 = vadd.f32 %v14507_v15, %v14506_v17  ;;  %v3304_v19 = vadd.f32 %v11595_v36, %v2834_v45  ;;  %v4713_v10 = vadd.f32 %v11605_v31, %v11585_v56  ;;  %v14510_v31 = vld [vmem:[#allocation231_spill] sm:$0xff]  ;;  %v14512_v15 = vld [vmem:[#allocation113_spill] sm:$0xff] }
 0x489   : > { %v5098_v62 = vpop.f32.mrf.mxu1  ;;  %v4954_v36 = vmul.f32 %v11208_v2, %v10816_v39 }
 0x48a   : > { %v5409_v14 = vmax.f32 %v5377_v34, 0.0  ;;  %v5182_v41 = vadd.f32 %v5098_v62, %v4712_v54  ;;  %v14508_v34 = vld [vmem:[#allocation228_spill] sm:$0xff]  ;;  %v3774_v27 = vadd.f32 %v11535_v48, %v3304_v19 }
 0x48c   : > { %v5441_v21 = vrot.slane %v5409_v14, 1  ;;  %v5218_v1 = vadd.f32 %v12019_v13, %v5182_v41  ;;  %8252 = vmatmul.msk.f32.gmra.mxu1 %vm1434_vm1, %v4953_v51  ;;  %v2300_v41 = vadd.f32 %v14508_v34, %v1785_v8  ;;  %v4244_v29 = vadd.f32 %v11610_v61, %v3774_v27 }
 0x48d   : > { %v4955_v61 = vmul.f32 %v11234_v42, %v10847_v16 }
 0x48e   : > { %v5250_v49 = vmax.f32 %v5218_v1, 0.0  ;;  %v5494_v32 = vsel %vm2355_vm3, %v5440_v57, %v5441_v21  ;;  %v4714_v48 = vadd.f32 %v11629_v38, %v4244_v29 }
 0x48f   : > { %v12110_v30 = vmax.f32 %v5408_v26, %v5494_v32  ;;  %v14509_v26 = vld [vmem:[#allocation232_spill] sm:$0xff] }
 0x490   : > { %v5378_v54 = vadd.f32 %v12035_v20, %v5250_v49  ;;  %v2835_v55 = vadd.f32 %v14509_v26, %v2300_v41  ;;  %v14511_v20 = vld [vmem:[#allocation176_spill] sm:$0xff]  ;;  %v14515_v41 = vld [vmem:[#allocation46_spill] sm:$0xff] }
 0x491   : > { %v5101_v62 = vpop.f32.mrf.mxu1  ;;  %v5534_v4 = vmax.f32 %v12083_v7, %v12110_v30  ;;  %v1788_v8 = vadd.f32 %v14511_v20, %v14510_v31 }
 0x492   : > { %v5410_v12 = vmax.f32 %v5378_v54, 0.0  ;;  %v5183_v57 = vadd.f32 %v5101_v62, %v4713_v10  ;;  %v3305_v45 = vadd.f32 %v11621_v58, %v2835_v55  ;;  %v14516_v55 = vld [vmem:[#allocation117_spill] sm:$0xff] }
 0x493   : > { %v2301_v19 = vadd.f32 %v14512_v15, %v1788_v8 }
 0x494   : > { %v5442_v51 = vrot.slane %v5410_v12, 1  ;;  %v5219_v56 = vadd.f32 %v12019_v13, %v5183_v57  ;;  %8253 = vmatmul.msk.f32.gmra.mxu1 %vm1434_vm1, %v4954_v36  ;;  %v3775_v58 = vadd.f32 %v11564_v28, %v3305_v45 }
 0x496   : > { %v5251_v1 = vmax.f32 %v5219_v56, 0.0  ;;  %v5493_v39 = vsel %vm2355_vm3, %v5441_v21, %v5442_v51  ;;  %v14513_v21 = vld [vmem:[#allocation238_spill] sm:$0xff]  ;;  %v4245_v36 = vadd.f32 %v11636_v63, %v3775_v58  ;;  %v14517_v63 = vld [vmem:[#allocation77_spill] sm:$0xff] }
 0x497   : > { %v12130_v2 = vmax.f32 %v5409_v14, %v5493_v39  ;;  %v2836_v14 = vadd.f32 %v14513_v21, %v2301_v19  ;;  %v4956_v8 = vmul.f32 %v14517_v63, %v10880_v47  ;;  %v14520_v39 = vld [vmem:[#allocation106_spill] sm:$0xff]  ;;  %v14527_v63 = vld [vmem:[#allocation247_spill] sm:$0xff] }
 0x498   : > { %v5379_v17 = vadd.f32 %v12046_v3, %v5251_v1  ;;  %v14514_v3 = vld [vmem:[#allocation237_spill] sm:$0xff]  ;;  %v4715_v28 = vadd.f32 %v11655_v60, %v4245_v36  ;;  %v14521_v58 = vld [vmem:[#allocation122_spill] sm:$0xff] }
 0x499   : > { %v5104_v49 = vpop.f32.mrf.mxu1  ;;  %v5535_v32 = vmax.f32 %v12095_v40, %v12130_v2  ;;  %v1791_v62 = vadd.f32 %v14515_v41, %v14514_v3  ;;  %v3306_v27 = vadd.f32 %v11647_v33, %v2836_v14 }
 0x49a   : > { %v5411_v10 = vmax.f32 %v5379_v17, 0.0  ;;  %v5184_v54 = vadd.f32 %v5104_v49, %v4714_v48 }
 0x49b   : > { %v2302_v56 = vadd.f32 %v14516_v55, %v1791_v62  ;;  %v3776_v33 = vadd.f32 %v11603_v24, %v3306_v27  ;;  %v14526_v27 = vld [vmem:[#allocation111_spill] sm:$0xff] }
 0x49c   : > { %v5443_v34 = vrot.slane %v5411_v10, 1  ;;  %v5220_v38 = vadd.f32 %v12019_v13, %v5184_v54  ;;  %8254 = vmatmul.msk.f32.gmra.mxu1 %vm1434_vm1, %v4955_v61 }
 0x49d   : > { %v4246_v17 = vadd.f32 %v11662_v25, %v3776_v33  ;;  %v14523_v25 = vld [vmem:[#allocation88_spill] sm:$0xff] }
 0x49e   : > { %v5252_v57 = vmax.f32 %v5220_v38, 0.0  ;;  %v5492_v16 = vsel %vm2355_vm3, %v5442_v51, %v5443_v34  ;;  %v14518_v51 = vld [vmem:[#allocation64_spill] sm:$0xff]  ;;  %v14522_v38 = vld [vmem:[#allocation55_spill] sm:$0xff] }
 0x49f   : > { %v12149_v42 = vmax.f32 %v5410_v12, %v5492_v16  ;;  %v2837_v12 = vadd.f32 %v14518_v51, %v2302_v56  ;;  %v4716_v49 = vadd.f32 %v11681_v5, %v4246_v17  ;;  %v4957_v3 = vmul.f32 %v14523_v25, %v14522_v38  ;;  %v14528_v51 = vld [vmem:[#allocation59_spill] sm:$0xff] }
 0x4a0   : > { %v5380_v26 = vadd.f32 %v12063_v50, %v5252_v57  ;;  %v14519_v50 = vld [vmem:[#allocation243_spill] sm:$0xff] }
 0x4a1   : > { %v5107_v31 = vpop.f32.mrf.mxu1  ;;  %v5536_v20 = vmax.f32 %v12110_v30, %v12149_v42  ;;  %v1794_v48 = vadd.f32 %v14520_v39, %v14519_v50  ;;  %v3307_v15 = vadd.f32 %v11673_v43, %v2837_v12  ;;  %v14631_v30 = vld [vmem:[#allocation146_spill] sm:$0xff] }
 0x4a2   : > { %v5412_v29 = vmax.f32 %v5380_v26, 0.0  ;;  %v5185_v45 = vadd.f32 %v5107_v31, %v4715_v28 }
 0x4a3   : > { %v2303_v54 = vadd.f32 %v14521_v58, %v1794_v48  ;;  %v3777_v43 = vadd.f32 %v11633_v35, %v3307_v15  ;;  %v14532_v48 = vld [vmem:[#allocation42_spill] sm:$0xff] }
 0x4a4   : > { %v5444_v1 = vrot.slane %v5412_v29, 1  ;;  %v5221_v60 = vadd.f32 %v12019_v13, %v5185_v45  ;;  %8255 = vmatmul.msk.f32.gmra.mxu1 %vm1434_vm1, %v4956_v8 }
 0x4a5   : > { %v4247_v16 = vadd.f32 %v11686_v23, %v3777_v43  ;;  %v14529_v23 = vld [vmem:[#allocation92_spill] sm:$0xff] }
 0x4a6   : > { %v5253_v19 = vmax.f32 %v5221_v60, 0.0  ;;  %v5491_v47 = vsel %vm2355_vm3, %v5443_v34, %v5444_v1  ;;  %v14524_v34 = vld [vmem:[#allocation51_spill] sm:$0xff]  ;;  %v4958_v12 = vmul.f32 %v14529_v23, %v14528_v51 }
 0x4a7   : > { %v12168_v24 = vmax.f32 %v5411_v10, %v5491_v47  ;;  %v2838_v10 = vadd.f32 %v14524_v34, %v2303_v54  ;;  %v4717_v56 = vadd.f32 %v11709_v18, %v4247_v16  ;;  %v14533_v54 = vld [vmem:[#allocation251_spill] sm:$0xff]  ;;  %v14540_v16 = vld [vmem:[#allocation102_spill] sm:$0xff] }
 0x4a8   : > { %v5381_v61 = vadd.f32 %v12006_v6, %v5253_v19  ;;  %v14525_v6 = vld [vmem:[#allocation246_spill] sm:$0xff] }
 0x4a9   : > { %v5110_v21 = vpop.f32.mrf.mxu1  ;;  %v5537_v14 = vmax.f32 %v12130_v2, %v12168_v24  ;;  %v1797_v57 = vadd.f32 %v14526_v27, %v14525_v6  ;;  %v3308_v28 = vadd.f32 %v11701_v46, %v2838_v10  ;;  %v14536_v10 = vld [vmem:[#allocation255_spill] sm:$0xff] }
 0x4aa   : > { %v5413_v41 = vmax.f32 %v5381_v61, 0.0  ;;  %v5186_v62 = vadd.f32 %v5110_v21, %v4716_v49  ;;  %v14539_v27 = vld [vmem:[#allocation195_spill] sm:$0xff] }
 0x4ab   : > { %v2304_v8 = vadd.f32 %v14527_v63, %v1797_v57  ;;  %v3778_v46 = vadd.f32 %v11659_v0, %v3308_v28  ;;  %v14542_v63 = vld [vmem:[#allocation45_spill] sm:$0xff] }
 0x4ac   : > { %v5445_v36 = vrot.slane %v5413_v41, 1  ;;  %v5222_v5 = vadd.f32 %v12019_v13, %v5186_v62  ;;  %8256 = vmatmul.msk.f32.gmra.mxu1 %vm1434_vm1, %v4957_v3  ;;  %v14534_v3 = vld [vmem:[#allocation147_spill] sm:$0xff] }
 0x4ad   : > { %v4248_v15 = vadd.f32 %v11714_v53, %v3778_v46  ;;  %v4959_v53 = vmul.f32 %v11693_v9, %v14534_v3  ;;  %v14544_v46 = vld [vmem:[#allocation150_spill] sm:$0xff] }
 0x4ae   : > { %v5254_v26 = vmax.f32 %v5222_v5, 0.0  ;;  %v5490_v35 = vsel %vm2355_vm3, %v5444_v1, %v5445_v36  ;;  %v14530_v1 = vld [vmem:[#allocation68_spill] sm:$0xff]  ;;  %v14538_v5 = vld [vmem:[#allocation125_spill] sm:$0xff] }
 0x4af   : > { %v12187_v55 = vmax.f32 %v5412_v29, %v5490_v35  ;;  %v2839_v29 = vadd.f32 %v14530_v1, %v2304_v8  ;;  %v4718_v61 = vadd.f32 %v11735_v59, %v4248_v15 }
 0x4b0   : > { %v5382_v31 = vadd.f32 %v12015_v37, %v5254_v26  ;;  %v14531_v37 = vld [vmem:[#allocation250_spill] sm:$0xff] }
 0x4b1   : > { %v5113_v33 = vpop.f32.mrf.mxu1  ;;  %v5538_v45 = vmax.f32 %v12149_v42, %v12187_v55  ;;  %v1800_v17 = vadd.f32 %v14532_v48, %v14531_v37  ;;  %v3309_v19 = vadd.f32 %v11727_v11, %v2839_v29  ;;  %v14535_v11 = vld [vmem:[#allocation98_spill] sm:$0xff]  ;;  %v14546_v29 = vld [vmem:[#allocation103_spill] sm:$0xff] }
 0x4b2   : > { %v5414_v60 = vmax.f32 %v5382_v31, 0.0  ;;  %v5187_v50 = vadd.f32 %v5113_v33, %v4717_v56  ;;  %v14541_v56 = vld [vmem:[#allocation233_spill] sm:$0xff]  ;;  %v14543_v33 = vld [vmem:[#allocation256_spill] sm:$0xff]  ;;  %v14626_v42 = vld [vmem:[#allocation154_spill] sm:$0xff] }
 0x4b3   : > { %v2305_v21 = vadd.f32 %v14533_v54, %v1800_v17  ;;  %v3779_v43 = vadd.f32 %v14535_v11, %v3309_v19  ;;  %v14548_v19 = vld [vmem:[#allocation259_spill] sm:$0xff]  ;;  %v14551_v54 = vld [vmem:[#allocation48_spill] sm:$0xff] }
 0x4b4   : > { %v5446_v39 = vrot.slane %v5414_v60, 1  ;;  %v5223_v18 = vadd.f32 %v12019_v13, %v5187_v50  ;;  %8257 = vmatmul.msk.f32.gmra.mxu1 %vm1434_vm1, %v4958_v12  ;;  %v14545_v50 = vld [vmem:[#allocation95_spill] sm:$0xff] }
 0x4b5   : > { %v4249_v57 = vadd.f32 %v14539_v27, %v3779_v43  ;;  %v4960_v1 = vmul.f32 %v14545_v50, %v14544_v46  ;;  %v14552_v11 = vld [vmem:[#allocation239_spill] sm:$0xff]  ;;  %v14556_v27 = vld [vmem:[#allocation44_spill] sm:$0xff] }
 0x4b6   : > { %v5255_v47 = vmax.f32 %v5223_v18, 0.0  ;;  %v5489_v0 = vsel %vm2355_vm3, %v5445_v36, %v5446_v39  ;;  %v14562_v46 = vld [vmem:[#allocation99_spill] sm:$0xff] }
 0x4b7   : > { %v12206_v49 = vmax.f32 %v5413_v41, %v5489_v0  ;;  %v2840_v41 = vadd.f32 %v14536_v10, %v2305_v21  ;;  %v4719_v31 = vadd.f32 %v14541_v56, %v4249_v57 }
 0x4b8   : > { %v5383_v58 = vadd.f32 %v12027_v22, %v5255_v47  ;;  %v14537_v22 = vld [vmem:[#allocation254_spill] sm:$0xff] }
 0x4b9   : > { %v5116_v38 = vpop.f32.mrf.mxu1  ;;  %v5539_v25 = vmax.f32 %v12168_v24, %v12206_v49  ;;  %v1803_v6 = vadd.f32 %v14538_v5, %v14537_v22  ;;  %v3310_v28 = vadd.f32 %v14540_v16, %v2840_v41  ;;  %v14549_v47 = vld [vmem:[#allocation130_spill] sm:$0xff]  ;;  %v14554_v41 = vld [vmem:[#allocation261_spill] sm:$0xff]  ;;  %v14557_v16 = vld [vmem:[#allocation183_spill] sm:$0xff] }
 0x4ba   : > { %v5415_v62 = vmax.f32 %v5383_v58, 0.0  ;;  %v5188_v34 = vadd.f32 %v5116_v38, %v4718_v61  ;;  %v1806_v0 = vadd.f32 %v14549_v47, %v14548_v19  ;;  %v14550_v61 = vld [vmem:[#allocation94_spill] sm:$0xff]  ;;  %v14565_v19 = vld [vmem:[#allocation263_spill] sm:$0xff] }
 0x4bb   : > { %v2306_v51 = vadd.f32 %v14543_v33, %v1803_v6  ;;  %v3780_v18 = vadd.f32 %v14546_v29, %v3310_v28  ;;  %v14555_v6 = vld [vmem:[#allocation153_spill] sm:$0xff] }
 0x4bc   : > { %v5447_v36 = vrot.slane %v5415_v62, 1  ;;  %v5224_v59 = vadd.f32 %v12019_v13, %v5188_v34  ;;  %8258 = vmatmul.msk.f32.gmra.mxu1 %vm1434_vm1, %v4959_v53  ;;  %v14553_v34 = vld [vmem:[#allocation133_spill] sm:$0xff]  ;;  %v4961_v57 = vmul.f32 %v14556_v27, %v14555_v6 }
 0x4bd   : > { %v4250_v58 = vadd.f32 %v14550_v61, %v3780_v18  ;;  %v14572_v6 = vld [vmem:[#allocation89_spill] sm:$0xff] }
 0x4be   : > { %v5256_v26 = vmax.f32 %v5224_v59, 0.0  ;;  %v5488_v9 = vsel %vm2355_vm3, %v5446_v39, %v5447_v36  ;;  %v14547_v39 = vld [vmem:[#allocation260_spill] sm:$0xff]  ;;  %v2307_v59 = vadd.f32 %v14554_v41, %v1806_v0  ;;  %v14570_v41 = vld [vmem:[#allocation266_spill] sm:$0xff] }
 0x4bf   : > { %v12225_v35 = vmax.f32 %v5414_v60, %v5488_v9  ;;  %v2841_v60 = vadd.f32 %v14547_v39, %v2306_v51  ;;  %v4720_v43 = vadd.f32 %v14552_v11, %v4250_v58  ;;  %v14561_v51 = vld [vmem:[#allocation188_spill] sm:$0xff]  ;;  %v14566_v58 = vld [vmem:[#allocation155_spill] sm:$0xff] }
 0x4c0   : > { %v5384_v8 = vadd.f32 %v14542_v63, %v5256_v26  ;;  %v14559_v63 = vld [vmem:[#allocation262_spill] sm:$0xff] }
 0x4c1   : > { %v5119_v23 = vpop.f32.mrf.mxu1  ;;  %v5540_v12 = vmax.f32 %v12187_v55, %v12225_v35  ;;  %v3311_v21 = vadd.f32 %v14551_v54, %v2841_v60  ;;  %v14564_v60 = vld [vmem:[#allocation139_spill] sm:$0xff]  ;;  %v14567_v54 = vld [vmem:[#allocation56_spill] sm:$0xff] }
 0x4c2   : > { %v5416_v37 = vmax.f32 %v5384_v8, 0.0  ;;  %v5189_v48 = vadd.f32 %v5119_v23, %v4719_v31  ;;  %v14560_v8 = vld [vmem:[#allocation57_spill] sm:$0xff] }
 0x4c3   : > { %v3781_v28 = vadd.f32 %v14557_v16, %v3311_v21  ;;  %v1809_v33 = vadd.f32 %v14560_v8, %v14559_v63  ;;  %v4962_v21 = vmul.f32 %v14567_v54, %v14566_v58  ;;  %v14575_v63 = vld [vmem:[#allocation225_spill] sm:$0xff]  ;;  %v14582_v54 = vld [vmem:[#allocation104_spill] sm:$0xff] }
 0x4c4   : > { %v5448_v17 = vrot.slane %v5416_v37, 1  ;;  %v5225_v15 = vadd.f32 %v12019_v13, %v5189_v48  ;;  %8259 = vmatmul.msk.f32.gmra.mxu1 %vm1434_vm1, %v4960_v1  ;;  %v14563_v48 = vld [vmem:[#allocation116_spill] sm:$0xff] }
 0x4c5   : > { %v4251_v23 = vadd.f32 %v14561_v51, %v3781_v28  ;;  %v2308_v47 = vadd.f32 %v14565_v19, %v1809_v33  ;;  %v14580_v19 = vld [vmem:[#allocation221_spill] sm:$0xff] }
 0x4c6   : > { %v5257_v38 = vmax.f32 %v5225_v15, 0.0  ;;  %v5487_v3 = vsel %vm2355_vm3, %v5447_v36, %v5448_v17  ;;  %v14558_v36 = vld [vmem:[#allocation63_spill] sm:$0xff] }
 0x4c7   : > { %v12244_v53 = vmax.f32 %v5415_v62, %v5487_v3  ;;  %v2842_v62 = vadd.f32 %v14558_v36, %v2307_v59  ;;  %v4721_v39 = vadd.f32 %v14563_v48, %v4251_v23  ;;  %v14571_v59 = vld [vmem:[#allocation215_spill] sm:$0xff] }
 0x4c8   : > { %v5385_v10 = vadd.f32 %v14553_v34, %v5257_v38  ;;  %v14568_v38 = vld [vmem:[#allocation201_spill] sm:$0xff]  ;;  %v14576_v23 = vld [vmem:[#allocation267_spill] sm:$0xff] }
 0x4c9   : > { %v5122_v22 = vpop.f32.mrf.mxu1  ;;  %v5541_v5 = vmax.f32 %v12206_v49, %v12244_v53  ;;  %v3312_v50 = vadd.f32 %v14562_v46, %v2842_v62  ;;  %v14574_v62 = vld [vmem:[#allocation115_spill] sm:$0xff] }
 0x4ca   : > { %v5417_v26 = vmax.f32 %v5385_v10, 0.0  ;;  %v5190_v9 = vadd.f32 %v5122_v22, %v4720_v43  ;;  %v1812_v22 = vadd.f32 %v14571_v59, %v14570_v41 }
 0x4cb   : > { %v3782_v3 = vadd.f32 %v14568_v38, %v3312_v50  ;;  %v14577_v50 = vld [vmem:[#allocation107_spill] sm:$0xff] }
 0x4cc   : > { %v5449_v56 = vrot.slane %v5417_v26, 1  ;;  %v5226_v31 = vadd.f32 %v12019_v13, %v5190_v9  ;;  %8260 = vmatmul.msk.f32.gmra.mxu1 %vm1434_vm1, %v4961_v57  ;;  %v14573_v57 = vld [vmem:[#allocation91_spill] sm:$0xff]  ;;  %v2309_v46 = vadd.f32 %v14576_v23, %v1812_v22  ;;  %v14590_v23 = vld [vmem:[#allocation112_spill] sm:$0xff] }
 0x4cd   : > { %v4252_v27 = vadd.f32 %v14572_v6, %v3782_v3  ;;  %v14585_v6 = vld [vmem:[#allocation50_spill] sm:$0xff] }
 0x4ce   : > { %v5258_v1 = vmax.f32 %v5226_v31, 0.0  ;;  %v5486_v29 = vsel %vm2355_vm3, %v5448_v17, %v5449_v56  ;;  %v14569_v17 = vld [vmem:[#allocation67_spill] sm:$0xff] }
 0x4cf   : > { %v12263_v18 = vmax.f32 %v5416_v37, %v5486_v29  ;;  %v2843_v37 = vadd.f32 %v14569_v17, %v2308_v47  ;;  %v4722_v31 = vadd.f32 %v14574_v62, %v4252_v27  ;;  %v14583_v17 = vld [vmem:[#allocation121_spill] sm:$0xff]  ;;  %v14587_v62 = vld [vmem:[#allocation72_spill] sm:$0xff] }
 0x4d0   : > { %v5386_v15 = vadd.f32 %v14564_v60, %v5258_v1 }
 0x4d1   : > { %v5125_v0 = vpop.f32.mrf.mxu1  ;;  %v5542_v61 = vmax.f32 %v12225_v35, %v12263_v18  ;;  %v3313_v16 = vadd.f32 %v14573_v57, %v2843_v37  ;;  %v14586_v57 = vld [vmem:[#allocation206_spill] sm:$0xff] }
 0x4d2   : > { %v5418_v11 = vmax.f32 %v5386_v15, 0.0  ;;  %v5191_v43 = vadd.f32 %v5125_v0, %v4721_v39  ;;  %v14578_v39 = vld [vmem:[#allocation70_spill] sm:$0xff]  ;;  %v14581_v0 = vld [vmem:[#allocation193_spill] sm:$0xff] }
 0x4d3   : > { %v3783_v1 = vadd.f32 %v14577_v50, %v3313_v16  ;;  %v2844_v60 = vadd.f32 %v14578_v39, %v2309_v46  ;;  %v14591_v50 = vld [vmem:[#allocation211_spill] sm:$0xff] }
 0x4d4   : > { %v5450_v34 = vrot.slane %v5418_v11, 1  ;;  %v5227_v10 = vadd.f32 %v12019_v13, %v5191_v43  ;;  %8261 = vmatmul.msk.f32.gmra.mxu1 %vm1434_vm1, %v4962_v21 }
 0x4d5   : > { %v4253_v58 = vadd.f32 %v14581_v0, %v3783_v1  ;;  %v3314_v21 = vadd.f32 %v14582_v54, %v2844_v60  ;;  %v14594_v54 = vld [vmem:[#allocation54_spill] sm:$0xff] }
 0x4d6   : > { %v5259_v28 = vmax.f32 %v5227_v10, 0.0  ;;  %v5485_v9 = vsel %vm2355_vm3, %v5449_v56, %v5450_v34  ;;  %v14579_v56 = vld [vmem:[#allocation160_spill] sm:$0xff]  ;;  %v14584_v10 = vld [vmem:[#allocation230_spill] sm:$0xff] }
 0x4d7   : > { %v12282_v36 = vmax.f32 %v5417_v26, %v5485_v9  ;;  %v1815_v47 = vadd.f32 %v14580_v19, %v14579_v56  ;;  %v4723_v37 = vadd.f32 %v14583_v17, %v4253_v58  ;;  %v3784_v16 = vadd.f32 %v14586_v57, %v3314_v21  ;;  %v14593_v19 = vld [vmem:[#allocation235_spill] sm:$0xff]  ;;  %v14599_v57 = vld [vmem:[#allocation109_spill] sm:$0xff] }
 0x4d8   : > { %v5387_v8 = vadd.f32 %v14575_v63, %v5259_v28 }
 0x4d9   : > { %v5128_v33 = vpop.f32.mrf.mxu1  ;;  %v5543_v51 = vmax.f32 %v12244_v53, %v12282_v36  ;;  %v2310_v27 = vadd.f32 %v14585_v6, %v1815_v47  ;;  %v4254_v46 = vadd.f32 %v14590_v23, %v3784_v16  ;;  %v14602_v23 = vld [vmem:[#allocation141_spill] sm:$0xff] }
 0x4da   : > { %v5419_v29 = vmax.f32 %v5387_v8, 0.0  ;;  %v5192_v48 = vadd.f32 %v5128_v33, %v4722_v31  ;;  %v14589_v8 = vld [vmem:[#allocation108_spill] sm:$0xff] }
 0x4db   : > { %v2845_v31 = vadd.f32 %v14587_v62, %v2310_v27 }
 0x4dc   : > { %v5451_v15 = vrot.slane %v5419_v29, 1  ;;  %v5228_v26 = vadd.f32 %v12019_v13, %v5192_v48 }
 0x4dd   : > { %v3315_v1 = vadd.f32 %v14591_v50, %v2845_v31 }
 0x4de   : > { %v5260_v38 = vmax.f32 %v5228_v26, 0.0  ;;  %v5484_v3 = vsel %vm2355_vm3, %v5450_v34, %v5451_v15  ;;  %v14588_v34 = vld [vmem:[#allocation271_spill] sm:$0xff]  ;;  %v14592_v26 = vld [vmem:[#allocation198_spill] sm:$0xff] }
 0x4df   : > { %v12298_v43 = vmax.f32 %v5418_v11, %v5484_v3  ;;  %v1818_v33 = vadd.f32 %v14589_v8, %v14588_v34  ;;  %v4724_v56 = vadd.f32 %v14592_v26, %v4254_v46  ;;  %v14601_v8 = vld [vmem:[#allocation52_spill] sm:$0xff] }
 0x4e0   : > { %v5388_v41 = vadd.f32 %v14584_v10, %v5260_v38  ;;  %v14595_v38 = vld [vmem:[#allocation53_spill] sm:$0xff]  ;;  %v14596_v10 = vld [vmem:[#allocation164_spill] sm:$0xff] }
 0x4e1   : > { %v5131_v59 = vpop.f32.mrf.mxu1  ;;  %v5544_v22 = vmax.f32 %v12263_v18, %v12298_v43  ;;  %v2311_v21 = vadd.f32 %v14594_v54, %v1818_v33  ;;  %v3785_v3 = vadd.f32 %v14595_v38, %v3315_v1  ;;  %v14604_v26 = vld [vmem:[#allocation196_spill] sm:$0xff]  ;;  %v14607_v38 = vld [vmem:[#allocation242_spill] sm:$0xff] }
 0x4e2   : > { %v5420_v28 = vmax.f32 %v5388_v41, 0.0  ;;  %v5193_v9 = vadd.f32 %v5131_v59, %v4723_v37 }
 0x4e3   : > { %v2846_v41 = vadd.f32 %v14596_v10, %v2311_v21  ;;  %v4255_v16 = vadd.f32 %v14599_v57, %v3785_v3 }
 0x4e4   : > { %v5452_v63 = vrot.slane %v5420_v28, 1  ;;  %v5229_v11 = vadd.f32 %v12019_v13, %v5193_v9  ;;  %v14600_v9 = vld [vmem:[#allocation120_spill] sm:$0xff] }
 0x4e5   : > { %v3316_v62 = vadd.f32 %v14600_v9, %v2846_v41  ;;  %v4725_v33 = vadd.f32 %v14601_v8, %v4255_v16  ;;  %v14609_v41 = vld [vmem:[#allocation114_spill] sm:$0xff]  ;;  %v14611_v8 = vld [vmem:[#allocation168_spill] sm:$0xff] }
 0x4e6   : > { %v5261_v48 = vmax.f32 %v5229_v11, 0.0  ;;  %v5483_v39 = vsel %vm2355_vm3, %v5451_v15, %v5452_v63  ;;  %v14597_v15 = vld [vmem:[#allocation181_spill] sm:$0xff]  ;;  %v14610_v16 = vld [vmem:[#allocation202_spill] sm:$0xff] }
 0x4e7   : > { %v5515_v60 = vmax.f32 %v5419_v29, %v5483_v39  ;;  %v14598_v29 = vld [vmem:[#allocation236_spill] sm:$0xff] }
 0x4e8   : > { %v5389_v47 = vadd.f32 %v14593_v19, %v5261_v48  ;;  %v1821_v27 = vadd.f32 %v14598_v29, %v14597_v15  ;;  %v14603_v48 = vld [vmem:[#allocation185_spill] sm:$0xff] }
 0x4e9   : > { %v5134_v0 = vpop.f32.mrf.mxu1  ;;  %v5545_v58 = vmax.f32 %v12282_v36, %v5515_v60  ;;  %v14619_v36 = vld [vmem:[#allocation131_spill] sm:$0xff] }
 0x4ea   : > { %v5421_v17 = vmax.f32 %v5389_v47, 0.0  ;;  %v5194_v37 = vadd.f32 %v5134_v0, %v4724_v56  ;;  %v2312_v39 = vadd.f32 %v14603_v48, %v1821_v27  ;;  %v3786_v56 = vadd.f32 %v14604_v26, %v3316_v62  ;;  %v14605_v0 = vld [vmem:[#allocation110_spill] sm:$0xff]  ;;  %v5315_v27 = vpop.permute.xlu2 %5314 }
 0x4ec   : > { %v5453_v59 = vrot.slane %v5421_v17, 1  ;;  %v5230_v6 = vadd.f32 %v12019_v13, %v5194_v37  ;;  %v2847_v54 = vadd.f32 %v14605_v0, %v2312_v39  ;;  %v14608_v37 = vld [vmem:[#allocation214_spill] sm:$0xff]  ;;  %v14613_v39 = vld [vmem:[#allocation171_spill] sm:$0xff]  ;;  %v14615_v0 = vld [vmem:[#allocation220_spill] sm:$0xff] }
 0x4ed   : > { %v4256_v10 = vadd.f32 %v14608_v37, %v3786_v56 }
 0x4ee   : > { %v5262_v31 = vmax.f32 %v5230_v6, 0.0  ;;  %v5482_v11 = vsel %vm2355_vm3, %v5452_v63, %v5453_v59  ;;  %v14606_v63 = vld [vmem:[#allocation58_spill] sm:$0xff]  ;;  %v3317_v6 = vadd.f32 %v14609_v41, %v2847_v54 }
 0x4ef   : > { %v12327_v34 = vmax.f32 %v5420_v28, %v5482_v11  ;;  %v1824_v3 = vadd.f32 %v14607_v38, %v14606_v63  ;;  %v4726_v9 = vadd.f32 %v14610_v16, %v4256_v10  ;;  %v5317_v63 = vpop.permute.xlu0 %5316 }
 0x4f0   : > { %v5390_v46 = vadd.f32 %v14602_v23, %v5262_v31  ;;  %v14612_v23 = vld [vmem:[#allocation204_spill] sm:$0xff] }
 0x4f1   : > { %v5137_v50 = vpop.f32.mrf.mxu1  ;;  %v5546_v1 = vmax.f32 %v12298_v43, %v12327_v34  ;;  %v14618_v43 = vld [vmem:[#allocation135_spill] sm:$0xff] }
 0x4f2   : > { %v5422_v19 = vmax.f32 %v5390_v46, 0.0  ;;  %v5195_v47 = vadd.f32 %v5137_v50, %v4725_v33  ;;  %v2313_v33 = vadd.f32 %v14611_v8, %v1824_v3  ;;  %v3787_v46 = vadd.f32 %v14612_v23, %v3317_v6  ;;  %v14616_v3 = vld [vmem:[#allocation118_spill] sm:$0xff]  ;;  %v14617_v6 = vld [vmem:[#allocation208_spill] sm:$0xff]  ;;  %v4215_v23 = vpop.f32.mrf.mxu3 }
 0x4f3   : > { %v14621_v8 = vld [vmem:[#allocation258_spill] sm:$0xff] }
 0x4f4   : > { %v5454_v21 = vrot.slane %v5422_v19, 1  ;;  %v5231_v28 = vadd.f32 %v12019_v13, %v5195_v47  ;;  %v2848_v26 = vadd.f32 %v14613_v39, %v2313_v33  ;;  %v14623_v39 = vld [vmem:[#allocation129_spill] sm:$0xff] }
 0x4f6   : > { %v5263_v15 = vmax.f32 %v5231_v28, 0.0  ;;  %v5481_v29 = vsel %vm2355_vm3, %v5453_v59, %v5454_v21  ;;  %v3318_v54 = vadd.f32 %v14615_v0, %v2848_v26 }
 0x4f7   : > { %v12343_v57 = vmax.f32 %v5421_v17, %v5481_v29  ;;  %v14614_v17 = vld [vmem:[#allocation126_spill] sm:$0xff] }
 0x4f8   : > { %v5391_v62 = vadd.f32 %v5315_v27, %v5263_v15  ;;  %v4257_v47 = vadd.f32 %v14614_v17, %v3787_v46  ;;  %v3788_v15 = vadd.f32 %v14617_v6, %v3318_v54  ;;  %v14622_v46 = vld [vmem:[#allocation142_spill] sm:$0xff]  ;;  %v14627_v54 = vld [vmem:[#allocation85_spill] sm:$0xff] }
 0x4f9   : > { %v5140_v31 = vpop.f32.mrf.mxu1  ;;  %v5547_v11 = vmax.f32 %v5515_v60, %v12343_v57 }
 0x4fa   : > { %v5423_v50 = vmax.f32 %v5391_v62, 0.0  ;;  %v5196_v48 = vadd.f32 %v5140_v31, %v4726_v9  ;;  %v4727_v37 = vadd.f32 %v14616_v3, %v4257_v47  ;;  %v4218_v6 = vpop.f32.mrf.mxu3 }
 0x4fb   : > { %5580 = vmatpush.msra.mxu2 %v5547_v11 }
 0x4fc   : > { %v5455_v56 = vrot.slane %v5423_v50, 1  ;;  %v5232_v59 = vadd.f32 %v12019_v13, %v5196_v48  ;;  %v4685_v48 = vpop.f32.mrf.mxu0 }
 0x4fd   : > { %5581 = vmatpush.msra.mxu2 %v5546_v1 }
 0x4fe   : > { %v5264_v28 = vmax.f32 %v5232_v59, 0.0  ;;  %v5480_v60 = vsel %vm2355_vm3, %v5454_v21, %v5455_v56  ;;  %v14624_v59 = vld [vmem:[#allocation134_spill] sm:$0xff] }
 0x4ff   : > { %5582 = vmatpush.msra.mxu2 %v5545_v58  ;;  %v12355_v38 = vmax.f32 %v5422_v19, %v5480_v60 }
 0x500   : > { %v5392_v10 = vadd.f32 %v5317_v63, %v5264_v28  ;;  %v14628_v28 = vld [vmem:[#allocation264_spill] sm:$0xff]  ;;  %v14629_v63 = vld [vmem:[#allocation213_spill] sm:$0xff] }
 0x501   : > { %v5143_v41 = vpop.f32.mrf.mxu1  ;;  %5583 = vmatpush.msra.mxu2 %v5544_v22  ;;  %v5548_v1 = vmax.f32 %v12327_v34, %v12355_v38  ;;  %v4258_v22 = vadd.f32 %v14618_v43, %v3788_v15  ;;  %v1836_v60 = vadd.f32 %v14628_v28, %v14627_v54  ;;  %v14633_v43 = vld [vmem:[#allocation123_spill] sm:$0xff] }
 0x502   : > { %v5424_v29 = vmax.f32 %v5392_v10, 0.0  ;;  %v5197_v27 = vadd.f32 %v5143_v41, %v4727_v37  ;;  %v5575_v34 = vld [vmem:[#allocation11 + $0x58] sm:$0xff] }
 0x503   : > { %5584 = vmatpush.msra.mxu2 %v5543_v51  ;;  %v4728_v51 = vadd.f32 %v14619_v36, %v4258_v22  ;;  %v14634_v36 = vld [vmem:[#allocation71_spill] sm:$0xff] }
 0x504   : > { %v5456_v58 = vrot.slane %v5424_v29, 1  ;;  %v5233_v19 = vadd.f32 %v12019_v13, %v5197_v27 }
 0x505   : > { %5585 = vmatpush.msra.mxu2 %v5542_v61 }
 0x506   : > { %v5265_v21 = vmax.f32 %v5233_v19, 0.0  ;;  %v5479_v16 = vsel %vm2355_vm3, %v5455_v56, %v5456_v58 }
 0x507   : > { %5586 = vmatpush.msra.mxu2 %v5541_v5  ;;  %v12377_v9 = vmax.f32 %v5423_v50, %v5479_v16  ;;  %v4688_v16 = vpop.f32.mrf.mxu0 }
 0x508   : > { %v5393_v62 = vadd.f32 %v12052_v52, %v5265_v21  ;;  %v14620_v52 = vld [vmem:[#allocation205_spill] sm:$0xff] }
 0x509   : > { %v5146_v31 = vpop.f32.mrf.mxu1  ;;  %5587 = vmatpush.msra.mxu2 %v5540_v12  ;;  %v5549_v18 = vmax.f32 %v12343_v57, %v12377_v9  ;;  %v1833_v35 = vadd.f32 %v14621_v8, %v14620_v52  ;;  %v5664_v57 = vld [vmem:[#allocation13 + $0x10] sm:$0xff] }
 0x50a   : > { %v5425_v61 = vmax.f32 %v5393_v62, 0.0  ;;  %v5198_v11 = vadd.f32 %v5146_v31, %v4728_v51  ;;  %v14635_v31 = vld [vmem:[#allocation82_spill] sm:$0xff] }
 0x50b   : > { %5588 = vmatpush.msra.mxu2 %v5539_v25  ;;  %v3745_v25 = vpop.f32.mrf.mxu2  ;;  %v2316_v26 = vadd.f32 %v14623_v39, %v1833_v35  ;;  %v14639_v39 = vld [vmem:[#allocation119_spill] sm:$0xff] }
 0x50c   : > { %v5457_v53 = vrot.slane %v5425_v61, 1  ;;  %v5234_v5 = vadd.f32 %v12019_v13, %v5198_v11 }
 0x50d   : > { %5589 = vmatpush.msra.mxu2 %v5538_v45 }
 0x50e   : > { %v5266_v12 = vmax.f32 %v5234_v5, 0.0  ;;  %v5478_v33 = vsel %vm2355_vm3, %v5456_v58, %v5457_v53  ;;  %v14637_v5 = vld [vmem:[#allocation137_spill] sm:$0xff] }
 0x50f   : > { %5590 = vmatpush.msra.mxu2 %v5537_v14  ;;  %v12400_v49 = vmax.f32 %v5424_v29, %v5478_v33  ;;  %v14625_v14 = vld [vmem:[#allocation93_spill] sm:$0xff]  ;;  %v14632_v29 = vld [vmem:[#allocation210_spill] sm:$0xff] }
 0x510   : > { %v5394_v50 = vadd.f32 %v14622_v46, %v5266_v12  ;;  %v2851_v17 = vadd.f32 %v14625_v14, %v2316_v26  ;;  %v2317_v27 = vadd.f32 %v14632_v29, %v1836_v60  ;;  %v4691_v60 = vpop.f32.mrf.mxu0 }
 0x511   : > { %v5149_v55 = vpop.f32.mrf.mxu1  ;;  %5591 = vmatpush.msra.mxu2 %v5536_v20  ;;  %v5550_v45 = vmax.f32 %v12355_v38, %v12400_v49  ;;  %v5533_v20 = vmax.f32 %v14626_v42, %v12095_v40  ;;  %v5577_v38 = vld [vmem:[#allocation11 + $0x68] sm:$0xff] }
 0x512   : > { %v5426_v56 = vmax.f32 %v5394_v50, 0.0  ;;  %v5199_v24 = vadd.f32 %v5149_v55, %v14624_v59  ;;  %v3321_v3 = vadd.f32 %v14629_v63, %v2851_v17  ;;  %v4221_v17 = vpop.f32.mrf.mxu3 }
 0x513   : > { %5592 = vmatpush.msra.mxu2 %v5535_v32  ;;  %v14630_v32 = vld [vmem:[#allocation151_spill] sm:$0xff]  ;;  %v3748_v21 = vpop.f32.mrf.mxu2 }
 0x514   : > { %v5458_v47 = vrot.slane %v5426_v56, 1  ;;  %v5235_v0 = vadd.f32 %v12019_v13, %v5199_v24  ;;  %v5532_v10 = vmax.f32 %v14630_v32, %v12083_v7  ;;  %v3791_v58 = vadd.f32 %v3745_v25, %v3321_v3  ;;  %v14638_v25 = vld [vmem:[#allocation144_spill] sm:$0xff] }
 0x515   : > { %5593 = vmatpush.msra.mxu2 %v5534_v4  ;;  %v2852_v7 = vadd.f32 %v14634_v36, %v2317_v27  ;;  %v14643_v3 = vld [vmem:[#allocation128_spill] sm:$0xff] }
 0x516   : > { %v5267_v37 = vmax.f32 %v5235_v0, 0.0  ;;  %v5477_v2 = vsel %vm2355_vm3, %v5457_v53, %v5458_v47  ;;  %v4261_v53 = vadd.f32 %v4215_v23, %v3791_v58  ;;  %v14640_v0 = vld [vmem:[#allocation178_spill] sm:$0xff] }
 0x517   : > { %5594 = vmatpush.msra.mxu2 %v5533_v20  ;;  %v12427_v41 = vmax.f32 %v5425_v61, %v5477_v2  ;;  %v14636_v61 = vld [vmem:[#allocation269_spill] sm:$0xff]  ;;  %v3322_v52 = vadd.f32 %v14637_v5, %v2852_v7 }
 0x518   : > { %v5395_v4 = vadd.f32 %v14631_v30, %v5267_v37  ;;  %v1839_v11 = vadd.f32 %v14636_v61, %v14635_v31  ;;  %v4731_v33 = vadd.f32 %v4685_v48, %v4261_v53  ;;  %v14642_v48 = vld [vmem:[#allocation162_spill] sm:$0xff]  ;;  %v14646_v7 = vld [vmem:[#allocation73_spill] sm:$0xff] }
 0x519   : > { %v5152_v15 = vpop.f32.mrf.mxu1  ;;  %5595 = vmatpush.msra.mxu2 %v5532_v10  ;;  %v5551_v40 = vmax.f32 %v12377_v9, %v12427_v41  ;;  %v3792_v59 = vadd.f32 %v3748_v21, %v3322_v52  ;;  %v14649_v52 = vld [vmem:[#allocation145_spill] sm:$0xff] }
 0x51a   : > { %v5427_v19 = vmax.f32 %v5395_v4, 0.0  ;;  %v5200_v22 = vadd.f32 %v5152_v15, %v14633_v43  ;;  %v2318_v26 = vadd.f32 %v14639_v39, %v1839_v11  ;;  %v14644_v15 = vld [vmem:[#allocation249_spill] sm:$0xff]  ;;  %v14645_v43 = vld [vmem:[#allocation124_spill] sm:$0xff]  ;;  %v4224_v53 = vpop.f32.mrf.mxu3 }
 0x51b   : > { %v3751_v14 = vpop.f32.mrf.mxu2  ;;  %v4262_v63 = vadd.f32 %v4218_v6, %v3792_v59  ;;  %v14650_v39 = vld [vmem:[#allocation148_spill] sm:$0xff]  ;;  %5706 = vmatpush.msrb.mxu2 %v5664_v57 }
 0x51c   : > { %v5459_v51 = vrot.slane %v5427_v19, 1  ;;  %v5236_v62 = vadd.f32 %v12019_v13, %v5200_v22  ;;  %v2853_v20 = vadd.f32 %v14640_v0, %v2318_v26  ;;  %v5573_v9 = vld [vmem:[#allocation11 + $0x48] sm:$0xff] }
 0x51d   : > { %v4732_v4 = vadd.f32 %v4688_v16, %v4262_v63  ;;  %v14653_v63 = vld [vmem:[#allocation179_spill] sm:$0xff] }
 0x51e   : > { %v5268_v8 = vmax.f32 %v5236_v62, 0.0  ;;  %v5476_v35 = vsel %vm2355_vm3, %v5458_v47, %v5459_v51  ;;  %v14641_v47 = vld [vmem:[#allocation79_spill] sm:$0xff]  ;;  %v3323_v37 = vadd.f32 %v14643_v3, %v2853_v20 }
 0x51f   : > { %v12441_v12 = vmax.f32 %v5426_v56, %v5476_v35  ;;  %v1842_v28 = vadd.f32 %v14642_v48, %v14641_v47  ;;  %v14652_v47 = vld [vmem:[#allocation86_spill] sm:$0xff] }
 0x520   : > { %v5396_v46 = vadd.f32 %v14638_v25, %v5268_v8  ;;  %v3793_v21 = vadd.f32 %v3751_v14, %v3323_v37  ;;  %v4694_v25 = vpop.f32.mrf.mxu0  ;;  %v14651_v14 = vld [vmem:[#allocation75_spill] sm:$0xff] }
 0x521   : > { %v5155_v50 = vpop.f32.mrf.mxu1  ;;  %v5552_v55 = vmax.f32 %v12400_v49, %v12441_v12  ;;  %v2319_v22 = vadd.f32 %v14645_v43, %v1842_v28  ;;  %v14655_v37 = vld [vmem:[#allocation223_spill] sm:$0xff] }
 0x522   : > { %v5428_v24 = vmax.f32 %v5396_v46, 0.0  ;;  %v5201_v23 = vadd.f32 %v5155_v50, %v4731_v33  ;;  %v4263_v5 = vadd.f32 %v4221_v17, %v3793_v21  ;;  %v5571_v49 = vld [vmem:[#allocation11 + $0x38] sm:$0xff] }
 0x523   : > { %v2854_v62 = vadd.f32 %v14646_v7, %v2319_v22  ;;  %v3754_v16 = vpop.f32.mrf.mxu2  ;;  %v14656_v22 = vld [vmem:[#allocation241_spill] sm:$0xff] }
 0x524   : > { %v5460_v54 = vrot.slane %v5428_v24, 1  ;;  %v5237_v56 = vadd.f32 %v12019_v13, %v5201_v23  ;;  %v4733_v50 = vadd.f32 %v4691_v60, %v4263_v5 }
 0x525   : > { %v3324_v8 = vadd.f32 %v14649_v52, %v2854_v62 }
 0x526   : > { %v5269_v2 = vmax.f32 %v5237_v56, 0.0  ;;  %v5475_v10 = vsel %vm2355_vm3, %v5459_v51, %v5460_v54  ;;  %v14647_v51 = vld [vmem:[#allocation84_spill] sm:$0xff] }
 0x527   : > { %v12454_v30 = vmax.f32 %v5427_v19, %v5475_v10  ;;  %v14648_v19 = vld [vmem:[#allocation74_spill] sm:$0xff]  ;;  %v3794_v20 = vadd.f32 %v3754_v16, %v3324_v8  ;;  %v14660_v8 = vld [vmem:[#allocation200_spill] sm:$0xff] }
 0x528   : > { %v5397_v29 = vadd.f32 %v14644_v15, %v5269_v2  ;;  %v1845_v11 = vadd.f32 %v14648_v19, %v14647_v51 }
 0x529   : > { %v5158_v27 = vpop.f32.mrf.mxu1  ;;  %v5553_v58 = vmax.f32 %v12427_v41, %v12454_v30  ;;  %v4264_v60 = vadd.f32 %v4224_v53, %v3794_v20  ;;  %v14658_v53 = vld [vmem:[#allocation90_spill] sm:$0xff]  ;;  %v5569_v41 = vld [vmem:[#allocation11 + $0x28] sm:$0xff] }
 0x52a   : > { %v5429_v36 = vmax.f32 %v5397_v29, 0.0  ;;  %v5202_v6 = vadd.f32 %v5158_v27, %v4732_v4  ;;  %v2320_v0 = vadd.f32 %v14651_v14, %v1845_v11  ;;  %v4227_v29 = vpop.f32.mrf.mxu3  ;;  %v14662_v20 = vld [vmem:[#allocation66_spill] sm:$0xff] }
 0x52b   : > { %v3757_v15 = vpop.f32.mrf.mxu2  ;;  %v4734_v43 = vadd.f32 %v4694_v25, %v4264_v60  ;;  %v14661_v25 = vld [vmem:[#allocation87_spill] sm:$0xff] }
 0x52c   : > { %v5461_v31 = vrot.slane %v5429_v36, 1  ;;  %v5238_v61 = vadd.f32 %v12019_v13, %v5202_v6  ;;  %v2855_v48 = vadd.f32 %v14652_v47, %v2320_v0  ;;  %v4697_v6 = vpop.f32.mrf.mxu0 }
 0x52e   : > { %v5270_v35 = vmax.f32 %v5238_v61, 0.0  ;;  %v5474_v33 = vsel %vm2355_vm3, %v5460_v54, %v5461_v31  ;;  %v3325_v2 = vadd.f32 %v14655_v37, %v2855_v48  ;;  %v14657_v61 = vld [vmem:[#allocation182_spill] sm:$0xff] }
 0x52f   : > { %v12467_v46 = vmax.f32 %v5428_v24, %v5474_v33  ;;  %v14654_v24 = vld [vmem:[#allocation62_spill] sm:$0xff] }
 0x530   : > { %v5398_v26 = vadd.f32 %v14650_v39, %v5270_v35  ;;  %v1848_v3 = vadd.f32 %v14654_v24, %v14653_v63  ;;  %v3795_v19 = vadd.f32 %v3757_v15, %v3325_v2  ;;  %v14664_v2 = vld [vmem:[#allocation244_spill] sm:$0xff] }
 0x531   : > { %v5161_v59 = vpop.f32.mrf.mxu1  ;;  %v5554_v23 = vmax.f32 %v12441_v12, %v12467_v46  ;;  %v5567_v12 = vld [vmem:[#allocation11 + $0x18] sm:$0xff] }
 0x532   : > { %v5430_v17 = vmax.f32 %v5398_v26, 0.0  ;;  %v5203_v56 = vadd.f32 %v5161_v59, %v4733_v50  ;;  %v2321_v51 = vadd.f32 %v14657_v61, %v1848_v3  ;;  %v4265_v33 = vadd.f32 %v4227_v29, %v3795_v19  ;;  %v4230_v47 = vpop.f32.mrf.mxu3  ;;  %v14665_v29 = vld [vmem:[#allocation245_spill] sm:$0xff]  ;;  %v14666_v61 = vld [vmem:[#allocation80_spill] sm:$0xff] }
 0x533   : > { %v3760_v59 = vpop.f32.mrf.mxu2 }
 0x534   : > { %v5462_v28 = vrot.slane %v5430_v17, 1  ;;  %v5239_v54 = vadd.f32 %v12019_v13, %v5203_v56  ;;  %v2856_v5 = vadd.f32 %v14658_v53, %v2321_v51  ;;  %v4735_v0 = vadd.f32 %v4697_v6, %v4265_v33  ;;  %v4700_v37 = vpop.f32.mrf.mxu0 }
 0x536   : > { %v5271_v10 = vmax.f32 %v5239_v54, 0.0  ;;  %v5473_v4 = vsel %vm2355_vm3, %v5461_v31, %v5462_v28  ;;  %v3326_v50 = vadd.f32 %v14661_v25, %v2856_v5  ;;  %v14663_v54 = vld [vmem:[#allocation191_spill] sm:$0xff] }
 0x537   : > { %v12480_v27 = vmax.f32 %v5429_v36, %v5473_v4  ;;  %v14659_v36 = vld [vmem:[#allocation186_spill] sm:$0xff]  ;;  %v8743_v4 = vld [vmem:[#allocation8] ss:$0 sm:$0xff] }
 0x538   : > { %v5399_v21 = vadd.f32 %v14656_v22, %v5271_v10  ;;  %v1851_v35 = vadd.f32 %v14660_v8, %v14659_v36  ;;  %v3796_v24 = vadd.f32 %v3760_v59, %v3326_v50  ;;  %v14667_v59 = vld [vmem:[#allocation218_spill] sm:$0xff] }
 0x539   : > { %v5164_v7 = vpop.f32.mrf.mxu1  ;;  %v5555_v62 = vmax.f32 %v12454_v30, %v12480_v27  ;;  %v5572_v30 = vld [vmem:[#allocation11 + $0x40] sm:$0xff] }
 0x53a   : > { %v5431_v11 = vmax.f32 %v5399_v21, 0.0  ;;  %v5204_v16 = vadd.f32 %v5164_v7, %v4734_v43  ;;  %v2322_v63 = vadd.f32 %v14663_v54, %v1851_v35  ;;  %v4266_v15 = vadd.f32 %v4230_v47, %v3796_v24  ;;  %v4233_v8 = vpop.f32.mrf.mxu3 }
 0x53b   : > { %v3763_v19 = vpop.f32.mrf.mxu2 }
 0x53c   : > { %v5463_v31 = vrot.slane %v5431_v11, 1  ;;  %v5240_v52 = vadd.f32 %v12019_v13, %v5204_v16  ;;  %v2857_v10 = vadd.f32 %v14664_v2, %v2322_v63  ;;  %v4736_v7 = vadd.f32 %v4700_v37, %v4266_v15  ;;  %v4703_v25 = vpop.f32.mrf.mxu0  ;;  %v14668_v2 = vld [vmem:[#allocation216_spill] sm:$0xff] }
 0x53d   : > { %v14669_v15 = vld [vmem:[#allocation252_spill] sm:$0xff] }
 0x53e   : > { %v5272_v39 = vmax.f32 %v5240_v52, 0.0  ;;  %v5472_v26 = vsel %vm2355_vm3, %v5462_v28, %v5463_v31  ;;  %v3327_v43 = vadd.f32 %v14665_v29, %v2857_v10 }
 0x53f   : > { %v12493_v14 = vmax.f32 %v5430_v17, %v5472_v26 }
 0x540   : > { %v5400_v56 = vadd.f32 %v14662_v20, %v5272_v39  ;;  %v3797_v5 = vadd.f32 %v3763_v19, %v3327_v43  ;;  %v5566_v19 = vld [vmem:[#allocation11 + $0x10] sm:$0xff] }
 0x541   : > { %v5167_v48 = vpop.f32.mrf.mxu1  ;;  %v5556_v13 = vmax.f32 %v12467_v46, %v12493_v14 }
 0x542   : > { %v5432_v3 = vmax.f32 %v5400_v56, 0.0  ;;  %v5205_v60 = vadd.f32 %v5167_v48, %v4735_v0  ;;  %v4267_v50 = vadd.f32 %v4233_v8, %v3797_v5 }
 0x544   : > { %v5464_v28 = vrot.slane %v5432_v3, 1  ;;  %v5241_v17 = vadd.f32 %v8743_v4, %v5205_v60  ;;  %v4737_v26 = vadd.f32 %v4703_v25, %v4267_v50 }
 0x546   : > { %v5273_v22 = vmax.f32 %v5241_v17, 0.0  ;;  %v5471_v21 = vsel %vm2355_vm3, %v5463_v31, %v5464_v28 }
 0x547   : > { %v5527_v6 = vmax.f32 %v5431_v11, %v5471_v21 }
 0x548   : > { %v5401_v51 = vadd.f32 %v14666_v61, %v5273_v22 }
 0x549   : > { %v5170_v16 = vpop.f32.mrf.mxu1  ;;  %v5557_v53 = vmax.f32 %v12480_v27, %v5527_v6  ;;  %v12546_v27 = vpop.permute.xlu0 %5775 }
 0x54a   : > { %v5433_v52 = vmax.f32 %v5401_v51, 0.0  ;;  %v5206_v36 = vadd.f32 %v5170_v16, %v4736_v7  ;;  %v5564_v51 = vld [vmem:[#allocation11] sm:$0xff] }
 0x54b   : > { %5596 = vmatmul.f32.vlgmr.msra.gmra.mxu2 %v5564_v51  ;;  %v5568_v16 = vld [vmem:[#allocation11 + $0x20] sm:$0xff] }
 0x54c   : > { %v5465_v35 = vrot.slane %v5433_v52, 1  ;;  %v5242_v33 = vadd.f32 %v8743_v4, %v5206_v36 }
 0x54e   : > { %v5274_v39 = vmax.f32 %v5242_v33, 0.0  ;;  %v5470_v31 = vsel %vm2355_vm3, %v5464_v28, %v5465_v35 }
 0x54f   : > { %v5528_v11 = vmax.f32 %v5432_v3, %v5470_v31 }
 0x550   : > { %v5402_v0 = vadd.f32 %v14667_v59, %v5274_v39 }
 0x551   : > { %v5173_v20 = vpop.f32.mrf.mxu1  ;;  %v5558_v56 = vmax.f32 %v12493_v14, %v5528_v11  ;;  %v12551_v5 = vpop.permute.xlu0 %5790 }
 0x552   : > { %v5434_v47 = vmax.f32 %v5402_v0, 0.0  ;;  %v5207_v48 = vadd.f32 %v5173_v20, %v4737_v26 }
 0x553   : > { %5599 = vmatmul.f32.gmra.mxu2 %v5566_v19 }
 0x554   : > { %v5466_v54 = vrot.slane %v5434_v47, 1  ;;  %v5243_v63 = vadd.f32 %v8743_v4, %v5207_v48  ;;  %v8274_v48 = vld [vmem:[%s13621_s9 + $0xe0] sm:$0xff] }
 0x556   : > { %v5275_v24 = vmax.f32 %v5243_v63, 0.0  ;;  %v5469_v60 = vsel %vm2355_vm3, %v5465_v35, %v5466_v54 }
 0x557   : > { %v5529_v37 = vmax.f32 %v5433_v52, %v5469_v60  ;;  %v12553_v52 = vpop.permute.xlu2 %5785 }
 0x558   : > { %v5403_v10 = vadd.f32 %v14668_v2, %v5275_v24 }
 0x559   : > { %v5559_v17 = vmax.f32 %v5527_v6, %v5529_v37  ;;  %v12558_v25 = vpop.permute.xlu0 %5805 }
 0x55a   : > { %v5435_v28 = vmax.f32 %v5403_v10, 0.0 }
 0x55b   : > { %5602 = vmatmul.f32.gmra.mxu2 %v5568_v16 }
 0x55c   : > { %v5467_v3 = vrot.slane %v5435_v28, 1 }
 0x55e   : > { %v5499_v29 = vsel %vm2355_vm3, %v5467_v3, %v14669_v15  ;;  %v5468_v43 = vsel %vm2355_vm3, %v5466_v54, %v5467_v3  ;;  %v8273_v54 = vld [vmem:[%s13621_s9 + $0xd8] sm:$0xff] }
 0x55f   : > { %v5531_v22 = vmax.f32 %v5435_v28, %v5499_v29  ;;  %v5530_v21 = vmax.f32 %v5434_v47, %v5468_v43  ;;  %v12560_v39 = vpop.permute.xlu2 %5800  ;;  %v8275_v47 = vld [vmem:[%s13621_s9 + $0xe8] sm:$0xff] }
 0x561   : > { %v5563_v4 = vmax.f32 %v5531_v22, %v14626_v42  ;;  %v5561_v7 = vmax.f32 %v5529_v37, %v5531_v22  ;;  %v5560_v61 = vmax.f32 %v5528_v11, %v5530_v21  ;;  %v5562_v6 = vmax.f32 %v5530_v21, %v14630_v32  ;;  %v5570_v42 = vld [vmem:[#allocation11 + $0x30] sm:$0xff]  ;;  %v5565_v32 = vld [vmem:[#allocation11 + $0x8] sm:$0xff]  ;;  %v12565_v20 = vpop.permute.xlu0 %5974 }
 0x563   : > { %5621 = vmatpush.msra.mxu3 %v5563_v4  ;;  %5605 = vmatmul.f32.gmra.mxu2 %v5570_v42 }
 0x565   : > { %5622 = vmatpush.msra.mxu3 %v5562_v6 }
 0x567   : > { %5623 = vmatpush.msra.mxu3 %v5561_v7 }
 0x569   : > { %5624 = vmatpush.msra.mxu3 %v5560_v61  ;;  %v12582_v2 = vpop.permute.xlu0 %5989 }
 0x56b   : > { %5625 = vmatpush.msra.mxu3 %v5559_v17  ;;  %5608 = vmatmul.f32.gmra.mxu2 %v5572_v30 }
 0x56d   : > { %5626 = vmatpush.msra.mxu3 %v5558_v56  ;;  %v12567_v56 = vpop.permute.xlu2 %5969 }
 0x56f   : > { %5627 = vmatpush.msra.mxu3 %v5557_v53  ;;  %v12549_v53 = vpop.permute.xlu1 %5780 }
 0x571   : > { %5628 = vmatpush.msra.mxu3 %v5556_v13  ;;  %v12589_v29 = vpop.permute.xlu0 %6004 }
 0x572   : > { %14670 = vst [vmem:[#allocation156_spill] sm:$0xff] %v12589_v29 }
 0x573   : > { %5629 = vmatpush.msra.mxu3 %v5555_v62 }
 0x575   : > { %5630 = vmatpush.msra.mxu3 %v5554_v23  ;;  %v12584_v10 = vpop.permute.xlu2 %5984 }
 0x577   : > { %5631 = vmatpush.msra.mxu3 %v5553_v58  ;;  %v5662_v58 = vld [vmem:[#allocation13] sm:$0xff]  ;;  %v12556_v33 = vpop.permute.xlu1 %5795 }
 0x579   : > { %5632 = vmatpush.msra.mxu3 %v5552_v55  ;;  %v5574_v55 = vld [vmem:[#allocation11 + $0x50] sm:$0xff]  ;;  %v12596_v61 = vpop.permute.xlu0 %6127 }
 0x57a   : > { %5611 = vmatmul.f32.gmra.mxu2 %v5574_v55 }
 0x57b   : > { %5633 = vmatpush.msra.mxu3 %v5551_v40  ;;  %v5576_v40 = vld [vmem:[#allocation11 + $0x60] sm:$0xff] }
 0x57d   : > { %5634 = vmatpush.msra.mxu3 %v5550_v45  ;;  %v5578_v45 = vld [vmem:[#allocation11 + $0x70] sm:$0xff]  ;;  %v12591_v43 = vpop.permute.xlu2 %5999 }
 0x57f   : > { %5635 = vmatpush.msra.mxu3 %v5549_v18  ;;  %v5663_v18 = vld [vmem:[#allocation13 + $0x8] sm:$0xff]  ;;  %v12563_v59 = vpop.permute.xlu1 %5810 }
 0x580   : > { %5707 = vmatpush.msrb.mxu2 %v5663_v18 }
 0x581   : > { %5636 = vmatpush.msra.mxu3 %v5548_v1  ;;  %v5579_v1 = vld [vmem:[#allocation11 + $0x78] sm:$0xff]  ;;  %v12603_v42 = vpop.permute.xlu0 %6269 }
 0x582   : > { %5637 = vmatmul.f32.vlgmr.msra.gmra.mxu3 %v5565_v32  ;;  %5614 = vmatmul.f32.gmra.mxu2 %v5576_v40  ;;  %14673 = vst [vmem:[#allocation158_spill] sm:$0xff] %v12603_v42 }
 0x583   : > { %5708 = vmatpush.msrb.mxu2 %v5662_v58  ;;  %v8270_v58 = vld [vmem:[%s13621_s9 + $0xc0] sm:$0xff] }
 0x585   : > { %5927 = vmatpush.msra.mxu2 %v8275_v47  ;;  %v12598_v6 = vpop.permute.xlu2 %6259 }
 0x586   : > { %14671 = vst [vmem:[#allocation138_spill] sm:$0xff] %v12598_v6 }
 0x587   : > { %5928 = vmatpush.msra.mxu2 %v8274_v48  ;;  %v12579_v37 = vpop.permute.xlu1 %5979  ;;  %v8366_v48 = vld [vmem:[%s13621_s9 + $0xf0] sm:$0xff] }
 0x589   : > { %5929 = vmatpush.msra.mxu2 %v8273_v54  ;;  %v8388_v54 = vld [vmem:[%s13621_s9 + $0x120] sm:$0xff] }
 0x58a   : > { %5640 = vmatmul.f32.gmra.mxu3 %v5567_v12  ;;  %5617 = vmatmul.f32.gmra.mxu2 %v5578_v45  ;;  %v12609_v12 = vpop.permute.xlu0 %6142 }
 0x58d   : > { %v12605_v32 = vpop.permute.xlu2 %6132 }
 0x58f   : > { %v12587_v15 = vpop.permute.xlu1 %5994 }
 0x592   : > { %5643 = vmatmul.f32.gmra.mxu3 %v5569_v41  ;;  %v12615_v40 = vpop.permute.xlu0 %6284 }
 0x593   : > { %14676 = vst [vmem:[#allocation170_spill] sm:$0xff] %v12615_v40 }
 0x595   : > { %v12611_v55 = vpop.permute.xlu2 %6274 }
 0x596   : > { %14674 = vst [vmem:[#allocation143_spill] sm:$0xff] %v12611_v55 }
 0x597   : > { %v12594_v7 = vpop.permute.xlu1 %6122 }
 0x59a   : > { %5646 = vmatmul.f32.gmra.mxu3 %v5571_v49  ;;  %v12621_v57 = vpop.permute.xlu0 %6157 }
 0x59d   : > { %v12617_v49 = vpop.permute.xlu2 %6147 }
 0x59f   : > { %v12601_v16 = vpop.permute.xlu1 %6264 }
 0x5a0   : > { %14672 = vst [vmem:[#allocation149_spill] sm:$0xff] %v12601_v16 }
 0x5a2   : > { %5649 = vmatmul.f32.gmra.mxu3 %v5573_v9  ;;  %v6397_v18 = vpop.permute.xlu0 %6396 }
 0x5a5   : > { %v12623_v9 = vpop.permute.xlu2 %6289 }
 0x5a6   : > { %14677 = vst [vmem:[#allocation41_spill] sm:$0xff] %v12623_v9 }
 0x5a7   : > { %v12607_v30 = vpop.permute.xlu1 %6137 }
 0x5aa   : > { %5652 = vmatmul.f32.gmra.mxu3 %v5575_v34  ;;  %v8272_v34 = vld [vmem:[%s13621_s9 + $0xd0] sm:$0xff] }
 0x5ab   : > { %5930 = vmatpush.msra.mxu2 %v8272_v34 }
 0x5af   : > { %v12613_v41 = vpop.permute.xlu1 %6279 }
 0x5b0   : > { %14675 = vst [vmem:[#allocation152_spill] sm:$0xff] %v12613_v41 }
 0x5b2   : > { %5655 = vmatmul.f32.gmra.mxu3 %v5577_v38  ;;  %v8271_v38 = vld [vmem:[%s13621_s9 + $0xc8] sm:$0xff] }
 0x5b3   : > { %5931 = vmatpush.msra.mxu2 %v8271_v38 }
 0x5b5   : > { %5932 = vmatpush.msra.mxu2 %v8270_v58 }
 0x5b7   : > { %v12619_v45 = vpop.permute.xlu1 %6152 }
 0x5ba   : > { %5658 = vmatmul.f32.gmra.mxu3 %v5579_v1 }
 0x5bf   : > { %v12631_v1 = vpop.permute.xlu1 %6294 }
 0x5c0   : > { %14678 = vst [vmem:[#allocation157_spill] sm:$0xff] %v12631_v1 }
 0x5ce   : > { %v5597_v46 = vpop.f32.mrf.mxu2 }
 0x5d6   : > { %v5600_v23 = vpop.f32.mrf.mxu2 }
 0x5de   : > { %v5603_v13 = vpop.f32.mrf.mxu2 }
 0x5e6   : > { %v5606_v35 = vpop.f32.mrf.mxu2 }
 0x5ee   : > { %v5609_v26 = vpop.f32.mrf.mxu2 }
 0x5fd   : > { %v5612_v60 = vpop.f32.mrf.mxu2 }
 0x605   : > { %v5638_v62 = vpop.f32.mrf.mxu3  ;;  %v5615_v3 = vpop.f32.mrf.mxu2 }
 0x606   : > { %v5639_v14 = vadd.f32 %v5638_v62, %v5597_v46  ;;  %v12636_v46 = vpop.permute.xlu2 %6670  ;;  %v8393_v62 = vld [vmem:[%s13621_s9 + $0x148] sm:$0xff] }
 0x607   : > { %6620 = vmatpush.msrb.mxu1 %v8393_v62 }
 0x608   : > { %8262 = vmatmul.msk.f32.vlgmr.msrb.gmra.mxu2 %vm1434_vm1, %v5639_v14  ;;  %v8370_v14 = vld [vmem:[%s13621_s9 + $0x110] sm:$0xff] }
 0x60d   : > { %v5641_v36 = vpop.f32.mrf.mxu3  ;;  %v5618_v4 = vpop.f32.mrf.mxu2 }
 0x60e   : > { %v5642_v8 = vadd.f32 %v5641_v36, %v5600_v23  ;;  %v8371_v23 = vld [vmem:[%s13621_s9 + $0x118] sm:$0xff]  ;;  %v8369_v36 = vld [vmem:[%s13621_s9 + $0x108] sm:$0xff]  ;;  %v6534_v47 = vpop.permute.xlu2 %6533 }
 0x60f   : > { %6483 = vmatpush.msrb.mxu0 %v8371_v23 }
 0x610   : > { %8263 = vmatmul.msk.f32.gmra.mxu2 %vm1434_vm1, %v5642_v8  ;;  %v8391_v8 = vld [vmem:[%s13621_s9 + $0x138] sm:$0xff] }
 0x611   : > { %6484 = vmatpush.msrb.mxu0 %v8370_v14 }
 0x613   : > { %6485 = vmatpush.msrb.mxu0 %v8369_v36 }
 0x615   : > { %v5644_v50 = vpop.f32.mrf.mxu3 }
 0x616   : > { %v5645_v31 = vadd.f32 %v5644_v50, %v5603_v13  ;;  %v8392_v13 = vld [vmem:[%s13621_s9 + $0x140] sm:$0xff] }
 0x617   : > { %6621 = vmatpush.msrb.mxu1 %v8392_v13  ;;  %v8368_v50 = vld [vmem:[%s13621_s9 + $0x100] sm:$0xff] }
 0x618   : > { %8264 = vmatmul.msk.f32.gmra.mxu2 %vm1434_vm1, %v5645_v31  ;;  %v8390_v31 = vld [vmem:[%s13621_s9 + $0x130] sm:$0xff]  ;;  %6486 = vmatpush.msrb.mxu0 %v8368_v50 }
 0x619   : > { %6622 = vmatpush.msrb.mxu1 %v8391_v8 }
 0x61b   : > { %6623 = vmatpush.msrb.mxu1 %v8390_v31 }
 0x61d   : > { %v5647_v11 = vpop.f32.mrf.mxu3 }
 0x61e   : > { %v5648_v0 = vadd.f32 %v5647_v11, %v5606_v35  ;;  %v12656_v35 = vpop.permute.xlu1 %6807  ;;  %v8367_v11 = vld [vmem:[%s13621_s9 + $0xf8] sm:$0xff] }
 0x61f   : > { %14679 = vst [vmem:[#allocation174_spill] sm:$0xff] %v12656_v35  ;;  %6487 = vmatpush.msrb.mxu0 %v8367_v11 }
 0x620   : > { %8265 = vmatmul.msk.f32.gmra.mxu2 %vm1434_vm1, %v5648_v0  ;;  %v8389_v0 = vld [vmem:[%s13621_s9 + $0x128] sm:$0xff] }
 0x621   : > { %6624 = vmatpush.msrb.mxu1 %v8389_v0  ;;  %6488 = vmatpush.msrb.mxu0 %v8366_v48 }
 0x623   : > { %6625 = vmatpush.msrb.mxu1 %v8388_v54 }
 0x625   : > { %v5650_v63 = vpop.f32.mrf.mxu3 }
 0x626   : > { %v5651_v24 = vadd.f32 %v5650_v63, %v5609_v26  ;;  %v12667_v26 = vpop.permute.xlu0 %6675  ;;  %v6402_v63 = vpop.permute.xlu1 %6401 }
 0x628   : > { %8266 = vmatmul.msk.f32.gmra.mxu2 %vm1434_vm1, %v5651_v24 }
 0x62d   : > { %v5653_v17 = vpop.f32.mrf.mxu3 }
 0x62e   : > { %v5654_v28 = vadd.f32 %v5653_v17, %v5612_v60  ;;  %v6539_v24 = vpop.permute.xlu0 %6538  ;;  %v12678_v60 = vpop.permute.xlu2 %6812  ;;  %v12680_v17 = vld [vmem:[#allocation14] ss:$0 sm:$0xff] }
 0x62f   : > { %14680 = vst [vmem:[#allocation43_spill] sm:$0xff] %v12678_v60 }
 0x630   : > { %8267 = vmatmul.msk.f32.gmra.mxu2 %vm1434_vm1, %v5654_v28 }
 0x635   : > { %v5656_v22 = vpop.f32.mrf.mxu3 }
 0x636   : > { %v5657_v21 = vadd.f32 %v5656_v22, %v5615_v3  ;;  %v12682_v3 = vpop.permute.xlu1 %6680 }
 0x638   : > { %8268 = vmatmul.msk.f32.gmra.mxu2 %vm1434_vm1, %v5657_v21  ;;  %v12685_v21 = vpop.permute.xlu0 %6817 }
 0x639   : > { %14681 = vst [vmem:[#allocation159_spill] sm:$0xff] %v12685_v21  ;;  %v5825_v21 = vld [vmem:[%s13621_s9 + $0x20] sm:$0xff] }
 0x63d   : > { %v5659_v51 = vpop.f32.mrf.mxu3 }
 0x63e   : > { %v5660_v19 = vadd.f32 %v5659_v51, %v5618_v4  ;;  %v12687_v4 = vpop.permute.xlu2 %6406  ;;  %v6544_v38 = vpop.permute.xlu1 %6543 }
 0x640   : > { %8269 = vmatmul.msk.f32.gmra.mxu2 %vm1434_vm1, %v5660_v19  ;;  %v12698_v23 = vpop.permute.xlu0 %6411 }
 0x646   : > { %v12700_v62 = vpop.permute.xlu2 %6685 }
 0x68b   : > { %v5710_v28 = vpop.f32.mrf.mxu2 }
 0x68c   : > { %v5711_v22 = vadd.f32 %v12680_v17, %v5710_v28 }
 0x68e   : > { %v12689_v51 = vmax.f32 %v5711_v22, 0.0  ;;  %v12729_v22 = vpop.permute.xlu1 %6822 }
 0x68f   : > { %14682 = vst [vmem:[#allocation167_spill] sm:$0xff] %v12729_v22 }
 0x690   : > { %8284 = vmatmul.msk.f32.vlgmr.msra.gmra.mxu2 %vm5827_vm4, %v12689_v51  ;;  %6953 = vrot.lane.b32.xlu1 %v12689_v51, %s9245_s27  ;;  %v13809_v14 = vrot.slane %v12689_v51, 7  ;;  %v13810_v13 = vrot.slane %v12689_v51, 1 }
 0x693   : > { %v5713_v19 = vpop.f32.mrf.mxu2 }
 0x694   : > { %v5714_v34 = vadd.f32 %v12680_v17, %v5713_v19 }
 0x696   : > { %v12696_v58 = vmax.f32 %v5714_v34, 0.0 }
 0x698   : > { %v5750_v36 = vrot.slane %v12696_v58, 7  ;;  %v6096_v8 = vrot.slane %v12696_v58, 1  ;;  %8285 = vmatmul.msk.f32.gmra.mxu2 %vm5827_vm4, %v12696_v58  ;;  %6955 = vrot.lane.b32.xlu2 %v12696_v58, %s9245_s27 }
 0x69a   : > { %v12714_v50 = vsel %vm2355_vm3, %v13810_v13, %v6096_v8  ;;  %v12720_v31 = vsel %vm1174_vm2, %v13809_v14, %v5750_v36 }
 0x69b   : > { %v5716_v11 = vpop.f32.mrf.mxu2  ;;  %v6434_v0 = vmul.f32 %v6397_v18, %v12714_v50  ;;  %v6571_v48 = vmul.f32 %v6534_v47, %v12720_v31  ;;  %v12735_v18 = vpop.permute.xlu0 %6690  ;;  %v5826_v47 = vld [vmem:[%s13621_s9 + $0x28] sm:$0xff] }
 0x69c   : > { %v5717_v54 = vadd.f32 %v12680_v17, %v5716_v11  ;;  %v6549_v11 = vpop.permute.xlu2 %6548  ;;  %5862 = vmatpush.msrb.mxu3 %v5826_v47  ;;  %v6417_v47 = vpop.permute.xlu1 %6416 }
 0x69d   : > { %8372 = vmatmul.msk.f32.vlgmr.msrb.gmra.mxu0 %vm5827_vm4, %v6434_v0  ;;  %8394 = vmatmul.msk.f32.vlgmr.msrb.gmra.mxu1 %vm5827_vm4, %v6571_v48 }
 0x69e   : > { %v12727_v28 = vmax.f32 %v5717_v54, 0.0  ;;  %5863 = vmatpush.msrb.mxu3 %v5825_v21  ;;  %v5823_v21 = vld [vmem:[%s13621_s9 + $0x10] sm:$0xff] }
 0x6a0   : > { %8286 = vmatmul.msk.f32.gmra.mxu2 %vm5827_vm4, %v12727_v28  ;;  %v6097_v19 = vrot.slane %v12727_v28, 1  ;;  %v5751_v34 = vrot.slane %v12727_v28, 7 }
 0x6a2   : > { %v12742_v0 = vsel %vm2355_vm3, %v6096_v8, %v6097_v19  ;;  %v12746_v48 = vsel %vm1174_vm2, %v5750_v36, %v5751_v34  ;;  %v8327_v36 = vld [vmem:[%s13621_s9 + $0x88] sm:$0xff] }
 0x6a3   : > { %v5719_v54 = vpop.f32.mrf.mxu2  ;;  %v6435_v14 = vmul.f32 %v6402_v63, %v12742_v0  ;;  %v6572_v13 = vmul.f32 %v6539_v24, %v12746_v48  ;;  %6209 = vmatpush.msrb.mxu2 %v8327_v36  ;;  %v5824_v63 = vld [vmem:[%s13621_s9 + $0x18] sm:$0xff]  ;;  %v8326_v24 = vld [vmem:[%s13621_s9 + $0x80] sm:$0xff]  ;;  %v6554_v60 = vpop.permute.xlu0 %6553 }
 0x6a4   : > { %v5720_v22 = vadd.f32 %v12680_v17, %v5719_v54  ;;  %5864 = vmatpush.msrb.mxu3 %v5824_v63  ;;  %v5822_v63 = vld [vmem:[%s13621_s9 + $0x8] sm:$0xff] }
 0x6a5   : > { %8373 = vmatmul.msk.f32.gmra.mxu0 %vm5827_vm4, %v6435_v14  ;;  %8395 = vmatmul.msk.f32.gmra.mxu1 %vm5827_vm4, %v6572_v13 }
 0x6a6   : > { %v12759_v8 = vmax.f32 %v5720_v22, 0.0  ;;  %6210 = vmatpush.msrb.mxu2 %v8326_v24  ;;  %v8325_v22 = vld [vmem:[%s13621_s9 + $0x78] sm:$0xff]  ;;  %5865 = vmatpush.msrb.mxu3 %v5823_v21  ;;  %v12797_v21 = vpop.permute.xlu2 %6827 }
 0x6a7   : > { %14683 = vst [vmem:[#allocation161_spill] sm:$0xff] %v12797_v21  ;;  %v12825_v21 = vpop.permute.xlu1 %6695 }
 0x6a8   : > { %8287 = vmatmul.msk.f32.gmra.mxu2 %vm5827_vm4, %v12759_v8  ;;  %v6098_v14 = vrot.slane %v12759_v8, 1  ;;  %v5752_v13 = vrot.slane %v12759_v8, 7  ;;  %5866 = vmatpush.msrb.mxu3 %v5822_v63 }
 0x6a9   : > { %6211 = vmatpush.msrb.mxu2 %v8325_v22 }
 0x6aa   : > { %v12779_v54 = vsel %vm2355_vm3, %v6097_v19, %v6098_v14  ;;  %v12783_v36 = vsel %vm1174_vm2, %v5751_v34, %v5752_v13  ;;  %v8324_v19 = vld [vmem:[%s13621_s9 + $0x70] sm:$0xff]  ;;  %v5821_v34 = vld [vmem:[%s13621_s9] sm:$0xff] }
 0x6ab   : > { %v5722_v24 = vpop.f32.mrf.mxu2  ;;  %v6436_v35 = vmul.f32 %v12687_v4, %v12779_v54  ;;  %v6573_v1 = vmul.f32 %v6544_v38, %v12783_v36  ;;  %6212 = vmatpush.msrb.mxu2 %v8324_v19  ;;  %5867 = vmatpush.msrb.mxu3 %v5821_v34  ;;  %v8323_v38 = vld [vmem:[%s13621_s9 + $0x68] sm:$0xff] }
 0x6ac   : > { %v5723_v9 = vadd.f32 %v12680_v17, %v5722_v24 }
 0x6ad   : > { %8374 = vmatmul.msk.f32.gmra.mxu0 %vm5827_vm4, %v6436_v35  ;;  %8396 = vmatmul.msk.f32.gmra.mxu1 %vm5827_vm4, %v6573_v1  ;;  %v8322_v35 = vld [vmem:[%s13621_s9 + $0x60] sm:$0xff] }
 0x6ae   : > { %v12802_v4 = vmax.f32 %v5723_v9, 0.0  ;;  %6213 = vmatpush.msrb.mxu2 %v8323_v38  ;;  %v12828_v38 = vpop.permute.xlu0 %6832 }
 0x6af   : > { %14684 = vst [vmem:[#allocation100_spill] sm:$0xff] %v12828_v38  ;;  %v6559_v41 = vpop.permute.xlu1 %6558 }
 0x6b0   : > { %8288 = vmatmul.msk.f32.gmra.mxu2 %vm5827_vm4, %v12802_v4  ;;  %v6099_v22 = vrot.slane %v12802_v4, 1  ;;  %v5753_v24 = vrot.slane %v12802_v4, 7 }
 0x6b1   : > { %6214 = vmatpush.msrb.mxu2 %v8322_v35 }
 0x6b2   : > { %v12816_v9 = vsel %vm2355_vm3, %v6098_v14, %v6099_v22  ;;  %v12820_v1 = vsel %vm1174_vm2, %v5752_v13, %v5753_v24  ;;  %v6422_v14 = vpop.permute.xlu2 %6421 }
 0x6b3   : > { %v5725_v63 = vpop.f32.mrf.mxu2  ;;  %v6437_v19 = vmul.f32 %v12698_v23, %v12816_v9  ;;  %v6574_v34 = vmul.f32 %v6549_v11, %v12820_v1 }
 0x6b4   : > { %v5726_v40 = vadd.f32 %v12680_v17, %v5725_v63 }
 0x6b5   : > { %8375 = vmatmul.msk.f32.gmra.mxu0 %vm5827_vm4, %v6437_v19  ;;  %8397 = vmatmul.msk.f32.gmra.mxu1 %vm5827_vm4, %v6574_v34 }
 0x6b6   : > { %v12832_v13 = vmax.f32 %v5726_v40, 0.0 }
 0x6b7   : > { %v12883_v29 = vpop.permute.xlu1 %6837 }
 0x6b8   : > { %6963 = vrot.lane.b32.xlu2 %v12832_v13, %s9245_s27  ;;  %8289 = vmatmul.msk.f32.gmra.mxu2 %vm5827_vm4, %v12832_v13  ;;  %v6100_v23 = vrot.slane %v12832_v13, 1  ;;  %v5754_v11 = vrot.slane %v12832_v13, 7  ;;  %14685 = vst [vmem:[#allocation163_spill] sm:$0xff] %v12883_v29  ;;  %v14687_v29 = vrot.slane %v12689_v51, 1 }
 0x6ba   : > { %v12842_v35 = vsel %vm2355_vm3, %v6099_v22, %v6100_v23  ;;  %v12846_v63 = vsel %vm1174_vm2, %v5753_v24, %v5754_v11  ;;  %v6427_v22 = vpop.permute.xlu0 %6426  ;;  %v12855_v42 = vpop.permute.xlu2 %6700 }
 0x6bb   : > { %v5728_v40 = vpop.f32.mrf.mxu2  ;;  %v6438_v19 = vmul.f32 %v6417_v47, %v12842_v35  ;;  %v6575_v34 = vmul.f32 %v6554_v60, %v12846_v63 }
 0x6bc   : > { %v5729_v38 = vadd.f32 %v12680_v17, %v5728_v40 }
 0x6bd   : > { %8376 = vmatmul.msk.f32.gmra.mxu0 %vm5827_vm4, %v6438_v19  ;;  %8398 = vmatmul.msk.f32.gmra.mxu1 %vm5827_vm4, %v6575_v34 }
 0x6be   : > { %v12853_v55 = vmax.f32 %v5729_v38, 0.0 }
 0x6c0   : > { %6957 = vrot.lane.b32.xlu2 %v12727_v28, %s9245_s27  ;;  %6965 = vrot.lane.b32.xlu1 %v12853_v55, %s9245_s27  ;;  %v6101_v60 = vrot.slane %v12853_v55, 1  ;;  %v5755_v47 = vrot.slane %v12853_v55, 7 }
 0x6c1   : > { %8290 = vmatmul.msk.f32.gmra.mxu2 %vm5827_vm4, %v12853_v55 }
 0x6c2   : > { %v12867_v24 = vsel %vm2355_vm3, %v6100_v23, %v6101_v60  ;;  %v12871_v38 = vsel %vm1174_vm2, %v5754_v11, %v5755_v47  ;;  %v8486_v23 = vld [vmem:[%s13629_s17 + $0x30] sm:$0xff] }
 0x6c3   : > { %v5731_v40 = vpop.f32.mrf.mxu2  ;;  %v6439_v19 = vmul.f32 %v6422_v14, %v12867_v24  ;;  %v6576_v34 = vmul.f32 %v6559_v41, %v12871_v38 }
 0x6c4   : > { %v5732_v16 = vadd.f32 %v12680_v17, %v5731_v40  ;;  %v12889_v17 = vpop.permute.xlu0 %6705 }
 0x6c5   : > { %8377 = vmatmul.msk.f32.gmra.mxu0 %vm5827_vm4, %v6439_v19  ;;  %8399 = vmatmul.msk.f32.gmra.mxu1 %vm5827_vm4, %v6576_v34  ;;  %14686 = vst [vmem:[#allocation105_spill] sm:$0xff] %v12889_v17 }
 0x6c6   : > { %v12881_v6 = vmax.f32 %v5732_v16, 0.0  ;;  %v6564_v16 = vpop.permute.xlu2 %6563 }
 0x6c8   : > { %v5756_v11 = vrot.slane %v12881_v6, 7  ;;  %6967 = vrot.lane.b32.xlu0 %v12881_v6, %s9245_s27  ;;  %7321 = vperm.xlu2 %8731, %v8486_v23   ;;  %v6102_v41 = vrot.slane %v12881_v6, 1 }
 0x6c9   : > { %6959 = vrot.lane.b32.xlu1 %v12759_v8, %s9245_s27  ;;  %8291 = vmatmul.msk.f32.gmra.mxu2 %vm5827_vm4, %v12881_v6 }
 0x6ca   : > { %v12897_v14 = vsel %vm1174_vm2, %v5755_v47, %v5756_v11  ;;  %v12901_v40 = vsel %vm2355_vm3, %v6101_v60, %v6102_v41  ;;  %v12911_v17 = vsel %vm2355_vm3, %v6102_v41, %v14687_v29  ;;  %v8487_v60 = vld [vmem:[%s13629_s17 + $0x38] sm:$0xff]  ;;  %v14688_v29 = vrot.slane %v12689_v51, 7  ;;  %v6432_v41 = vpop.permute.xlu1 %6431 }
 0x6cb   : > { %v5813_v19 = vmul.f32 %v12546_v27, %v12897_v14  ;;  %v6440_v34 = vmul.f32 %v6427_v22, %v12901_v40  ;;  %v6577_v23 = vmul.f32 %v6564_v16, %v12897_v14  ;;  %v7113_v27 = vld [vmem:[%s13629_s17 + $0x8] sm:$0xff]  ;;  %v6160_v22 = vmul.f32 %v12594_v7, %v12911_v17 }
 0x6cc   : > { %v12930_v47 = vsel %vm1174_vm2, %v5756_v11, %v14688_v29  ;;  %v6569_v16 = vpop.permute.xlu0 %6568  ;;  %v6441_v7 = vmul.f32 %v6432_v41, %v12911_v17  ;;  %v7112_v11 = vld [vmem:[%s13629_s17] sm:$0xff]  ;;  %v8510_v29 = vld [vmem:[%s13629_s17 + $0x50] sm:$0xff]  ;;  %v6162_v41 = vmul.f32 %v12605_v32, %v12742_v0  ;;  %v8463_v32 = vld [vmem:[%s13629_s17 + $0x18] sm:$0xff] }
 0x6cd   : > { %8276 = vmatmul.msk.f32.vlgmr.msrb.gmra.mxu3 %vm5827_vm4, %v5813_v19  ;;  %8378 = vmatmul.msk.f32.gmra.mxu0 %vm5827_vm4, %v6440_v34  ;;  %v5814_v19 = vmul.f32 %v12549_v53, %v12930_v47  ;;  %v6578_v34 = vmul.f32 %v6569_v16, %v12930_v47  ;;  %v8474_v53 = vld [vmem:[%s13629_s17 + $0x20] sm:$0xff]  ;;  %v8304_v16 = vld [vmem:[%s13621_s9 + $0x50] sm:$0xff] }
 0x6ce   : > { %8400 = vmatmul.msk.f32.gmra.mxu1 %vm5827_vm4, %v6577_v23  ;;  %v8475_v23 = vld [vmem:[%s13629_s17 + $0x28] sm:$0xff] }
 0x6d0   : > { %6961 = vrot.lane.b32.xlu0 %v12802_v4, %s9245_s27  ;;  %7326 = vperm.xlu2 %8731, %v8487_v60   ;;  %v6161_v60 = vmul.f32 %v12596_v61, %v12714_v50  ;;  %v8498_v61 = vld [vmem:[%s13629_s17 + $0x40] sm:$0xff] }
 0x6d1   : > { %7121 = vperm.xlu1 %8730, %v7113_v27   ;;  %8328 = vmatmul.msk.f32.vlgmr.msrb.gmra.mxu2 %vm5827_vm4, %v6160_v22  ;;  %v5815_v27 = vmul.f32 %v12553_v52, %v12720_v31  ;;  %v8462_v22 = vld [vmem:[%s13629_s17 + $0x10] sm:$0xff]  ;;  %v8305_v52 = vld [vmem:[%s13621_s9 + $0x58] sm:$0xff] }
 0x6d2   : > { %6056 = vmatpush.msra.mxu3 %v8305_v52  ;;  %v8535_v52 = vld [vmem:[%s13629_s17 + $0x78] sm:$0xff] }
 0x6d4   : > { %6057 = vmatpush.msra.mxu3 %v8304_v16  ;;  %v6164_v16 = vmul.f32 %v12609_v12, %v12816_v9  ;;  %v6165_v12 = vmul.f32 %v12617_v49, %v12842_v35  ;;  %v5820_v49 = vmul.f32 %v12563_v59, %v12871_v38  ;;  %v6008_v59 = vmul.f32 %v12565_v20, %v12689_v51  ;;  %v8349_v20 = vld [vmem:[%s13621_s9 + $0xb8] sm:$0xff] }
 0x6d5   : > { %8277 = vmatmul.msk.f32.gmra.mxu3 %vm5827_vm4, %v5814_v19  ;;  %8379 = vmatmul.msk.f32.gmra.mxu0 %vm5827_vm4, %v6441_v7  ;;  %v5816_v19 = vmul.f32 %v12551_v5, %v12746_v48  ;;  %v8511_v7 = vld [vmem:[%s13629_s17 + $0x58] sm:$0xff]  ;;  %v8499_v5 = vld [vmem:[%s13629_s17 + $0x48] sm:$0xff] }
 0x6d6   : > { %8401 = vmatmul.msk.f32.gmra.mxu1 %vm5827_vm4, %v6578_v34  ;;  %v8415_v34 = vld [vmem:[%s13621_s9 + $0x178] sm:$0xff] }
 0x6d7   : > { %6757 = vmatpush.msra.mxu2 %v8415_v34  ;;  %v5819_v34 = vmul.f32 %v12558_v25, %v12846_v63  ;;  %v6167_v25 = vmul.f32 %v12621_v57, %v12901_v40  ;;  %v6709_v57 = vmul.f32 %v12667_v26, %v12727_v28  ;;  %v6010_v26 = vmul.f32 %v12584_v10, %v12727_v28  ;;  %v8345_v10 = vld [vmem:[%s13621_s9 + $0x98] sm:$0xff] }
 0x6d8   : > { %7116 = vperm.xlu0 %8729, %v7112_v11   ;;  %7267 = vperm.xlu2 %8731, %v8475_v23   ;;  %v8303_v11 = vld [vmem:[%s13621_s9 + $0x48] sm:$0xff]  ;;  %v6163_v23 = vmul.f32 %v12607_v30, %v12779_v54  ;;  %v8301_v30 = vld [vmem:[%s13621_s9 + $0x38] sm:$0xff]  ;;  %v6011_v28 = vmul.f32 %v12582_v2, %v12759_v8  ;;  %v6713_v2 = vmul.f32 %v12825_v21, %v12853_v55 }
 0x6d9   : > { %7262 = vperm.xlu1 %8730, %v8474_v53   ;;  %8329 = vmatmul.msk.f32.gmra.mxu2 %vm5827_vm4, %v6161_v60  ;;  %v8414_v53 = vld [vmem:[%s13621_s9 + $0x170] sm:$0xff]  ;;  %v8302_v60 = vld [vmem:[%s13621_s9 + $0x40] sm:$0xff] }
 0x6da   : > { %6058 = vmatpush.msra.mxu3 %v8303_v11  ;;  %6758 = vmatpush.msra.mxu2 %v8414_v53  ;;  %v6166_v11 = vmul.f32 %v12619_v45, %v12867_v24  ;;  %v6708_v45 = vmul.f32 %v12636_v46, %v12696_v58  ;;  %v6710_v46 = vmul.f32 %v12682_v3, %v12759_v8  ;;  %v14690_v21 = vld [vmem:[#allocation105_spill] sm:$0xff] }
 0x6db   : > { %v6711_v3 = vmul.f32 %v12700_v62, %v12802_v4  ;;  %v8344_v62 = vld [vmem:[%s13621_s9 + $0x90] sm:$0xff]  ;;  %v6712_v53 = vmul.f32 %v12735_v18, %v12832_v13  ;;  %v6013_v8 = vmul.f32 %v12591_v43, %v12832_v13  ;;  %v6714_v18 = vmul.f32 %v12855_v42, %v12881_v6 }
 0x6dc   : > { %6059 = vmatpush.msra.mxu3 %v8302_v60  ;;  %v6012_v60 = vmul.f32 %v12587_v15, %v12802_v4  ;;  %v14689_v15 = vld [vmem:[#allocation156_spill] sm:$0xff]  ;;  %v14691_v43 = vld [vmem:[#allocation138_spill] sm:$0xff]  ;;  %v14692_v42 = vld [vmem:[#allocation149_spill] sm:$0xff] }
 0x6dd   : > { %8278 = vmatmul.msk.f32.gmra.mxu3 %vm5827_vm4, %v5815_v27  ;;  %v8413_v27 = vld [vmem:[%s13621_s9 + $0x168] sm:$0xff]  ;;  %v6014_v4 = vmul.f32 %v14689_v15, %v12853_v55  ;;  %v6297_v13 = vmul.f32 %v14691_v43, %v12930_v47 }
 0x6de   : > { %6759 = vmatpush.msra.mxu2 %v8413_v27  ;;  %6060 = vmatpush.msra.mxu3 %v8301_v30  ;;  %v8437_v47 = vld [vmem:[%s13621_s9 + $0x1a8] sm:$0xff] }
 0x6e0   : > { %7202 = vperm.xlu0 %8729, %v8462_v22   ;;  %7435 = vperm.xlu2 %8731, %v8510_v29   ;;  %v5817_v22 = vmul.f32 %v12556_v33, %v12783_v36  ;;  %v8412_v29 = vld [vmem:[%s13621_s9 + $0x160] sm:$0xff]  ;;  %v8411_v33 = vld [vmem:[%s13621_s9 + $0x158] sm:$0xff] }
 0x6e1   : > { %7380 = vperm.xlu1 %8730, %v8498_v61   ;;  %8330 = vmatmul.msk.f32.gmra.mxu2 %vm5827_vm4, %v6162_v41  ;;  %v8300_v61 = vld [vmem:[%s13621_s9 + $0x30] sm:$0xff] }
 0x6e2   : > { %v8534_v41 = vld [vmem:[%s13629_s17 + $0x70] sm:$0xff]  ;;  %6760 = vmatpush.msra.mxu2 %v8412_v29  ;;  %6061 = vmatpush.msra.mxu3 %v8300_v61  ;;  %v6298_v61 = vmul.f32 %v14692_v42, %v12720_v31  ;;  %v14694_v31 = vld [vmem:[#allocation143_spill] sm:$0xff] }
 0x6e3   : > { %v14702_v42 = vld [vmem:[#allocation167_spill] sm:$0xff] }
 0x6e4   : > { %6761 = vmatpush.msra.mxu2 %v8411_v33  ;;  %6346 = vmatpush.msrb.mxu3 %v8349_v20  ;;  %v14693_v33 = vld [vmem:[#allocation158_spill] sm:$0xff] }
 0x6e5   : > { %8279 = vmatmul.msk.f32.gmra.mxu3 %vm5827_vm4, %v5816_v19  ;;  %v8410_v19 = vld [vmem:[%s13621_s9 + $0x150] sm:$0xff] }
 0x6e6   : > { %6762 = vmatpush.msra.mxu2 %v8410_v19  ;;  %v6300_v19 = vmul.f32 %v14694_v31, %v12783_v36  ;;  %v8433_v36 = vld [vmem:[%s13621_s9 + $0x188] sm:$0xff] }
 0x6e8   : > { %7207 = vperm.xlu0 %8729, %v8463_v32   ;;  %7440 = vperm.xlu2 %8731, %v8511_v7   ;;  %v5818_v32 = vmul.f32 %v12560_v39, %v12820_v1  ;;  %v8522_v7 = vld [vmem:[%s13629_s17 + $0x60] sm:$0xff]  ;;  %v8523_v39 = vld [vmem:[%s13629_s17 + $0x68] sm:$0xff] }
 0x6e9   : > { %7385 = vperm.xlu1 %8730, %v8499_v5   ;;  %8331 = vmatmul.msk.f32.gmra.mxu2 %vm5827_vm4, %v6163_v23  ;;  %v6007_v5 = vmul.f32 %v12567_v56, %v12881_v6  ;;  %v6009_v56 = vmul.f32 %v12579_v37, %v12696_v58  ;;  %v8348_v23 = vld [vmem:[%s13621_s9 + $0xb0] sm:$0xff]  ;;  %v8347_v37 = vld [vmem:[%s13621_s9 + $0xa8] sm:$0xff]  ;;  %v8346_v58 = vld [vmem:[%s13621_s9 + $0xa0] sm:$0xff] }
 0x6ea   : > { %6347 = vmatpush.msrb.mxu3 %v8348_v23  ;;  %v14698_v23 = vld [vmem:[#allocation157_spill] sm:$0xff] }
 0x6ec   : > { %6348 = vmatpush.msrb.mxu3 %v8347_v37  ;;  %v6304_v37 = vmul.f32 %v14698_v23, %v12897_v14 }
 0x6ed   : > { %8280 = vmatmul.msk.f32.gmra.mxu3 %vm5827_vm4, %v5817_v22  ;;  %v6715_v22 = vmul.f32 %v14690_v21, %v12689_v51  ;;  %v6299_v51 = vmul.f32 %v14693_v33, %v12746_v48  ;;  %v8435_v48 = vld [vmem:[%s13621_s9 + $0x198] sm:$0xff] }
 0x6ee   : > { %6349 = vmatpush.msrb.mxu3 %v8346_v58 }
 0x6f0   : > { %7545 = vperm.xlu0 %8729, %v8534_v41   ;;  %6350 = vmatpush.msrb.mxu3 %v8345_v10 }
 0x6f1   : > { %7550 = vperm.xlu1 %8730, %v8535_v52   ;;  %8332 = vmatmul.msk.f32.gmra.mxu2 %vm5827_vm4, %v6164_v16 }
 0x6f2   : > { %6351 = vmatpush.msrb.mxu3 %v8344_v62 }
 0x6f5   : > { %8281 = vmatmul.msk.f32.gmra.mxu3 %vm5827_vm4, %v5818_v32  ;;  %v8436_v32 = vld [vmem:[%s13621_s9 + $0x1a0] sm:$0xff] }
 0x6f8   : > { %7490 = vperm.xlu0 %8729, %v8522_v7  }
 0x6f9   : > { %8333 = vmatmul.msk.f32.gmra.mxu2 %vm5827_vm4, %v6165_v12 }
 0x6fd   : > { %8282 = vmatmul.msk.f32.gmra.mxu3 %vm5827_vm4, %v5819_v34  ;;  %v8434_v34 = vld [vmem:[%s13621_s9 + $0x190] sm:$0xff] }
 0x700   : > { %7495 = vperm.xlu0 %8729, %v8523_v39   ;;  %v14695_v39 = vld [vmem:[#allocation152_spill] sm:$0xff] }
 0x701   : > { %8334 = vmatmul.msk.f32.gmra.mxu2 %vm5827_vm4, %v6166_v11  ;;  %v6301_v11 = vmul.f32 %v14695_v39, %v12820_v1 }
 0x705   : > { %8283 = vmatmul.msk.f32.gmra.mxu3 %vm5827_vm4, %v5820_v49  ;;  %v8432_v49 = vld [vmem:[%s13621_s9 + $0x180] sm:$0xff] }
 0x709   : > { %8335 = vmatmul.msk.f32.gmra.mxu2 %vm5827_vm4, %v6167_v25 }
 0x70d   : > { %8306 = vmatmul.msk.f32.vlgmr.msra.gmra.mxu3 %vm5827_vm4, %v6007_v5 }
 0x70e   : > { %6894 = vmatpush.msra.mxu3 %v8437_v47  ;;  %v14703_v47 = vld [vmem:[#allocation161_spill] sm:$0xff] }
 0x710   : > { %6895 = vmatpush.msra.mxu3 %v8436_v32 }
 0x711   : > { %8416 = vmatmul.msk.f32.vlgmr.msra.gmra.mxu2 %vm5827_vm4, %v6708_v45  ;;  %v14696_v45 = vld [vmem:[#allocation170_spill] sm:$0xff] }
 0x712   : > { %6896 = vmatpush.msra.mxu3 %v8435_v48 }
 0x713   : > { %v5934_v27 = vpop.f32.mrf.mxu2 }
 0x714   : > { %6897 = vmatpush.msra.mxu3 %v8434_v34 }
 0x715   : > { %8307 = vmatmul.msk.f32.gmra.mxu3 %vm5827_vm4, %v6008_v59  ;;  %v6302_v59 = vmul.f32 %v14696_v45, %v12846_v63  ;;  %v14699_v63 = vld [vmem:[#allocation174_spill] sm:$0xff] }
 0x716   : > { %6898 = vmatpush.msra.mxu3 %v8433_v36 }
 0x718   : > { %6899 = vmatpush.msra.mxu3 %v8432_v49 }
 0x719   : > { %8417 = vmatmul.msk.f32.gmra.mxu2 %vm5827_vm4, %v6709_v57 }
 0x71b   : > { %v5937_v30 = vpop.f32.mrf.mxu2 }
 0x71d   : > { %8308 = vmatmul.msk.f32.gmra.mxu3 %vm5827_vm4, %v6009_v56  ;;  %v14697_v56 = vld [vmem:[#allocation41_spill] sm:$0xff] }
 0x721   : > { %8418 = vmatmul.msk.f32.gmra.mxu2 %vm5827_vm4, %v6710_v46  ;;  %v6303_v46 = vmul.f32 %v14697_v56, %v12871_v38 }
 0x723   : > { %v5940_v29 = vpop.f32.mrf.mxu2 }
 0x725   : > { %8309 = vmatmul.msk.f32.gmra.mxu3 %vm5827_vm4, %v6010_v26 }
 0x729   : > { %8419 = vmatmul.msk.f32.gmra.mxu2 %vm5827_vm4, %v6711_v3 }
 0x72b   : > { %v13125_v41 = vpop.f32.mrf.mxu2 }
 0x72d   : > { %8310 = vmatmul.msk.f32.gmra.mxu3 %vm5827_vm4, %v6011_v28  ;;  %v6845_v28 = vmul.f32 %v14699_v63, %v12742_v0 }
 0x731   : > { %8420 = vmatmul.msk.f32.gmra.mxu2 %vm5827_vm4, %v6712_v53 }
 0x733   : > { %v13131_v52 = vpop.f32.mrf.mxu2 }
 0x735   : > { %8311 = vmatmul.msk.f32.gmra.mxu3 %vm5827_vm4, %v6012_v60 }
 0x739   : > { %8421 = vmatmul.msk.f32.gmra.mxu2 %vm5827_vm4, %v6713_v2  ;;  %v14700_v2 = vld [vmem:[#allocation43_spill] sm:$0xff] }
 0x73b   : > { %v5949_v7 = vpop.f32.mrf.mxu2 }
 0x73d   : > { %8312 = vmatmul.msk.f32.gmra.mxu3 %vm5827_vm4, %v6013_v8  ;;  %v6846_v8 = vmul.f32 %v14700_v2, %v12779_v54 }
 0x741   : > { %8422 = vmatmul.msk.f32.gmra.mxu2 %vm5827_vm4, %v6714_v18 }
 0x744   : > { %v5952_v5 = vpop.f32.mrf.mxu2 }
 0x745   : > { %8313 = vmatmul.msk.f32.gmra.mxu3 %vm5827_vm4, %v6014_v4 }
 0x749   : > { %8423 = vmatmul.msk.f32.gmra.mxu2 %vm5827_vm4, %v6715_v22  ;;  %v14701_v22 = vld [vmem:[#allocation159_spill] sm:$0xff] }
 0x74a   : > { %v6847_v43 = vmul.f32 %v14701_v22, %v12816_v9  ;;  %v6849_v9 = vmul.f32 %v14703_v47, %v12867_v24  ;;  %v14705_v24 = vld [vmem:[#allocation163_spill] sm:$0xff] }
 0x74c   : > { %v5955_v1 = vpop.f32.mrf.mxu2 }
 0x74d   : > { %8350 = vmatmul.msk.f32.vlgmr.msrb.gmra.mxu3 %vm5827_vm4, %v6297_v13 }
 0x750   : > { %v5869_v6 = vpop.f32.mrf.mxu3 }
 0x751   : > { %v5935_v62 = vadd.f32 %v5934_v27, %v5869_v6 }
 0x754   : > { %v6216_v3 = vpop.f32.mrf.mxu2 }
 0x755   : > { %8351 = vmatmul.msk.f32.gmra.mxu3 %vm5827_vm4, %v6298_v61  ;;  %v6848_v61 = vmul.f32 %v14702_v42, %v12842_v35  ;;  %v14704_v35 = vld [vmem:[#allocation100_spill] sm:$0xff] }
 0x756   : > { %v6850_v48 = vmul.f32 %v14704_v35, %v12901_v40 }
 0x758   : > { %v5872_v55 = vpop.f32.mrf.mxu3 }
 0x759   : > { %v5938_v14 = vadd.f32 %v5937_v30, %v5872_v55 }
 0x75c   : > { %v6219_v38 = vpop.f32.mrf.mxu2 }
 0x75d   : > { %8352 = vmatmul.msk.f32.gmra.mxu3 %vm5827_vm4, %v6299_v51 }
 0x760   : > { %v5875_v16 = vpop.f32.mrf.mxu3 }
 0x761   : > { %v5941_v27 = vadd.f32 %v5940_v29, %v5875_v16 }
 0x764   : > { %v6222_v21 = vpop.f32.mrf.mxu2 }
 0x765   : > { %8353 = vmatmul.msk.f32.gmra.mxu3 %vm5827_vm4, %v6300_v19 }
 0x768   : > { %v5878_v12 = vpop.f32.mrf.mxu3 }
 0x769   : > { %v5944_v30 = vadd.f32 %v13125_v41, %v5878_v12 }
 0x76c   : > { %v6225_v33 = vpop.f32.mrf.mxu2 }
 0x76d   : > { %8354 = vmatmul.msk.f32.gmra.mxu3 %vm5827_vm4, %v6301_v11  ;;  %v6851_v11 = vmul.f32 %v14705_v24, %v12911_v17 }
 0x770   : > { %v5881_v25 = vpop.f32.mrf.mxu3 }
 0x771   : > { %v5947_v16 = vadd.f32 %v13131_v52, %v5881_v25  ;;  %v6843_v25 = vpop.permute.xlu2 %6842 }
 0x774   : > { %v6228_v29 = vpop.f32.mrf.mxu2 }
 0x775   : > { %8355 = vmatmul.msk.f32.gmra.mxu3 %vm5827_vm4, %v6302_v59  ;;  %v6852_v59 = vmul.f32 %v6843_v25, %v12714_v50 }
 0x778   : > { %v5884_v57 = vpop.f32.mrf.mxu3 }
 0x779   : > { %v5950_v41 = vadd.f32 %v5949_v7, %v5884_v57 }
 0x77c   : > { %v6231_v12 = vpop.f32.mrf.mxu2 }
 0x77d   : > { %8356 = vmatmul.msk.f32.gmra.mxu3 %vm5827_vm4, %v6303_v46 }
 0x780   : > { %v5887_v20 = vpop.f32.mrf.mxu3 }
 0x781   : > { %v5953_v26 = vadd.f32 %v5952_v5, %v5887_v20 }
 0x784   : > { %v6234_v45 = vpop.f32.mrf.mxu2 }
 0x785   : > { %8357 = vmatmul.msk.f32.gmra.mxu3 %vm5827_vm4, %v6304_v37 }
 0x788   : > { %v5890_v58 = vpop.f32.mrf.mxu3 }
 0x789   : > { %v5956_v10 = vadd.f32 %v5955_v1, %v5890_v58 }
 0x78c   : > { %v13193_v63 = vpop.f32.mrf.mxu2 }
 0x78d   : > { %8438 = vmatmul.msk.f32.vlgmr.msra.gmra.mxu3 %vm5827_vm4, %v6845_v28  ;;  %v6490_v28 = vpop.f32.mrf.mxu0 }
 0x790   : > { %v6063_v53 = vpop.f32.mrf.mxu3 }
 0x791   : > { %v6087_v60 = vadd.f32 %v6063_v53, %v5935_v62 }
 0x793   : > { %v6240_v18 = vadd.f32 %v6216_v3, %v6087_v60 }
 0x794   : > { %v6764_v53 = vpop.f32.mrf.mxu2 }
 0x795   : > { %8439 = vmatmul.msk.f32.gmra.mxu3 %vm5827_vm4, %v6846_v8  ;;  %v6493_v2 = vpop.f32.mrf.mxu0 }
 0x798   : > { %v6066_v15 = vpop.f32.mrf.mxu3 }
 0x799   : > { %v6088_v4 = vadd.f32 %v6066_v15, %v5938_v14 }
 0x79b   : > { %v6241_v0 = vadd.f32 %v6219_v38, %v6088_v4  ;;  %v6627_v38 = vpop.f32.mrf.mxu1 }
 0x79c   : > { %v6767_v15 = vpop.f32.mrf.mxu2 }
 0x79d   : > { %8440 = vmatmul.msk.f32.gmra.mxu3 %vm5827_vm4, %v6847_v43 }
 0x7a0   : > { %v6069_v13 = vpop.f32.mrf.mxu3 }
 0x7a1   : > { %v6089_v6 = vadd.f32 %v6069_v13, %v5941_v27 }
 0x7a3   : > { %v6242_v54 = vadd.f32 %v6222_v21, %v6089_v6  ;;  %v6630_v8 = vpop.f32.mrf.mxu1  ;;  %v6496_v21 = vpop.f32.mrf.mxu0 }
 0x7a5   : > { %8441 = vmatmul.msk.f32.gmra.mxu3 %vm5827_vm4, %v6848_v61 }
 0x7a8   : > { %v6072_v55 = vpop.f32.mrf.mxu3 }
 0x7a9   : > { %v6090_v51 = vadd.f32 %v6072_v55, %v5944_v30 }
 0x7ab   : > { %v6243_v31 = vadd.f32 %v6225_v33, %v6090_v51  ;;  %v6633_v27 = vpop.f32.mrf.mxu1  ;;  %v6770_v33 = vpop.f32.mrf.mxu2 }
 0x7ac   : > { %v6499_v30 = vpop.f32.mrf.mxu0 }
 0x7ad   : > { %8442 = vmatmul.msk.f32.gmra.mxu3 %vm5827_vm4, %v6849_v9 }
 0x7b0   : > { %v6075_v19 = vpop.f32.mrf.mxu3 }
 0x7b1   : > { %v6091_v32 = vadd.f32 %v6075_v19, %v5947_v16 }
 0x7b3   : > { %v6244_v34 = vadd.f32 %v6228_v29, %v6091_v32  ;;  %v6954_v29 = vpop.permute.xlu1 %6953  ;;  %v6636_v16 = vpop.f32.mrf.mxu1 }
 0x7b5   : > { %8443 = vmatmul.msk.f32.gmra.mxu3 %vm5827_vm4, %v6850_v48 }
 0x7b8   : > { %v6078_v36 = vpop.f32.mrf.mxu3 }
 0x7b9   : > { %v6092_v39 = vadd.f32 %v6078_v36, %v5950_v41  ;;  %v6773_v41 = vpop.f32.mrf.mxu2 }
 0x7bb   : > { %v6245_v49 = vadd.f32 %v6231_v12, %v6092_v39 }
 0x7bd   : > { %8444 = vmatmul.msk.f32.gmra.mxu3 %vm5827_vm4, %v6851_v11  ;;  %v6502_v11 = vpop.f32.mrf.mxu0 }
 0x7c0   : > { %v6081_v5 = vpop.f32.mrf.mxu3 }
 0x7c1   : > { %v6093_v52 = vadd.f32 %v6081_v5, %v5953_v26 }
 0x7c3   : > { %v6246_v40 = vadd.f32 %v6234_v45, %v6093_v52 }
 0x7c5   : > { %8445 = vmatmul.msk.f32.gmra.mxu3 %vm5827_vm4, %v6852_v59 }
 0x7c8   : > { %v6084_v56 = vpop.f32.mrf.mxu3 }
 0x7c9   : > { %v13191_v7 = vadd.f32 %v6084_v56, %v5956_v10  ;;  %v13210_v56 = vpop.permute.xlu1 %6965 }
 0x7d0   : > { %v6353_v57 = vpop.f32.mrf.mxu3 }
 0x7d1   : > { %v6377_v46 = vadd.f32 %v6353_v57, %v6240_v18  ;;  %v6639_v57 = vpop.f32.mrf.mxu1 }
 0x7d3   : > { %v6514_v18 = vadd.f32 %v6490_v28, %v6377_v46 }
 0x7d5   : > { %v6651_v4 = vadd.f32 %v6627_v38, %v6514_v18  ;;  %v13218_v18 = vpop.permute.xlu0 %6967 }
 0x7d7   : > { %v6788_v43 = vadd.f32 %v6764_v53, %v6651_v4  ;;  %v6505_v53 = vpop.f32.mrf.mxu0 }
 0x7d8   : > { %v6356_v1 = vpop.f32.mrf.mxu3 }
 0x7d9   : > { %v6378_v20 = vadd.f32 %v6356_v1, %v6241_v0  ;;  %v13201_v0 = vld [vmem:[#allocation16] ss:$0 sm:$0xff] }
 0x7db   : > { %v6515_v22 = vadd.f32 %v6493_v2, %v6378_v20 }
 0x7dd   : > { %v6652_v61 = vadd.f32 %v6630_v8, %v6515_v22  ;;  %v6642_v22 = vpop.f32.mrf.mxu1 }
 0x7df   : > { %v6789_v47 = vadd.f32 %v6767_v15, %v6652_v61 }
 0x7e0   : > { %v6359_v17 = vpop.f32.mrf.mxu3 }
 0x7e1   : > { %v6379_v23 = vadd.f32 %v6359_v17, %v6242_v54  ;;  %v6956_v54 = vpop.permute.xlu2 %6955 }
 0x7e3   : > { %v6516_v55 = vadd.f32 %v6496_v21, %v6379_v23  ;;  %v6960_v21 = vpop.permute.xlu1 %6959 }
 0x7e5   : > { %v6653_v35 = vadd.f32 %v6633_v27, %v6516_v55 }
 0x7e7   : > { %v6790_v24 = vadd.f32 %v6770_v33, %v6653_v35  ;;  %v6645_v35 = vpop.f32.mrf.mxu1 }
 0x7e8   : > { %v6362_v37 = vpop.f32.mrf.mxu3 }
 0x7e9   : > { %v6380_v3 = vadd.f32 %v6362_v37, %v6243_v31  ;;  %v13205_v48 = vpop.permute.xlu2 %6963 }
 0x7eb   : > { %v6517_v12 = vadd.f32 %v6499_v30, %v6380_v3 }
 0x7f0   : > { %v6365_v58 = vpop.f32.mrf.mxu3 }
 0x7f1   : > { %v6381_v26 = vadd.f32 %v6365_v58, %v6244_v34  ;;  %v6958_v20 = vpop.permute.xlu2 %6957  ;;  %v6776_v58 = vpop.f32.mrf.mxu2 }
 0x7f3   : > { %v6518_v23 = vadd.f32 %v6502_v11, %v6381_v26 }
 0x7f5   : > { %v6655_v8 = vadd.f32 %v6639_v57, %v6518_v23  ;;  %v6648_v23 = vpop.f32.mrf.mxu1 }
 0x7f8   : > { %v6368_v50 = vpop.f32.mrf.mxu3 }
 0x7f9   : > { %v13195_v62 = vadd.f32 %v6368_v50, %v6245_v49  ;;  %v6779_v33 = vpop.f32.mrf.mxu2 }
 0x800   : > { %v6371_v10 = vpop.f32.mrf.mxu3 }
 0x801   : > { %v13197_v60 = vadd.f32 %v6371_v10, %v6246_v40  ;;  %v6654_v40 = vadd.f32 %v6636_v16, %v6517_v12  ;;  %v6247_v12 = vadd.f32 %v13193_v63, %v13191_v7 }
 0x803   : > { %v6791_v3 = vadd.f32 %v6773_v41, %v6654_v40 }
 0x808   : > { %v13199_v14 = vpop.f32.mrf.mxu3 }
 0x810   : > { %v6901_v13 = vpop.f32.mrf.mxu3 }
 0x811   : > { %v6925_v6 = vadd.f32 %v6901_v13, %v6788_v43  ;;  %v6519_v43 = vadd.f32 %v6505_v53, %v13195_v62  ;;  %v6792_v13 = vadd.f32 %v6776_v58, %v6655_v8 }
 0x813   : > { %v6937_v42 = vadd.f32 %v13201_v0, %v6925_v6 }
 0x815   : > { %v6945_v51 = vmax.f32 %v6937_v42, 0.0 }
 0x817   : > { %v6977_v19 = vadd.f32 %v6954_v29, %v6945_v51  ;;  %v6656_v51 = vadd.f32 %v6642_v22, %v6519_v43  ;;  %v6962_v29 = vpop.permute.xlu0 %6961 }
 0x818   : > { %v6904_v9 = vpop.f32.mrf.mxu3 }
 0x819   : > { %v6926_v31 = vadd.f32 %v6904_v9, %v6789_v47  ;;  %v6985_v36 = vmax.f32 %v6977_v19, 0.0  ;;  %v6508_v47 = vpop.f32.mrf.mxu0 }
 0x81a   : > { %v6520_v16 = vadd.f32 %v6508_v47, %v13197_v60  ;;  %v7059_v47 = vld [vmem:[#allocation19 + $0x10] sm:$0xff] }
 0x81b   : > { %v6938_v32 = vadd.f32 %v13201_v0, %v6926_v31  ;;  %v13207_v25 = vrot.slane %v6985_v36, 1 }
 0x81d   : > { %v6946_v34 = vmax.f32 %v6938_v32, 0.0  ;;  %v6793_v32 = vadd.f32 %v6779_v33, %v6656_v51  ;;  %v7062_v33 = vld [vmem:[#allocation19 + $0x28] sm:$0xff] }
 0x81e   : > { %7083 = vmatpush.msra.mxu1 %v7062_v33 }
 0x81f   : > { %v6978_v39 = vadd.f32 %v6956_v54, %v6946_v34  ;;  %v13402_v33 = vpop.permute.xlu0 %7116 }
 0x820   : > { %v6907_v49 = vpop.f32.mrf.mxu3 }
 0x821   : > { %v6986_v5 = vmax.f32 %v6978_v39, 0.0  ;;  %v6927_v52 = vadd.f32 %v6907_v49, %v6790_v24  ;;  %v6384_v24 = vadd.f32 %v13199_v14, %v6247_v12 }
 0x823   : > { %v6994_v45 = vrot.slane %v6986_v5, 1  ;;  %v6939_v59 = vadd.f32 %v13201_v0, %v6927_v52  ;;  %v6782_v52 = vpop.f32.mrf.mxu2 }
 0x825   : > { %v6947_v46 = vmax.f32 %v6939_v59, 0.0  ;;  %v7007_v1 = vsel %vm2355_vm3, %v13207_v25, %v6994_v45  ;;  %v6511_v59 = vpop.f32.mrf.mxu0 }
 0x826   : > { %v13215_v17 = vmax.f32 %v6985_v36, %v7007_v1  ;;  %v6521_v57 = vadd.f32 %v6511_v59, %v6384_v24  ;;  %v7133_v24 = vld [vmem:[%s13627_s15 + $0x38] sm:$0xff] }
 0x827   : > { %v6979_v37 = vadd.f32 %v6958_v20, %v6947_v46  ;;  %7148 = vmatpush.msrb.mxu2 %v7133_v24  ;;  %v8507_v59 = vld [vmem:[%s13627_s15 + $0x178] sm:$0xff]  ;;  %v8524_v24 = vld [vmem:[%s13627_s15 + $0x1c0] sm:$0xff] }
 0x828   : > { %v6910_v28 = vpop.f32.mrf.mxu3  ;;  %v6658_v58 = vadd.f32 %v6648_v23, %v6521_v57  ;;  %v8469_v57 = vld [vmem:[%s13627_s15 + $0x68] sm:$0xff]  ;;  %v7129_v23 = vld [vmem:[%s13627_s15 + $0x18] sm:$0xff] }
 0x829   : > { %v6987_v50 = vmax.f32 %v6979_v37, 0.0  ;;  %v6928_v38 = vadd.f32 %v6910_v28, %v6791_v3 }
 0x82b   : > { %v6995_v10 = vrot.slane %v6987_v50, 1  ;;  %v6940_v2 = vadd.f32 %v13201_v0, %v6928_v38  ;;  %v6785_v38 = vpop.f32.mrf.mxu2 }
 0x82d   : > { %v6948_v15 = vmax.f32 %v6940_v2, 0.0  ;;  %v7006_v4 = vsel %vm2355_vm3, %v6994_v45, %v6995_v10 }
 0x82e   : > { %v13222_v26 = vmax.f32 %v6986_v5, %v7006_v4  ;;  %v6657_v5 = vadd.f32 %v6645_v35, %v6520_v16  ;;  %v7057_v35 = vld [vmem:[#allocation19] sm:$0xff] }
 0x82f   : > { %v6980_v27 = vadd.f32 %v6960_v21, %v6948_v15 }
 0x830   : > { %v6913_v6 = vpop.f32.mrf.mxu3  ;;  %v7017_v42 = vmax.f32 %v13215_v17, %v13222_v26  ;;  %v6794_v1 = vadd.f32 %v6782_v52, %v6657_v5  ;;  %v8450_v5 = vld [vmem:[%s13627_s15 + $0x100] sm:$0xff]  ;;  %v7132_v52 = vld [vmem:[%s13627_s15 + $0x30] sm:$0xff] }
 0x831   : > { %v6988_v61 = vmax.f32 %v6980_v27, 0.0  ;;  %v6929_v54 = vadd.f32 %v6913_v6, %v6792_v13  ;;  %7149 = vmatpush.msrb.mxu2 %v7132_v52 }
 0x833   : > { %v6996_v30 = vrot.slane %v6988_v61, 1  ;;  %v6941_v55 = vadd.f32 %v13201_v0, %v6929_v54 }
 0x835   : > { %v6949_v9 = vmax.f32 %v6941_v55, 0.0  ;;  %v7005_v31 = vsel %vm2355_vm3, %v6995_v10, %v6996_v30  ;;  %v7060_v55 = vld [vmem:[#allocation19 + $0x18] sm:$0xff] }
 0x836   : > { %v13230_v62 = vmax.f32 %v6987_v50, %v7005_v31 }
 0x837   : > { %v6981_v19 = vadd.f32 %v6962_v29, %v6949_v9 }
 0x838   : > { %v6916_v34 = vpop.f32.mrf.mxu3  ;;  %v7018_v41 = vmax.f32 %v13222_v26, %v13230_v62  ;;  %v8454_v26 = vld [vmem:[%s13627_s15 + $0x120] sm:$0xff] }
 0x839   : > { %v6989_v36 = vmax.f32 %v6981_v19, 0.0  ;;  %v6930_v39 = vadd.f32 %v6916_v34, %v6793_v32  ;;  %v7026_v32 = vld [vmem:[#allocation17 + $0x8] sm:$0xff]  ;;  %v8457_v34 = vld [vmem:[%s13627_s15 + $0x138] sm:$0xff] }
 0x83a   : > { %7177 = vmatpush.msrb.mxu3 %v8457_v34  ;;  %v13448_v34 = vpop.permute.xlu2 %7321 }
 0x83b   : > { %v6997_v11 = vrot.slane %v6989_v36, 1  ;;  %v6942_v49 = vadd.f32 %v13201_v0, %v6930_v39  ;;  %v8451_v39 = vld [vmem:[%s13627_s15 + $0x108] sm:$0xff] }
 0x83d   : > { %v6950_v60 = vmax.f32 %v6942_v49, 0.0  ;;  %v7004_v45 = vsel %vm2355_vm3, %v6996_v30, %v6997_v11  ;;  %v7061_v30 = vld [vmem:[#allocation19 + $0x20] sm:$0xff]  ;;  %v8483_v49 = vld [vmem:[%s13627_s15 + $0xb8] sm:$0xff] }
 0x83e   : > { %v7012_v40 = vmax.f32 %v6988_v61, %v7004_v45  ;;  %7084 = vmatpush.msra.mxu1 %v7061_v30  ;;  %v8482_v45 = vld [vmem:[%s13627_s15 + $0xb0] sm:$0xff] }
 0x83f   : > { %v6982_v46 = vadd.f32 %v13205_v48, %v6950_v60  ;;  %v6795_v48 = vadd.f32 %v6785_v38, %v6658_v58  ;;  %v8470_v60 = vld [vmem:[%s13627_s15 + $0x70] sm:$0xff]  ;;  %v8504_v58 = vld [vmem:[%s13627_s15 + $0x160] sm:$0xff] }
 0x840   : > { %v6919_v7 = vpop.f32.mrf.mxu3  ;;  %v7019_v63 = vmax.f32 %v13230_v62, %v7012_v40  ;;  %7085 = vmatpush.msra.mxu1 %v7060_v55  ;;  %v8456_v62 = vld [vmem:[%s13627_s15 + $0x130] sm:$0xff]  ;;  %v8517_v55 = vld [vmem:[%s13627_s15 + $0x1a8] sm:$0xff] }
 0x841   : > { %v6990_v20 = vmax.f32 %v6982_v46, 0.0  ;;  %v6931_v14 = vadd.f32 %v6919_v7, %v6794_v1  ;;  %7178 = vmatpush.msrb.mxu3 %v8456_v62  ;;  %v8481_v46 = vld [vmem:[%s13627_s15 + $0xa8] sm:$0xff]  ;;  %v8506_v1 = vld [vmem:[%s13627_s15 + $0x170] sm:$0xff]  ;;  %v7130_v7 = vld [vmem:[%s13627_s15 + $0x20] sm:$0xff] }
 0x842   : > { %7086 = vmatpush.msra.mxu1 %v7059_v47  ;;  %v8478_v38 = vld [vmem:[%s13627_s15 + $0x90] sm:$0xff]  ;;  %v8516_v47 = vld [vmem:[%s13627_s15 + $0x1a0] sm:$0xff]  ;;  %v8489_v62 = vld [vmem:[%s13627_s15 + $0xc8] sm:$0xff]  ;;  %v13473_v52 = vpop.permute.xlu2 %7326 }
 0x843   : > { %v6998_v37 = vrot.slane %v6990_v20, 1  ;;  %v6943_v3 = vadd.f32 %v13201_v0, %v6931_v14  ;;  %v8505_v14 = vld [vmem:[%s13627_s15 + $0x168] sm:$0xff]  ;;  %v8530_v30 = vld [vmem:[%s13627_s15 + $0x1f0] sm:$0xff] }
 0x845   : > { %v6951_v28 = vmax.f32 %v6943_v3, 0.0  ;;  %v7003_v50 = vsel %vm2355_vm3, %v6997_v11, %v6998_v37  ;;  %v8471_v11 = vld [vmem:[%s13627_s15 + $0x78] sm:$0xff] }
 0x846   : > { %v7013_v53 = vmax.f32 %v6989_v36, %v7003_v50  ;;  %v8452_v36 = vld [vmem:[%s13627_s15 + $0x110] sm:$0xff]  ;;  %v8479_v3 = vld [vmem:[%s13627_s15 + $0x98] sm:$0xff] }
 0x847   : > { %v6983_v10 = vadd.f32 %v13210_v56, %v6951_v28  ;;  %v7128_v28 = vld [vmem:[%s13627_s15 + $0x10] sm:$0xff] }
 0x848   : > { %v6922_v2 = vpop.f32.mrf.mxu3  ;;  %v7020_v8 = vmax.f32 %v7012_v40, %v7013_v53  ;;  %v7131_v40 = vld [vmem:[%s13627_s15 + $0x28] sm:$0xff]  ;;  %v8466_v50 = vld [vmem:[%s13627_s15 + $0x50] sm:$0xff] }
 0x849   : > { %v6991_v15 = vmax.f32 %v6983_v10, 0.0  ;;  %v6932_v4 = vadd.f32 %v6922_v2, %v6795_v48  ;;  %7150 = vmatpush.msrb.mxu2 %v7131_v40  ;;  %v7127_v10 = vld [vmem:[%s13627_s15 + $0x8] sm:$0xff] }
 0x84a   : > { %v8465_v48 = vld [vmem:[%s13627_s15 + $0x48] sm:$0xff] }
 0x84b   : > { %v6999_v21 = vrot.slane %v6991_v15, 1  ;;  %v6944_v22 = vadd.f32 %v13201_v0, %v6932_v4  ;;  %7151 = vmatpush.msrb.mxu2 %v7130_v7  ;;  %v8477_v2 = vld [vmem:[%s13627_s15 + $0x88] sm:$0xff]  ;;  %v8464_v4 = vld [vmem:[%s13627_s15 + $0x40] sm:$0xff] }
 0x84d   : > { %v6952_v43 = vmax.f32 %v6944_v22, 0.0  ;;  %v7002_v27 = vsel %vm2355_vm3, %v6998_v37, %v6999_v21  ;;  %v8467_v37 = vld [vmem:[%s13627_s15 + $0x58] sm:$0xff]  ;;  %7152 = vmatpush.msrb.mxu2 %v7129_v23  ;;  %v8501_v22 = vld [vmem:[%s13627_s15 + $0x148] sm:$0xff] }
 0x84e   : > { %v7014_v13 = vmax.f32 %v6990_v20, %v7002_v27  ;;  %v8480_v20 = vld [vmem:[%s13627_s15 + $0xa0] sm:$0xff]  ;;  %v8519_v27 = vld [vmem:[%s13627_s15 + $0x1b8] sm:$0xff] }
 0x84f   : > { %v6984_v6 = vadd.f32 %v13218_v18, %v6952_v43  ;;  %v7058_v18 = vld [vmem:[#allocation19 + $0x8] sm:$0xff]  ;;  %7153 = vmatpush.msrb.mxu2 %v7128_v28 }
 0x850   : > { %v7021_v61 = vmax.f32 %v7013_v53, %v7014_v13  ;;  %7087 = vmatpush.msra.mxu1 %v7058_v18  ;;  %v8503_v53 = vld [vmem:[%s13627_s15 + $0x158] sm:$0xff] }
 0x851   : > { %v6992_v54 = vmax.f32 %v6984_v6, 0.0  ;;  %7154 = vmatpush.msrb.mxu2 %v7127_v10  ;;  %v8495_v43 = vld [vmem:[%s13627_s15 + $0xf8] sm:$0xff]  ;;  %v8500_v6 = vld [vmem:[%s13627_s15 + $0x140] sm:$0xff] }
 0x852   : > { %7088 = vmatpush.msra.mxu1 %v7057_v35  ;;  %v8515_v18 = vld [vmem:[%s13627_s15 + $0x198] sm:$0xff]  ;;  %v8526_v35 = vld [vmem:[%s13627_s15 + $0x1d0] sm:$0xff] }
 0x853   : > { %v7000_v56 = vrot.slane %v6992_v54, 1  ;;  %v8543_v10 = vld [vmem:[%s13627_s15 + $0x238] sm:$0xff] }
 0x854   : > { %7295 = vmatpush.msrb.mxu1 %v8483_v49 }
 0x855   : > { %v7008_v51 = vsel %vm2355_vm3, %v7000_v56, %v13207_v25  ;;  %v7001_v0 = vsel %vm2355_vm3, %v6999_v21, %v7000_v56  ;;  %v7025_v25 = vld [vmem:[#allocation17] sm:$0xff]  ;;  %v8493_v56 = vld [vmem:[%s13627_s15 + $0xe8] sm:$0xff] }
 0x856   : > { %v7016_v9 = vmax.f32 %v6992_v54, %v7008_v51  ;;  %v7015_v31 = vmax.f32 %v6991_v15, %v7001_v0  ;;  %7296 = vmatpush.msrb.mxu1 %v8482_v45  ;;  %v7126_v15 = vld [vmem:[%s13627_s15] sm:$0xff]  ;;  %v8518_v54 = vld [vmem:[%s13627_s15 + $0x1b0] sm:$0xff]  ;;  %v8529_v51 = vld [vmem:[%s13627_s15 + $0x1e8] sm:$0xff] }
 0x857   : > { %v8476_v21 = vld [vmem:[%s13627_s15 + $0x80] sm:$0xff]  ;;  %7155 = vmatpush.msrb.mxu2 %v7126_v15 }
 0x858   : > { %v7024_v29 = vmax.f32 %v7016_v9, %v13215_v17  ;;  %v7023_v16 = vmax.f32 %v7015_v31, %v7016_v9  ;;  %v7022_v19 = vmax.f32 %v7014_v13, %v7015_v31  ;;  %v8455_v17 = vld [vmem:[%s13627_s15 + $0x128] sm:$0xff]  ;;  %7297 = vmatpush.msrb.mxu1 %v8481_v46  ;;  %v8531_v13 = vld [vmem:[%s13627_s15 + $0x1f8] sm:$0xff]  ;;  %v8492_v0 = vld [vmem:[%s13627_s15 + $0xe0] sm:$0xff] }
 0x859   : > { %7179 = vmatpush.msrb.mxu3 %v8455_v17  ;;  %7354 = vmatpush.msra.mxu2 %v8495_v43  ;;  %v8528_v9 = vld [vmem:[%s13627_s15 + $0x1e0] sm:$0xff]  ;;  %v8491_v31 = vld [vmem:[%s13627_s15 + $0xd8] sm:$0xff]  ;;  %v8513_v17 = vld [vmem:[%s13627_s15 + $0x188] sm:$0xff] }
 0x85a   : > { %7042 = vmatpush.msra.mxu0 %v7024_v29  ;;  %7298 = vmatpush.msrb.mxu1 %v8480_v20  ;;  %v13431_v29 = vpop.permute.xlu1 %7121 }
 0x85b   : > { %7180 = vmatpush.msrb.mxu3 %v8454_v26  ;;  %v7203_v26 = vpop.permute.xlu0 %7202 }
 0x85c   : > { %7043 = vmatpush.msra.mxu0 %v7023_v16  ;;  %7299 = vmatpush.msrb.mxu1 %v8479_v3  ;;  %v8527_v16 = vld [vmem:[%s13627_s15 + $0x1d8] sm:$0xff] }
 0x85e   : > { %7044 = vmatpush.msra.mxu0 %v7022_v19  ;;  %7300 = vmatpush.msrb.mxu1 %v8478_v38  ;;  %v8736_v19 = vld [vmem:[%s13626_s14] ss:$0 sm:$0xff] }
 0x860   : > { %7045 = vmatpush.msra.mxu0 %v7021_v61  ;;  %7301 = vmatpush.msrb.mxu1 %v8477_v2  ;;  %v8494_v61 = vld [vmem:[%s13627_s15 + $0xf0] sm:$0xff] }
 0x861   : > { %7355 = vmatpush.msra.mxu2 %v8494_v61  ;;  %v8540_v61 = vld [vmem:[%s13627_s15 + $0x220] sm:$0xff] }
 0x862   : > { %7046 = vmatpush.msra.mxu0 %v7020_v8  ;;  %v8502_v8 = vld [vmem:[%s13627_s15 + $0x150] sm:$0xff]  ;;  %7302 = vmatpush.msrb.mxu1 %v8476_v21  ;;  %v7263_v49 = vpop.permute.xlu1 %7262 }
 0x863   : > { %7356 = vmatpush.msra.mxu2 %v8493_v56  ;;  %v7208_v45 = vpop.permute.xlu0 %7207  ;;  %v8539_v56 = vld [vmem:[%s13627_s15 + $0x218] sm:$0xff] }
 0x864   : > { %7047 = vmatpush.msra.mxu0 %v7019_v63  ;;  %v8468_v63 = vld [vmem:[%s13627_s15 + $0x60] sm:$0xff] }
 0x865   : > { %7357 = vmatpush.msra.mxu2 %v8492_v0  ;;  %v8538_v0 = vld [vmem:[%s13627_s15 + $0x210] sm:$0xff] }
 0x866   : > { %7048 = vmatpush.msra.mxu0 %v7018_v41 }
 0x867   : > { %7358 = vmatpush.msra.mxu2 %v8491_v31 }
 0x868   : > { %7049 = vmatpush.msra.mxu0 %v7017_v42  ;;  %v8453_v42 = vld [vmem:[%s13627_s15 + $0x118] sm:$0xff] }
 0x869   : > { %8446 = vmatmul.msk.f32.vlgmr.msra.gmra.mxu0 %vm7027_vm5, %v7025_v25  ;;  %7181 = vmatpush.msrb.mxu3 %v8453_v42  ;;  %v8490_v25 = vld [vmem:[%s13627_s15 + $0xd0] sm:$0xff] }
 0x86a   : > { %7235 = vmatpush.msrb.mxu0 %v8471_v11  ;;  %7359 = vmatpush.msra.mxu2 %v8490_v25 }
 0x86b   : > { %7182 = vmatpush.msrb.mxu3 %v8452_v36  ;;  %v8488_v36 = vld [vmem:[%s13627_s15 + $0xc0] sm:$0xff]  ;;  %v7546_v15 = vpop.permute.xlu0 %7545 }
 0x86c   : > { %7236 = vmatpush.msrb.mxu0 %v8470_v60  ;;  %7360 = vmatpush.msra.mxu2 %v8489_v62 }
 0x86d   : > { %7183 = vmatpush.msrb.mxu3 %v8451_v39  ;;  %v8512_v39 = vld [vmem:[%s13627_s15 + $0x180] sm:$0xff] }
 0x86e   : > { %7237 = vmatpush.msrb.mxu0 %v8469_v57  ;;  %7361 = vmatpush.msra.mxu2 %v8488_v36 }
 0x86f   : > { %7184 = vmatpush.msrb.mxu3 %v8450_v5 }
 0x870   : > { %7238 = vmatpush.msrb.mxu0 %v8468_v63 }
 0x871   : > { %8447 = vmatmul.msk.f32.gmra.mxu0 %vm7027_vm5, %v7026_v32  ;;  %7413 = vmatpush.msra.mxu3 %v8507_v59  ;;  %v8514_v32 = vld [vmem:[%s13627_s15 + $0x190] sm:$0xff] }
 0x872   : > { %7239 = vmatpush.msrb.mxu0 %v8467_v37 }
 0x873   : > { %7414 = vmatpush.msra.mxu3 %v8506_v1  ;;  %v7491_v31 = vpop.permute.xlu0 %7490 }
 0x874   : > { %7240 = vmatpush.msrb.mxu0 %v8466_v50 }
 0x875   : > { %7415 = vmatpush.msra.mxu3 %v8505_v14 }
 0x876   : > { %7241 = vmatpush.msrb.mxu0 %v8465_v48  ;;  %v7268_v48 = vpop.permute.xlu2 %7267 }
 0x877   : > { %7416 = vmatpush.msra.mxu3 %v8504_v58  ;;  %v7381_v58 = vpop.permute.xlu1 %7380 }
 0x878   : > { %7242 = vmatpush.msrb.mxu0 %v8464_v4 }
 0x879   : > { %7417 = vmatpush.msra.mxu3 %v8503_v53 }
 0x87a   : > { %7468 = vmatpush.msra.mxu0 %v8519_v27 }
 0x87b   : > { %7418 = vmatpush.msra.mxu3 %v8502_v8  ;;  %v8542_v8 = vld [vmem:[%s13627_s15 + $0x230] sm:$0xff]  ;;  %v7496_v62 = vpop.permute.xlu0 %7495 }
 0x87c   : > { %7469 = vmatpush.msra.mxu0 %v8518_v54 }
 0x87d   : > { %7419 = vmatpush.msra.mxu3 %v8501_v22  ;;  %v8541_v22 = vld [vmem:[%s13627_s15 + $0x228] sm:$0xff] }
 0x87e   : > { %7470 = vmatpush.msra.mxu0 %v8517_v55 }
 0x87f   : > { %7420 = vmatpush.msra.mxu3 %v8500_v6 }
 0x880   : > { %7471 = vmatpush.msra.mxu0 %v8516_v47  ;;  %v7436_v47 = vpop.permute.xlu2 %7435 }
 0x882   : > { %7472 = vmatpush.msra.mxu0 %v8515_v18  ;;  %v8537_v18 = vld [vmem:[%s13627_s15 + $0x208] sm:$0xff] }
 0x884   : > { %7473 = vmatpush.msra.mxu0 %v8514_v32 }
 0x886   : > { %7474 = vmatpush.msra.mxu0 %v8513_v17 }
 0x888   : > { %7475 = vmatpush.msra.mxu0 %v8512_v39 }
 0x8e6   : > { %v7051_v41 = vpop.f32.mrf.mxu0 }
 0x8e7   : > { %8448 = vmatmul.msk.f32.vlgmr.msra.gmra.mxu1 %vm5827_vm4, %v7051_v41  ;;  %v8525_v41 = vld [vmem:[%s13627_s15 + $0x1c8] sm:$0xff] }
 0x8e8   : > { %7523 = vmatpush.msra.mxu1 %v8531_v13 }
 0x8ea   : > { %7524 = vmatpush.msra.mxu1 %v8530_v30  ;;  %v7386_v30 = vpop.permute.xlu1 %7385 }
 0x8ec   : > { %7525 = vmatpush.msra.mxu1 %v8529_v51 }
 0x8ee   : > { %v7054_v12 = vpop.f32.mrf.mxu0  ;;  %7526 = vmatpush.msra.mxu1 %v8528_v9 }
 0x8ef   : > { %8449 = vmatmul.msk.f32.gmra.mxu1 %vm5827_vm4, %v7054_v12 }
 0x8f0   : > { %7527 = vmatpush.msra.mxu1 %v8527_v16 }
 0x8f2   : > { %7528 = vmatpush.msra.mxu1 %v8526_v35  ;;  %v7441_v35 = vpop.permute.xlu2 %7440 }
 0x8f4   : > { %7529 = vmatpush.msra.mxu1 %v8525_v41  ;;  %v7551_v41 = vpop.permute.xlu1 %7550 }
 0x8f6   : > { %7530 = vmatpush.msra.mxu1 %v8524_v24 }
 0x964   : > { %v7090_v42 = vpop.f32.mrf.mxu1 }
 0x965   : > { %v7091_v12 = vadd.f32 %v8736_v19, %v7090_v42 }
 0x967   : > { %v13468_v11 = vmax.f32 %v7091_v12, 0.0 }
 0x969   : > { %8460 = vmatmul.msk.f32.vlgmr.msrb.gmra.mxu3 %vm7027_vm5, %v13468_v11  ;;  %7603 = vrot.lane.b32.xlu1 %v13468_v11, %s9246_s25  ;;  %v7107_v40 = vrot.slane %v13468_v11, 3  ;;  %v7192_v57 = vrot.slane %v13468_v11, 4  ;;  %v7252_v46 = vrot.slane %v13468_v11, 5  ;;  %v7371_v14 = vrot.slane %v13468_v11, 1 }
 0x96a   : > { %v7312_v51 = vrot.slane %v13468_v11, 7 }
 0x96c   : > { %v7093_v5 = vpop.f32.mrf.mxu1 }
 0x96d   : > { %v7094_v60 = vadd.f32 %v8736_v19, %v7093_v5  ;;  %v8536_v19 = vld [vmem:[%s13627_s15 + $0x200] sm:$0xff] }
 0x96f   : > { %v13475_v59 = vmax.f32 %v7094_v60, 0.0 }
 0x971   : > { %8461 = vmatmul.msk.f32.gmra.mxu3 %vm7027_vm5, %v13475_v59  ;;  %v7108_v1 = vrot.slane %v13475_v59, 3  ;;  %v7193_v7 = vrot.slane %v13475_v59, 4  ;;  %v7253_v63 = vrot.slane %v13475_v59, 5  ;;  %v7372_v20 = vrot.slane %v13475_v59, 1  ;;  %7605 = vrot.lane.b32.xlu2 %v13475_v59, %s9246_s25 }
 0x973   : > { %v7111_v23 = vsel %vm7109_vm6, %v7108_v1, %v7107_v40  ;;  %v7196_v37 = vsel %vm7194_vm7, %v7193_v7, %v7192_v57  ;;  %v13497_v3 = vsel %vm7254_vm8, %v7253_v63, %v7252_v46  ;;  %v7373_v53 = vsel %vm2355_vm3, %v7371_v14, %v7372_v20 }
 0x974   : > { %v7124_v28 = vmul.f32 %v13402_v33, %v7111_v23  ;;  %v7210_v50 = vmul.f32 %v7203_v26, %v7196_v37  ;;  %v7270_v38 = vmul.f32 %v7263_v49, %v13497_v3  ;;  %v7388_v2 = vmul.f32 %v7381_v58, %v7373_v53 }
 0x975   : > { %v7110_v4 = vsel %vm7109_vm6, %v7107_v40, %v7108_v1  ;;  %v7195_v21 = vsel %vm7194_vm7, %v7192_v57, %v7193_v7  ;;  %v7255_v43 = vsel %vm7254_vm8, %v7252_v46, %v7253_v63  ;;  %v7374_v6 = vsel %vm2355_vm3, %v7372_v20, %v7371_v14 }
 0x976   : > { %8458 = vmatmul.msk.f32.vlgmr.msrb.gmra.mxu2 %vm7027_vm5, %v7124_v28  ;;  %8472 = vmatmul.msk.f32.vlgmr.msrb.gmra.mxu0 %vm7027_vm5, %v7210_v50  ;;  %v7125_v27 = vmul.f32 %v13431_v29, %v7110_v4  ;;  %v7211_v13 = vmul.f32 %v7208_v45, %v7195_v21  ;;  %v7271_v54 = vmul.f32 %v7268_v48, %v7255_v43  ;;  %v7313_v33 = vrot.slane %v13475_v59, 7  ;;  %v7663_v50 = vld [vmem:[#allocation22 + $0x38] sm:$0xff] }
 0x977   : > { %8484 = vmatmul.msk.f32.vlgmr.msrb.gmra.mxu1 %vm7027_vm5, %v7270_v38  ;;  %7578 = vmatpush.msrb.mxu2 %v8543_v10  ;;  %v7389_v55 = vmul.f32 %v7386_v30, %v7374_v6  ;;  %v7443_v29 = vmul.f32 %v7436_v47, %v7110_v4  ;;  %v7498_v25 = vmul.f32 %v7491_v31, %v7195_v21  ;;  %v7662_v38 = vld [vmem:[#allocation22 + $0x30] sm:$0xff]  ;;  %v7660_v21 = vld [vmem:[#allocation22 + $0x20] sm:$0xff]  ;;  %v7657_v30 = vld [vmem:[#allocation22 + $0x8] sm:$0xff] }
 0x978   : > { %v7315_v9 = vsel %vm1174_vm2, %v7313_v33, %v7312_v51  ;;  %v7314_v32 = vsel %vm1174_vm2, %v7312_v51, %v7313_v33  ;;  %v7444_v17 = vmul.f32 %v7441_v35, %v7111_v23  ;;  %v7499_v26 = vmul.f32 %v7496_v62, %v7196_v37  ;;  %7679 = vmatpush.msrb.mxu0 %v7663_v50  ;;  %v7658_v6 = vld [vmem:[#allocation22 + $0x10] sm:$0xff] }
 0x979   : > { %8508 = vmatmul.msk.f32.vlgmr.msra.gmra.mxu3 %vm7027_vm5, %v7388_v2  ;;  %7579 = vmatpush.msrb.mxu2 %v8542_v8  ;;  %v7329_v16 = vmul.f32 %v13448_v34, %v7315_v9  ;;  %v7330_v34 = vmul.f32 %v13473_v52, %v7314_v32  ;;  %v7553_v42 = vmul.f32 %v7546_v15, %v7255_v43  ;;  %v8737_v2 = vld [vmem:[%s13628_s16] ss:$0 sm:$0xff]  ;;  %v7661_v8 = vld [vmem:[#allocation22 + $0x28] sm:$0xff] }
 0x97a   : > { %v7554_v12 = vmul.f32 %v7551_v41, %v13497_v3  ;;  %7680 = vmatpush.msrb.mxu0 %v7662_v38 }
 0x97b   : > { %7580 = vmatpush.msrb.mxu2 %v8541_v22 }
 0x97c   : > { %7681 = vmatpush.msrb.mxu0 %v7661_v8 }
 0x97d   : > { %7581 = vmatpush.msrb.mxu2 %v8540_v61 }
 0x97e   : > { %8459 = vmatmul.msk.f32.gmra.mxu2 %vm7027_vm5, %v7125_v27  ;;  %8473 = vmatmul.msk.f32.gmra.mxu0 %vm7027_vm5, %v7211_v13  ;;  %v7659_v13 = vld [vmem:[#allocation22 + $0x18] sm:$0xff] }
 0x97f   : > { %8485 = vmatmul.msk.f32.gmra.mxu1 %vm7027_vm5, %v7271_v54  ;;  %7582 = vmatpush.msrb.mxu2 %v8539_v56 }
 0x980   : > { %7682 = vmatpush.msrb.mxu0 %v7660_v21 }
 0x981   : > { %8509 = vmatmul.msk.f32.gmra.mxu3 %vm7027_vm5, %v7389_v55  ;;  %7583 = vmatpush.msrb.mxu2 %v8538_v0 }
 0x982   : > { %7683 = vmatpush.msrb.mxu0 %v7659_v13 }
 0x983   : > { %7584 = vmatpush.msrb.mxu2 %v8537_v18 }
 0x984   : > { %7684 = vmatpush.msrb.mxu0 %v7658_v6 }
 0x985   : > { %7585 = vmatpush.msrb.mxu2 %v8536_v19 }
 0x986   : > { %8496 = vmatmul.msk.f32.vlgmr.msra.gmra.mxu2 %vm7027_vm5, %v7329_v16  ;;  %8520 = vmatmul.msk.f32.vlgmr.msra.gmra.mxu0 %vm7027_vm5, %v7443_v29 }
 0x987   : > { %8532 = vmatmul.msk.f32.vlgmr.msra.gmra.mxu1 %vm7027_vm5, %v7498_v25  ;;  %7685 = vmatpush.msrb.mxu0 %v7657_v30 }
 0x98e   : > { %8497 = vmatmul.msk.f32.gmra.mxu2 %vm7027_vm5, %v7330_v34  ;;  %8521 = vmatmul.msk.f32.gmra.mxu0 %vm7027_vm5, %v7444_v17 }
 0x98f   : > { %8533 = vmatmul.msk.f32.gmra.mxu1 %vm7027_vm5, %v7499_v26 }
 0x996   : > { %8544 = vmatmul.msk.f32.vlgmr.msrb.gmra.mxu2 %vm7027_vm5, %v7553_v42 }
 0x99e   : > { %8545 = vmatmul.msk.f32.gmra.mxu2 %vm7027_vm5, %v7554_v12 }
 0x9cb   : > { %v7606_v18 = vpop.permute.xlu2 %7605 }
 0x9db   : > { %v7604_v55 = vpop.permute.xlu1 %7603 }
 0x9ec   : > { %v7186_v36 = vpop.f32.mrf.mxu3 }
 0x9f3   : > { %v7244_v24 = vpop.f32.mrf.mxu0 }
 0x9f4   : > { %v7304_v11 = vpop.f32.mrf.mxu1  ;;  %v7189_v52 = vpop.f32.mrf.mxu3 }
 0x9f9   : > { %v7157_v39 = vpop.f32.mrf.mxu2 }
 0x9fa   : > { %v7187_v5 = vadd.f32 %v7186_v36, %v7157_v39 }
 0x9fb   : > { %v7247_v45 = vpop.f32.mrf.mxu0 }
 0x9fc   : > { %v7250_v60 = vadd.f32 %v7244_v24, %v7187_v5  ;;  %v7307_v46 = vpop.f32.mrf.mxu1  ;;  %v7422_v7 = vpop.f32.mrf.mxu3 }
 0x9fe   : > { %v7310_v57 = vadd.f32 %v7304_v11, %v7250_v60  ;;  %v7631_v60 = vld [vmem:[#allocation20] sm:$0xf] }
 0xa01   : > { %v7160_v49 = vpop.f32.mrf.mxu2 }
 0xa02   : > { %v7190_v40 = vadd.f32 %v7189_v52, %v7160_v49 }
 0xa03   : > { %v7477_v14 = vpop.f32.mrf.mxu0 }
 0xa04   : > { %v7251_v63 = vadd.f32 %v7247_v45, %v7190_v40  ;;  %v7532_v28 = vpop.f32.mrf.mxu1  ;;  %v7425_v53 = vpop.f32.mrf.mxu3  ;;  %v7656_v45 = vld [vmem:[#allocation22] sm:$0xff]  ;;  %v8738_v40 = vld [vmem:[%s14706_s5] ss:$0 sm:$0xff] }
 0xa05   : > { %7686 = vmatpush.msrb.mxu0 %v7656_v45 }
 0xa06   : > { %v7311_v37 = vadd.f32 %v7307_v46, %v7251_v63 }
 0xa09   : > { %v7363_v59 = vpop.f32.mrf.mxu2 }
 0xa0a   : > { %v7369_v1 = vadd.f32 %v7363_v59, %v7310_v57 }
 0xa0b   : > { %v7480_v22 = vpop.f32.mrf.mxu0 }
 0xa0c   : > { %v7428_v20 = vadd.f32 %v7422_v7, %v7369_v1  ;;  %v7535_v61 = vpop.f32.mrf.mxu1 }
 0xa0e   : > { %v7483_v58 = vadd.f32 %v7477_v14, %v7428_v20 }
 0xa10   : > { %v7538_v48 = vadd.f32 %v7532_v28, %v7483_v58 }
 0xa11   : > { %v7366_v23 = vpop.f32.mrf.mxu2 }
 0xa12   : > { %v7370_v3 = vadd.f32 %v7366_v23, %v7311_v37 }
 0xa14   : > { %v7429_v10 = vadd.f32 %v7425_v53, %v7370_v3 }
 0xa16   : > { %v7484_v27 = vadd.f32 %v7480_v22, %v7429_v10 }
 0xa18   : > { %v7539_v33 = vadd.f32 %v7535_v61, %v7484_v27 }
 0xa19   : > { %v7587_v15 = vpop.f32.mrf.mxu2 }
 0xa1a   : > { %v7593_v4 = vadd.f32 %v7587_v15, %v7538_v48 }
 0xa1c   : > { %v7599_v43 = vadd.f32 %v8737_v2, %v7593_v4 }
 0xa1e   : > { %v7601_v54 = vmax.f32 %v7599_v43, 0.0 }
 0xa20   : > { %v7609_v0 = vadd.f32 %v7604_v55, %v7601_v54 }
 0xa21   : > { %v7590_v56 = vpop.f32.mrf.mxu2 }
 0xa22   : > { %v7594_v51 = vadd.f32 %v7590_v56, %v7539_v33  ;;  %v7611_v31 = vmax.f32 %v7609_v0, 0.0 }
 0xa24   : > { %v7600_v47 = vadd.f32 %v8737_v2, %v7594_v51  ;;  %v7613_v19 = vrot.slane %v7611_v31, 1  ;;  %v7619_v25 = vrot.slane %v7611_v31, 4  ;;  %v7623_v32 = vrot.slane %v7611_v31, 5 }
 0xa26   : > { %v7602_v9 = vmax.f32 %v7600_v47, 0.0 }
 0xa28   : > { %v7610_v29 = vadd.f32 %v7606_v18, %v7602_v9 }
 0xa2a   : > { %v7612_v16 = vmax.f32 %v7610_v29, 0.0 }
 0xa2c   : > { %v7614_v35 = vrot.slane %v7612_v16, 1  ;;  %v7620_v62 = vrot.slane %v7612_v16, 4  ;;  %v7624_v34 = vrot.slane %v7612_v16, 5 }
 0xa2e   : > { %v7616_v17 = vsel %vm2355_vm3, %v7614_v35, %v7613_v19  ;;  %v7622_v26 = vsel %vm7194_vm7, %v7620_v62, %v7619_v25  ;;  %v7626_v42 = vsel %vm7254_vm8, %v7624_v34, %v7623_v32  ;;  %v7615_v41 = vsel %vm2355_vm3, %v7613_v19, %v7614_v35 }
 0xa2f   : > { %v7618_v12 = vmax.f32 %v7612_v16, %v7616_v17  ;;  %v7628_v36 = vmax.f32 %v7622_v26, %v7626_v42  ;;  %v7617_v39 = vmax.f32 %v7611_v31, %v7615_v41  ;;  %v7621_v24 = vsel %vm7194_vm7, %v7619_v25, %v7620_v62 }
 0xa30   : > { %v7625_v11 = vsel %vm7254_vm8, %v7623_v32, %v7624_v34 }
 0xa31   : > { %v7630_v49 = vmax.f32 %v7618_v12, %v7628_v36  ;;  %v7627_v5 = vmax.f32 %v7621_v24, %v7625_v11 }
 0xa33   : > { %7650 = vmatpush.msrb.mxu3 %v7630_v49  ;;  %v7629_v52 = vmax.f32 %v7617_v39, %v7627_v5 }
 0xa35   : > { %7651 = vmatpush.msrb.mxu3 %v7629_v52 }
 0xa36   : > { %8546 = vmatmul.msk.f32.vlgmr.msrb.gmra.mxu3 %vm7632_vm9, %v7631_v60 }
 0xab9   : > { %v7653_v59 = vpop.f32.mrf.mxu3 }
 0xaba   : > { %8547 = vmatmul.msk.f32.vlgmr.msrb.gmra.mxu0 %vm7027_vm5, %v7653_v59 }
 0xb37   : > { %v7688_v57 = vpop.f32.mrf.mxu0 }
 0xb38   : > { %v7689_v44 = vadd.f32 %v8738_v40, %v7688_v57 }
 0xb3a   : > { %v7691_v46 = vmax.f32 %v7689_v44, 0.0 }
 0xb3c   : > { %v7693_v1 = vsel %vm7692_vm10, %v7691_v46, 0.0 }
 0xb3d   : > { %v7694_v7 = vrot.slane %v7693_v1, 4 }
 0xb3f   : > { %v7695_v63 = vadd.f32 %v7694_v7, %v7693_v1 }
 0xb41   : > { %v7696_v20 = vrot.slane %v7695_v63, 2 }
 0xb43   : > { %v7697_v14 = vadd.f32 %v7696_v20, %v7695_v63 }
 0xb45   : > { %v7698_v23 = vrot.slane %v7697_v14, 1 }
 0xb47   : > { %v7699_v37 = vadd.f32 %v7698_v23, %v7697_v14 }
 0xb49   : > { %v7700_v3 = vmul.f32 0.25, %v7699_v37 }
 0xb4b   : > { %v7702_v58 = vsel %vm7701_vm11, %v7700_v3, -inf }
 0xb4c   : > { %7703 = vmax.xlane.f32.xlu0 %v7702_v58 }
 0xbbf   : > { %v7704_v28 = vpop.xlane.xlu0 %7703 }
 0xbc0   : > { %v7705_v50 = vsub.f32 %v7700_v3, %v7704_v28 }
 0xbc2   : > { %v7706_v38 = vmul.f32 1.442695, %v7705_v50 }
 0xbc4   : > { %8739 = vpow2.f32 %v7706_v38 }
 0xbca   : > { %v8740_v53 = vpop.eup %8739 }
 0xbcb   : > { %v7708_v10 = vsel %vm7701_vm11, %v8740_v53, 0.0 }
 0xbcc   : > { %7709 = vadd.xlane.f32.xlu1 %v7708_v10 }
 0xc3f   : > { %v7710_v48 = vpop.xlane.xlu1 %7709 }
 0xc40   : > { %8741 = vlog2.f32 %v7710_v48 }
 0xc46   : > { %v8742_v2 = vpop.eup %8741 }
 0xc47   : > { %v7712_v8 = vmul.f32 0.6931472, %v8742_v2 }
 0xc49   : > { %v7713_v15 = vsub.f32 %v7705_v50, %v7712_v8 }
 0xc4b   : > { %7715 = vst.msk [vmem:[%s851_s4] sm:$0x1] %vm7714_vm12, %v7713_v15 }
 0xc4c   : > { %9161 = shalt.err (!%p9158_p8)
}
 0xc4d   : > { %8603 = dma.vmem_to_hbm [thread:$0]  (%p9395_p5), %s7728_s23, 16, %s7730_s20, %s7717_s28  }
 0xc4e PF: > { %s14711_s5 = sld [smem:[#allocation35_spill]] }
 0xc4f   : > { %s14712_s24 = sld [smem:[#allocation32_spill]] }
 0xc54   : > { %p8675_p9 = scmp.ge.s32.totalorder %s14711_s5, 2 }
 0xc55   : > { %s7741_s27 = sand.u32 1, %s14712_s24  }
 0xc56   : > { %p8646_p10 = pnand %p8675_p9, %p9399_p6  ;;  %s7742_s8 = scalar_lea.sflag [#allocation4], %s7741_s27 }
 0xc58   : > { %p8647_p11 = pneg %p8646_p10 }
 0xc5a   : > { %9207 = dma.done.wait (%p8647_p11), %s7742_s8, 16  }
 0xc5b   : > { %9209 = vsyncadd (%p8647_p11), %s7742_s8, 4294967280  ;;  %s14714_s27 = sld [smem:[#allocation36_spill]] }
 0xc5c   : > { %s14715_s2 = sld [smem:[#allocation33_spill]] }
 0xc5d   : > { %s14716_s25 = sld [smem:[#allocation34_spill]] }
 0xc5e   : > { %s14717_s26 = sld [smem:[#allocation37_spill]] }
 0xc61   : > { %p38_p12 = scmp.ge.s32.totalorder %s14714_s27, 4  }
 0xc63   :  { %40 = sbr.rel (!%p38_p12) target bundleno = 22 (0x16), region = 237 }
 0xc68   :  { %7747 = vsyncpa [#allocation3], 1 }
 0xc69   :  { %7749 = vsyncpa [#allocation3 + $0x1], 1 }
 0xc6a   :  { %7750 = vsyncpa [#allocation6], 1 }
 0xc6b   :  { %7751 = vsyncpa [#allocation9], 1 }
 0xc6c   :  { %7752 = vsyncpa [#allocation12], 1 }
 0xc6d   :  { %7753 = vsyncpa [#allocation15], 1 }
 0xc6e   :  { %7754 = vsyncpa [#allocation18], 1 }
 0xc6f   :  { %7755 = vsyncpa [#allocation21], 1 }
 0xc70   :  { %7756 = vsyncpa [#allocation4], 1 }
 0xc71   :  { %7758 = vsyncpa [#allocation4 + $0x1], 1 }

</bundles_post_ra>
